<compile_context>
chip_gen: v5e
topology: v5e:2x2
jax: 0.10.0
libtpu: 0.0.40
codegen_flags: <defaults>
</compile_context>

<pallas_src>
import functools

import jax
import jax.numpy as jnp
from jax.experimental import pallas as pl
from jax.experimental.pallas import tpu as pltpu


# ----------------------------------------------------------------------------
# Gate nonlinearities
# ----------------------------------------------------------------------------
def _sigmoid(x):
    # sigmoid(x) == 0.5 * tanh(0.5 * x) + 0.5 : one EUP transcendental.
    return 0.5 * jnp.tanh(0.5 * x) + 0.5


def _hard_sigmoid(x):
    # PyTorch Hardsigmoid: clip(x / 6 + 0.5, 0, 1) — pure VPU, no EUP slot.
    return jnp.clip(x * (1.0 / 6.0) + 0.5, 0.0, 1.0)


# ----------------------------------------------------------------------------
# Kernel
# ----------------------------------------------------------------------------
def _lstm_kernel(x_ref, h0_ref, c0_ref, w_ih_ref, w_hh_ref, b_ref,
                 out_ref, hn_ref, cn_ref,
                 gx_sc, h_sc, c_sc,
                 *, hidden_p, block_t, seq_len, reverse, ragged,
                 mxu_dtype, hard_gates):
    """One (batch-tile, time-block) grid step: `block_t` LSTM steps, unrolled."""
    tb = pl.program_id(1)          # time-block index ("arbitrary" / sequential)
    nt = pl.num_programs(1)
    Hp = hidden_p
    bt = block_t
    Bb = h_sc.shape[0]

    # Re-initialize the carried state at the first (in recurrence order)
    # time block of every batch tile.
    @pl.when(tb == 0)
    def _():
        h_sc[...] = h0_ref[...].astype(jnp.float32)
        c_sc[...] = c0_ref[...].astype(jnp.float32)

    # ---- Fused input projection for the whole time block: one big MXU matmul
    # over Bb*bt rows (no recurrent dependence), bias folded in.  Lives only in
    # VMEM — the (B, T, 4H) gates tensor never exists in HBM.
    x_blk = x_ref[...]                                      # (Bb, bt, I)
    in_sz = x_blk.shape[-1]
    gx = jnp.dot(x_blk.reshape(Bb * bt, in_sz), w_ih_ref[...],
                 preferred_element_type=jnp.float32)
    gx = gx + b_ref[...].astype(jnp.float32)
    gx_sc[...] = gx.reshape(Bb, bt, 4 * Hp)

    w_hh = w_hh_ref[...]
    arr_tb = (nt - 1 - tb) if reverse else tb               # array-side block idx
    t_base = arr_tb * bt
    sig = _hard_sigmoid if hard_gates else _sigmoid

    def run_steps(masked):
        h = h_sc[...]                                       # (Bb, Hp) f32 carry
        c = c_sc[...]
        for step in range(bt):
            # Walk local steps in recurrence order; idx stays array-local so
            # outputs land back at their original time positions.
            idx = (bt - 1 - step) if reverse else step
            gates = gx_sc[:, idx, :] + jnp.dot(
                h.astype(mxu_dtype), w_hh, preferred_element_type=jnp.float32)
            # Hp is a multiple of 128 -> lane-aligned (free) gate slices.
            i_g = sig(gates[:, 0 * Hp:1 * Hp])
            f_g = sig(gates[:, 1 * Hp:2 * Hp])
            g_g = jnp.tanh(gates[:, 2 * Hp:3 * Hp])
            o_g = sig(gates[:, 3 * Hp:4 * Hp])
            c_new = f_g * c + i_g * g_g
            h_new = o_g * jnp.tanh(c_new)
            if masked:
                # Padded timesteps must not advance the recurrent state.
                valid = (t_base + idx) < seq_len
                c = jnp.where(valid, c_new, c)
                h = jnp.where(valid, h_new, h)
            else:
                c, h = c_new, h_new
            # Lane-dense (Hp % 128 == 0) unmasked store; padded time rows hold
            # garbage and are sliced off in the wrapper.
            out_ref[:, idx, :] = h_new.astype(out_ref.dtype)
        h_sc[...] = h
        c_sc[...] = c

    if ragged:
        # Only the single padded array block pays for the mask blend.
        is_pad_block = arr_tb == nt - 1

        @pl.when(is_pad_block)
        def _():
            run_steps(True)

        @pl.when(arr_tb != nt - 1)
        def _():
            run_steps(False)
    else:
        run_steps(False)

    # Emit the final state after the last (in recurrence order) time block.
    @pl.when(tb == nt - 1)
    def _():
        hn_ref[...] = h_sc[...].astype(hn_ref.dtype)
        cn_ref[...] = c_sc[...].astype(cn_ref.dtype)


# ----------------------------------------------------------------------------
# Wrapper helpers
# ----------------------------------------------------------------------------
def _pad_gate_cols(w, H, Hp):
    """Pad each of the 4 gate column blocks of a (..., 4*H) array to width Hp."""
    if Hp == H:
        return w
    parts = [w[..., k * H:(k + 1) * H] for k in range(4)]
    pad = [(0, 0)] * (w.ndim - 1) + [(0, Hp - H)]
    return jnp.concatenate([jnp.pad(p, pad) for p in parts], axis=-1)


def _physical_vmem_bytes():
    # v5e/v6e: 128 MiB per TensorCore; v7x: 64 MiB.  Fall back to the smallest.
    try:
        info = pltpu.get_tpu_info()
        cap = getattr(info, "vmem_capacity_bytes", None)
        if cap:
            return int(cap)
    except Exception:
        pass
    return 64 * 1024 * 1024


def _pick_batch_block(B, requested):
    """Never shrink the per-step matmul M-dim just to tile the batch."""
    if requested is not None:
        if (0 < requested <= B and B % requested == 0
                and (requested % 8 == 0 or requested == B)):
            return requested
        return B
    # Auto: split in two only when each half keeps >= 128 matmul rows (full
    # MXU/EUP fill) — this is what gives v7x's second TensorCore its own work.
    if B % 16 == 0 and B // 2 >= 128:
        return B // 2
    return B


def _estimate_vmem(Bb, bt, I, Hp, in_bytes, out_bytes):
    """Conservative per-grid-step VMEM footprint (double-buffered streams)."""
    x_blk = 2 * Bb * bt * I * in_bytes              # streamed input
    o_blk = 2 * Bb * bt * Hp * out_bytes            # streamed output
    gates = 2 * Bb * bt * 4 * Hp * 4                # f32 gates scratch + matmul temp
    wgt = 2 * (I + Hp + 1) * 4 * Hp * in_bytes      # w_ih, w_hh, b
    state = 6 * Bb * Hp * out_bytes                 # h0, c0, h_n, c_n blocks
    carry = 2 * Bb * Hp * 4                         # f32 h/c carry scratch
    return x_blk + o_blk + gates + wgt + state + carry


# ----------------------------------------------------------------------------
# Public entry point
# ----------------------------------------------------------------------------
def quant_lstm_layer(x, w_ih, w_hh, b, initial_state=None, go_forward=True, *,
                     block_t=64, batch_block=None,
                     compute_dtype=jnp.bfloat16, hard_sigmoid=False):
    """Pallas equivalent of QuantLstmLayer.forward (batch_lengths=None path).

    Args:
      x:     (batch, timesteps, input_size)
      w_ih:  (input_size, 4*hidden)   gates ordered [i, f, g, o]
      w_hh:  (hidden, 4*hidden)
      b:     (1, 4*hidden)
      initial_state: optional (h_0, c_0), each (batch, hidden) or (1, batch, hidden)
      go_forward: process forward if True, else backwards (outputs written back
                  to their original time indices, like the PyTorch module).
      block_t: target timesteps per grid step (shrunk to fit the VMEM budget).
      batch_block: optional batch tile (multiple of 8 dividing batch).
      compute_dtype: MXU feed dtype (bf16 default); carry/gates stay in f32.
      hard_sigmoid: use hard-sigmoid i/f/o gates (pure VPU) — quantized-model
                    approximation, off by default.

    Returns:
      output (batch, timesteps, hidden), (h_n, c_n) each (1, batch, hidden).
    """
    B, T, I = x.shape
    H = w_hh.shape[0]
    out_dtype = x.dtype

    if initial_state is None:
        h0 = jnp.zeros((B, H), out_dtype)
        c0 = jnp.zeros((B, H), out_dtype)
    else:
        h0, c0 = initial_state
        if h0.ndim == 3:                      # (1, B, H) as in the PyTorch module
            h0, c0 = h0[0], c0[0]

    # ---- Lane padding: hidden -> multiple of 128 so gate slices / per-step
    # output stores are lane-aligned and dense.  Padded lanes stay exactly 0.
    Hp = ((H + 127) // 128) * 128
    w_ih_p = _pad_gate_cols(w_ih, H, Hp)
    w_hh_p = _pad_gate_cols(w_hh, H, Hp)
    if Hp != H:
        w_hh_p = jnp.pad(w_hh_p, ((0, Hp - H), (0, 0)))
        h0 = jnp.pad(h0, ((0, 0), (0, Hp - H)))
        c0 = jnp.pad(c0, ((0, 0), (0, Hp - H)))
    b_p = _pad_gate_cols(b, H, Hp).astype(jnp.float32)

    # ---- MXU feed dtype: halves streamed-input traffic / weight VMEM (bf16).
    x_c = x.astype(compute_dtype)
    w_ih_c = w_ih_p.astype(compute_dtype)
    w_hh_c = w_hh_p.astype(compute_dtype)

    # ---- Batch tiling.
    batch_block = _pick_batch_block(B, batch_block)
    nb = B // batch_block

    # ---- Time blocking from an explicit per-generation VMEM budget.
    in_bytes = jnp.dtype(compute_dtype).itemsize
    out_bytes = jnp.dtype(out_dtype).itemsize
    vmem_limit = max(int(_physical_vmem_bytes() * 0.75), 32 * 1024 * 1024)
    block_budget = int(vmem_limit * 0.9)

    # Sublane granularity of the streamed x tiles (8 rows f32, 16 rows bf16)
    # keeps the in-kernel (Bb, bt, I) -> (Bb*bt, I) collapse a pure retiling.
    gran = 8 * max(1, 4 // in_bytes)
    t_ceil = ((T + gran - 1) // gran) * gran
    bt = min(max(block_t, gran) // gran * gran, t_ceil)
    while bt > gran and _estimate_vmem(batch_block, bt, I, Hp,
                                       in_bytes, out_bytes) > block_budget:
        bt -= gran
    nt = pl.cdiv(T, bt)
    t_pad = nt * bt
    ragged = t_pad != T
    if ragged:
        x_c = jnp.pad(x_c, ((0, 0), (0, t_pad - T), (0, 0)))

    reverse = not go_forward
    if reverse:
        t_map = lambda bb, tb: (bb, nt - 1 - tb, 0)
    else:
        t_map = lambda bb, tb: (bb, tb, 0)

    kernel = functools.partial(
        _lstm_kernel, hidden_p=Hp, block_t=bt, seq_len=T, reverse=reverse,
        ragged=ragged, mxu_dtype=compute_dtype, hard_gates=hard_sigmoid)

    def build_in_specs(single_buffered):
        # Grid-invariant inputs need only one VMEM buffer — frees VMEM for a
        # larger bt / batch_block at production H.  (x keeps the default
        # double-buffered stream; deepen with pl.Buffered(3) on v5e if the
        # input DMA ever becomes exposed.)
        inv = {"pipeline_mode": pl.Buffered(1)} if single_buffered else {}
        return [
            pl.BlockSpec((batch_block, bt, I), t_map),                        # x
            pl.BlockSpec((batch_block, Hp), lambda bb, tb: (bb, 0), **inv),   # h0
            pl.BlockSpec((batch_block, Hp), lambda bb, tb: (bb, 0), **inv),   # c0
            pl.BlockSpec((I, 4 * Hp), lambda bb, tb: (0, 0), **inv),          # w_ih
            pl.BlockSpec((Hp, 4 * Hp), lambda bb, tb: (0, 0), **inv),         # w_hh
            pl.BlockSpec((1, 4 * Hp), lambda bb, tb: (0, 0), **inv),          # b
        ]

    def invoke(single_buffered):
        return pl.pallas_call(
            kernel,
            out_shape=(
                jax.ShapeDtypeStruct((B, t_pad, Hp), out_dtype),   # output
                jax.ShapeDtypeStruct((B, Hp), out_dtype),          # h_n
                jax.ShapeDtypeStruct((B, Hp), out_dtype),          # c_n
            ),
            grid_spec=pltpu.PrefetchScalarGridSpec(
                num_scalar_prefetch=0,
                grid=(nb, nt),
                in_specs=build_in_specs(single_buffered),
                out_specs=[
                    pl.BlockSpec((batch_block, bt, Hp), t_map),
                    pl.BlockSpec((batch_block, Hp), lambda bb, tb: (bb, 0)),
                    pl.BlockSpec((batch_block, Hp), lambda bb, tb: (bb, 0)),
                ],
                scratch_shapes=[
                    pltpu.VMEM((batch_block, bt, 4 * Hp), jnp.float32),  # gates_x
                    pltpu.VMEM((batch_block, Hp), jnp.float32),          # h carry
                    pltpu.VMEM((batch_block, Hp), jnp.float32),          # c carry
                ],
            ),
            compiler_params=pltpu.CompilerParams(
                dimension_semantics=("parallel", "arbitrary"),
                vmem_limit_bytes=vmem_limit),
        )(x_c, h0, c0, w_ih_c, w_hh_c, b_p)

    try:
        out_p, h_n, c_n = invoke(True)
    except Exception:
        # pipeline_mode=pl.Buffered(1) not supported by this jax/Mosaic build;
        # fall back to default double-buffering of the invariant inputs.
        out_p, h_n, c_n = invoke(False)

    output = out_p[:, :T, :H]
    return output, (h_n[None, :, :H], c_n[None, :, :H])


# ----------------------------------------------------------------------------
# Pure-JAX reference (mirrors the PyTorch forward, batch_lengths=None)
# ----------------------------------------------------------------------------
def _reference_lstm_layer(x, w_ih, w_hh, b, initial_state=None, go_forward=True,
                          hard_sigmoid=False):
    B, T, I = x.shape
    H = w_hh.shape[0]
    if initial_state is None:
        h = jnp.zeros((B, H), x.dtype)
        c = jnp.zeros((B, H), x.dtype)
    else:
        h, c = initial_state
        if h.ndim == 3:
            h, c = h[0], c[0]
    sig = _hard_sigmoid if hard_sigmoid else jax.nn.sigmoid

    def cell(carry, x_t):
        h, c = carry
        gates = x_t @ w_ih + h @ w_hh + b
        i = sig(gates[:, 0 * H:1 * H])
        f = sig(gates[:, 1 * H:2 * H])
        g = jnp.tanh(gates[:, 2 * H:3 * H])
        o = sig(gates[:, 3 * H:4 * H])
        c_new = f * c + i * g
        h_new = o * jnp.tanh(c_new)
        return (h_new, c_new), h_new

    xs = jnp.transpose(x, (1, 0, 2))
    if not go_forward:
        xs = xs[::-1]
    (h_n, c_n), outs = jax.lax.scan(cell, (h, c), xs)
    if not go_forward:
        outs = outs[::-1]
    return jnp.transpose(outs, (1, 0, 2)), (h_n[None], c_n[None])


# ----------------------------------------------------------------------------
# Self-test
# ----------------------------------------------------------------------------
if __name__ == "__main__":
    key = jax.random.PRNGKey(0)

    def run_case(batch, seq, input_size, hidden_size, go_forward, *,
                 block_t=64, batch_block=None, compute_dtype=jnp.bfloat16,
                 hard_sigmoid=False, use_init_state=True, atol=5e-2):
        k = jax.random.split(jax.random.fold_in(key, batch * 1000 + seq), 6)
        x = jax.random.normal(k[0], (batch, seq, input_size), jnp.float32)
        w_ih = jax.random.normal(k[1], (input_size, 4 * hidden_size), jnp.float32) * 0.1
        w_hh = jax.random.normal(k[2], (hidden_size, 4 * hidden_size), jnp.float32) * 0.1
        b = jax.random.normal(k[3], (1, 4 * hidden_size), jnp.float32) * 0.1
        if use_init_state:
            init = (jax.random.normal(k[4], (batch, hidden_size), jnp.float32) * 0.1,
                    jax.random.normal(k[5], (batch, hidden_size), jnp.float32) * 0.1)
        else:
            init = None

        out, (h_n, c_n) = quant_lstm_layer(
            x, w_ih, w_hh, b, initial_state=init, go_forward=go_forward,
            block_t=block_t, batch_block=batch_block,
            compute_dtype=compute_dtype, hard_sigmoid=hard_sigmoid)
        jax.block_until_ready(out)

        ref_out, (ref_h, ref_c) = _reference_lstm_layer(
            x, w_ih, w_hh, b, initial_state=init, go_forward=go_forward,
            hard_sigmoid=hard_sigmoid)

        assert out.shape == (batch, seq, hidden_size)
        assert h_n.shape == (1, batch, hidden_size)
        assert c_n.shape == (1, batch, hidden_size)
        err = float(jnp.max(jnp.abs(out - ref_out)))
        assert err <= atol, f"output max err {err} > {atol}"
        assert float(jnp.max(jnp.abs(h_n - ref_h))) <= atol
        assert float(jnp.max(jnp.abs(c_n - ref_c))) <= atol

    # f32 MXU feed: tight check of the recurrence, both directions, exact fit.
    for fwd in (True, False):
        run_case(8, 8, 16, 32, fwd, compute_dtype=jnp.float32, atol=5e-5)

    # bf16 MXU feed (default): ragged T, multiple time blocks, both directions.
    for fwd in (True, False):
        run_case(16, 24, 16, 32, fwd, block_t=16, atol=5e-2)

    # f32, multi-block ragged + hard-sigmoid gate path (tight check).
    run_case(8, 20, 16, 32, True, block_t=8, compute_dtype=jnp.float32,
             hard_sigmoid=True, atol=5e-5)

    # Large batch: auto batch split (nb=2 "parallel" axis for v7x), zero init.
    run_case(256, 20, 16, 32, True, block_t=16, use_init_state=False, atol=5e-2)

    print("KERNEL_OK")
</pallas_src>

<mosaic_0001>
module attributes {stable_mosaic.version = 11 : i64} {
  func.func @_lstm_kernel(%arg0: i32, %arg1: i32, %arg2: memref<8x8x16xf32, #tpu.memory_space<vmem>>, %arg3: memref<8x128xf32, #tpu.memory_space<vmem>>, %arg4: memref<8x128xf32, #tpu.memory_space<vmem>>, %arg5: memref<16x512xf32, #tpu.memory_space<vmem>>, %arg6: memref<128x512xf32, #tpu.memory_space<vmem>>, %arg7: memref<1x512xf32, #tpu.memory_space<vmem>>, %arg8: memref<8x8x128xf32, #tpu.memory_space<vmem>>, %arg9: memref<8x128xf32, #tpu.memory_space<vmem>>, %arg10: memref<8x128xf32, #tpu.memory_space<vmem>>, %arg11: memref<8x8x512xf32, #tpu.memory_space<vmem>>, %arg12: memref<8x128xf32, #tpu.memory_space<vmem>>, %arg13: memref<8x128xf32, #tpu.memory_space<vmem>>) attributes {dimension_semantics = [#tpu.dimension_semantics<parallel>, #tpu.dimension_semantics<arbitrary>], iteration_bounds = array<i64: 1, 1>, scalar_prefetch = 0 : i64, scratch_operands = 3 : i64, tpu.core_type = #tpu.core_type<tc>, window_params = [{transform_indices = @transform_0, window_bounds = array<i64: 8, 8, 16>}, {pipeline_mode = #tpu.pipeline_mode<synchronous>, transform_indices = @transform_1, window_bounds = array<i64: 8, 128>}, {pipeline_mode = #tpu.pipeline_mode<synchronous>, transform_indices = @transform_2, window_bounds = array<i64: 8, 128>}, {pipeline_mode = #tpu.pipeline_mode<synchronous>, transform_indices = @transform_3, window_bounds = array<i64: 16, 512>}, {pipeline_mode = #tpu.pipeline_mode<synchronous>, transform_indices = @transform_4, window_bounds = array<i64: 128, 512>}, {pipeline_mode = #tpu.pipeline_mode<synchronous>, transform_indices = @transform_5, window_bounds = array<i64: 1, 512>}, {transform_indices = @transform_6, window_bounds = array<i64: 8, 8, 128>}, {transform_indices = @transform_7, window_bounds = array<i64: 8, 128>}, {transform_indices = @transform_8, window_bounds = array<i64: 8, 128>}]} {
    %c0_i32 = arith.constant 0 : i32
    %0 = arith.cmpi eq, %arg1, %c0_i32 : i32
    %1 = arith.extui %0 : i1 to i32
    %c0_i32_0 = arith.constant 0 : i32
    %2 = arith.cmpi ne, %1, %c0_i32_0 : i32
    scf.if %2 {
      %c0_143 = arith.constant 0 : index
      %c0_144 = arith.constant 0 : index
      %324 = vector.load %arg3[%c0_143, %c0_144] : memref<8x128xf32, #tpu.memory_space<vmem>>, vector<8x128xf32>
      %c0_145 = arith.constant 0 : index
      %c0_146 = arith.constant 0 : index
      %325 = vector.load %arg12[%c0_145, %c0_146] : memref<8x128xf32, #tpu.memory_space<vmem>>, vector<8x128xf32>
      tpu.vector_store %arg12[%c0_145, %c0_146], %324 {strides = array<i32>} : memref<8x128xf32, #tpu.memory_space<vmem>>, vector<8x128xf32>,
      %c0_147 = arith.constant 0 : index
      %c0_148 = arith.constant 0 : index
      %326 = vector.load %arg4[%c0_147, %c0_148] : memref<8x128xf32, #tpu.memory_space<vmem>>, vector<8x128xf32>
      %c0_149 = arith.constant 0 : index
      %c0_150 = arith.constant 0 : index
      %327 = vector.load %arg13[%c0_149, %c0_150] : memref<8x128xf32, #tpu.memory_space<vmem>>, vector<8x128xf32>
      tpu.vector_store %arg13[%c0_149, %c0_150], %326 {strides = array<i32>} : memref<8x128xf32, #tpu.memory_space<vmem>>, vector<8x128xf32>,
    } else {
    }
    %c0 = arith.constant 0 : index
    %c0_1 = arith.constant 0 : index
    %c0_2 = arith.constant 0 : index
    %3 = vector.load %arg2[%c0, %c0_1, %c0_2] : memref<8x8x16xf32, #tpu.memory_space<vmem>>, vector<8x8x16xf32>
    %4 = vector.shape_cast %3 : vector<8x8x16xf32> to vector<64x16xf32>
    %c0_3 = arith.constant 0 : index
    %c0_4 = arith.constant 0 : index
    %5 = vector.load %arg5[%c0_3, %c0_4] : memref<16x512xf32, #tpu.memory_space<vmem>>, vector<16x512xf32>
    %cst = arith.constant dense<0.000000e+00> : vector<64x512xf32>
    %6 = tpu.matmul %4, %5, %cst {dimension_numbers = #tpu.dot_dimension_numbers<[1], [0], [0], [1], [0, 0, 1, 1], [], []>} : vector<64x16xf32>, vector<16x512xf32>, vector<64x512xf32> -> vector<64x512xf32>
    %c0_5 = arith.constant 0 : index
    %c0_6 = arith.constant 0 : index
    %7 = vector.load %arg7[%c0_5, %c0_6] : memref<1x512xf32, #tpu.memory_space<vmem>>, vector<1x512xf32>
    %8 = vector.broadcast %7 : vector<1x512xf32> to vector<64x512xf32>
    %9 = arith.addf %6, %8 : vector<64x512xf32>
    %10 = vector.shape_cast %9 : vector<64x512xf32> to vector<8x8x512xf32>
    %c0_7 = arith.constant 0 : index
    %c0_8 = arith.constant 0 : index
    %c0_9 = arith.constant 0 : index
    %11 = vector.load %arg11[%c0_7, %c0_8, %c0_9] : memref<8x8x512xf32, #tpu.memory_space<vmem>>, vector<8x8x512xf32>
    tpu.vector_store %arg11[%c0_7, %c0_8, %c0_9], %10 {strides = array<i32>} : memref<8x8x512xf32, #tpu.memory_space<vmem>>, vector<8x8x512xf32>,
    %c0_10 = arith.constant 0 : index
    %c0_11 = arith.constant 0 : index
    %12 = vector.load %arg6[%c0_10, %c0_11] : memref<128x512xf32, #tpu.memory_space<vmem>>, vector<128x512xf32>
    %c0_12 = arith.constant 0 : index
    %c0_13 = arith.constant 0 : index
    %13 = vector.load %arg12[%c0_12, %c0_13] : memref<8x128xf32, #tpu.memory_space<vmem>>, vector<8x128xf32>
    %c0_14 = arith.constant 0 : index
    %c0_15 = arith.constant 0 : index
    %14 = vector.load %arg13[%c0_14, %c0_15] : memref<8x128xf32, #tpu.memory_space<vmem>>, vector<8x128xf32>
    %c0_16 = arith.constant 0 : index
    %c0_17 = arith.constant 0 : index
    %c0_18 = arith.constant 0 : index
    %15 = vector.load %arg11[%c0_16, %c0_17, %c0_18] : memref<8x8x512xf32, #tpu.memory_space<vmem>>, vector<8x1x512xf32>
    %16 = vector.shape_cast %15 : vector<8x1x512xf32> to vector<8x512xf32>
    %cst_19 = arith.constant dense<0.000000e+00> : vector<8x512xf32>
    %17 = tpu.matmul %13, %12, %cst_19 {dimension_numbers = #tpu.dot_dimension_numbers<[1], [0], [0], [1], [0, 0, 1, 1], [], []>} : vector<8x128xf32>, vector<128x512xf32>, vector<8x512xf32> -> vector<8x512xf32>
    %18 = arith.addf %16, %17 : vector<8x512xf32>
    %19 = vector.extract_strided_slice %18 {offsets = [0, 0], sizes = [8, 128], strides = [1, 1]} : vector<8x512xf32> to vector<8x128xf32>
    %cst_20 = arith.constant 5.000000e-01 : f32
    %20 = vector.broadcast %cst_20 : f32 to vector<8x128xf32>
    %21 = arith.mulf %20, %19 : vector<8x128xf32>
    %22 = math.tanh %21 : vector<8x128xf32>
    %cst_21 = arith.constant 5.000000e-01 : f32
    %23 = vector.broadcast %cst_21 : f32 to vector<8x128xf32>
    %24 = arith.mulf %23, %22 : vector<8x128xf32>
    %cst_22 = arith.constant 5.000000e-01 : f32
    %25 = vector.broadcast %cst_22 : f32 to vector<8x128xf32>
    %26 = arith.addf %24, %25 : vector<8x128xf32>
    %27 = vector.extract_strided_slice %18 {offsets = [0, 128], sizes = [8, 128], strides = [1, 1]} : vector<8x512xf32> to vector<8x128xf32>
    %cst_23 = arith.constant 5.000000e-01 : f32
    %28 = vector.broadcast %cst_23 : f32 to vector<8x128xf32>
    %29 = arith.mulf %28, %27 : vector<8x128xf32>
    %30 = math.tanh %29 : vector<8x128xf32>
    %cst_24 = arith.constant 5.000000e-01 : f32
    %31 = vector.broadcast %cst_24 : f32 to vector<8x128xf32>
    %32 = arith.mulf %31, %30 : vector<8x128xf32>
    %cst_25 = arith.constant 5.000000e-01 : f32
    %33 = vector.broadcast %cst_25 : f32 to vector<8x128xf32>
    %34 = arith.addf %32, %33 : vector<8x128xf32>
    %35 = vector.extract_strided_slice %18 {offsets = [0, 256], sizes = [8, 128], strides = [1, 1]} : vector<8x512xf32> to vector<8x128xf32>
    %36 = math.tanh %35 : vector<8x128xf32>
    %37 = vector.extract_strided_slice %18 {offsets = [0, 384], sizes = [8, 128], strides = [1, 1]} : vector<8x512xf32> to vector<8x128xf32>
    %cst_26 = arith.constant 5.000000e-01 : f32
    %38 = vector.broadcast %cst_26 : f32 to vector<8x128xf32>
    %39 = arith.mulf %38, %37 : vector<8x128xf32>
    %40 = math.tanh %39 : vector<8x128xf32>
    %cst_27 = arith.constant 5.000000e-01 : f32
    %41 = vector.broadcast %cst_27 : f32 to vector<8x128xf32>
    %42 = arith.mulf %41, %40 : vector<8x128xf32>
    %cst_28 = arith.constant 5.000000e-01 : f32
    %43 = vector.broadcast %cst_28 : f32 to vector<8x128xf32>
    %44 = arith.addf %42, %43 : vector<8x128xf32>
    %45 = arith.mulf %34, %14 : vector<8x128xf32>
    %46 = arith.mulf %26, %36 : vector<8x128xf32>
    %47 = arith.addf %45, %46 : vector<8x128xf32>
    %48 = math.tanh %47 : vector<8x128xf32>
    %49 = arith.mulf %44, %48 : vector<8x128xf32>
    %c0_29 = arith.constant 0 : index
    %c0_30 = arith.constant 0 : index
    %c0_31 = arith.constant 0 : index
    %50 = vector.load %arg8[%c0_29, %c0_30, %c0_31] : memref<8x8x128xf32, #tpu.memory_space<vmem>>, vector<8x1x128xf32>
    %51 = vector.shape_cast %50 : vector<8x1x128xf32> to vector<8x128xf32>
    %52 = vector.shape_cast %49 : vector<8x128xf32> to vector<8x1x128xf32>
    tpu.vector_store %arg8[%c0_29, %c0_30, %c0_31], %52 {strides = array<i32>} : memref<8x8x128xf32, #tpu.memory_space<vmem>>, vector<8x1x128xf32>,
    %c0_32 = arith.constant 0 : index
    %c1 = arith.constant 1 : index
    %c0_33 = arith.constant 0 : index
    %53 = vector.load %arg11[%c0_32, %c1, %c0_33] : memref<8x8x512xf32, #tpu.memory_space<vmem>>, vector<8x1x512xf32>
    %54 = vector.shape_cast %53 : vector<8x1x512xf32> to vector<8x512xf32>
    %cst_34 = arith.constant dense<0.000000e+00> : vector<8x512xf32>
    %55 = tpu.matmul %49, %12, %cst_34 {dimension_numbers = #tpu.dot_dimension_numbers<[1], [0], [0], [1], [0, 0, 1, 1], [], []>} : vector<8x128xf32>, vector<128x512xf32>, vector<8x512xf32> -> vector<8x512xf32>
    %56 = arith.addf %54, %55 : vector<8x512xf32>
    %57 = vector.extract_strided_slice %56 {offsets = [0, 0], sizes = [8, 128], strides = [1, 1]} : vector<8x512xf32> to vector<8x128xf32>
    %cst_35 = arith.constant 5.000000e-01 : f32
    %58 = vector.broadcast %cst_35 : f32 to vector<8x128xf32>
    %59 = arith.mulf %58, %57 : vector<8x128xf32>
    %60 = math.tanh %59 : vector<8x128xf32>
    %cst_36 = arith.constant 5.000000e-01 : f32
    %61 = vector.broadcast %cst_36 : f32 to vector<8x128xf32>
    %62 = arith.mulf %61, %60 : vector<8x128xf32>
    %cst_37 = arith.constant 5.000000e-01 : f32
    %63 = vector.broadcast %cst_37 : f32 to vector<8x128xf32>
    %64 = arith.addf %62, %63 : vector<8x128xf32>
    %65 = vector.extract_strided_slice %56 {offsets = [0, 128], sizes = [8, 128], strides = [1, 1]} : vector<8x512xf32> to vector<8x128xf32>
    %cst_38 = arith.constant 5.000000e-01 : f32
    %66 = vector.broadcast %cst_38 : f32 to vector<8x128xf32>
    %67 = arith.mulf %66, %65 : vector<8x128xf32>
    %68 = math.tanh %67 : vector<8x128xf32>
    %cst_39 = arith.constant 5.000000e-01 : f32
    %69 = vector.broadcast %cst_39 : f32 to vector<8x128xf32>
    %70 = arith.mulf %69, %68 : vector<8x128xf32>
    %cst_40 = arith.constant 5.000000e-01 : f32
    %71 = vector.broadcast %cst_40 : f32 to vector<8x128xf32>
    %72 = arith.addf %70, %71 : vector<8x128xf32>
    %73 = vector.extract_strided_slice %56 {offsets = [0, 256], sizes = [8, 128], strides = [1, 1]} : vector<8x512xf32> to vector<8x128xf32>
    %74 = math.tanh %73 : vector<8x128xf32>
    %75 = vector.extract_strided_slice %56 {offsets = [0, 384], sizes = [8, 128], strides = [1, 1]} : vector<8x512xf32> to vector<8x128xf32>
    %cst_41 = arith.constant 5.000000e-01 : f32
    %76 = vector.broadcast %cst_41 : f32 to vector<8x128xf32>
    %77 = arith.mulf %76, %75 : vector<8x128xf32>
    %78 = math.tanh %77 : vector<8x128xf32>
    %cst_42 = arith.constant 5.000000e-01 : f32
    %79 = vector.broadcast %cst_42 : f32 to vector<8x128xf32>
    %80 = arith.mulf %79, %78 : vector<8x128xf32>
    %cst_43 = arith.constant 5.000000e-01 : f32
    %81 = vector.broadcast %cst_43 : f32 to vector<8x128xf32>
    %82 = arith.addf %80, %81 : vector<8x128xf32>
    %83 = arith.mulf %72, %47 : vector<8x128xf32>
    %84 = arith.mulf %64, %74 : vector<8x128xf32>
    %85 = arith.addf %83, %84 : vector<8x128xf32>
    %86 = math.tanh %85 : vector<8x128xf32>
    %87 = arith.mulf %82, %86 : vector<8x128xf32>
    %c0_44 = arith.constant 0 : index
    %c1_45 = arith.constant 1 : index
    %c0_46 = arith.constant 0 : index
    %88 = vector.load %arg8[%c0_44, %c1_45, %c0_46] : memref<8x8x128xf32, #tpu.memory_space<vmem>>, vector<8x1x128xf32>
    %89 = vector.shape_cast %88 : vector<8x1x128xf32> to vector<8x128xf32>
    %90 = vector.shape_cast %87 : vector<8x128xf32> to vector<8x1x128xf32>
    tpu.vector_store %arg8[%c0_44, %c1_45, %c0_46], %90 {strides = array<i32>} : memref<8x8x128xf32, #tpu.memory_space<vmem>>, vector<8x1x128xf32>,
    %c0_47 = arith.constant 0 : index
    %c2 = arith.constant 2 : index
    %c0_48 = arith.constant 0 : index
    %91 = vector.load %arg11[%c0_47, %c2, %c0_48] : memref<8x8x512xf32, #tpu.memory_space<vmem>>, vector<8x1x512xf32>
    %92 = vector.shape_cast %91 : vector<8x1x512xf32> to vector<8x512xf32>
    %cst_49 = arith.constant dense<0.000000e+00> : vector<8x512xf32>
    %93 = tpu.matmul %87, %12, %cst_49 {dimension_numbers = #tpu.dot_dimension_numbers<[1], [0], [0], [1], [0, 0, 1, 1], [], []>} : vector<8x128xf32>, vector<128x512xf32>, vector<8x512xf32> -> vector<8x512xf32>
    %94 = arith.addf %92, %93 : vector<8x512xf32>
    %95 = vector.extract_strided_slice %94 {offsets = [0, 0], sizes = [8, 128], strides = [1, 1]} : vector<8x512xf32> to vector<8x128xf32>
    %cst_50 = arith.constant 5.000000e-01 : f32
    %96 = vector.broadcast %cst_50 : f32 to vector<8x128xf32>
    %97 = arith.mulf %96, %95 : vector<8x128xf32>
    %98 = math.tanh %97 : vector<8x128xf32>
    %cst_51 = arith.constant 5.000000e-01 : f32
    %99 = vector.broadcast %cst_51 : f32 to vector<8x128xf32>
    %100 = arith.mulf %99, %98 : vector<8x128xf32>
    %cst_52 = arith.constant 5.000000e-01 : f32
    %101 = vector.broadcast %cst_52 : f32 to vector<8x128xf32>
    %102 = arith.addf %100, %101 : vector<8x128xf32>
    %103 = vector.extract_strided_slice %94 {offsets = [0, 128], sizes = [8, 128], strides = [1, 1]} : vector<8x512xf32> to vector<8x128xf32>
    %cst_53 = arith.constant 5.000000e-01 : f32
    %104 = vector.broadcast %cst_53 : f32 to vector<8x128xf32>
    %105 = arith.mulf %104, %103 : vector<8x128xf32>
    %106 = math.tanh %105 : vector<8x128xf32>
    %cst_54 = arith.constant 5.000000e-01 : f32
    %107 = vector.broadcast %cst_54 : f32 to vector<8x128xf32>
    %108 = arith.mulf %107, %106 : vector<8x128xf32>
    %cst_55 = arith.constant 5.000000e-01 : f32
    %109 = vector.broadcast %cst_55 : f32 to vector<8x128xf32>
    %110 = arith.addf %108, %109 : vector<8x128xf32>
    %111 = vector.extract_strided_slice %94 {offsets = [0, 256], sizes = [8, 128], strides = [1, 1]} : vector<8x512xf32> to vector<8x128xf32>
    %112 = math.tanh %111 : vector<8x128xf32>
    %113 = vector.extract_strided_slice %94 {offsets = [0, 384], sizes = [8, 128], strides = [1, 1]} : vector<8x512xf32> to vector<8x128xf32>
    %cst_56 = arith.constant 5.000000e-01 : f32
    %114 = vector.broadcast %cst_56 : f32 to vector<8x128xf32>
    %115 = arith.mulf %114, %113 : vector<8x128xf32>
    %116 = math.tanh %115 : vector<8x128xf32>
    %cst_57 = arith.constant 5.000000e-01 : f32
    %117 = vector.broadcast %cst_57 : f32 to vector<8x128xf32>
    %118 = arith.mulf %117, %116 : vector<8x128xf32>
    %cst_58 = arith.constant 5.000000e-01 : f32
    %119 = vector.broadcast %cst_58 : f32 to vector<8x128xf32>
    %120 = arith.addf %118, %119 : vector<8x128xf32>
    %121 = arith.mulf %110, %85 : vector<8x128xf32>
    %122 = arith.mulf %102, %112 : vector<8x128xf32>
    %123 = arith.addf %121, %122 : vector<8x128xf32>
    %124 = math.tanh %123 : vector<8x128xf32>
    %125 = arith.mulf %120, %124 : vector<8x128xf32>
    %c0_59 = arith.constant 0 : index
    %c2_60 = arith.constant 2 : index
    %c0_61 = arith.constant 0 : index
    %126 = vector.load %arg8[%c0_59, %c2_60, %c0_61] : memref<8x8x128xf32, #tpu.memory_space<vmem>>, vector<8x1x128xf32>
    %127 = vector.shape_cast %126 : vector<8x1x128xf32> to vector<8x128xf32>
    %128 = vector.shape_cast %125 : vector<8x128xf32> to vector<8x1x128xf32>
    tpu.vector_store %arg8[%c0_59, %c2_60, %c0_61], %128 {strides = array<i32>} : memref<8x8x128xf32, #tpu.memory_space<vmem>>, vector<8x1x128xf32>,
    %c0_62 = arith.constant 0 : index
    %c3 = arith.constant 3 : index
    %c0_63 = arith.constant 0 : index
    %129 = vector.load %arg11[%c0_62, %c3, %c0_63] : memref<8x8x512xf32, #tpu.memory_space<vmem>>, vector<8x1x512xf32>
    %130 = vector.shape_cast %129 : vector<8x1x512xf32> to vector<8x512xf32>
    %cst_64 = arith.constant dense<0.000000e+00> : vector<8x512xf32>
    %131 = tpu.matmul %125, %12, %cst_64 {dimension_numbers = #tpu.dot_dimension_numbers<[1], [0], [0], [1], [0, 0, 1, 1], [], []>} : vector<8x128xf32>, vector<128x512xf32>, vector<8x512xf32> -> vector<8x512xf32>
    %132 = arith.addf %130, %131 : vector<8x512xf32>
    %133 = vector.extract_strided_slice %132 {offsets = [0, 0], sizes = [8, 128], strides = [1, 1]} : vector<8x512xf32> to vector<8x128xf32>
    %cst_65 = arith.constant 5.000000e-01 : f32
    %134 = vector.broadcast %cst_65 : f32 to vector<8x128xf32>
    %135 = arith.mulf %134, %133 : vector<8x128xf32>
    %136 = math.tanh %135 : vector<8x128xf32>
    %cst_66 = arith.constant 5.000000e-01 : f32
    %137 = vector.broadcast %cst_66 : f32 to vector<8x128xf32>
    %138 = arith.mulf %137, %136 : vector<8x128xf32>
    %cst_67 = arith.constant 5.000000e-01 : f32
    %139 = vector.broadcast %cst_67 : f32 to vector<8x128xf32>
    %140 = arith.addf %138, %139 : vector<8x128xf32>
    %141 = vector.extract_strided_slice %132 {offsets = [0, 128], sizes = [8, 128], strides = [1, 1]} : vector<8x512xf32> to vector<8x128xf32>
    %cst_68 = arith.constant 5.000000e-01 : f32
    %142 = vector.broadcast %cst_68 : f32 to vector<8x128xf32>
    %143 = arith.mulf %142, %141 : vector<8x128xf32>
    %144 = math.tanh %143 : vector<8x128xf32>
    %cst_69 = arith.constant 5.000000e-01 : f32
    %145 = vector.broadcast %cst_69 : f32 to vector<8x128xf32>
    %146 = arith.mulf %145, %144 : vector<8x128xf32>
    %cst_70 = arith.constant 5.000000e-01 : f32
    %147 = vector.broadcast %cst_70 : f32 to vector<8x128xf32>
    %148 = arith.addf %146, %147 : vector<8x128xf32>
    %149 = vector.extract_strided_slice %132 {offsets = [0, 256], sizes = [8, 128], strides = [1, 1]} : vector<8x512xf32> to vector<8x128xf32>
    %150 = math.tanh %149 : vector<8x128xf32>
    %151 = vector.extract_strided_slice %132 {offsets = [0, 384], sizes = [8, 128], strides = [1, 1]} : vector<8x512xf32> to vector<8x128xf32>
    %cst_71 = arith.constant 5.000000e-01 : f32
    %152 = vector.broadcast %cst_71 : f32 to vector<8x128xf32>
    %153 = arith.mulf %152, %151 : vector<8x128xf32>
    %154 = math.tanh %153 : vector<8x128xf32>
    %cst_72 = arith.constant 5.000000e-01 : f32
    %155 = vector.broadcast %cst_72 : f32 to vector<8x128xf32>
    %156 = arith.mulf %155, %154 : vector<8x128xf32>
    %cst_73 = arith.constant 5.000000e-01 : f32
    %157 = vector.broadcast %cst_73 : f32 to vector<8x128xf32>
    %158 = arith.addf %156, %157 : vector<8x128xf32>
    %159 = arith.mulf %148, %123 : vector<8x128xf32>
    %160 = arith.mulf %140, %150 : vector<8x128xf32>
    %161 = arith.addf %159, %160 : vector<8x128xf32>
    %162 = math.tanh %161 : vector<8x128xf32>
    %163 = arith.mulf %158, %162 : vector<8x128xf32>
    %c0_74 = arith.constant 0 : index
    %c3_75 = arith.constant 3 : index
    %c0_76 = arith.constant 0 : index
    %164 = vector.load %arg8[%c0_74, %c3_75, %c0_76] : memref<8x8x128xf32, #tpu.memory_space<vmem>>, vector<8x1x128xf32>
    %165 = vector.shape_cast %164 : vector<8x1x128xf32> to vector<8x128xf32>
    %166 = vector.shape_cast %163 : vector<8x128xf32> to vector<8x1x128xf32>
    tpu.vector_store %arg8[%c0_74, %c3_75, %c0_76], %166 {strides = array<i32>} : memref<8x8x128xf32, #tpu.memory_space<vmem>>, vector<8x1x128xf32>,
    %c0_77 = arith.constant 0 : index
    %c4 = arith.constant 4 : index
    %c0_78 = arith.constant 0 : index
    %167 = vector.load %arg11[%c0_77, %c4, %c0_78] : memref<8x8x512xf32, #tpu.memory_space<vmem>>, vector<8x1x512xf32>
    %168 = vector.shape_cast %167 : vector<8x1x512xf32> to vector<8x512xf32>
    %cst_79 = arith.constant dense<0.000000e+00> : vector<8x512xf32>
    %169 = tpu.matmul %163, %12, %cst_79 {dimension_numbers = #tpu.dot_dimension_numbers<[1], [0], [0], [1], [0, 0, 1, 1], [], []>} : vector<8x128xf32>, vector<128x512xf32>, vector<8x512xf32> -> vector<8x512xf32>
    %170 = arith.addf %168, %169 : vector<8x512xf32>
    %171 = vector.extract_strided_slice %170 {offsets = [0, 0], sizes = [8, 128], strides = [1, 1]} : vector<8x512xf32> to vector<8x128xf32>
    %cst_80 = arith.constant 5.000000e-01 : f32
    %172 = vector.broadcast %cst_80 : f32 to vector<8x128xf32>
    %173 = arith.mulf %172, %171 : vector<8x128xf32>
    %174 = math.tanh %173 : vector<8x128xf32>
    %cst_81 = arith.constant 5.000000e-01 : f32
    %175 = vector.broadcast %cst_81 : f32 to vector<8x128xf32>
    %176 = arith.mulf %175, %174 : vector<8x128xf32>
    %cst_82 = arith.constant 5.000000e-01 : f32
    %177 = vector.broadcast %cst_82 : f32 to vector<8x128xf32>
    %178 = arith.addf %176, %177 : vector<8x128xf32>
    %179 = vector.extract_strided_slice %170 {offsets = [0, 128], sizes = [8, 128], strides = [1, 1]} : vector<8x512xf32> to vector<8x128xf32>
    %cst_83 = arith.constant 5.000000e-01 : f32
    %180 = vector.broadcast %cst_83 : f32 to vector<8x128xf32>
    %181 = arith.mulf %180, %179 : vector<8x128xf32>
    %182 = math.tanh %181 : vector<8x128xf32>
    %cst_84 = arith.constant 5.000000e-01 : f32
    %183 = vector.broadcast %cst_84 : f32 to vector<8x128xf32>
    %184 = arith.mulf %183, %182 : vector<8x128xf32>
    %cst_85 = arith.constant 5.000000e-01 : f32
    %185 = vector.broadcast %cst_85 : f32 to vector<8x128xf32>
    %186 = arith.addf %184, %185 : vector<8x128xf32>
    %187 = vector.extract_strided_slice %170 {offsets = [0, 256], sizes = [8, 128], strides = [1, 1]} : vector<8x512xf32> to vector<8x128xf32>
    %188 = math.tanh %187 : vector<8x128xf32>
    %189 = vector.extract_strided_slice %170 {offsets = [0, 384], sizes = [8, 128], strides = [1, 1]} : vector<8x512xf32> to vector<8x128xf32>
    %cst_86 = arith.constant 5.000000e-01 : f32
    %190 = vector.broadcast %cst_86 : f32 to vector<8x128xf32>
    %191 = arith.mulf %190, %189 : vector<8x128xf32>
    %192 = math.tanh %191 : vector<8x128xf32>
    %cst_87 = arith.constant 5.000000e-01 : f32
    %193 = vector.broadcast %cst_87 : f32 to vector<8x128xf32>
    %194 = arith.mulf %193, %192 : vector<8x128xf32>
    %cst_88 = arith.constant 5.000000e-01 : f32
    %195 = vector.broadcast %cst_88 : f32 to vector<8x128xf32>
    %196 = arith.addf %194, %195 : vector<8x128xf32>
    %197 = arith.mulf %186, %161 : vector<8x128xf32>
    %198 = arith.mulf %178, %188 : vector<8x128xf32>
    %199 = arith.addf %197, %198 : vector<8x128xf32>
    %200 = math.tanh %199 : vector<8x128xf32>
    %201 = arith.mulf %196, %200 : vector<8x128xf32>
    %c0_89 = arith.constant 0 : index
    %c4_90 = arith.constant 4 : index
    %c0_91 = arith.constant 0 : index
    %202 = vector.load %arg8[%c0_89, %c4_90, %c0_91] : memref<8x8x128xf32, #tpu.memory_space<vmem>>, vector<8x1x128xf32>
    %203 = vector.shape_cast %202 : vector<8x1x128xf32> to vector<8x128xf32>
    %204 = vector.shape_cast %201 : vector<8x128xf32> to vector<8x1x128xf32>
    tpu.vector_store %arg8[%c0_89, %c4_90, %c0_91], %204 {strides = array<i32>} : memref<8x8x128xf32, #tpu.memory_space<vmem>>, vector<8x1x128xf32>,
    %c0_92 = arith.constant 0 : index
    %c5 = arith.constant 5 : index
    %c0_93 = arith.constant 0 : index
    %205 = vector.load %arg11[%c0_92, %c5, %c0_93] : memref<8x8x512xf32, #tpu.memory_space<vmem>>, vector<8x1x512xf32>
    %206 = vector.shape_cast %205 : vector<8x1x512xf32> to vector<8x512xf32>
    %cst_94 = arith.constant dense<0.000000e+00> : vector<8x512xf32>
    %207 = tpu.matmul %201, %12, %cst_94 {dimension_numbers = #tpu.dot_dimension_numbers<[1], [0], [0], [1], [0, 0, 1, 1], [], []>} : vector<8x128xf32>, vector<128x512xf32>, vector<8x512xf32> -> vector<8x512xf32>
    %208 = arith.addf %206, %207 : vector<8x512xf32>
    %209 = vector.extract_strided_slice %208 {offsets = [0, 0], sizes = [8, 128], strides = [1, 1]} : vector<8x512xf32> to vector<8x128xf32>
    %cst_95 = arith.constant 5.000000e-01 : f32
    %210 = vector.broadcast %cst_95 : f32 to vector<8x128xf32>
    %211 = arith.mulf %210, %209 : vector<8x128xf32>
    %212 = math.tanh %211 : vector<8x128xf32>
    %cst_96 = arith.constant 5.000000e-01 : f32
    %213 = vector.broadcast %cst_96 : f32 to vector<8x128xf32>
    %214 = arith.mulf %213, %212 : vector<8x128xf32>
    %cst_97 = arith.constant 5.000000e-01 : f32
    %215 = vector.broadcast %cst_97 : f32 to vector<8x128xf32>
    %216 = arith.addf %214, %215 : vector<8x128xf32>
    %217 = vector.extract_strided_slice %208 {offsets = [0, 128], sizes = [8, 128], strides = [1, 1]} : vector<8x512xf32> to vector<8x128xf32>
    %cst_98 = arith.constant 5.000000e-01 : f32
    %218 = vector.broadcast %cst_98 : f32 to vector<8x128xf32>
    %219 = arith.mulf %218, %217 : vector<8x128xf32>
    %220 = math.tanh %219 : vector<8x128xf32>
    %cst_99 = arith.constant 5.000000e-01 : f32
    %221 = vector.broadcast %cst_99 : f32 to vector<8x128xf32>
    %222 = arith.mulf %221, %220 : vector<8x128xf32>
    %cst_100 = arith.constant 5.000000e-01 : f32
    %223 = vector.broadcast %cst_100 : f32 to vector<8x128xf32>
    %224 = arith.addf %222, %223 : vector<8x128xf32>
    %225 = vector.extract_strided_slice %208 {offsets = [0, 256], sizes = [8, 128], strides = [1, 1]} : vector<8x512xf32> to vector<8x128xf32>
    %226 = math.tanh %225 : vector<8x128xf32>
    %227 = vector.extract_strided_slice %208 {offsets = [0, 384], sizes = [8, 128], strides = [1, 1]} : vector<8x512xf32> to vector<8x128xf32>
    %cst_101 = arith.constant 5.000000e-01 : f32
    %228 = vector.broadcast %cst_101 : f32 to vector<8x128xf32>
    %229 = arith.mulf %228, %227 : vector<8x128xf32>
    %230 = math.tanh %229 : vector<8x128xf32>
    %cst_102 = arith.constant 5.000000e-01 : f32
    %231 = vector.broadcast %cst_102 : f32 to vector<8x128xf32>
    %232 = arith.mulf %231, %230 : vector<8x128xf32>
    %cst_103 = arith.constant 5.000000e-01 : f32
    %233 = vector.broadcast %cst_103 : f32 to vector<8x128xf32>
    %234 = arith.addf %232, %233 : vector<8x128xf32>
    %235 = arith.mulf %224, %199 : vector<8x128xf32>
    %236 = arith.mulf %216, %226 : vector<8x128xf32>
    %237 = arith.addf %235, %236 : vector<8x128xf32>
    %238 = math.tanh %237 : vector<8x128xf32>
    %239 = arith.mulf %234, %238 : vector<8x128xf32>
    %c0_104 = arith.constant 0 : index
    %c5_105 = arith.constant 5 : index
    %c0_106 = arith.constant 0 : index
    %240 = vector.load %arg8[%c0_104, %c5_105, %c0_106] : memref<8x8x128xf32, #tpu.memory_space<vmem>>, vector<8x1x128xf32>
    %241 = vector.shape_cast %240 : vector<8x1x128xf32> to vector<8x128xf32>
    %242 = vector.shape_cast %239 : vector<8x128xf32> to vector<8x1x128xf32>
    tpu.vector_store %arg8[%c0_104, %c5_105, %c0_106], %242 {strides = array<i32>} : memref<8x8x128xf32, #tpu.memory_space<vmem>>, vector<8x1x128xf32>,
    %c0_107 = arith.constant 0 : index
    %c6 = arith.constant 6 : index
    %c0_108 = arith.constant 0 : index
    %243 = vector.load %arg11[%c0_107, %c6, %c0_108] : memref<8x8x512xf32, #tpu.memory_space<vmem>>, vector<8x1x512xf32>
    %244 = vector.shape_cast %243 : vector<8x1x512xf32> to vector<8x512xf32>
    %cst_109 = arith.constant dense<0.000000e+00> : vector<8x512xf32>
    %245 = tpu.matmul %239, %12, %cst_109 {dimension_numbers = #tpu.dot_dimension_numbers<[1], [0], [0], [1], [0, 0, 1, 1], [], []>} : vector<8x128xf32>, vector<128x512xf32>, vector<8x512xf32> -> vector<8x512xf32>
    %246 = arith.addf %244, %245 : vector<8x512xf32>
    %247 = vector.extract_strided_slice %246 {offsets = [0, 0], sizes = [8, 128], strides = [1, 1]} : vector<8x512xf32> to vector<8x128xf32>
    %cst_110 = arith.constant 5.000000e-01 : f32
    %248 = vector.broadcast %cst_110 : f32 to vector<8x128xf32>
    %249 = arith.mulf %248, %247 : vector<8x128xf32>
    %250 = math.tanh %249 : vector<8x128xf32>
    %cst_111 = arith.constant 5.000000e-01 : f32
    %251 = vector.broadcast %cst_111 : f32 to vector<8x128xf32>
    %252 = arith.mulf %251, %250 : vector<8x128xf32>
    %cst_112 = arith.constant 5.000000e-01 : f32
    %253 = vector.broadcast %cst_112 : f32 to vector<8x128xf32>
    %254 = arith.addf %252, %253 : vector<8x128xf32>
    %255 = vector.extract_strided_slice %246 {offsets = [0, 128], sizes = [8, 128], strides = [1, 1]} : vector<8x512xf32> to vector<8x128xf32>
    %cst_113 = arith.constant 5.000000e-01 : f32
    %256 = vector.broadcast %cst_113 : f32 to vector<8x128xf32>
    %257 = arith.mulf %256, %255 : vector<8x128xf32>
    %258 = math.tanh %257 : vector<8x128xf32>
    %cst_114 = arith.constant 5.000000e-01 : f32
    %259 = vector.broadcast %cst_114 : f32 to vector<8x128xf32>
    %260 = arith.mulf %259, %258 : vector<8x128xf32>
    %cst_115 = arith.constant 5.000000e-01 : f32
    %261 = vector.broadcast %cst_115 : f32 to vector<8x128xf32>
    %262 = arith.addf %260, %261 : vector<8x128xf32>
    %263 = vector.extract_strided_slice %246 {offsets = [0, 256], sizes = [8, 128], strides = [1, 1]} : vector<8x512xf32> to vector<8x128xf32>
    %264 = math.tanh %263 : vector<8x128xf32>
    %265 = vector.extract_strided_slice %246 {offsets = [0, 384], sizes = [8, 128], strides = [1, 1]} : vector<8x512xf32> to vector<8x128xf32>
    %cst_116 = arith.constant 5.000000e-01 : f32
    %266 = vector.broadcast %cst_116 : f32 to vector<8x128xf32>
    %267 = arith.mulf %266, %265 : vector<8x128xf32>
    %268 = math.tanh %267 : vector<8x128xf32>
    %cst_117 = arith.constant 5.000000e-01 : f32
    %269 = vector.broadcast %cst_117 : f32 to vector<8x128xf32>
    %270 = arith.mulf %269, %268 : vector<8x128xf32>
    %cst_118 = arith.constant 5.000000e-01 : f32
    %271 = vector.broadcast %cst_118 : f32 to vector<8x128xf32>
    %272 = arith.addf %270, %271 : vector<8x128xf32>
    %273 = arith.mulf %262, %237 : vector<8x128xf32>
    %274 = arith.mulf %254, %264 : vector<8x128xf32>
    %275 = arith.addf %273, %274 : vector<8x128xf32>
    %276 = math.tanh %275 : vector<8x128xf32>
    %277 = arith.mulf %272, %276 : vector<8x128xf32>
    %c0_119 = arith.constant 0 : index
    %c6_120 = arith.constant 6 : index
    %c0_121 = arith.constant 0 : index
    %278 = vector.load %arg8[%c0_119, %c6_120, %c0_121] : memref<8x8x128xf32, #tpu.memory_space<vmem>>, vector<8x1x128xf32>
    %279 = vector.shape_cast %278 : vector<8x1x128xf32> to vector<8x128xf32>
    %280 = vector.shape_cast %277 : vector<8x128xf32> to vector<8x1x128xf32>
    tpu.vector_store %arg8[%c0_119, %c6_120, %c0_121], %280 {strides = array<i32>} : memref<8x8x128xf32, #tpu.memory_space<vmem>>, vector<8x1x128xf32>,
    %c0_122 = arith.constant 0 : index
    %c7 = arith.constant 7 : index
    %c0_123 = arith.constant 0 : index
    %281 = vector.load %arg11[%c0_122, %c7, %c0_123] : memref<8x8x512xf32, #tpu.memory_space<vmem>>, vector<8x1x512xf32>
    %282 = vector.shape_cast %281 : vector<8x1x512xf32> to vector<8x512xf32>
    %cst_124 = arith.constant dense<0.000000e+00> : vector<8x512xf32>
    %283 = tpu.matmul %277, %12, %cst_124 {dimension_numbers = #tpu.dot_dimension_numbers<[1], [0], [0], [1], [0, 0, 1, 1], [], []>} : vector<8x128xf32>, vector<128x512xf32>, vector<8x512xf32> -> vector<8x512xf32>
    %284 = arith.addf %282, %283 : vector<8x512xf32>
    %285 = vector.extract_strided_slice %284 {offsets = [0, 0], sizes = [8, 128], strides = [1, 1]} : vector<8x512xf32> to vector<8x128xf32>
    %cst_125 = arith.constant 5.000000e-01 : f32
    %286 = vector.broadcast %cst_125 : f32 to vector<8x128xf32>
    %287 = arith.mulf %286, %285 : vector<8x128xf32>
    %288 = math.tanh %287 : vector<8x128xf32>
    %cst_126 = arith.constant 5.000000e-01 : f32
    %289 = vector.broadcast %cst_126 : f32 to vector<8x128xf32>
    %290 = arith.mulf %289, %288 : vector<8x128xf32>
    %cst_127 = arith.constant 5.000000e-01 : f32
    %291 = vector.broadcast %cst_127 : f32 to vector<8x128xf32>
    %292 = arith.addf %290, %291 : vector<8x128xf32>
    %293 = vector.extract_strided_slice %284 {offsets = [0, 128], sizes = [8, 128], strides = [1, 1]} : vector<8x512xf32> to vector<8x128xf32>
    %cst_128 = arith.constant 5.000000e-01 : f32
    %294 = vector.broadcast %cst_128 : f32 to vector<8x128xf32>
    %295 = arith.mulf %294, %293 : vector<8x128xf32>
    %296 = math.tanh %295 : vector<8x128xf32>
    %cst_129 = arith.constant 5.000000e-01 : f32
    %297 = vector.broadcast %cst_129 : f32 to vector<8x128xf32>
    %298 = arith.mulf %297, %296 : vector<8x128xf32>
    %cst_130 = arith.constant 5.000000e-01 : f32
    %299 = vector.broadcast %cst_130 : f32 to vector<8x128xf32>
    %300 = arith.addf %298, %299 : vector<8x128xf32>
    %301 = vector.extract_strided_slice %284 {offsets = [0, 256], sizes = [8, 128], strides = [1, 1]} : vector<8x512xf32> to vector<8x128xf32>
    %302 = math.tanh %301 : vector<8x128xf32>
    %303 = vector.extract_strided_slice %284 {offsets = [0, 384], sizes = [8, 128], strides = [1, 1]} : vector<8x512xf32> to vector<8x128xf32>
    %cst_131 = arith.constant 5.000000e-01 : f32
    %304 = vector.broadcast %cst_131 : f32 to vector<8x128xf32>
    %305 = arith.mulf %304, %303 : vector<8x128xf32>
    %306 = math.tanh %305 : vector<8x128xf32>
    %cst_132 = arith.constant 5.000000e-01 : f32
    %307 = vector.broadcast %cst_132 : f32 to vector<8x128xf32>
    %308 = arith.mulf %307, %306 : vector<8x128xf32>
    %cst_133 = arith.constant 5.000000e-01 : f32
    %309 = vector.broadcast %cst_133 : f32 to vector<8x128xf32>
    %310 = arith.addf %308, %309 : vector<8x128xf32>
    %311 = arith.mulf %300, %275 : vector<8x128xf32>
    %312 = arith.mulf %292, %302 : vector<8x128xf32>
    %313 = arith.addf %311, %312 : vector<8x128xf32>
    %314 = math.tanh %313 : vector<8x128xf32>
    %315 = arith.mulf %310, %314 : vector<8x128xf32>
    %c0_134 = arith.constant 0 : index
    %c7_135 = arith.constant 7 : index
    %c0_136 = arith.constant 0 : index
    %316 = vector.load %arg8[%c0_134, %c7_135, %c0_136] : memref<8x8x128xf32, #tpu.memory_space<vmem>>, vector<8x1x128xf32>
    %317 = vector.shape_cast %316 : vector<8x1x128xf32> to vector<8x128xf32>
    %318 = vector.shape_cast %315 : vector<8x128xf32> to vector<8x1x128xf32>
    tpu.vector_store %arg8[%c0_134, %c7_135, %c0_136], %318 {strides = array<i32>} : memref<8x8x128xf32, #tpu.memory_space<vmem>>, vector<8x1x128xf32>,
    %c0_137 = arith.constant 0 : index
    %c0_138 = arith.constant 0 : index
    %319 = vector.load %arg12[%c0_137, %c0_138] : memref<8x128xf32, #tpu.memory_space<vmem>>, vector<8x128xf32>
    tpu.vector_store %arg12[%c0_137, %c0_138], %315 {strides = array<i32>} : memref<8x128xf32, #tpu.memory_space<vmem>>, vector<8x128xf32>,
    %c0_139 = arith.constant 0 : index
    %c0_140 = arith.constant 0 : index
    %320 = vector.load %arg13[%c0_139, %c0_140] : memref<8x128xf32, #tpu.memory_space<vmem>>, vector<8x128xf32>
    tpu.vector_store %arg13[%c0_139, %c0_140], %313 {strides = array<i32>} : memref<8x128xf32, #tpu.memory_space<vmem>>, vector<8x128xf32>,
    %c0_i32_141 = arith.constant 0 : i32
    %321 = arith.cmpi eq, %arg1, %c0_i32_141 : i32
    %322 = arith.extui %321 : i1 to i32
    %c0_i32_142 = arith.constant 0 : i32
    %323 = arith.cmpi ne, %322, %c0_i32_142 : i32
    scf.if %323 {
      %c0_143 = arith.constant 0 : index
      %c0_144 = arith.constant 0 : index
      %324 = vector.load %arg12[%c0_143, %c0_144] : memref<8x128xf32, #tpu.memory_space<vmem>>, vector<8x128xf32>
      %c0_145 = arith.constant 0 : index
      %c0_146 = arith.constant 0 : index
      %325 = vector.load %arg9[%c0_145, %c0_146] : memref<8x128xf32, #tpu.memory_space<vmem>>, vector<8x128xf32>
      tpu.vector_store %arg9[%c0_145, %c0_146], %324 {strides = array<i32>} : memref<8x128xf32, #tpu.memory_space<vmem>>, vector<8x128xf32>,
      %c0_147 = arith.constant 0 : index
      %c0_148 = arith.constant 0 : index
      %326 = vector.load %arg13[%c0_147, %c0_148] : memref<8x128xf32, #tpu.memory_space<vmem>>, vector<8x128xf32>
      %c0_149 = arith.constant 0 : index
      %c0_150 = arith.constant 0 : index
      %327 = vector.load %arg10[%c0_149, %c0_150] : memref<8x128xf32, #tpu.memory_space<vmem>>, vector<8x128xf32>
      tpu.vector_store %arg10[%c0_149, %c0_150], %326 {strides = array<i32>} : memref<8x128xf32, #tpu.memory_space<vmem>>, vector<8x128xf32>,
    } else {
    }
    return
  }
  func.func @transform_0(%arg0: i32, %arg1: i32) -> (i32, i32, i32) {
    %c0_i32 = arith.constant 0 : i32
    %c0_i32_0 = arith.constant 0 : i32
    return %arg0, %arg1, %c0_i32 : i32, i32, i32
  }
  func.func @transform_1(%arg0: i32, %arg1: i32) -> (i32, i32) {
    %c0_i32 = arith.constant 0 : i32
    %c0_i32_0 = arith.constant 0 : i32
    return %arg0, %c0_i32 : i32, i32
  }
  func.func @transform_2(%arg0: i32, %arg1: i32) -> (i32, i32) {
    %c0_i32 = arith.constant 0 : i32
    %c0_i32_0 = arith.constant 0 : i32
    return %arg0, %c0_i32 : i32, i32
  }
  func.func @transform_3(%arg0: i32, %arg1: i32) -> (i32, i32) {
    %c0_i32 = arith.constant 0 : i32
    %c0_i32_0 = arith.constant 0 : i32
    %c0_i32_1 = arith.constant 0 : i32
    return %c0_i32, %c0_i32_0 : i32, i32
  }
  func.func @transform_4(%arg0: i32, %arg1: i32) -> (i32, i32) {
    %c0_i32 = arith.constant 0 : i32
    %c0_i32_0 = arith.constant 0 : i32
    %c0_i32_1 = arith.constant 0 : i32
    return %c0_i32, %c0_i32_0 : i32, i32
  }
  func.func @transform_5(%arg0: i32, %arg1: i32) -> (i32, i32) {
    %c0_i32 = arith.constant 0 : i32
    %c0_i32_0 = arith.constant 0 : i32
    %c0_i32_1 = arith.constant 0 : i32
    return %c0_i32, %c0_i32_0 : i32, i32
  }
  func.func @transform_6(%arg0: i32, %arg1: i32) -> (i32, i32, i32) {
    %c0_i32 = arith.constant 0 : i32
    %c0_i32_0 = arith.constant 0 : i32
    return %arg0, %arg1, %c0_i32 : i32, i32, i32
  }
  func.func @transform_7(%arg0: i32, %arg1: i32) -> (i32, i32) {
    %c0_i32 = arith.constant 0 : i32
    %c0_i32_0 = arith.constant 0 : i32
    return %arg0, %c0_i32 : i32, i32
  }
  func.func @transform_8(%arg0: i32, %arg1: i32) -> (i32, i32) {
    %c0_i32 = arith.constant 0 : i32
    %c0_i32_0 = arith.constant 0 : i32
    return %arg0, %c0_i32 : i32, i32
  }
}

module attributes {stable_mosaic.version = 11 : i64} {
  func.func @_lstm_kernel(%arg0: i32, %arg1: i32, %arg2: memref<8x8x16xf32, #tpu.memory_space<vmem>>, %arg3: memref<8x128xf32, #tpu.memory_space<vmem>>, %arg4: memref<8x128xf32, #tpu.memory_space<vmem>>, %arg5: memref<16x512xf32, #tpu.memory_space<vmem>>, %arg6: memref<128x512xf32, #tpu.memory_space<vmem>>, %arg7: memref<1x512xf32, #tpu.memory_space<vmem>>, %arg8: memref<8x8x128xf32, #tpu.memory_space<vmem>>, %arg9: memref<8x128xf32, #tpu.memory_space<vmem>>, %arg10: memref<8x128xf32, #tpu.memory_space<vmem>>, %arg11: memref<8x8x512xf32, #tpu.memory_space<vmem>>, %arg12: memref<8x128xf32, #tpu.memory_space<vmem>>, %arg13: memref<8x128xf32, #tpu.memory_space<vmem>>) attributes {dimension_semantics = [#tpu.dimension_semantics<parallel>, #tpu.dimension_semantics<arbitrary>], iteration_bounds = array<i64: 1, 1>, scalar_prefetch = 0 : i64, scratch_operands = 3 : i64, tpu.core_type = #tpu.core_type<tc>, window_params = [{transform_indices = @transform_0, window_bounds = array<i64: 8, 8, 16>}, {transform_indices = @transform_1, window_bounds = array<i64: 8, 128>}, {transform_indices = @transform_2, window_bounds = array<i64: 8, 128>}, {pipeline_mode = #tpu.pipeline_mode<synchronous>, transform_indices = @transform_3, window_bounds = array<i64: 16, 512>}, {pipeline_mode = #tpu.pipeline_mode<synchronous>, transform_indices = @transform_4, window_bounds = array<i64: 128, 512>}, {pipeline_mode = #tpu.pipeline_mode<synchronous>, transform_indices = @transform_5, window_bounds = array<i64: 1, 512>}, {transform_indices = @transform_6, window_bounds = array<i64: 8, 8, 128>}, {transform_indices = @transform_7, window_bounds = array<i64: 8, 128>}, {transform_indices = @transform_8, window_bounds = array<i64: 8, 128>}]} {
    %c0_i32 = arith.constant 0 : i32
    %0 = arith.cmpi eq, %arg1, %c0_i32 : i32
    %1 = arith.extui %0 : i1 to i32
    %c0_i32_0 = arith.constant 0 : i32
    %2 = arith.cmpi ne, %1, %c0_i32_0 : i32
    scf.if %2 {
      %c0_143 = arith.constant 0 : index
      %c0_144 = arith.constant 0 : index
      %324 = vector.load %arg3[%c0_143, %c0_144] : memref<8x128xf32, #tpu.memory_space<vmem>>, vector<8x128xf32>
      %c0_145 = arith.constant 0 : index
      %c0_146 = arith.constant 0 : index
      %325 = vector.load %arg12[%c0_145, %c0_146] : memref<8x128xf32, #tpu.memory_space<vmem>>, vector<8x128xf32>
      tpu.vector_store %arg12[%c0_145, %c0_146], %324 {strides = array<i32>} : memref<8x128xf32, #tpu.memory_space<vmem>>, vector<8x128xf32>,
      %c0_147 = arith.constant 0 : index
      %c0_148 = arith.constant 0 : index
      %326 = vector.load %arg4[%c0_147, %c0_148] : memref<8x128xf32, #tpu.memory_space<vmem>>, vector<8x128xf32>
      %c0_149 = arith.constant 0 : index
      %c0_150 = arith.constant 0 : index
      %327 = vector.load %arg13[%c0_149, %c0_150] : memref<8x128xf32, #tpu.memory_space<vmem>>, vector<8x128xf32>
      tpu.vector_store %arg13[%c0_149, %c0_150], %326 {strides = array<i32>} : memref<8x128xf32, #tpu.memory_space<vmem>>, vector<8x128xf32>,
    } else {
    }
    %c0 = arith.constant 0 : index
    %c0_1 = arith.constant 0 : index
    %c0_2 = arith.constant 0 : index
    %3 = vector.load %arg2[%c0, %c0_1, %c0_2] : memref<8x8x16xf32, #tpu.memory_space<vmem>>, vector<8x8x16xf32>
    %4 = vector.shape_cast %3 : vector<8x8x16xf32> to vector<64x16xf32>
    %c0_3 = arith.constant 0 : index
    %c0_4 = arith.constant 0 : index
    %5 = vector.load %arg5[%c0_3, %c0_4] : memref<16x512xf32, #tpu.memory_space<vmem>>, vector<16x512xf32>
    %cst = arith.constant dense<0.000000e+00> : vector<64x512xf32>
    %6 = tpu.matmul %4, %5, %cst {dimension_numbers = #tpu.dot_dimension_numbers<[1], [0], [0], [1], [0, 0, 1, 1], [], []>} : vector<64x16xf32>, vector<16x512xf32>, vector<64x512xf32> -> vector<64x512xf32>
    %c0_5 = arith.constant 0 : index
    %c0_6 = arith.constant 0 : index
    %7 = vector.load %arg7[%c0_5, %c0_6] : memref<1x512xf32, #tpu.memory_space<vmem>>, vector<1x512xf32>
    %8 = vector.broadcast %7 : vector<1x512xf32> to vector<64x512xf32>
    %9 = arith.addf %6, %8 : vector<64x512xf32>
    %10 = vector.shape_cast %9 : vector<64x512xf32> to vector<8x8x512xf32>
    %c0_7 = arith.constant 0 : index
    %c0_8 = arith.constant 0 : index
    %c0_9 = arith.constant 0 : index
    %11 = vector.load %arg11[%c0_7, %c0_8, %c0_9] : memref<8x8x512xf32, #tpu.memory_space<vmem>>, vector<8x8x512xf32>
    tpu.vector_store %arg11[%c0_7, %c0_8, %c0_9], %10 {strides = array<i32>} : memref<8x8x512xf32, #tpu.memory_space<vmem>>, vector<8x8x512xf32>,
    %c0_10 = arith.constant 0 : index
    %c0_11 = arith.constant 0 : index
    %12 = vector.load %arg6[%c0_10, %c0_11] : memref<128x512xf32, #tpu.memory_space<vmem>>, vector<128x512xf32>
    %c0_12 = arith.constant 0 : index
    %c0_13 = arith.constant 0 : index
    %13 = vector.load %arg12[%c0_12, %c0_13] : memref<8x128xf32, #tpu.memory_space<vmem>>, vector<8x128xf32>
    %c0_14 = arith.constant 0 : index
    %c0_15 = arith.constant 0 : index
    %14 = vector.load %arg13[%c0_14, %c0_15] : memref<8x128xf32, #tpu.memory_space<vmem>>, vector<8x128xf32>
    %c0_16 = arith.constant 0 : index
    %c0_17 = arith.constant 0 : index
    %c0_18 = arith.constant 0 : index
    %15 = vector.load %arg11[%c0_16, %c0_17, %c0_18] : memref<8x8x512xf32, #tpu.memory_space<vmem>>, vector<8x1x512xf32>
    %16 = vector.shape_cast %15 : vector<8x1x512xf32> to vector<8x512xf32>
    %cst_19 = arith.constant dense<0.000000e+00> : vector<8x512xf32>
    %17 = tpu.matmul %13, %12, %cst_19 {dimension_numbers = #tpu.dot_dimension_numbers<[1], [0], [0], [1], [0, 0, 1, 1], [], []>} : vector<8x128xf32>, vector<128x512xf32>, vector<8x512xf32> -> vector<8x512xf32>
    %18 = arith.addf %16, %17 : vector<8x512xf32>
    %19 = vector.extract_strided_slice %18 {offsets = [0, 0], sizes = [8, 128], strides = [1, 1]} : vector<8x512xf32> to vector<8x128xf32>
    %cst_20 = arith.constant 5.000000e-01 : f32
    %20 = vector.broadcast %cst_20 : f32 to vector<8x128xf32>
    %21 = arith.mulf %20, %19 : vector<8x128xf32>
    %22 = math.tanh %21 : vector<8x128xf32>
    %cst_21 = arith.constant 5.000000e-01 : f32
    %23 = vector.broadcast %cst_21 : f32 to vector<8x128xf32>
    %24 = arith.mulf %23, %22 : vector<8x128xf32>
    %cst_22 = arith.constant 5.000000e-01 : f32
    %25 = vector.broadcast %cst_22 : f32 to vector<8x128xf32>
    %26 = arith.addf %24, %25 : vector<8x128xf32>
    %27 = vector.extract_strided_slice %18 {offsets = [0, 128], sizes = [8, 128], strides = [1, 1]} : vector<8x512xf32> to vector<8x128xf32>
    %cst_23 = arith.constant 5.000000e-01 : f32
    %28 = vector.broadcast %cst_23 : f32 to vector<8x128xf32>
    %29 = arith.mulf %28, %27 : vector<8x128xf32>
    %30 = math.tanh %29 : vector<8x128xf32>
    %cst_24 = arith.constant 5.000000e-01 : f32
    %31 = vector.broadcast %cst_24 : f32 to vector<8x128xf32>
    %32 = arith.mulf %31, %30 : vector<8x128xf32>
    %cst_25 = arith.constant 5.000000e-01 : f32
    %33 = vector.broadcast %cst_25 : f32 to vector<8x128xf32>
    %34 = arith.addf %32, %33 : vector<8x128xf32>
    %35 = vector.extract_strided_slice %18 {offsets = [0, 256], sizes = [8, 128], strides = [1, 1]} : vector<8x512xf32> to vector<8x128xf32>
    %36 = math.tanh %35 : vector<8x128xf32>
    %37 = vector.extract_strided_slice %18 {offsets = [0, 384], sizes = [8, 128], strides = [1, 1]} : vector<8x512xf32> to vector<8x128xf32>
    %cst_26 = arith.constant 5.000000e-01 : f32
    %38 = vector.broadcast %cst_26 : f32 to vector<8x128xf32>
    %39 = arith.mulf %38, %37 : vector<8x128xf32>
    %40 = math.tanh %39 : vector<8x128xf32>
    %cst_27 = arith.constant 5.000000e-01 : f32
    %41 = vector.broadcast %cst_27 : f32 to vector<8x128xf32>
    %42 = arith.mulf %41, %40 : vector<8x128xf32>
    %cst_28 = arith.constant 5.000000e-01 : f32
    %43 = vector.broadcast %cst_28 : f32 to vector<8x128xf32>
    %44 = arith.addf %42, %43 : vector<8x128xf32>
    %45 = arith.mulf %34, %14 : vector<8x128xf32>
    %46 = arith.mulf %26, %36 : vector<8x128xf32>
    %47 = arith.addf %45, %46 : vector<8x128xf32>
    %48 = math.tanh %47 : vector<8x128xf32>
    %49 = arith.mulf %44, %48 : vector<8x128xf32>
    %c0_29 = arith.constant 0 : index
    %c0_30 = arith.constant 0 : index
    %c0_31 = arith.constant 0 : index
    %50 = vector.load %arg8[%c0_29, %c0_30, %c0_31] : memref<8x8x128xf32, #tpu.memory_space<vmem>>, vector<8x1x128xf32>
    %51 = vector.shape_cast %50 : vector<8x1x128xf32> to vector<8x128xf32>
    %52 = vector.shape_cast %49 : vector<8x128xf32> to vector<8x1x128xf32>
    tpu.vector_store %arg8[%c0_29, %c0_30, %c0_31], %52 {strides = array<i32>} : memref<8x8x128xf32, #tpu.memory_space<vmem>>, vector<8x1x128xf32>,
    %c0_32 = arith.constant 0 : index
    %c1 = arith.constant 1 : index
    %c0_33 = arith.constant 0 : index
    %53 = vector.load %arg11[%c0_32, %c1, %c0_33] : memref<8x8x512xf32, #tpu.memory_space<vmem>>, vector<8x1x512xf32>
    %54 = vector.shape_cast %53 : vector<8x1x512xf32> to vector<8x512xf32>
    %cst_34 = arith.constant dense<0.000000e+00> : vector<8x512xf32>
    %55 = tpu.matmul %49, %12, %cst_34 {dimension_numbers = #tpu.dot_dimension_numbers<[1], [0], [0], [1], [0, 0, 1, 1], [], []>} : vector<8x128xf32>, vector<128x512xf32>, vector<8x512xf32> -> vector<8x512xf32>
    %56 = arith.addf %54, %55 : vector<8x512xf32>
    %57 = vector.extract_strided_slice %56 {offsets = [0, 0], sizes = [8, 128], strides = [1, 1]} : vector<8x512xf32> to vector<8x128xf32>
    %cst_35 = arith.constant 5.000000e-01 : f32
    %58 = vector.broadcast %cst_35 : f32 to vector<8x128xf32>
    %59 = arith.mulf %58, %57 : vector<8x128xf32>
    %60 = math.tanh %59 : vector<8x128xf32>
    %cst_36 = arith.constant 5.000000e-01 : f32
    %61 = vector.broadcast %cst_36 : f32 to vector<8x128xf32>
    %62 = arith.mulf %61, %60 : vector<8x128xf32>
    %cst_37 = arith.constant 5.000000e-01 : f32
    %63 = vector.broadcast %cst_37 : f32 to vector<8x128xf32>
    %64 = arith.addf %62, %63 : vector<8x128xf32>
    %65 = vector.extract_strided_slice %56 {offsets = [0, 128], sizes = [8, 128], strides = [1, 1]} : vector<8x512xf32> to vector<8x128xf32>
    %cst_38 = arith.constant 5.000000e-01 : f32
    %66 = vector.broadcast %cst_38 : f32 to vector<8x128xf32>
    %67 = arith.mulf %66, %65 : vector<8x128xf32>
    %68 = math.tanh %67 : vector<8x128xf32>
    %cst_39 = arith.constant 5.000000e-01 : f32
    %69 = vector.broadcast %cst_39 : f32 to vector<8x128xf32>
    %70 = arith.mulf %69, %68 : vector<8x128xf32>
    %cst_40 = arith.constant 5.000000e-01 : f32
    %71 = vector.broadcast %cst_40 : f32 to vector<8x128xf32>
    %72 = arith.addf %70, %71 : vector<8x128xf32>
    %73 = vector.extract_strided_slice %56 {offsets = [0, 256], sizes = [8, 128], strides = [1, 1]} : vector<8x512xf32> to vector<8x128xf32>
    %74 = math.tanh %73 : vector<8x128xf32>
    %75 = vector.extract_strided_slice %56 {offsets = [0, 384], sizes = [8, 128], strides = [1, 1]} : vector<8x512xf32> to vector<8x128xf32>
    %cst_41 = arith.constant 5.000000e-01 : f32
    %76 = vector.broadcast %cst_41 : f32 to vector<8x128xf32>
    %77 = arith.mulf %76, %75 : vector<8x128xf32>
    %78 = math.tanh %77 : vector<8x128xf32>
    %cst_42 = arith.constant 5.000000e-01 : f32
    %79 = vector.broadcast %cst_42 : f32 to vector<8x128xf32>
    %80 = arith.mulf %79, %78 : vector<8x128xf32>
    %cst_43 = arith.constant 5.000000e-01 : f32
    %81 = vector.broadcast %cst_43 : f32 to vector<8x128xf32>
    %82 = arith.addf %80, %81 : vector<8x128xf32>
    %83 = arith.mulf %72, %47 : vector<8x128xf32>
    %84 = arith.mulf %64, %74 : vector<8x128xf32>
    %85 = arith.addf %83, %84 : vector<8x128xf32>
    %86 = math.tanh %85 : vector<8x128xf32>
    %87 = arith.mulf %82, %86 : vector<8x128xf32>
    %c0_44 = arith.constant 0 : index
    %c1_45 = arith.constant 1 : index
    %c0_46 = arith.constant 0 : index
    %88 = vector.load %arg8[%c0_44, %c1_45, %c0_46] : memref<8x8x128xf32, #tpu.memory_space<vmem>>, vector<8x1x128xf32>
    %89 = vector.shape_cast %88 : vector<8x1x128xf32> to vector<8x128xf32>
    %90 = vector.shape_cast %87 : vector<8x128xf32> to vector<8x1x128xf32>
    tpu.vector_store %arg8[%c0_44, %c1_45, %c0_46], %90 {strides = array<i32>} : memref<8x8x128xf32, #tpu.memory_space<vmem>>, vector<8x1x128xf32>,
    %c0_47 = arith.constant 0 : index
    %c2 = arith.constant 2 : index
    %c0_48 = arith.constant 0 : index
    %91 = vector.load %arg11[%c0_47, %c2, %c0_48] : memref<8x8x512xf32, #tpu.memory_space<vmem>>, vector<8x1x512xf32>
    %92 = vector.shape_cast %91 : vector<8x1x512xf32> to vector<8x512xf32>
    %cst_49 = arith.constant dense<0.000000e+00> : vector<8x512xf32>
    %93 = tpu.matmul %87, %12, %cst_49 {dimension_numbers = #tpu.dot_dimension_numbers<[1], [0], [0], [1], [0, 0, 1, 1], [], []>} : vector<8x128xf32>, vector<128x512xf32>, vector<8x512xf32> -> vector<8x512xf32>
    %94 = arith.addf %92, %93 : vector<8x512xf32>
    %95 = vector.extract_strided_slice %94 {offsets = [0, 0], sizes = [8, 128], strides = [1, 1]} : vector<8x512xf32> to vector<8x128xf32>
    %cst_50 = arith.constant 5.000000e-01 : f32
    %96 = vector.broadcast %cst_50 : f32 to vector<8x128xf32>
    %97 = arith.mulf %96, %95 : vector<8x128xf32>
    %98 = math.tanh %97 : vector<8x128xf32>
    %cst_51 = arith.constant 5.000000e-01 : f32
    %99 = vector.broadcast %cst_51 : f32 to vector<8x128xf32>
    %100 = arith.mulf %99, %98 : vector<8x128xf32>
    %cst_52 = arith.constant 5.000000e-01 : f32
    %101 = vector.broadcast %cst_52 : f32 to vector<8x128xf32>
    %102 = arith.addf %100, %101 : vector<8x128xf32>
    %103 = vector.extract_strided_slice %94 {offsets = [0, 128], sizes = [8, 128], strides = [1, 1]} : vector<8x512xf32> to vector<8x128xf32>
    %cst_53 = arith.constant 5.000000e-01 : f32
    %104 = vector.broadcast %cst_53 : f32 to vector<8x128xf32>
    %105 = arith.mulf %104, %103 : vector<8x128xf32>
    %106 = math.tanh %105 : vector<8x128xf32>
    %cst_54 = arith.constant 5.000000e-01 : f32
    %107 = vector.broadcast %cst_54 : f32 to vector<8x128xf32>
    %108 = arith.mulf %107, %106 : vector<8x128xf32>
    %cst_55 = arith.constant 5.000000e-01 : f32
    %109 = vector.broadcast %cst_55 : f32 to vector<8x128xf32>
    %110 = arith.addf %108, %109 : vector<8x128xf32>
    %111 = vector.extract_strided_slice %94 {offsets = [0, 256], sizes = [8, 128], strides = [1, 1]} : vector<8x512xf32> to vector<8x128xf32>
    %112 = math.tanh %111 : vector<8x128xf32>
    %113 = vector.extract_strided_slice %94 {offsets = [0, 384], sizes = [8, 128], strides = [1, 1]} : vector<8x512xf32> to vector<8x128xf32>
    %cst_56 = arith.constant 5.000000e-01 : f32
    %114 = vector.broadcast %cst_56 : f32 to vector<8x128xf32>
    %115 = arith.mulf %114, %113 : vector<8x128xf32>
    %116 = math.tanh %115 : vector<8x128xf32>
    %cst_57 = arith.constant 5.000000e-01 : f32
    %117 = vector.broadcast %cst_57 : f32 to vector<8x128xf32>
    %118 = arith.mulf %117, %116 : vector<8x128xf32>
    %cst_58 = arith.constant 5.000000e-01 : f32
    %119 = vector.broadcast %cst_58 : f32 to vector<8x128xf32>
    %120 = arith.addf %118, %119 : vector<8x128xf32>
    %121 = arith.mulf %110, %85 : vector<8x128xf32>
    %122 = arith.mulf %102, %112 : vector<8x128xf32>
    %123 = arith.addf %121, %122 : vector<8x128xf32>
    %124 = math.tanh %123 : vector<8x128xf32>
    %125 = arith.mulf %120, %124 : vector<8x128xf32>
    %c0_59 = arith.constant 0 : index
    %c2_60 = arith.constant 2 : index
    %c0_61 = arith.constant 0 : index
    %126 = vector.load %arg8[%c0_59, %c2_60, %c0_61] : memref<8x8x128xf32, #tpu.memory_space<vmem>>, vector<8x1x128xf32>
    %127 = vector.shape_cast %126 : vector<8x1x128xf32> to vector<8x128xf32>
    %128 = vector.shape_cast %125 : vector<8x128xf32> to vector<8x1x128xf32>
    tpu.vector_store %arg8[%c0_59, %c2_60, %c0_61], %128 {strides = array<i32>} : memref<8x8x128xf32, #tpu.memory_space<vmem>>, vector<8x1x128xf32>,
    %c0_62 = arith.constant 0 : index
    %c3 = arith.constant 3 : index
    %c0_63 = arith.constant 0 : index
    %129 = vector.load %arg11[%c0_62, %c3, %c0_63] : memref<8x8x512xf32, #tpu.memory_space<vmem>>, vector<8x1x512xf32>
    %130 = vector.shape_cast %129 : vector<8x1x512xf32> to vector<8x512xf32>
    %cst_64 = arith.constant dense<0.000000e+00> : vector<8x512xf32>
    %131 = tpu.matmul %125, %12, %cst_64 {dimension_numbers = #tpu.dot_dimension_numbers<[1], [0], [0], [1], [0, 0, 1, 1], [], []>} : vector<8x128xf32>, vector<128x512xf32>, vector<8x512xf32> -> vector<8x512xf32>
    %132 = arith.addf %130, %131 : vector<8x512xf32>
    %133 = vector.extract_strided_slice %132 {offsets = [0, 0], sizes = [8, 128], strides = [1, 1]} : vector<8x512xf32> to vector<8x128xf32>
    %cst_65 = arith.constant 5.000000e-01 : f32
    %134 = vector.broadcast %cst_65 : f32 to vector<8x128xf32>
    %135 = arith.mulf %134, %133 : vector<8x128xf32>
    %136 = math.tanh %135 : vector<8x128xf32>
    %cst_66 = arith.constant 5.000000e-01 : f32
    %137 = vector.broadcast %cst_66 : f32 to vector<8x128xf32>
    %138 = arith.mulf %137, %136 : vector<8x128xf32>
    %cst_67 = arith.constant 5.000000e-01 : f32
    %139 = vector.broadcast %cst_67 : f32 to vector<8x128xf32>
    %140 = arith.addf %138, %139 : vector<8x128xf32>
    %141 = vector.extract_strided_slice %132 {offsets = [0, 128], sizes = [8, 128], strides = [1, 1]} : vector<8x512xf32> to vector<8x128xf32>
    %cst_68 = arith.constant 5.000000e-01 : f32
    %142 = vector.broadcast %cst_68 : f32 to vector<8x128xf32>
    %143 = arith.mulf %142, %141 : vector<8x128xf32>
    %144 = math.tanh %143 : vector<8x128xf32>
    %cst_69 = arith.constant 5.000000e-01 : f32
    %145 = vector.broadcast %cst_69 : f32 to vector<8x128xf32>
    %146 = arith.mulf %145, %144 : vector<8x128xf32>
    %cst_70 = arith.constant 5.000000e-01 : f32
    %147 = vector.broadcast %cst_70 : f32 to vector<8x128xf32>
    %148 = arith.addf %146, %147 : vector<8x128xf32>
    %149 = vector.extract_strided_slice %132 {offsets = [0, 256], sizes = [8, 128], strides = [1, 1]} : vector<8x512xf32> to vector<8x128xf32>
    %150 = math.tanh %149 : vector<8x128xf32>
    %151 = vector.extract_strided_slice %132 {offsets = [0, 384], sizes = [8, 128], strides = [1, 1]} : vector<8x512xf32> to vector<8x128xf32>
    %cst_71 = arith.constant 5.000000e-01 : f32
    %152 = vector.broadcast %cst_71 : f32 to vector<8x128xf32>
    %153 = arith.mulf %152, %151 : vector<8x128xf32>
    %154 = math.tanh %153 : vector<8x128xf32>
    %cst_72 = arith.constant 5.000000e-01 : f32
    %155 = vector.broadcast %cst_72 : f32 to vector<8x128xf32>
    %156 = arith.mulf %155, %154 : vector<8x128xf32>
    %cst_73 = arith.constant 5.000000e-01 : f32
    %157 = vector.broadcast %cst_73 : f32 to vector<8x128xf32>
    %158 = arith.addf %156, %157 : vector<8x128xf32>
    %159 = arith.mulf %148, %123 : vector<8x128xf32>
    %160 = arith.mulf %140, %150 : vector<8x128xf32>
    %161 = arith.addf %159, %160 : vector<8x128xf32>
    %162 = math.tanh %161 : vector<8x128xf32>
    %163 = arith.mulf %158, %162 : vector<8x128xf32>
    %c0_74 = arith.constant 0 : index
    %c3_75 = arith.constant 3 : index
    %c0_76 = arith.constant 0 : index
    %164 = vector.load %arg8[%c0_74, %c3_75, %c0_76] : memref<8x8x128xf32, #tpu.memory_space<vmem>>, vector<8x1x128xf32>
    %165 = vector.shape_cast %164 : vector<8x1x128xf32> to vector<8x128xf32>
    %166 = vector.shape_cast %163 : vector<8x128xf32> to vector<8x1x128xf32>
    tpu.vector_store %arg8[%c0_74, %c3_75, %c0_76], %166 {strides = array<i32>} : memref<8x8x128xf32, #tpu.memory_space<vmem>>, vector<8x1x128xf32>,
    %c0_77 = arith.constant 0 : index
    %c4 = arith.constant 4 : index
    %c0_78 = arith.constant 0 : index
    %167 = vector.load %arg11[%c0_77, %c4, %c0_78] : memref<8x8x512xf32, #tpu.memory_space<vmem>>, vector<8x1x512xf32>
    %168 = vector.shape_cast %167 : vector<8x1x512xf32> to vector<8x512xf32>
    %cst_79 = arith.constant dense<0.000000e+00> : vector<8x512xf32>
    %169 = tpu.matmul %163, %12, %cst_79 {dimension_numbers = #tpu.dot_dimension_numbers<[1], [0], [0], [1], [0, 0, 1, 1], [], []>} : vector<8x128xf32>, vector<128x512xf32>, vector<8x512xf32> -> vector<8x512xf32>
    %170 = arith.addf %168, %169 : vector<8x512xf32>
    %171 = vector.extract_strided_slice %170 {offsets = [0, 0], sizes = [8, 128], strides = [1, 1]} : vector<8x512xf32> to vector<8x128xf32>
    %cst_80 = arith.constant 5.000000e-01 : f32
    %172 = vector.broadcast %cst_80 : f32 to vector<8x128xf32>
    %173 = arith.mulf %172, %171 : vector<8x128xf32>
    %174 = math.tanh %173 : vector<8x128xf32>
    %cst_81 = arith.constant 5.000000e-01 : f32
    %175 = vector.broadcast %cst_81 : f32 to vector<8x128xf32>
    %176 = arith.mulf %175, %174 : vector<8x128xf32>
    %cst_82 = arith.constant 5.000000e-01 : f32
    %177 = vector.broadcast %cst_82 : f32 to vector<8x128xf32>
    %178 = arith.addf %176, %177 : vector<8x128xf32>
    %179 = vector.extract_strided_slice %170 {offsets = [0, 128], sizes = [8, 128], strides = [1, 1]} : vector<8x512xf32> to vector<8x128xf32>
    %cst_83 = arith.constant 5.000000e-01 : f32
    %180 = vector.broadcast %cst_83 : f32 to vector<8x128xf32>
    %181 = arith.mulf %180, %179 : vector<8x128xf32>
    %182 = math.tanh %181 : vector<8x128xf32>
    %cst_84 = arith.constant 5.000000e-01 : f32
    %183 = vector.broadcast %cst_84 : f32 to vector<8x128xf32>
    %184 = arith.mulf %183, %182 : vector<8x128xf32>
    %cst_85 = arith.constant 5.000000e-01 : f32
    %185 = vector.broadcast %cst_85 : f32 to vector<8x128xf32>
    %186 = arith.addf %184, %185 : vector<8x128xf32>
    %187 = vector.extract_strided_slice %170 {offsets = [0, 256], sizes = [8, 128], strides = [1, 1]} : vector<8x512xf32> to vector<8x128xf32>
    %188 = math.tanh %187 : vector<8x128xf32>
    %189 = vector.extract_strided_slice %170 {offsets = [0, 384], sizes = [8, 128], strides = [1, 1]} : vector<8x512xf32> to vector<8x128xf32>
    %cst_86 = arith.constant 5.000000e-01 : f32
    %190 = vector.broadcast %cst_86 : f32 to vector<8x128xf32>
    %191 = arith.mulf %190, %189 : vector<8x128xf32>
    %192 = math.tanh %191 : vector<8x128xf32>
    %cst_87 = arith.constant 5.000000e-01 : f32
    %193 = vector.broadcast %cst_87 : f32 to vector<8x128xf32>
    %194 = arith.mulf %193, %192 : vector<8x128xf32>
    %cst_88 = arith.constant 5.000000e-01 : f32
    %195 = vector.broadcast %cst_88 : f32 to vector<8x128xf32>
    %196 = arith.addf %194, %195 : vector<8x128xf32>
    %197 = arith.mulf %186, %161 : vector<8x128xf32>
    %198 = arith.mulf %178, %188 : vector<8x128xf32>
    %199 = arith.addf %197, %198 : vector<8x128xf32>
    %200 = math.tanh %199 : vector<8x128xf32>
    %201 = arith.mulf %196, %200 : vector<8x128xf32>
    %c0_89 = arith.constant 0 : index
    %c4_90 = arith.constant 4 : index
    %c0_91 = arith.constant 0 : index
    %202 = vector.load %arg8[%c0_89, %c4_90, %c0_91] : memref<8x8x128xf32, #tpu.memory_space<vmem>>, vector<8x1x128xf32>
    %203 = vector.shape_cast %202 : vector<8x1x128xf32> to vector<8x128xf32>
    %204 = vector.shape_cast %201 : vector<8x128xf32> to vector<8x1x128xf32>
    tpu.vector_store %arg8[%c0_89, %c4_90, %c0_91], %204 {strides = array<i32>} : memref<8x8x128xf32, #tpu.memory_space<vmem>>, vector<8x1x128xf32>,
    %c0_92 = arith.constant 0 : index
    %c5 = arith.constant 5 : index
    %c0_93 = arith.constant 0 : index
    %205 = vector.load %arg11[%c0_92, %c5, %c0_93] : memref<8x8x512xf32, #tpu.memory_space<vmem>>, vector<8x1x512xf32>
    %206 = vector.shape_cast %205 : vector<8x1x512xf32> to vector<8x512xf32>
    %cst_94 = arith.constant dense<0.000000e+00> : vector<8x512xf32>
    %207 = tpu.matmul %201, %12, %cst_94 {dimension_numbers = #tpu.dot_dimension_numbers<[1], [0], [0], [1], [0, 0, 1, 1], [], []>} : vector<8x128xf32>, vector<128x512xf32>, vector<8x512xf32> -> vector<8x512xf32>
    %208 = arith.addf %206, %207 : vector<8x512xf32>
    %209 = vector.extract_strided_slice %208 {offsets = [0, 0], sizes = [8, 128], strides = [1, 1]} : vector<8x512xf32> to vector<8x128xf32>
    %cst_95 = arith.constant 5.000000e-01 : f32
    %210 = vector.broadcast %cst_95 : f32 to vector<8x128xf32>
    %211 = arith.mulf %210, %209 : vector<8x128xf32>
    %212 = math.tanh %211 : vector<8x128xf32>
    %cst_96 = arith.constant 5.000000e-01 : f32
    %213 = vector.broadcast %cst_96 : f32 to vector<8x128xf32>
    %214 = arith.mulf %213, %212 : vector<8x128xf32>
    %cst_97 = arith.constant 5.000000e-01 : f32
    %215 = vector.broadcast %cst_97 : f32 to vector<8x128xf32>
    %216 = arith.addf %214, %215 : vector<8x128xf32>
    %217 = vector.extract_strided_slice %208 {offsets = [0, 128], sizes = [8, 128], strides = [1, 1]} : vector<8x512xf32> to vector<8x128xf32>
    %cst_98 = arith.constant 5.000000e-01 : f32
    %218 = vector.broadcast %cst_98 : f32 to vector<8x128xf32>
    %219 = arith.mulf %218, %217 : vector<8x128xf32>
    %220 = math.tanh %219 : vector<8x128xf32>
    %cst_99 = arith.constant 5.000000e-01 : f32
    %221 = vector.broadcast %cst_99 : f32 to vector<8x128xf32>
    %222 = arith.mulf %221, %220 : vector<8x128xf32>
    %cst_100 = arith.constant 5.000000e-01 : f32
    %223 = vector.broadcast %cst_100 : f32 to vector<8x128xf32>
    %224 = arith.addf %222, %223 : vector<8x128xf32>
    %225 = vector.extract_strided_slice %208 {offsets = [0, 256], sizes = [8, 128], strides = [1, 1]} : vector<8x512xf32> to vector<8x128xf32>
    %226 = math.tanh %225 : vector<8x128xf32>
    %227 = vector.extract_strided_slice %208 {offsets = [0, 384], sizes = [8, 128], strides = [1, 1]} : vector<8x512xf32> to vector<8x128xf32>
    %cst_101 = arith.constant 5.000000e-01 : f32
    %228 = vector.broadcast %cst_101 : f32 to vector<8x128xf32>
    %229 = arith.mulf %228, %227 : vector<8x128xf32>
    %230 = math.tanh %229 : vector<8x128xf32>
    %cst_102 = arith.constant 5.000000e-01 : f32
    %231 = vector.broadcast %cst_102 : f32 to vector<8x128xf32>
    %232 = arith.mulf %231, %230 : vector<8x128xf32>
    %cst_103 = arith.constant 5.000000e-01 : f32
    %233 = vector.broadcast %cst_103 : f32 to vector<8x128xf32>
    %234 = arith.addf %232, %233 : vector<8x128xf32>
    %235 = arith.mulf %224, %199 : vector<8x128xf32>
    %236 = arith.mulf %216, %226 : vector<8x128xf32>
    %237 = arith.addf %235, %236 : vector<8x128xf32>
    %238 = math.tanh %237 : vector<8x128xf32>
    %239 = arith.mulf %234, %238 : vector<8x128xf32>
    %c0_104 = arith.constant 0 : index
    %c5_105 = arith.constant 5 : index
    %c0_106 = arith.constant 0 : index
    %240 = vector.load %arg8[%c0_104, %c5_105, %c0_106] : memref<8x8x128xf32, #tpu.memory_space<vmem>>, vector<8x1x128xf32>
    %241 = vector.shape_cast %240 : vector<8x1x128xf32> to vector<8x128xf32>
    %242 = vector.shape_cast %239 : vector<8x128xf32> to vector<8x1x128xf32>
    tpu.vector_store %arg8[%c0_104, %c5_105, %c0_106], %242 {strides = array<i32>} : memref<8x8x128xf32, #tpu.memory_space<vmem>>, vector<8x1x128xf32>,
    %c0_107 = arith.constant 0 : index
    %c6 = arith.constant 6 : index
    %c0_108 = arith.constant 0 : index
    %243 = vector.load %arg11[%c0_107, %c6, %c0_108] : memref<8x8x512xf32, #tpu.memory_space<vmem>>, vector<8x1x512xf32>
    %244 = vector.shape_cast %243 : vector<8x1x512xf32> to vector<8x512xf32>
    %cst_109 = arith.constant dense<0.000000e+00> : vector<8x512xf32>
    %245 = tpu.matmul %239, %12, %cst_109 {dimension_numbers = #tpu.dot_dimension_numbers<[1], [0], [0], [1], [0, 0, 1, 1], [], []>} : vector<8x128xf32>, vector<128x512xf32>, vector<8x512xf32> -> vector<8x512xf32>
    %246 = arith.addf %244, %245 : vector<8x512xf32>
    %247 = vector.extract_strided_slice %246 {offsets = [0, 0], sizes = [8, 128], strides = [1, 1]} : vector<8x512xf32> to vector<8x128xf32>
    %cst_110 = arith.constant 5.000000e-01 : f32
    %248 = vector.broadcast %cst_110 : f32 to vector<8x128xf32>
    %249 = arith.mulf %248, %247 : vector<8x128xf32>
    %250 = math.tanh %249 : vector<8x128xf32>
    %cst_111 = arith.constant 5.000000e-01 : f32
    %251 = vector.broadcast %cst_111 : f32 to vector<8x128xf32>
    %252 = arith.mulf %251, %250 : vector<8x128xf32>
    %cst_112 = arith.constant 5.000000e-01 : f32
    %253 = vector.broadcast %cst_112 : f32 to vector<8x128xf32>
    %254 = arith.addf %252, %253 : vector<8x128xf32>
    %255 = vector.extract_strided_slice %246 {offsets = [0, 128], sizes = [8, 128], strides = [1, 1]} : vector<8x512xf32> to vector<8x128xf32>
    %cst_113 = arith.constant 5.000000e-01 : f32
    %256 = vector.broadcast %cst_113 : f32 to vector<8x128xf32>
    %257 = arith.mulf %256, %255 : vector<8x128xf32>
    %258 = math.tanh %257 : vector<8x128xf32>
    %cst_114 = arith.constant 5.000000e-01 : f32
    %259 = vector.broadcast %cst_114 : f32 to vector<8x128xf32>
    %260 = arith.mulf %259, %258 : vector<8x128xf32>
    %cst_115 = arith.constant 5.000000e-01 : f32
    %261 = vector.broadcast %cst_115 : f32 to vector<8x128xf32>
    %262 = arith.addf %260, %261 : vector<8x128xf32>
    %263 = vector.extract_strided_slice %246 {offsets = [0, 256], sizes = [8, 128], strides = [1, 1]} : vector<8x512xf32> to vector<8x128xf32>
    %264 = math.tanh %263 : vector<8x128xf32>
    %265 = vector.extract_strided_slice %246 {offsets = [0, 384], sizes = [8, 128], strides = [1, 1]} : vector<8x512xf32> to vector<8x128xf32>
    %cst_116 = arith.constant 5.000000e-01 : f32
    %266 = vector.broadcast %cst_116 : f32 to vector<8x128xf32>
    %267 = arith.mulf %266, %265 : vector<8x128xf32>
    %268 = math.tanh %267 : vector<8x128xf32>
    %cst_117 = arith.constant 5.000000e-01 : f32
    %269 = vector.broadcast %cst_117 : f32 to vector<8x128xf32>
    %270 = arith.mulf %269, %268 : vector<8x128xf32>
    %cst_118 = arith.constant 5.000000e-01 : f32
    %271 = vector.broadcast %cst_118 : f32 to vector<8x128xf32>
    %272 = arith.addf %270, %271 : vector<8x128xf32>
    %273 = arith.mulf %262, %237 : vector<8x128xf32>
    %274 = arith.mulf %254, %264 : vector<8x128xf32>
    %275 = arith.addf %273, %274 : vector<8x128xf32>
    %276 = math.tanh %275 : vector<8x128xf32>
    %277 = arith.mulf %272, %276 : vector<8x128xf32>
    %c0_119 = arith.constant 0 : index
    %c6_120 = arith.constant 6 : index
    %c0_121 = arith.constant 0 : index
    %278 = vector.load %arg8[%c0_119, %c6_120, %c0_121] : memref<8x8x128xf32, #tpu.memory_space<vmem>>, vector<8x1x128xf32>
    %279 = vector.shape_cast %278 : vector<8x1x128xf32> to vector<8x128xf32>
    %280 = vector.shape_cast %277 : vector<8x128xf32> to vector<8x1x128xf32>
    tpu.vector_store %arg8[%c0_119, %c6_120, %c0_121], %280 {strides = array<i32>} : memref<8x8x128xf32, #tpu.memory_space<vmem>>, vector<8x1x128xf32>,
    %c0_122 = arith.constant 0 : index
    %c7 = arith.constant 7 : index
    %c0_123 = arith.constant 0 : index
    %281 = vector.load %arg11[%c0_122, %c7, %c0_123] : memref<8x8x512xf32, #tpu.memory_space<vmem>>, vector<8x1x512xf32>
    %282 = vector.shape_cast %281 : vector<8x1x512xf32> to vector<8x512xf32>
    %cst_124 = arith.constant dense<0.000000e+00> : vector<8x512xf32>
    %283 = tpu.matmul %277, %12, %cst_124 {dimension_numbers = #tpu.dot_dimension_numbers<[1], [0], [0], [1], [0, 0, 1, 1], [], []>} : vector<8x128xf32>, vector<128x512xf32>, vector<8x512xf32> -> vector<8x512xf32>
    %284 = arith.addf %282, %283 : vector<8x512xf32>
    %285 = vector.extract_strided_slice %284 {offsets = [0, 0], sizes = [8, 128], strides = [1, 1]} : vector<8x512xf32> to vector<8x128xf32>
    %cst_125 = arith.constant 5.000000e-01 : f32
    %286 = vector.broadcast %cst_125 : f32 to vector<8x128xf32>
    %287 = arith.mulf %286, %285 : vector<8x128xf32>
    %288 = math.tanh %287 : vector<8x128xf32>
    %cst_126 = arith.constant 5.000000e-01 : f32
    %289 = vector.broadcast %cst_126 : f32 to vector<8x128xf32>
    %290 = arith.mulf %289, %288 : vector<8x128xf32>
    %cst_127 = arith.constant 5.000000e-01 : f32
    %291 = vector.broadcast %cst_127 : f32 to vector<8x128xf32>
    %292 = arith.addf %290, %291 : vector<8x128xf32>
    %293 = vector.extract_strided_slice %284 {offsets = [0, 128], sizes = [8, 128], strides = [1, 1]} : vector<8x512xf32> to vector<8x128xf32>
    %cst_128 = arith.constant 5.000000e-01 : f32
    %294 = vector.broadcast %cst_128 : f32 to vector<8x128xf32>
    %295 = arith.mulf %294, %293 : vector<8x128xf32>
    %296 = math.tanh %295 : vector<8x128xf32>
    %cst_129 = arith.constant 5.000000e-01 : f32
    %297 = vector.broadcast %cst_129 : f32 to vector<8x128xf32>
    %298 = arith.mulf %297, %296 : vector<8x128xf32>
    %cst_130 = arith.constant 5.000000e-01 : f32
    %299 = vector.broadcast %cst_130 : f32 to vector<8x128xf32>
    %300 = arith.addf %298, %299 : vector<8x128xf32>
    %301 = vector.extract_strided_slice %284 {offsets = [0, 256], sizes = [8, 128], strides = [1, 1]} : vector<8x512xf32> to vector<8x128xf32>
    %302 = math.tanh %301 : vector<8x128xf32>
    %303 = vector.extract_strided_slice %284 {offsets = [0, 384], sizes = [8, 128], strides = [1, 1]} : vector<8x512xf32> to vector<8x128xf32>
    %cst_131 = arith.constant 5.000000e-01 : f32
    %304 = vector.broadcast %cst_131 : f32 to vector<8x128xf32>
    %305 = arith.mulf %304, %303 : vector<8x128xf32>
    %306 = math.tanh %305 : vector<8x128xf32>
    %cst_132 = arith.constant 5.000000e-01 : f32
    %307 = vector.broadcast %cst_132 : f32 to vector<8x128xf32>
    %308 = arith.mulf %307, %306 : vector<8x128xf32>
    %cst_133 = arith.constant 5.000000e-01 : f32
    %309 = vector.broadcast %cst_133 : f32 to vector<8x128xf32>
    %310 = arith.addf %308, %309 : vector<8x128xf32>
    %311 = arith.mulf %300, %275 : vector<8x128xf32>
    %312 = arith.mulf %292, %302 : vector<8x128xf32>
    %313 = arith.addf %311, %312 : vector<8x128xf32>
    %314 = math.tanh %313 : vector<8x128xf32>
    %315 = arith.mulf %310, %314 : vector<8x128xf32>
    %c0_134 = arith.constant 0 : index
    %c7_135 = arith.constant 7 : index
    %c0_136 = arith.constant 0 : index
    %316 = vector.load %arg8[%c0_134, %c7_135, %c0_136] : memref<8x8x128xf32, #tpu.memory_space<vmem>>, vector<8x1x128xf32>
    %317 = vector.shape_cast %316 : vector<8x1x128xf32> to vector<8x128xf32>
    %318 = vector.shape_cast %315 : vector<8x128xf32> to vector<8x1x128xf32>
    tpu.vector_store %arg8[%c0_134, %c7_135, %c0_136], %318 {strides = array<i32>} : memref<8x8x128xf32, #tpu.memory_space<vmem>>, vector<8x1x128xf32>,
    %c0_137 = arith.constant 0 : index
    %c0_138 = arith.constant 0 : index
    %319 = vector.load %arg12[%c0_137, %c0_138] : memref<8x128xf32, #tpu.memory_space<vmem>>, vector<8x128xf32>
    tpu.vector_store %arg12[%c0_137, %c0_138], %315 {strides = array<i32>} : memref<8x128xf32, #tpu.memory_space<vmem>>, vector<8x128xf32>,
    %c0_139 = arith.constant 0 : index
    %c0_140 = arith.constant 0 : index
    %320 = vector.load %arg13[%c0_139, %c0_140] : memref<8x128xf32, #tpu.memory_space<vmem>>, vector<8x128xf32>
    tpu.vector_store %arg13[%c0_139, %c0_140], %313 {strides = array<i32>} : memref<8x128xf32, #tpu.memory_space<vmem>>, vector<8x128xf32>,
    %c0_i32_141 = arith.constant 0 : i32
    %321 = arith.cmpi eq, %arg1, %c0_i32_141 : i32
    %322 = arith.extui %321 : i1 to i32
    %c0_i32_142 = arith.constant 0 : i32
    %323 = arith.cmpi ne, %322, %c0_i32_142 : i32
    scf.if %323 {
      %c0_143 = arith.constant 0 : index
      %c0_144 = arith.constant 0 : index
      %324 = vector.load %arg12[%c0_143, %c0_144] : memref<8x128xf32, #tpu.memory_space<vmem>>, vector<8x128xf32>
      %c0_145 = arith.constant 0 : index
      %c0_146 = arith.constant 0 : index
      %325 = vector.load %arg9[%c0_145, %c0_146] : memref<8x128xf32, #tpu.memory_space<vmem>>, vector<8x128xf32>
      tpu.vector_store %arg9[%c0_145, %c0_146], %324 {strides = array<i32>} : memref<8x128xf32, #tpu.memory_space<vmem>>, vector<8x128xf32>,
      %c0_147 = arith.constant 0 : index
      %c0_148 = arith.constant 0 : index
      %326 = vector.load %arg13[%c0_147, %c0_148] : memref<8x128xf32, #tpu.memory_space<vmem>>, vector<8x128xf32>
      %c0_149 = arith.constant 0 : index
      %c0_150 = arith.constant 0 : index
      %327 = vector.load %arg10[%c0_149, %c0_150] : memref<8x128xf32, #tpu.memory_space<vmem>>, vector<8x128xf32>
      tpu.vector_store %arg10[%c0_149, %c0_150], %326 {strides = array<i32>} : memref<8x128xf32, #tpu.memory_space<vmem>>, vector<8x128xf32>,
    } else {
    }
    return
  }
  func.func @transform_0(%arg0: i32, %arg1: i32) -> (i32, i32, i32) {
    %c0_i32 = arith.constant 0 : i32
    %c0_i32_0 = arith.constant 0 : i32
    return %arg0, %arg1, %c0_i32 : i32, i32, i32
  }
  func.func @transform_1(%arg0: i32, %arg1: i32) -> (i32, i32) {
    %c0_i32 = arith.constant 0 : i32
    %c0_i32_0 = arith.constant 0 : i32
    return %arg0, %c0_i32 : i32, i32
  }
  func.func @transform_2(%arg0: i32, %arg1: i32) -> (i32, i32) {
    %c0_i32 = arith.constant 0 : i32
    %c0_i32_0 = arith.constant 0 : i32
    return %arg0, %c0_i32 : i32, i32
  }
  func.func @transform_3(%arg0: i32, %arg1: i32) -> (i32, i32) {
    %c0_i32 = arith.constant 0 : i32
    %c0_i32_0 = arith.constant 0 : i32
    %c0_i32_1 = arith.constant 0 : i32
    return %c0_i32, %c0_i32_0 : i32, i32
  }
  func.func @transform_4(%arg0: i32, %arg1: i32) -> (i32, i32) {
    %c0_i32 = arith.constant 0 : i32
    %c0_i32_0 = arith.constant 0 : i32
    %c0_i32_1 = arith.constant 0 : i32
    return %c0_i32, %c0_i32_0 : i32, i32
  }
  func.func @transform_5(%arg0: i32, %arg1: i32) -> (i32, i32) {
    %c0_i32 = arith.constant 0 : i32
    %c0_i32_0 = arith.constant 0 : i32
    %c0_i32_1 = arith.constant 0 : i32
    return %c0_i32, %c0_i32_0 : i32, i32
  }
  func.func @transform_6(%arg0: i32, %arg1: i32) -> (i32, i32, i32) {
    %c0_i32 = arith.constant 0 : i32
    %c0_i32_0 = arith.constant 0 : i32
    return %arg0, %arg1, %c0_i32 : i32, i32, i32
  }
  func.func @transform_7(%arg0: i32, %arg1: i32) -> (i32, i32) {
    %c0_i32 = arith.constant 0 : i32
    %c0_i32_0 = arith.constant 0 : i32
    return %arg0, %c0_i32 : i32, i32
  }
  func.func @transform_8(%arg0: i32, %arg1: i32) -> (i32, i32) {
    %c0_i32 = arith.constant 0 : i32
    %c0_i32_0 = arith.constant 0 : i32
    return %arg0, %c0_i32 : i32, i32
  }
}

</mosaic_0001>

<bundles_post_ra>
// kernel: tpu_custom_call.1
= control target key start
LH: loop header
LB: loop body
LE: loop exit
PB: predicated region body
PF: predicated region fallthrough
CT: control target
= control target key end

     0   :  { %14 = vsyncpa [#allocation6], 0  ;;  %s6711_s0 = inlined_call_operand.hbm [shape: f32[8,8,16], index: 0, kind: input, shape index: {}]   ;;  %s6712_s1 = inlined_call_operand.hbm [shape: f32[8,128], index: 1, kind: input, shape index: {}]   ;;  %s6713_s2 = inlined_call_operand.hbm [shape: f32[8,128], index: 2, kind: input, shape index: {}]   ;;  %s6714_s3 = inlined_call_operand.hbm [shape: f32[16,512], index: 3, kind: input, shape index: {}]   ;;  %s6715_s4 = inlined_call_operand.hbm [shape: f32[128,512], index: 4, kind: input, shape index: {}]   ;;  %s6716_s5 = inlined_call_operand.vmem [shape: f32[1,512], index: 5, kind: input, shape index: {}]   ;;  %s6717_s6 = inlined_call_operand.hbm [shape: f32[8,8,128], index: 6, kind: output, shape index: {0}]   ;;  %s6718_s7 = inlined_call_operand.hbm [shape: f32[8,128], index: 7, kind: output, shape index: {1}]   ;;  %s6719_s8 = inlined_call_operand.hbm [shape: f32[8,128], index: 8, kind: output, shape index: {2}]  }
   0x1   :  { %15 = vsyncpa [#allocation9], 0 }
   0x2   :  { %16 = vsyncpa [#allocation12], 0 }
   0x3   :  { %17 = vsyncpa [#allocation7], 0  ;;  %s37_s29 = sshll.u32 %s6712_s1, 4  ;;  %s38_s29 = int_to_ptr.hbm [resolvable:$true] %s37_s29 }
   0x4   :  { %18 = vsyncpa [#allocation16], 0  ;;  %s4681_s30 = smov [#allocation8]   ;;  %s58_s12 = sshll.u32 %s6714_s3, 4  ;;  %s59_s12 = int_to_ptr.hbm [resolvable:$true] %s58_s12 }
   0x5   :  { %s39_s9 = sshll.u32 %s4681_s30, 4  ;;  %s4682_s13 = smov [#allocation11]   ;;  %s40_s9 = int_to_ptr.vmem [resolvable:$true] %s39_s9 }
   0x6   :  { %42 = dma.hbm_to_vmem [thread:$0]  %s38_s29, 128, %s40_s9, [#allocation9]  }
   0x7   :  { %s60_s14 = sshll.u32 %s4682_s13, 4  ;;  %s4683_s15 = smov 512   ;;  %s61_s14 = int_to_ptr.vmem [resolvable:$true] %s60_s14 }
   0x8   :  { %s4684_s16 = smov 32   ;;  %s23_s1 = sshll.u32 %s6711_s0, 4  ;;  %s24_s1 = int_to_ptr.hbm [resolvable:$true] %s23_s1 }
   0x9   :  { %66 = dma.hbm_to_vmem [thread:$0]  %s59_s12, 1024, %s61_s14, [#allocation12], %s4683_s15, %s4683_s15, %s4684_s16  }
   0xa   :  { %s4685_s19 = smov [#allocation5]   ;;  %s48_s3 = sshll.u32 %s6713_s2, 4  ;;  %s49_s3 = int_to_ptr.hbm [resolvable:$true] %s48_s3 }
   0xb   :  { %s25_s20 = sshll.u32 %s4685_s19, 4  ;;  %s4686_s23 = smov 128   ;;  %s26_s20 = int_to_ptr.vmem [resolvable:$true] %s25_s20 }
   0xc   :  { %s4687_s24 = smov 8   ;;  %s4688_s25 = smov [#allocation10]  }
   0xd   :  { %31 = dma.hbm_to_vmem [thread:$0]  %s24_s1, 1024, %s26_s20, [#allocation6], %s4686_s23, %s4686_s23, %s4687_s24  }
   0xe   :  { %s50_s26 = sshll.u32 %s4688_s25, 4  ;;  %s71_s0 = sshll.u32 %s6715_s4, 4  ;;  %s51_s26 = int_to_ptr.vmem [resolvable:$true] %s50_s26  ;;  %s72_s0 = int_to_ptr.hbm [resolvable:$true] %s71_s0 }
   0xf   :  { %53 = dma.hbm_to_vmem [thread:$0]  %s49_s3, 128, %s51_s26, [#allocation9]  }
  0x10   :  { %s4689_s29 = smov [#allocation13]  }
  0x11   :  { %s73_s30 = sshll.u32 %s4689_s29, 4  ;;  %s74_s30 = int_to_ptr.vmem [resolvable:$true] %s73_s30 }
  0x12   :  { %79 = dma.hbm_to_vmem [thread:$0]  %s72_s0, 8192, %s74_s30, [#allocation12], %s4683_s15, %s4683_s15, %s4684_s16  }
  0x13   :  { %4671 = dma.done.wait [#allocation6], 1024  }
  0x14   :  { %4672 = vsyncadd [#allocation6], 4294966272 }
  0x15   :  { %4673 = dma.done.wait [#allocation9], 256  }
  0x16   :  { %4674 = vsyncadd [#allocation9], 4294967040 }
  0x17   :  { %4675 = dma.done.wait [#allocation12], 9216  }
  0x18   :  { %4676 = vsyncadd [#allocation12], 4294958080  ;;  %v124_v0 = vld [vmem:[#allocation11 + $0x30] sm:$0xff]  ;;  %v125_v1 = vld [vmem:[#allocation11 + $0x38] sm:$0xff]  ;;  %vm136_vm0 = vcmask 130048   ;;  %vm525_vm1 = vcmask 1040384  }
  0x19   :  { %v120_v2 = vld [vmem:[#allocation11 + $0x10] sm:$0xff]  ;;  %257 = vmatpush.msra.mxu2 %v124_v0  ;;  %298 = vmatpush.msra.mxu3 %v125_v1  ;;  %v121_v3 = vld [vmem:[#allocation11 + $0x18] sm:$0xff]  ;;  %v122_v7 = vld [vmem:[#allocation11 + $0x20] sm:$0xff]  ;;  %vm527_vm2 = vcmask 1042434   ;;  %vm529_vm3 = vcmask 1041408   ;;  %vm531_vm4 = vcmask 1041409  }
  0x1a   :  { %v110_v4 = vld [vmem:[#allocation5] sm:$0xff]  ;;  %v4758_v6 = vld [vmem:[#allocation13 + $0x1f8] sm:$0xff]  ;;  %v123_v8 = vld [vmem:[#allocation11 + $0x28] sm:$0xff]  ;;  %175 = vmatpush.msra.mxu0 %v122_v7  ;;  %vm533_vm5 = vcmask 1043459   ;;  %vm535_vm6 = vcmask 1042433   ;;  %vm539_vm7 = vcmask 1044484  }
  0x1b   :  { %v4756_v5 = vld [vmem:[#allocation13 + $0x1f0] sm:$0xff]  ;;  %258 = vmatpush.msra.mxu2 %v120_v2  ;;  %299 = vmatpush.msra.mxu3 %v121_v3  ;;  %v4764_v10 = vld [vmem:[#allocation13 + $0x1d8] sm:$0xff]  ;;  %v118_v11 = vld [vmem:[#allocation11] sm:$0xff]  ;;  %vm541_vm8 = vcmask 1043458   ;;  %vm545_vm9 = vcmask 1045509   ;;  %vm547_vm10 = vcmask 1044483  }
  0x1c   :  { %3619 = vmatmul.msk.f32.vlgmr.msra.gmra.mxu2 %vm136_vm0, %v110_v4  ;;  %3627 = vmatmul.msk.f32.vlgmr.msra.gmra.mxu3 %vm136_vm0, %v110_v4  ;;  %v4762_v9 = vld [vmem:[#allocation13 + $0x1d0] sm:$0xff]  ;;  %v119_v12 = vld [vmem:[#allocation11 + $0x8] sm:$0xff]  ;;  %v4772_v14 = vld [vmem:[#allocation13 + $0x1e0] sm:$0xff]  ;;  %vm551_vm11 = vcmask 1046534   ;;  %vm553_vm12 = vcmask 1045508   ;;  %vm557_vm13 = vcmask 1046528  }
  0x1d   :  { %478 = vmatpush.msrb.mxu2 %v4756_v5  ;;  %498 = vmatpush.msrb.mxu3 %v4758_v6  ;;  %v4770_v13 = vld [vmem:[#allocation13 + $0x1e8] sm:$0xff]  ;;  %v4774_v15 = vld [vmem:[#allocation13 + $0x1b0] sm:$0xff]  ;;  %v4776_v16 = vld [vmem:[#allocation13 + $0x1b8] sm:$0xff]  ;;  %vm559_vm14 = vcmask 1046533   ;;  %vm564_vm15 = vcmask 1045504   ;;  %s3557_s12 = sshll.u32 %s6717_s6, 4  ;;  %s3558_s12 = int_to_ptr.hbm [resolvable:$true] %s3557_s12 }
  0x1e   :  { %216 = vmatpush.msra.mxu1 %v123_v8  ;;  %176 = vmatpush.msra.mxu0 %v118_v11  ;;  %v111_v17 = vld [vmem:[#allocation5 + $0x8] sm:$0xff]  ;;  %v4782_v18 = vld [vmem:[#allocation13 + $0x1c8] sm:$0xff]  ;;  %v4784_v19 = vld [vmem:[#allocation13 + $0x1c0] sm:$0xff]  ;;  %s4691_s6 = smov [#allocation15]   ;;  %s3571_s16 = sshll.u32 %s6718_s7, 4  ;;  %s3572_s16 = int_to_ptr.hbm [resolvable:$true] %s3571_s16 }
  0x1f   :  { %479 = vmatpush.msrb.mxu2 %v4762_v9  ;;  %499 = vmatpush.msrb.mxu3 %v4764_v10  ;;  %v4788_v20 = vld [vmem:[#allocation13 + $0x190] sm:$0xff]  ;;  %v4790_v21 = vld [vmem:[#allocation13 + $0x198] sm:$0xff]  ;;  %v4794_v22 = vld [vmem:[#allocation13 + $0x1a8] sm:$0xff]  ;;  %s3569_s13 = sshll.u32 %s4691_s6, 4  ;;  %s4692_s7 = smov [#allocation17]   ;;  %s3570_s13 = int_to_ptr.vmem [resolvable:$true] %s3569_s13 }
  0x20   :  { %217 = vmatpush.msra.mxu1 %v119_v12  ;;  %3603 = vmatmul.msk.f32.vlgmr.msra.gmra.mxu0 %vm136_vm0, %v110_v4  ;;  %v4796_v23 = vld [vmem:[#allocation13 + $0x1a0] sm:$0xff]  ;;  %v4800_v24 = vld [vmem:[#allocation13 + $0x170] sm:$0xff]  ;;  %v4802_v25 = vld [vmem:[#allocation13 + $0x178] sm:$0xff]  ;;  %s3580_s17 = sshll.u32 %s4692_s7, 4  ;;  %s3582_s19 = sshll.u32 %s6719_s8, 4  ;;  %s3581_s17 = int_to_ptr.vmem [resolvable:$true] %s3580_s17  ;;  %s3583_s19 = int_to_ptr.hbm [resolvable:$true] %s3582_s19 }
  0x21   :  { %3611 = vmatmul.msk.f32.vlgmr.msra.gmra.mxu1 %vm136_vm0, %v110_v4  ;;  %438 = vmatpush.msrb.mxu0 %v4772_v14  ;;  %v4808_v26 = vld [vmem:[#allocation13 + $0x188] sm:$0xff]  ;;  %v4810_v27 = vld [vmem:[#allocation13 + $0x180] sm:$0xff]  ;;  %v4814_v28 = vld [vmem:[#allocation13 + $0x150] sm:$0xff] }
  0x22   :  { %458 = vmatpush.msrb.mxu1 %v4770_v13  ;;  %480 = vmatpush.msrb.mxu2 %v4774_v15  ;;  %v4816_v29 = vld [vmem:[#allocation13 + $0x158] sm:$0xff]  ;;  %v112_v30 = vld [vmem:[#allocation5 + $0x10] sm:$0xff]  ;;  %v4822_v31 = vld [vmem:[#allocation13 + $0x168] sm:$0xff] }
  0x23   :  { %500 = vmatpush.msrb.mxu3 %v4776_v16  ;;  %439 = vmatpush.msrb.mxu0 %v4784_v19  ;;  %v4824_v32 = vld [vmem:[#allocation13 + $0x160] sm:$0xff]  ;;  %v4828_v33 = vld [vmem:[#allocation13 + $0x130] sm:$0xff]  ;;  %v4830_v34 = vld [vmem:[#allocation13 + $0x138] sm:$0xff] }
  0x24   :  { %3620 = vmatmul.msk.f32.gmra.mxu2 %vm136_vm0, %v111_v17  ;;  %3628 = vmatmul.msk.f32.gmra.mxu3 %vm136_vm0, %v111_v17  ;;  %v4834_v35 = vld [vmem:[#allocation13 + $0x148] sm:$0xff]  ;;  %v4836_v36 = vld [vmem:[#allocation13 + $0x140] sm:$0xff]  ;;  %v4840_v37 = vld [vmem:[#allocation13 + $0x110] sm:$0xff] }
  0x25   :  { %459 = vmatpush.msrb.mxu1 %v4782_v18  ;;  %481 = vmatpush.msrb.mxu2 %v4788_v20  ;;  %v4842_v38 = vld [vmem:[#allocation13 + $0x118] sm:$0xff]  ;;  %v4848_v39 = vld [vmem:[#allocation13 + $0x128] sm:$0xff]  ;;  %v4850_v40 = vld [vmem:[#allocation13 + $0x120] sm:$0xff] }
  0x26   :  { %501 = vmatpush.msrb.mxu3 %v4790_v21  ;;  %440 = vmatpush.msrb.mxu0 %v4796_v23  ;;  %v4854_v41 = vld [vmem:[#allocation13 + $0xf0] sm:$0xff]  ;;  %v4856_v42 = vld [vmem:[#allocation13 + $0xf8] sm:$0xff]  ;;  %v113_v43 = vld [vmem:[#allocation5 + $0x18] sm:$0xff] }
  0x27   :  { %460 = vmatpush.msrb.mxu1 %v4794_v22  ;;  %482 = vmatpush.msrb.mxu2 %v4800_v24  ;;  %v4862_v44 = vld [vmem:[#allocation13 + $0x108] sm:$0xff]  ;;  %v4864_v45 = vld [vmem:[#allocation13 + $0x100] sm:$0xff]  ;;  %v4868_v46 = vld [vmem:[#allocation13 + $0xd0] sm:$0xff] }
  0x28   :  { %502 = vmatpush.msrb.mxu3 %v4802_v25  ;;  %3604 = vmatmul.msk.f32.gmra.mxu0 %vm136_vm0, %v111_v17  ;;  %v4870_v47 = vld [vmem:[#allocation13 + $0xd8] sm:$0xff]  ;;  %v4874_v48 = vld [vmem:[#allocation13 + $0xe8] sm:$0xff]  ;;  %v4876_v49 = vld [vmem:[#allocation13 + $0xe0] sm:$0xff] }
  0x29   :  { %3612 = vmatmul.msk.f32.gmra.mxu1 %vm136_vm0, %v111_v17  ;;  %441 = vmatpush.msrb.mxu0 %v4810_v27  ;;  %v4880_v50 = vld [vmem:[#allocation13 + $0xb0] sm:$0xff]  ;;  %v4882_v51 = vld [vmem:[#allocation13 + $0xb8] sm:$0xff]  ;;  %v4888_v52 = vld [vmem:[#allocation13 + $0xc8] sm:$0xff] }
  0x2a   :  { %461 = vmatpush.msrb.mxu1 %v4808_v26  ;;  %483 = vmatpush.msrb.mxu2 %v4814_v28  ;;  %v4890_v53 = vld [vmem:[#allocation13 + $0xc0] sm:$0xff]  ;;  %v4894_v54 = vld [vmem:[#allocation13 + $0x90] sm:$0xff]  ;;  %v4896_v55 = vld [vmem:[#allocation13 + $0x98] sm:$0xff] }
  0x2b   :  { %503 = vmatpush.msrb.mxu3 %v4816_v29  ;;  %442 = vmatpush.msrb.mxu0 %v4824_v32  ;;  %v114_v56 = vld [vmem:[#allocation5 + $0x20] sm:$0xff]  ;;  %v4902_v57 = vld [vmem:[#allocation13 + $0xa8] sm:$0xff]  ;;  %v4904_v58 = vld [vmem:[#allocation13 + $0xa0] sm:$0xff] }
  0x2c   :  { %3621 = vmatmul.msk.f32.gmra.mxu2 %vm136_vm0, %v112_v30  ;;  %3629 = vmatmul.msk.f32.gmra.mxu3 %vm136_vm0, %v112_v30  ;;  %v4908_v59 = vld [vmem:[#allocation13 + $0x70] sm:$0xff]  ;;  %v4910_v60 = vld [vmem:[#allocation13 + $0x78] sm:$0xff]  ;;  %v4914_v61 = vld [vmem:[#allocation13 + $0x88] sm:$0xff] }
  0x2d   :  { %462 = vmatpush.msrb.mxu1 %v4822_v31  ;;  %484 = vmatpush.msrb.mxu2 %v4828_v33  ;;  %v4916_v62 = vld [vmem:[#allocation13 + $0x80] sm:$0xff]  ;;  %v4920_v63 = vld [vmem:[#allocation13 + $0x50] sm:$0xff]  ;;  %v4922_v0 = vld [vmem:[#allocation13 + $0x58] sm:$0xff] }
  0x2e   :  { %504 = vmatpush.msrb.mxu3 %v4830_v34  ;;  %443 = vmatpush.msrb.mxu0 %v4836_v36  ;;  %v4928_v1 = vld [vmem:[#allocation13 + $0x68] sm:$0xff]  ;;  %v4930_v2 = vld [vmem:[#allocation13 + $0x60] sm:$0xff]  ;;  %v4934_v3 = vld [vmem:[#allocation13 + $0x30] sm:$0xff] }
  0x2f   :  { %463 = vmatpush.msrb.mxu1 %v4834_v35  ;;  %485 = vmatpush.msrb.mxu2 %v4840_v37  ;;  %6826 = vst [vmem:[#allocation23_spill] sm:$0xff] %v4934_v3  ;;  %v4936_v4 = vld [vmem:[#allocation13 + $0x38] sm:$0xff]  ;;  %v4942_v8 = vld [vmem:[#allocation13 + $0x48] sm:$0xff]  ;;  %v4944_v11 = vld [vmem:[#allocation13 + $0x40] sm:$0xff] }
  0x30   :  { %505 = vmatpush.msrb.mxu3 %v4842_v38  ;;  %3605 = vmatmul.msk.f32.gmra.mxu0 %vm136_vm0, %v112_v30  ;;  %6827 = vst [vmem:[#allocation24_spill] sm:$0xff] %v4936_v4  ;;  %v115_v7 = vld [vmem:[#allocation5 + $0x28] sm:$0xff]  ;;  %v4948_v12 = vld [vmem:[#allocation13 + $0x10] sm:$0xff] }
  0x31   :  { %3613 = vmatmul.msk.f32.gmra.mxu1 %vm136_vm0, %v112_v30  ;;  %444 = vmatpush.msrb.mxu0 %v4850_v40  ;;  %v4950_v17 = vld [vmem:[#allocation13 + $0x18] sm:$0xff]  ;;  %v4954_v30 = vld [vmem:[#allocation13 + $0x28] sm:$0xff] }
  0x32   :  { %464 = vmatpush.msrb.mxu1 %v4848_v39  ;;  %486 = vmatpush.msrb.mxu2 %v4854_v41 }
  0x33   :  { %506 = vmatpush.msrb.mxu3 %v4856_v42  ;;  %445 = vmatpush.msrb.mxu0 %v4864_v45 }
  0x34   :  { %3622 = vmatmul.msk.f32.gmra.mxu2 %vm136_vm0, %v113_v43  ;;  %3630 = vmatmul.msk.f32.gmra.mxu3 %vm136_vm0, %v113_v43 }
  0x35   :  { %465 = vmatpush.msrb.mxu1 %v4862_v44  ;;  %487 = vmatpush.msrb.mxu2 %v4868_v46 }
  0x36   :  { %507 = vmatpush.msrb.mxu3 %v4870_v47  ;;  %446 = vmatpush.msrb.mxu0 %v4876_v49 }
  0x37   :  { %466 = vmatpush.msrb.mxu1 %v4874_v48  ;;  %488 = vmatpush.msrb.mxu2 %v4880_v50 }
  0x38   :  { %508 = vmatpush.msrb.mxu3 %v4882_v51  ;;  %3606 = vmatmul.msk.f32.gmra.mxu0 %vm136_vm0, %v113_v43 }
  0x39   :  { %3614 = vmatmul.msk.f32.gmra.mxu1 %vm136_vm0, %v113_v43  ;;  %447 = vmatpush.msrb.mxu0 %v4890_v53  ;;  %v4956_v43 = vld [vmem:[#allocation13 + $0x20] sm:$0xff] }
  0x3a   :  { %467 = vmatpush.msrb.mxu1 %v4888_v52  ;;  %489 = vmatpush.msrb.mxu2 %v4894_v54 }
  0x3b   :  { %509 = vmatpush.msrb.mxu3 %v4896_v55  ;;  %448 = vmatpush.msrb.mxu0 %v4904_v58 }
  0x3c   :  { %3623 = vmatmul.msk.f32.gmra.mxu2 %vm136_vm0, %v114_v56  ;;  %3631 = vmatmul.msk.f32.gmra.mxu3 %vm136_vm0, %v114_v56 }
  0x3d   :  { %468 = vmatpush.msrb.mxu1 %v4902_v57  ;;  %490 = vmatpush.msrb.mxu2 %v4908_v59 }
  0x3e   :  { %510 = vmatpush.msrb.mxu3 %v4910_v60  ;;  %449 = vmatpush.msrb.mxu0 %v4916_v62 }
  0x3f   :  { %469 = vmatpush.msrb.mxu1 %v4914_v61  ;;  %491 = vmatpush.msrb.mxu2 %v4920_v63 }
  0x40   :  { %511 = vmatpush.msrb.mxu3 %v4922_v0  ;;  %3607 = vmatmul.msk.f32.gmra.mxu0 %vm136_vm0, %v114_v56 }
  0x41   :  { %3615 = vmatmul.msk.f32.gmra.mxu1 %vm136_vm0, %v114_v56  ;;  %450 = vmatpush.msrb.mxu0 %v4930_v2  ;;  %v4964_v56 = vld [vmem:[#allocation13 + $0x8] sm:$0xff] }
  0x42   :  { %470 = vmatpush.msrb.mxu1 %v4928_v1  ;;  %492 = vmatpush.msrb.mxu2 %v4934_v3  ;;  %v116_v3 = vld [vmem:[#allocation5 + $0x30] sm:$0xff] }
  0x43   :  { %512 = vmatpush.msrb.mxu3 %v4936_v4  ;;  %451 = vmatpush.msrb.mxu0 %v4944_v11  ;;  %v4966_v4 = vld [vmem:[#allocation13] sm:$0xff] }
  0x44   :  { %3624 = vmatmul.msk.f32.gmra.mxu2 %vm136_vm0, %v115_v7  ;;  %3632 = vmatmul.msk.f32.gmra.mxu3 %vm136_vm0, %v115_v7 }
  0x45   :  { %471 = vmatpush.msrb.mxu1 %v4942_v8  ;;  %493 = vmatpush.msrb.mxu2 %v4948_v12 }
  0x46   :  { %513 = vmatpush.msrb.mxu3 %v4950_v17  ;;  %452 = vmatpush.msrb.mxu0 %v4956_v43 }
  0x47   :  { %472 = vmatpush.msrb.mxu1 %v4954_v30  ;;  %892 = vmatpush.msra.mxu2 %v4756_v5 }
  0x48   :  { %912 = vmatpush.msra.mxu3 %v4758_v6  ;;  %3608 = vmatmul.msk.f32.gmra.mxu0 %vm136_vm0, %v115_v7 }
  0x49   :  { %3616 = vmatmul.msk.f32.gmra.mxu1 %vm136_vm0, %v115_v7  ;;  %453 = vmatpush.msrb.mxu0 %v4966_v4  ;;  %v117_v7 = vld [vmem:[#allocation5 + $0x38] sm:$0xff] }
  0x4a   :  { %473 = vmatpush.msrb.mxu1 %v4964_v56  ;;  %893 = vmatpush.msra.mxu2 %v4762_v9 }
  0x4b   :  { %852 = vmatpush.msra.mxu0 %v4772_v14  ;;  %913 = vmatpush.msra.mxu3 %v4764_v10 }
  0x4c   :  { %872 = vmatpush.msra.mxu1 %v4770_v13  ;;  %3625 = vmatmul.msk.f32.gmra.mxu2 %vm136_vm0, %v116_v3 }
  0x4d   :  { %3633 = vmatmul.msk.f32.gmra.mxu3 %vm136_vm0, %v116_v3  ;;  %853 = vmatpush.msra.mxu0 %v4784_v19 }
  0x4e   :  { %873 = vmatpush.msra.mxu1 %v4782_v18  ;;  %894 = vmatpush.msra.mxu2 %v4774_v15 }
  0x4f   :  { %854 = vmatpush.msra.mxu0 %v4796_v23  ;;  %914 = vmatpush.msra.mxu3 %v4776_v16 }
  0x50   :  { %874 = vmatpush.msra.mxu1 %v4794_v22  ;;  %3609 = vmatmul.msk.f32.gmra.mxu0 %vm136_vm0, %v116_v3 }
  0x51   :  { %3617 = vmatmul.msk.f32.gmra.mxu1 %vm136_vm0, %v116_v3  ;;  %855 = vmatpush.msra.mxu0 %v4810_v27  ;;  %v106_v3 = vld [vmem:[#allocation8] sm:$0xff] }
  0x52   :  { %875 = vmatpush.msra.mxu1 %v4808_v26  ;;  %895 = vmatpush.msra.mxu2 %v4788_v20 }
  0x53   :  { %915 = vmatpush.msra.mxu3 %v4790_v21  ;;  %856 = vmatpush.msra.mxu0 %v4824_v32 }
  0x54   :  { %3626 = vmatmul.msk.f32.gmra.mxu2 %vm136_vm0, %v117_v7  ;;  %876 = vmatpush.msra.mxu1 %v4822_v31 }
  0x55   :  { %3634 = vmatmul.msk.f32.gmra.mxu3 %vm136_vm0, %v117_v7  ;;  %896 = vmatpush.msra.mxu2 %v4800_v24 }
  0x56   :  { %916 = vmatpush.msra.mxu3 %v4802_v25  ;;  %857 = vmatpush.msra.mxu0 %v4836_v36 }
  0x57   :  { %877 = vmatpush.msra.mxu1 %v4834_v35  ;;  %897 = vmatpush.msra.mxu2 %v4814_v28 }
  0x58   :  { %917 = vmatpush.msra.mxu3 %v4816_v29  ;;  %3610 = vmatmul.msk.f32.gmra.mxu0 %vm136_vm0, %v117_v7 }
  0x59   :  { %3618 = vmatmul.msk.f32.gmra.mxu1 %vm136_vm0, %v117_v7  ;;  %858 = vmatpush.msra.mxu0 %v4850_v40  ;;  %v6828_v7 = vld [vmem:[#allocation23_spill] sm:$0xff]  ;;  %vm569_vm0 = vcmask 1046529  }
  0x5a   :  { %878 = vmatpush.msra.mxu1 %v4848_v39  ;;  %898 = vmatpush.msra.mxu2 %v4828_v33 }
  0x5b   :  { %918 = vmatpush.msra.mxu3 %v4830_v34  ;;  %859 = vmatpush.msra.mxu0 %v4864_v45 }
  0x5c   :  { %494 = vmatmul.f32.vlgmr.msrb.gmra.mxu2 %v106_v3  ;;  %879 = vmatpush.msra.mxu1 %v4862_v44 }
  0x5d   :  { %514 = vmatmul.f32.vlgmr.msrb.gmra.mxu3 %v106_v3  ;;  %899 = vmatpush.msra.mxu2 %v4840_v37 }
  0x5e   :  { %919 = vmatpush.msra.mxu3 %v4842_v38  ;;  %860 = vmatpush.msra.mxu0 %v4876_v49 }
  0x5f   :  { %880 = vmatpush.msra.mxu1 %v4874_v48  ;;  %900 = vmatpush.msra.mxu2 %v4854_v41 }
  0x60   :  { %920 = vmatpush.msra.mxu3 %v4856_v42  ;;  %454 = vmatmul.f32.vlgmr.msrb.gmra.mxu0 %v106_v3 }
  0x61   :  { %474 = vmatmul.f32.vlgmr.msrb.gmra.mxu1 %v106_v3  ;;  %861 = vmatpush.msra.mxu0 %v4890_v53  ;;  %v6829_v3 = vld [vmem:[#allocation24_spill] sm:$0xff] }
  0x62   :  { %881 = vmatpush.msra.mxu1 %v4888_v52  ;;  %901 = vmatpush.msra.mxu2 %v4868_v46 }
  0x63   :  { %921 = vmatpush.msra.mxu3 %v4870_v47  ;;  %862 = vmatpush.msra.mxu0 %v4904_v58 }
  0x64   :  { %882 = vmatpush.msra.mxu1 %v4902_v57  ;;  %902 = vmatpush.msra.mxu2 %v4880_v50 }
  0x65   :  { %922 = vmatpush.msra.mxu3 %v4882_v51  ;;  %863 = vmatpush.msra.mxu0 %v4916_v62 }
  0x66   :  { %883 = vmatpush.msra.mxu1 %v4914_v61  ;;  %903 = vmatpush.msra.mxu2 %v4894_v54 }
  0x67   :  { %923 = vmatpush.msra.mxu3 %v4896_v55  ;;  %864 = vmatpush.msra.mxu0 %v4930_v2 }
  0x68   :  { %884 = vmatpush.msra.mxu1 %v4928_v1  ;;  %904 = vmatpush.msra.mxu2 %v4908_v59 }
  0x69   :  { %924 = vmatpush.msra.mxu3 %v4910_v60  ;;  %865 = vmatpush.msra.mxu0 %v4944_v11 }
  0x6a   :  { %885 = vmatpush.msra.mxu1 %v4942_v8  ;;  %905 = vmatpush.msra.mxu2 %v4920_v63 }
  0x6b   :  { %925 = vmatpush.msra.mxu3 %v4922_v0  ;;  %866 = vmatpush.msra.mxu0 %v4956_v43 }
  0x6c   :  { %886 = vmatpush.msra.mxu1 %v4954_v30  ;;  %906 = vmatpush.msra.mxu2 %v6828_v7 }
  0x6d   :  { %926 = vmatpush.msra.mxu3 %v6829_v3  ;;  %867 = vmatpush.msra.mxu0 %v4966_v4 }
  0x6e   :  { %887 = vmatpush.msra.mxu1 %v4964_v56  ;;  %907 = vmatpush.msra.mxu2 %v4948_v12 }
  0x6f   :  { %927 = vmatpush.msra.mxu3 %v4950_v17  ;;  %1235 = vmatpush.msrb.mxu0 %v4772_v14 }
  0x70   :  { %1255 = vmatpush.msrb.mxu1 %v4770_v13  ;;  %1275 = vmatpush.msrb.mxu2 %v4756_v5  ;;  %v126_v5 = vld [vmem:[%s6716_s5] sm:$0xf]  ;;  %s4690_s5 = smov [#allocation14]  }
  0x71   :  { %1295 = vmatpush.msrb.mxu3 %v4758_v6  ;;  %1236 = vmatpush.msrb.mxu0 %v4784_v19  ;;  %v5111_v6 = vperm.slane %v126_v5, 0  ;;  %v5117_v13 = vperm.slane %v126_v5, 3  ;;  %s3555_s9 = sshll.u32 %s4690_s5, 4  ;;  %s3556_s9 = int_to_ptr.vmem [resolvable:$true] %s3555_s9 }
  0x72   :  { %1256 = vmatpush.msrb.mxu1 %v4782_v18  ;;  %1276 = vmatpush.msrb.mxu2 %v4762_v9  ;;  %v5113_v9 = vperm.slane %v126_v5, 1 }
  0x73   :  { %1296 = vmatpush.msrb.mxu3 %v4764_v10  ;;  %1237 = vmatpush.msrb.mxu0 %v4796_v23  ;;  %v5115_v10 = vperm.slane %v126_v5, 2 }
  0x74   :  { %1257 = vmatpush.msrb.mxu1 %v4794_v22  ;;  %1277 = vmatpush.msrb.mxu2 %v4774_v15 }
  0x75   :  { %1297 = vmatpush.msrb.mxu3 %v4776_v16  ;;  %1238 = vmatpush.msrb.mxu0 %v4810_v27 }
  0x76   :  { %1258 = vmatpush.msrb.mxu1 %v4808_v26  ;;  %1278 = vmatpush.msrb.mxu2 %v4788_v20 }
  0x77   :  { %1298 = vmatpush.msrb.mxu3 %v4790_v21  ;;  %1239 = vmatpush.msrb.mxu0 %v4824_v32 }
  0x78   :  { %1259 = vmatpush.msrb.mxu1 %v4822_v31  ;;  %1279 = vmatpush.msrb.mxu2 %v4800_v24 }
  0x79   :  { %1299 = vmatpush.msrb.mxu3 %v4802_v25  ;;  %1240 = vmatpush.msrb.mxu0 %v4836_v36 }
  0x7a   :  { %1260 = vmatpush.msrb.mxu1 %v4834_v35  ;;  %1280 = vmatpush.msrb.mxu2 %v4814_v28 }
  0x7b   :  { %1300 = vmatpush.msrb.mxu3 %v4816_v29  ;;  %1241 = vmatpush.msrb.mxu0 %v4850_v40 }
  0x7c   :  { %1261 = vmatpush.msrb.mxu1 %v4848_v39  ;;  %1281 = vmatpush.msrb.mxu2 %v4828_v33 }
  0x7d   :  { %1301 = vmatpush.msrb.mxu3 %v4830_v34  ;;  %1242 = vmatpush.msrb.mxu0 %v4864_v45 }
  0x7e   :  { %1262 = vmatpush.msrb.mxu1 %v4862_v44  ;;  %1282 = vmatpush.msrb.mxu2 %v4840_v37 }
  0x7f   :  { %1302 = vmatpush.msrb.mxu3 %v4842_v38  ;;  %1243 = vmatpush.msrb.mxu0 %v4876_v49 }
  0x80   :  { %1263 = vmatpush.msrb.mxu1 %v4874_v48  ;;  %1283 = vmatpush.msrb.mxu2 %v4854_v41 }
  0x81   :  { %1303 = vmatpush.msrb.mxu3 %v4856_v42  ;;  %1244 = vmatpush.msrb.mxu0 %v4890_v53 }
  0x82   :  { %1264 = vmatpush.msrb.mxu1 %v4888_v52  ;;  %1284 = vmatpush.msrb.mxu2 %v4868_v46 }
  0x83   :  { %1304 = vmatpush.msrb.mxu3 %v4870_v47  ;;  %1245 = vmatpush.msrb.mxu0 %v4904_v58 }
  0x84   :  { %1265 = vmatpush.msrb.mxu1 %v4902_v57  ;;  %1285 = vmatpush.msrb.mxu2 %v4880_v50 }
  0x85   :  { %1305 = vmatpush.msrb.mxu3 %v4882_v51  ;;  %1246 = vmatpush.msrb.mxu0 %v4916_v62 }
  0x86   :  { %1266 = vmatpush.msrb.mxu1 %v4914_v61  ;;  %1286 = vmatpush.msrb.mxu2 %v4894_v54 }
  0x87   :  { %1306 = vmatpush.msrb.mxu3 %v4896_v55  ;;  %1247 = vmatpush.msrb.mxu0 %v4930_v2 }
  0x88   :  { %1267 = vmatpush.msrb.mxu1 %v4928_v1  ;;  %1287 = vmatpush.msrb.mxu2 %v4908_v59 }
  0x89   :  { %1307 = vmatpush.msrb.mxu3 %v4910_v60  ;;  %1248 = vmatpush.msrb.mxu0 %v4944_v11 }
  0x8a   :  { %1268 = vmatpush.msrb.mxu1 %v4942_v8  ;;  %1288 = vmatpush.msrb.mxu2 %v4920_v63 }
  0x8b   :  { %1308 = vmatpush.msrb.mxu3 %v4922_v0  ;;  %1249 = vmatpush.msrb.mxu0 %v4956_v43 }
  0x8c   :  { %1269 = vmatpush.msrb.mxu1 %v4954_v30  ;;  %1289 = vmatpush.msrb.mxu2 %v6828_v7 }
  0x8d   :  { %1309 = vmatpush.msrb.mxu3 %v6829_v3  ;;  %1250 = vmatpush.msrb.mxu0 %v4966_v4 }
  0x8e   :  { %1270 = vmatpush.msrb.mxu1 %v4964_v56  ;;  %1290 = vmatpush.msrb.mxu2 %v4948_v12 }
  0x8f   :  { %1310 = vmatpush.msrb.mxu3 %v4950_v17 }
  0x9d   :  { %v178_v14 = vpop.f32.mrf.mxu0 }
  0x9e   :  { %v219_v15 = vpop.f32.mrf.mxu1  ;;  %v179_v16 = vadd.f32 %v178_v14, %v5111_v6 }
  0x9f   :  { %v220_v18 = vadd.f32 %v219_v15, %v5113_v9  ;;  %v260_v19 = vpop.f32.mrf.mxu2  ;;  %v301_v20 = vpop.f32.mrf.mxu3 }
  0xa0   :  { %v261_v21 = vadd.f32 %v260_v19, %v5115_v10  ;;  %v302_v22 = vadd.f32 %v301_v20, %v5117_v13  ;;  %325 = vst [vmem:[#allocation2] sm:$0xff] %v179_v16 }
  0xa1   :  { %326 = vst [vmem:[#allocation2 + $0x8] sm:$0xff] %v220_v18 }
  0xa2   :  { %327 = vst [vmem:[#allocation2 + $0x10] sm:$0xff] %v261_v21 }
  0xa3   :  { %328 = vst [vmem:[#allocation2 + $0x18] sm:$0xff] %v302_v22 }
  0xa5   :  { %v181_v23 = vpop.f32.mrf.mxu0 }
  0xa6   :  { %v222_v24 = vpop.f32.mrf.mxu1  ;;  %v182_v25 = vadd.f32 %v181_v23, %v5111_v6 }
  0xa7   :  { %v223_v26 = vadd.f32 %v222_v24, %v5113_v9  ;;  %v263_v27 = vpop.f32.mrf.mxu2  ;;  %v304_v28 = vpop.f32.mrf.mxu3 }
  0xa8   :  { %329 = vst [vmem:[#allocation2 + $0x20] sm:$0xff] %v182_v25  ;;  %v264_v29 = vadd.f32 %v263_v27, %v5115_v10  ;;  %v305_v31 = vadd.f32 %v304_v28, %v5117_v13 }
  0xa9   :  { %330 = vst [vmem:[#allocation2 + $0x28] sm:$0xff] %v223_v26 }
  0xaa   :  { %331 = vst [vmem:[#allocation2 + $0x30] sm:$0xff] %v264_v29 }
  0xab   :  { %332 = vst [vmem:[#allocation2 + $0x38] sm:$0xff] %v305_v31 }
  0xad   :  { %v184_v32 = vpop.f32.mrf.mxu0 }
  0xae   :  { %v225_v33 = vpop.f32.mrf.mxu1  ;;  %v185_v34 = vadd.f32 %v184_v32, %v5111_v6 }
  0xaf   :  { %v226_v35 = vadd.f32 %v225_v33, %v5113_v9  ;;  %v266_v36 = vpop.f32.mrf.mxu2  ;;  %v307_v37 = vpop.f32.mrf.mxu3 }
  0xb0   :  { %v267_v38 = vadd.f32 %v266_v36, %v5115_v10  ;;  %v308_v39 = vadd.f32 %v307_v37, %v5117_v13  ;;  %333 = vst [vmem:[#allocation2 + $0x40] sm:$0xff] %v185_v34 }
  0xb1   :  { %334 = vst [vmem:[#allocation2 + $0x48] sm:$0xff] %v226_v35 }
  0xb2   :  { %335 = vst [vmem:[#allocation2 + $0x50] sm:$0xff] %v267_v38 }
  0xb3   :  { %336 = vst [vmem:[#allocation2 + $0x58] sm:$0xff] %v308_v39 }
  0xb5   :  { %v187_v40 = vpop.f32.mrf.mxu0 }
  0xb6   :  { %v228_v41 = vpop.f32.mrf.mxu1  ;;  %v188_v42 = vadd.f32 %v187_v40, %v5111_v6 }
  0xb7   :  { %v229_v44 = vadd.f32 %v228_v41, %v5113_v9  ;;  %v269_v45 = vpop.f32.mrf.mxu2  ;;  %v310_v46 = vpop.f32.mrf.mxu3 }
  0xb8   :  { %337 = vst [vmem:[#allocation2 + $0x60] sm:$0xff] %v188_v42  ;;  %v270_v47 = vadd.f32 %v269_v45, %v5115_v10  ;;  %v311_v48 = vadd.f32 %v310_v46, %v5117_v13  ;;  %v425_v45 = vld [vmem:[#allocation2 + $0x20] ss:$8 sm:$0xf] }
  0xb9   :  { %338 = vst [vmem:[#allocation2 + $0x68] sm:$0xff] %v229_v44  ;;  %v423_v44 = vld [vmem:[#allocation2] ss:$8 sm:$0xf] }
  0xba   :  { %339 = vst [vmem:[#allocation2 + $0x70] sm:$0xff] %v270_v47 }
  0xbb   :  { %340 = vst [vmem:[#allocation2 + $0x78] sm:$0xff] %v311_v48 }
  0xbd   :  { %v190_v49 = vpop.f32.mrf.mxu0 }
  0xbe   :  { %v231_v50 = vpop.f32.mrf.mxu1  ;;  %v191_v51 = vadd.f32 %v190_v49, %v5111_v6 }
  0xbf   :  { %v232_v52 = vadd.f32 %v231_v50, %v5113_v9  ;;  %v272_v53 = vpop.f32.mrf.mxu2  ;;  %v313_v54 = vpop.f32.mrf.mxu3  ;;  %v427_v50 = vld [vmem:[#allocation2 + $0x40] ss:$8 sm:$0xf] }
  0xc0   :  { %v273_v55 = vadd.f32 %v272_v53, %v5115_v10  ;;  %v314_v57 = vadd.f32 %v313_v54, %v5117_v13  ;;  %341 = vst [vmem:[#allocation2 + $0x80] sm:$0xff] %v191_v51 }
  0xc1   :  { %342 = vst [vmem:[#allocation2 + $0x88] sm:$0xff] %v232_v52 }
  0xc2   :  { %343 = vst [vmem:[#allocation2 + $0x90] sm:$0xff] %v273_v55  ;;  %v429_v55 = vld [vmem:[#allocation2 + $0x60] ss:$8 sm:$0xf] }
  0xc3   :  { %344 = vst [vmem:[#allocation2 + $0x98] sm:$0xff] %v314_v57 }
  0xc5   :  { %v193_v58 = vpop.f32.mrf.mxu0 }
  0xc6   :  { %v234_v59 = vpop.f32.mrf.mxu1  ;;  %v194_v60 = vadd.f32 %v193_v58, %v5111_v6 }
  0xc7   :  { %v235_v61 = vadd.f32 %v234_v59, %v5113_v9  ;;  %v275_v62 = vpop.f32.mrf.mxu2  ;;  %v316_v63 = vpop.f32.mrf.mxu3 }
  0xc8   :  { %345 = vst [vmem:[#allocation2 + $0xa0] sm:$0xff] %v194_v60  ;;  %v276_v0 = vadd.f32 %v275_v62, %v5115_v10  ;;  %v317_v1 = vadd.f32 %v316_v63, %v5117_v13 }
  0xc9   :  { %346 = vst [vmem:[#allocation2 + $0xa8] sm:$0xff] %v235_v61 }
  0xca   :  { %347 = vst [vmem:[#allocation2 + $0xb0] sm:$0xff] %v276_v0  ;;  %v431_v59 = vld [vmem:[#allocation2 + $0x80] ss:$8 sm:$0xf] }
  0xcb   :  { %348 = vst [vmem:[#allocation2 + $0xb8] sm:$0xff] %v317_v1 }
  0xcd   :  { %v196_v2 = vpop.f32.mrf.mxu0 }
  0xce   :  { %v237_v4 = vpop.f32.mrf.mxu1  ;;  %v197_v8 = vadd.f32 %v196_v2, %v5111_v6 }
  0xcf   :  { %v238_v11 = vadd.f32 %v237_v4, %v5113_v9  ;;  %v278_v12 = vpop.f32.mrf.mxu2 }
  0xd0   :  { %v319_v17 = vpop.f32.mrf.mxu3  ;;  %v279_v30 = vadd.f32 %v278_v12, %v5115_v10  ;;  %349 = vst [vmem:[#allocation2 + $0xc0] sm:$0xff] %v197_v8 }
  0xd1   :  { %v320_v43 = vadd.f32 %v319_v17, %v5117_v13  ;;  %350 = vst [vmem:[#allocation2 + $0xc8] sm:$0xff] %v238_v11 }
  0xd2   :  { %351 = vst [vmem:[#allocation2 + $0xd0] sm:$0xff] %v279_v30  ;;  %v433_v60 = vld [vmem:[#allocation2 + $0xa0] ss:$8 sm:$0xf] }
  0xd3   :  { %352 = vst [vmem:[#allocation2 + $0xd8] sm:$0xff] %v320_v43 }
  0xd5   :  { %v199_v56 = vpop.f32.mrf.mxu0 }
  0xd6   :  { %v240_v7 = vpop.f32.mrf.mxu1  ;;  %v200_v3 = vadd.f32 %v199_v56, %v5111_v6 }
  0xd7   :  { %v241_v5 = vadd.f32 %v240_v7, %v5113_v9  ;;  %v281_v14 = vpop.f32.mrf.mxu2 }
  0xd8   :  { %v322_v15 = vpop.f32.mrf.mxu3  ;;  %353 = vst [vmem:[#allocation2 + $0xe0] sm:$0xff] %v200_v3  ;;  %v282_v16 = vadd.f32 %v281_v14, %v5115_v10 }
  0xd9   :  { %354 = vst [vmem:[#allocation2 + $0xe8] sm:$0xff] %v241_v5  ;;  %v323_v18 = vadd.f32 %v322_v15, %v5117_v13 }
  0xda   :  { %355 = vst [vmem:[#allocation2 + $0xf0] sm:$0xff] %v282_v16  ;;  %v435_v2 = vld [vmem:[#allocation2 + $0xc0] ss:$8 sm:$0xf] }
  0xdb   :  { %356 = vst [vmem:[#allocation2 + $0xf8] sm:$0xff] %v323_v18 }
  0xdd   :  { %v455_v6 = vpop.f32.mrf.mxu0 }
  0xde   :  { %v475_v19 = vpop.f32.mrf.mxu1 }
  0xdf   :  { %v522_v9 = vrot.slane %v475_v19, 7  ;;  %v495_v20 = vpop.f32.mrf.mxu2 }
  0xe0   :  { %v515_v10 = vpop.f32.mrf.mxu3  ;;  %v523_v13 = vrot.slane %v495_v20, 6 }
  0xe1   :  { %v524_v21 = vrot.slane %v515_v10, 5  ;;  %v526_v22 = vsel %vm525_vm1, %v455_v6, %v522_v9  ;;  %v532_v23 = vsel %vm531_vm4, %v455_v6, %v522_v9  ;;  %v538_v24 = vsel %vm527_vm2, %v455_v6, %v522_v9 }
  0xe2   :  { %v544_v25 = vsel %vm533_vm5, %v455_v6, %v522_v9  ;;  %v550_v38 = vsel %vm539_vm7, %v455_v6, %v522_v9  ;;  %v556_v40 = vsel %vm545_vm9, %v455_v6, %v522_v9  ;;  %v562_v42 = vsel %vm551_vm11, %v455_v6, %v522_v9  ;;  %v437_v11 = vld [vmem:[#allocation2 + $0xe0] ss:$8 sm:$0xf] }
  0xe3   :  { %v528_v26 = vsel %vm527_vm2, %v523_v13, %v524_v21  ;;  %v534_v27 = vsel %vm533_vm5, %v523_v13, %v524_v21  ;;  %v540_v28 = vsel %vm539_vm7, %v523_v13, %v524_v21  ;;  %v546_v29 = vsel %vm545_vm9, %v523_v13, %v524_v21 }
  0xe4   :  { %v530_v31 = vsel %vm529_vm3, %v526_v22, %v528_v26  ;;  %v536_v32 = vsel %vm535_vm6, %v532_v23, %v534_v27  ;;  %v542_v33 = vsel %vm541_vm8, %v538_v24, %v540_v28  ;;  %v548_v34 = vsel %vm547_vm10, %v544_v25, %v546_v29 }
  0xe5   :  { %v537_v35 = vrot.slane %v536_v32, 1  ;;  %v543_v36 = vrot.slane %v542_v33, 2  ;;  %v549_v37 = vrot.slane %v548_v34, 3  ;;  %v552_v39 = vsel %vm551_vm11, %v523_v13, %v524_v21 }
  0xe6   :  { %v558_v41 = vsel %vm557_vm13, %v524_v21, %v523_v13  ;;  %v554_v46 = vsel %vm553_vm12, %v550_v38, %v552_v39  ;;  %v563_v48 = vsel %vm525_vm1, %v523_v13, %v524_v21  ;;  %v567_v49 = vsel %vm557_vm13, %v522_v9, %v455_v6 }
  0xe7   :  { %v560_v47 = vsel %vm559_vm14, %v556_v40, %v558_v41  ;;  %v565_v51 = vsel %vm564_vm15, %v563_v48, %v562_v42  ;;  %v568_v52 = vsel %vm531_vm4, %v523_v13, %v524_v21  ;;  %v5174_v53 = vadd.f32 %v530_v31, %v423_v44 }
  0xe8   :  { %v5176_v54 = vadd.f32 %v537_v35, %v425_v45  ;;  %v570_v57 = vsel %vm569_vm0, %v568_v52, %v567_v49  ;;  %v5179_v58 = vadd.f32 %v543_v36, %v427_v50  ;;  %v5181_v61 = vadd.f32 %v549_v37, %v429_v55 }
  0xe9   :  { %v555_v62 = vrot.slane %v554_v46, 4  ;;  %v561_v63 = vrot.slane %v560_v47, 5  ;;  %v566_v0 = vrot.slane %v565_v51, 6  ;;  %v571_v1 = vrot.slane %v570_v57, 7 }
  0xea   :  { %v588_v4 = vmul.f32 0.5, %v5174_v53  ;;  %v589_v8 = vmul.f32 0.5, %v5176_v54  ;;  %v590_v43 = vmul.f32 0.5, %v5179_v58  ;;  %v591_v7 = vmul.f32 0.5, %v5181_v61 }
  0xeb   :  { %v5185_v12 = vadd.f32 %v555_v62, %v431_v59  ;;  %v5187_v17 = vadd.f32 %v561_v63, %v433_v60  ;;  %v5189_v30 = vadd.f32 %v566_v0, %v435_v2  ;;  %v5192_v56 = vadd.f32 %v571_v1, %v437_v11 }
  0xec   :  { %3647 = vtanh.f32 %v588_v4  ;;  %v628_v5 = vrot.slane %v5174_v53, 1  ;;  %v629_v15 = vrot.slane %v5176_v54, 1  ;;  %v630_v18 = vrot.slane %v5179_v58, 1 }
  0xed   :  { %v592_v3 = vmul.f32 0.5, %v5185_v12  ;;  %v593_v14 = vmul.f32 0.5, %v5187_v17  ;;  %3649 = vtanh.f32 %v589_v8  ;;  %v594_v16 = vmul.f32 0.5, %v5189_v30 }
  0xee   :  { %3651 = vtanh.f32 %v590_v43  ;;  %v595_v19 = vmul.f32 0.5, %v5192_v56  ;;  %v631_v6 = vrot.slane %v5181_v61, 1  ;;  %v632_v9 = vrot.slane %v5185_v12, 1 }
  0xef   :  { %3653 = vtanh.f32 %v591_v7  ;;  %v633_v20 = vrot.slane %v5187_v17, 1  ;;  %v634_v10 = vrot.slane %v5189_v30, 1  ;;  %v644_v13 = vmul.f32 0.5, %v628_v5 }
  0xf0   :  { %3655 = vtanh.f32 %v592_v3  ;;  %v635_v22 = vrot.slane %v5192_v56, 1  ;;  %v645_v23 = vmul.f32 0.5, %v629_v15  ;;  %v646_v24 = vmul.f32 0.5, %v630_v18 }
  0xf1   :  { %3657 = vtanh.f32 %v593_v14  ;;  %v647_v26 = vmul.f32 0.5, %v631_v6  ;;  %v648_v27 = vmul.f32 0.5, %v632_v9  ;;  %v649_v31 = vmul.f32 0.5, %v633_v20 }
  0xf2   :  { %v3648_v21 = vpop.eup %3647  ;;  %3659 = vtanh.f32 %v594_v16  ;;  %v650_v32 = vmul.f32 0.5, %v634_v10  ;;  %v651_v34 = vmul.f32 0.5, %v635_v22  ;;  %v676_v35 = vrot.slane %v5174_v53, 2  ;;  %v5239_v22 = vld [vmem:[#allocation10] sm:$0xff] }
  0xf3   :  { %v3650_v25 = vpop.eup %3649  ;;  %3661 = vtanh.f32 %v595_v19  ;;  %v604_v29 = vmul.f32 0.5, %v3648_v21  ;;  %v677_v36 = vrot.slane %v5176_v54, 2  ;;  %v678_v38 = vrot.slane %v5179_v58, 2 }
  0xf4   :  { %v3652_v28 = vpop.eup %3651  ;;  %3663 = vtanh.f32 %v644_v13  ;;  %v679_v39 = vrot.slane %v5181_v61, 2  ;;  %v680_v40 = vrot.slane %v5185_v12, 2  ;;  %v605_v42 = vmul.f32 0.5, %v3650_v25 }
  0xf5   :  { %v3654_v33 = vpop.eup %3653  ;;  %3665 = vtanh.f32 %v645_v23  ;;  %v681_v44 = vrot.slane %v5187_v17, 2  ;;  %v682_v45 = vrot.slane %v5189_v30, 2  ;;  %v606_v47 = vmul.f32 0.5, %v3652_v28 }
  0xf6   :  { %v3656_v37 = vpop.eup %3655  ;;  %3667 = vtanh.f32 %v646_v24  ;;  %v607_v48 = vmul.f32 0.5, %v3654_v33  ;;  %v5214_v49 = vadd.f32 0.5, %v604_v29  ;;  %v683_v52 = vrot.slane %v5192_v56, 2 }
  0xf7   :  { %v3658_v41 = vpop.eup %3657  ;;  %3669 = vtanh.f32 %v647_v26  ;;  %v608_v51 = vmul.f32 0.5, %v3656_v37  ;;  %v700_v55 = vrot.slane %v5174_v53, 3  ;;  %v701_v62 = vrot.slane %v5176_v54, 3 }
  0xf8   :  { %v3660_v46 = vpop.eup %3659  ;;  %3671 = vtanh.f32 %v648_v27  ;;  %v609_v59 = vmul.f32 0.5, %v3658_v41  ;;  %v5219_v1 = vadd.f32 0.5, %v605_v42  ;;  %v702_v2 = vrot.slane %v5179_v58, 3 }
  0xf9   :  { %v3662_v50 = vpop.eup %3661  ;;  %3673 = vtanh.f32 %v649_v31  ;;  %v610_v60 = vmul.f32 0.5, %v3660_v46  ;;  %v5222_v8 = vadd.f32 0.5, %v606_v47  ;;  %v5224_v11 = vadd.f32 0.5, %v607_v48 }
  0xfa   :  { %v3664_v57 = vpop.eup %3663  ;;  %3675 = vtanh.f32 %v650_v32  ;;  %v611_v0 = vmul.f32 0.5, %v3662_v50  ;;  %v703_v53 = vrot.slane %v5181_v61, 3  ;;  %v5227_v3 = vadd.f32 0.5, %v608_v51 }
  0xfb   :  { %v3666_v63 = vpop.eup %3665  ;;  %3677 = vtanh.f32 %v651_v34  ;;  %v660_v43 = vmul.f32 0.5, %v3664_v57  ;;  %v704_v54 = vrot.slane %v5185_v12, 3  ;;  %v705_v14 = vrot.slane %v5187_v17, 3 }
  0xfc   :  { %v3668_v4 = vpop.eup %3667  ;;  %v661_v5 = vmul.f32 0.5, %v3666_v63  ;;  %v5231_v16 = vadd.f32 0.5, %v609_v59  ;;  %v5233_v58 = vadd.f32 0.5, %v610_v60  ;;  %v706_v19 = vrot.slane %v5189_v30, 3 }
  0xfd   :  { %v3670_v7 = vpop.eup %3669  ;;  %v662_v18 = vmul.f32 0.5, %v3668_v4  ;;  %v5236_v9 = vadd.f32 0.5, %v611_v0  ;;  %3679 = vtanh.f32 %v676_v35  ;;  %v707_v20 = vrot.slane %v5192_v56, 3 }
  0xfe   :  { %v3672_v15 = vpop.eup %3671  ;;  %v663_v61 = vmul.f32 0.5, %v3670_v7  ;;  %v668_v12 = vadd.f32 0.5, %v660_v43  ;;  %3681 = vtanh.f32 %v677_v36  ;;  %v716_v17 = vmul.f32 0.5, %v700_v55 }
  0xff   :  { %v3674_v6 = vpop.eup %3673  ;;  %v664_v13 = vmul.f32 0.5, %v3672_v15  ;;  %v669_v24 = vadd.f32 0.5, %v661_v5  ;;  %3683 = vtanh.f32 %v678_v38  ;;  %v717_v25 = vmul.f32 0.5, %v701_v62 }
 0x100   :  { %v3676_v10 = vpop.eup %3675  ;;  %v665_v23 = vmul.f32 0.5, %v3674_v6  ;;  %v670_v27 = vadd.f32 0.5, %v662_v18  ;;  %3685 = vtanh.f32 %v679_v39  ;;  %v718_v28 = vmul.f32 0.5, %v702_v2 }
 0x101   :  { %v3678_v21 = vpop.eup %3677  ;;  %v666_v26 = vmul.f32 0.5, %v3676_v10  ;;  %v671_v29 = vadd.f32 0.5, %v663_v61  ;;  %3687 = vtanh.f32 %v680_v40  ;;  %v719_v31 = vmul.f32 0.5, %v703_v53 }
 0x102   :  { %v720_v56 = vmul.f32 0.5, %v704_v54  ;;  %v667_v32 = vmul.f32 0.5, %v3678_v21  ;;  %v672_v33 = vadd.f32 0.5, %v664_v13  ;;  %3689 = vtanh.f32 %v681_v44 }
 0x103   :  { %v749_v34 = vrot.slane %v5239_v22, 1  ;;  %v3680_v35 = vpop.eup %3679  ;;  %v673_v36 = vadd.f32 0.5, %v665_v23  ;;  %3691 = vtanh.f32 %v682_v45  ;;  %v721_v37 = vmul.f32 0.5, %v705_v14 }
 0x104   :  { %v750_v38 = vrot.slane %v5239_v22, 2  ;;  %v3682_v41 = vpop.eup %3681  ;;  %v674_v39 = vadd.f32 0.5, %v666_v26  ;;  %3693 = vtanh.f32 %v683_v52  ;;  %v722_v42 = vmul.f32 0.5, %v706_v19 }
 0x105   :  { %v751_v40 = vrot.slane %v5239_v22, 3  ;;  %v3684_v46 = vpop.eup %3683  ;;  %v723_v47 = vmul.f32 0.5, %v707_v20  ;;  %3695 = vtanh.f32 %v716_v17  ;;  %v752_v44 = vrot.slane %v5239_v22, 4 }
 0x106   :  { %v753_v48 = vrot.slane %v5239_v22, 5  ;;  %v3686_v50 = vpop.eup %3685  ;;  %v675_v51 = vadd.f32 0.5, %v667_v32  ;;  %3697 = vtanh.f32 %v717_v25  ;;  %v763_v30 = vmul.f32 %v668_v12, %v5239_v22 }
 0x107   :  { %v764_v45 = vmul.f32 %v749_v34, %v669_v24  ;;  %v3688_v55 = vpop.eup %3687  ;;  %3699 = vtanh.f32 %v718_v28  ;;  %v754_v52 = vrot.slane %v5239_v22, 6  ;;  %v755_v57 = vrot.slane %v5239_v22, 7 }
 0x108   :  { %v765_v59 = vmul.f32 %v750_v38, %v670_v27  ;;  %v3690_v60 = vpop.eup %3689  ;;  %3701 = vtanh.f32 %v719_v31  ;;  %v766_v62 = vmul.f32 %v751_v40, %v671_v29  ;;  %v771_v63 = vmul.f32 %v3680_v35, %v5214_v49 }
 0x109   :  { %v772_v0 = vmul.f32 %v3682_v41, %v5219_v1  ;;  %v3692_v2 = vpop.eup %3691  ;;  %3703 = vtanh.f32 %v720_v56  ;;  %v767_v4 = vmul.f32 %v752_v44, %v672_v33  ;;  %v768_v43 = vmul.f32 %v753_v48, %v673_v36 }
 0x10a   :  { %v773_v53 = vmul.f32 %v3684_v46, %v5222_v8  ;;  %v3694_v7 = vpop.eup %3693  ;;  %3705 = vtanh.f32 %v721_v37  ;;  %v774_v5 = vmul.f32 %v3686_v50, %v5224_v11  ;;  %v5255_v54 = vadd.f32 %v771_v63, %v763_v30  ;;  %v5286_v63 = vld [vmem:[#allocation13 + $0x1e8] sm:$0xff] }
 0x10b   :  { %v5257_v14 = vadd.f32 %v772_v0, %v764_v45  ;;  %v3696_v15 = vpop.eup %3695  ;;  %3707 = vtanh.f32 %v722_v42  ;;  %v769_v18 = vmul.f32 %v754_v52, %v674_v39  ;;  %v775_v49 = vmul.f32 %v3688_v55, %v5227_v3  ;;  %v5289_v0 = vld [vmem:[#allocation13 + $0x1f0] sm:$0xff] }
 0x10c   :  { %v5260_v1 = vadd.f32 %v773_v53, %v765_v59  ;;  %v3698_v19 = vpop.eup %3697  ;;  %3709 = vtanh.f32 %v723_v47  ;;  %v770_v6 = vmul.f32 %v755_v57, %v675_v51  ;;  %v776_v8 = vmul.f32 %v3690_v60, %v5231_v16  ;;  %v5301_v53 = vld [vmem:[#allocation13 + $0x1d0] sm:$0xff] }
 0x10d   :  { %v5263_v61 = vadd.f32 %v774_v5, %v766_v62  ;;  %v3700_v20 = vpop.eup %3699  ;;  %v777_v11 = vmul.f32 %v3692_v2, %v5233_v58  ;;  %v5266_v10 = vadd.f32 %v775_v49, %v767_v4  ;;  %3711 = vtanh.f32 %v5255_v54  ;;  %v5283_v62 = vld [vmem:[#allocation13 + $0x1e0] sm:$0xff]  ;;  %v5292_v2 = vld [vmem:[#allocation13 + $0x1f8] sm:$0xff] }
 0x10e   :  { %v3702_v13 = vpop.eup %3701  ;;  %v732_v12 = vmul.f32 0.5, %v3696_v15  ;;  %v778_v3 = vmul.f32 %v3694_v7, %v5236_v9  ;;  %v5270_v17 = vadd.f32 %v776_v8, %v768_v43  ;;  %3713 = vtanh.f32 %v5257_v14  ;;  %v5295_v4 = vld [vmem:[#allocation13 + $0x1c0] sm:$0xff]  ;;  %v5298_v43 = vld [vmem:[#allocation13 + $0x1c8] sm:$0xff]  ;;  %v5304_v7 = vld [vmem:[#allocation13 + $0x1d8] sm:$0xff] }
 0x10f   :  { %v3704_v21 = vpop.eup %3703  ;;  %v733_v22 = vmul.f32 0.5, %v3698_v19  ;;  %v5273_v16 = vadd.f32 %v777_v11, %v769_v18  ;;  %3715 = vtanh.f32 %v5260_v1  ;;  %v734_v58 = vmul.f32 0.5, %v3700_v20  ;;  %v5307_v5 = vld [vmem:[#allocation13 + $0x1a0] sm:$0xff]  ;;  %v5310_v15 = vld [vmem:[#allocation13 + $0x1a8] sm:$0xff]  ;;  %v5313_v18 = vld [vmem:[#allocation13 + $0x1b0] sm:$0xff] }
 0x110   :  { %v3706_v23 = vpop.eup %3705  ;;  %v5276_v24 = vadd.f32 %v778_v3, %v770_v6  ;;  %3717 = vtanh.f32 %v5263_v61  ;;  %v735_v26 = vmul.f32 0.5, %v3702_v13  ;;  %v736_v27 = vmul.f32 0.5, %v3704_v21  ;;  %v5316_v49 = vld [vmem:[#allocation13 + $0x1b8] sm:$0xff]  ;;  %v5319_v19 = vld [vmem:[#allocation13 + $0x180] sm:$0xff]  ;;  %v5322_v6 = vld [vmem:[#allocation13 + $0x188] sm:$0xff] }
 0x111   :  { %v3708_v25 = vpop.eup %3707  ;;  %3719 = vtanh.f32 %v5266_v10  ;;  %v740_v28 = vadd.f32 0.5, %v732_v12  ;;  %v737_v31 = vmul.f32 0.5, %v3706_v23  ;;  %v741_v56 = vadd.f32 0.5, %v733_v22  ;;  %6830 = vst [vmem:[#allocation23_spill] sm:$0xff] %v5322_v6  ;;  %v5325_v8 = vld [vmem:[#allocation13 + $0x190] sm:$0xff]  ;;  %v5328_v20 = vld [vmem:[#allocation13 + $0x198] sm:$0xff] }
 0x112   :  { %v3710_v9 = vpop.eup %3709  ;;  %3721 = vtanh.f32 %v5270_v17  ;;  %v738_v33 = vmul.f32 0.5, %v3708_v25  ;;  %v742_v34 = vadd.f32 0.5, %v734_v58  ;;  %v743_v38 = vadd.f32 0.5, %v735_v26  ;;  %6831 = vst [vmem:[#allocation24_spill] sm:$0xff] %v5325_v8  ;;  %v5331_v11 = vld [vmem:[#allocation13 + $0x160] sm:$0xff]  ;;  %v5334_v13 = vld [vmem:[#allocation13 + $0x168] sm:$0xff] }
 0x113   :  { %v3712_v29 = vpop.eup %3711  ;;  %3723 = vtanh.f32 %v5273_v16  ;;  %v739_v37 = vmul.f32 0.5, %v3710_v9  ;;  %v744_v42 = vadd.f32 0.5, %v736_v27  ;;  %v745_v47 = vadd.f32 0.5, %v737_v31  ;;  %6832 = vst [vmem:[#allocation25_spill] sm:$0xff] %v5328_v20  ;;  %v5337_v12 = vld [vmem:[#allocation13 + $0x170] sm:$0xff]  ;;  %v5340_v3 = vld [vmem:[#allocation13 + $0x178] sm:$0xff] }
 0x114   :  { %v3714_v32 = vpop.eup %3713  ;;  %3725 = vtanh.f32 %v5276_v24  ;;  %v795_v35 = vmul.f32 %v3712_v29, %v740_v28  ;;  %v746_v50 = vadd.f32 0.5, %v738_v33  ;;  %6833 = vst [vmem:[#allocation26_spill] sm:$0xff] %v5331_v11  ;;  %v5343_v21 = vld [vmem:[#allocation13 + $0x140] sm:$0xff]  ;;  %v5346_v22 = vld [vmem:[#allocation13 + $0x148] sm:$0xff]  ;;  %v5349_v23 = vld [vmem:[#allocation13 + $0x150] sm:$0xff] }
 0x115   :  { %v3716_v36 = vpop.eup %3715  ;;  %v796_v41 = vmul.f32 %v3714_v32, %v741_v56  ;;  %v747_v45 = vadd.f32 0.5, %v739_v37  ;;  %6834 = vst [vmem:[#allocation27_spill] sm:$0xff] %v5334_v13  ;;  %v5352_v58 = vld [vmem:[#allocation13 + $0x158] sm:$0xff]  ;;  %v5355_v25 = vld [vmem:[#allocation13 + $0x120] sm:$0xff]  ;;  %v5358_v26 = vld [vmem:[#allocation13 + $0x128] sm:$0xff] }
 0x116   :  { %v3718_v39 = vpop.eup %3717  ;;  %v797_v40 = vmul.f32 %v3716_v36, %v742_v34  ;;  %803 = vst [vmem:[#allocation14] sm:$0x1] %v795_v35  ;;  %v5361_v9 = vld [vmem:[#allocation13 + $0x130] sm:$0xff]  ;;  %v5364_v27 = vld [vmem:[#allocation13 + $0x138] sm:$0xff]  ;;  %v5367_v28 = vld [vmem:[#allocation13 + $0x100] sm:$0xff] }
 0x117   :  { %v3720_v46 = vpop.eup %3719  ;;  %v798_v44 = vmul.f32 %v3718_v39, %v743_v38  ;;  %804 = vst [vmem:[#allocation14 + $0x8] sm:$0x1] %v796_v41  ;;  %v5370_v29 = vld [vmem:[#allocation13 + $0x108] sm:$0xff]  ;;  %v5373_v31 = vld [vmem:[#allocation13 + $0x110] sm:$0xff]  ;;  %v5376_v56 = vld [vmem:[#allocation13 + $0x118] sm:$0xff] }
 0x118   :  { %v3722_v48 = vpop.eup %3721  ;;  %v799_v51 = vmul.f32 %v3720_v46, %v744_v42  ;;  %805 = vst [vmem:[#allocation14 + $0x10] sm:$0x1] %v797_v40  ;;  %v5379_v32 = vld [vmem:[#allocation13 + $0xe0] sm:$0xff]  ;;  %v5382_v33 = vld [vmem:[#allocation13 + $0xe8] sm:$0xff]  ;;  %v5385_v34 = vld [vmem:[#allocation13 + $0xf0] sm:$0xff] }
 0x119   :  { %v3724_v30 = vpop.eup %3723  ;;  %v800_v55 = vmul.f32 %v3722_v48, %v745_v47  ;;  %806 = vst [vmem:[#allocation14 + $0x18] sm:$0x1] %v798_v44  ;;  %v5391_v36 = vld [vmem:[#allocation13 + $0xc0] sm:$0xff]  ;;  %v5394_v37 = vld [vmem:[#allocation13 + $0xc8] sm:$0xff]  ;;  %v5397_v38 = vld [vmem:[#allocation13 + $0xd0] sm:$0xff] }
 0x11a   :  { %v3726_v52 = vpop.eup %3725  ;;  %v801_v57 = vmul.f32 %v3724_v30, %v746_v50  ;;  %807 = vst [vmem:[#allocation14 + $0x20] sm:$0x1] %v799_v51  ;;  %v5403_v39 = vld [vmem:[#allocation13 + $0xa0] sm:$0xff]  ;;  %v5406_v42 = vld [vmem:[#allocation13 + $0xa8] sm:$0xff]  ;;  %v5412_v46 = vld [vmem:[#allocation13 + $0xb8] sm:$0xff] }
 0x11b   :  { %v802_v59 = vmul.f32 %v3726_v52, %v747_v45  ;;  %808 = vst [vmem:[#allocation14 + $0x28] sm:$0x1] %v800_v55  ;;  %v5415_v47 = vld [vmem:[#allocation13 + $0x80] sm:$0xff]  ;;  %v5421_v48 = vld [vmem:[#allocation13 + $0x90] sm:$0xff]  ;;  %v5424_v50 = vld [vmem:[#allocation13 + $0x98] sm:$0xff] }
 0x11c   :  { %809 = vst [vmem:[#allocation14 + $0x30] sm:$0x1] %v801_v57  ;;  %v5430_v30 = vld [vmem:[#allocation13 + $0x68] sm:$0xff]  ;;  %v5433_v45 = vld [vmem:[#allocation13 + $0x70] sm:$0xff]  ;;  %v5439_v52 = vld [vmem:[#allocation13 + $0x40] sm:$0xff] }
 0x11d   :  { %810 = vst [vmem:[#allocation14 + $0x38] sm:$0x1] %v802_v59 }
 0x11e   :  { %835 = vst [vmem:[#allocation1] ss:$9 sm:$0xff] %v795_v35  ;;  %v5388_v35 = vld [vmem:[#allocation13 + $0xf8] sm:$0xff] }
 0x11f   :  { %837 = vst [vmem:[#allocation1 + $0x1] ss:$9 sm:$0xff] %v796_v41  ;;  %v5400_v41 = vld [vmem:[#allocation13 + $0xd8] sm:$0xff] }
 0x120   :  { %839 = vst [vmem:[#allocation1 + $0x2] ss:$9 sm:$0xff] %v797_v40  ;;  %v5409_v40 = vld [vmem:[#allocation13 + $0xb0] sm:$0xff] }
 0x121   :  { %841 = vst [vmem:[#allocation1 + $0x3] ss:$9 sm:$0xff] %v798_v44  ;;  %v5418_v44 = vld [vmem:[#allocation13 + $0x88] sm:$0xff] }
 0x122   :  { %843 = vst [vmem:[#allocation1 + $0x4] ss:$9 sm:$0xff] %v799_v51  ;;  %v5427_v51 = vld [vmem:[#allocation13 + $0x60] sm:$0xff] }
 0x123   :  { %845 = vst [vmem:[#allocation1 + $0x5] ss:$9 sm:$0xff] %v800_v55  ;;  %v5436_v55 = vld [vmem:[#allocation13 + $0x78] sm:$0xff] }
 0x124   :  { %847 = vst [vmem:[#allocation1 + $0x6] ss:$9 sm:$0xff] %v801_v57  ;;  %v5442_v57 = vld [vmem:[#allocation13 + $0x48] sm:$0xff] }
 0x125   :  { %849 = vst [vmem:[#allocation1 + $0x7] ss:$9 sm:$0xff] %v802_v59  ;;  %v5445_v59 = vld [vmem:[#allocation13 + $0x50] sm:$0xff] }
 0x126   :  { %6835 = vst [vmem:[#allocation28_spill] sm:$0xff] %v5337_v12 }
 0x127   :  { %6836 = vst [vmem:[#allocation29_spill] sm:$0xff] %v5340_v3 }
 0x128   :  { %6837 = vst [vmem:[#allocation30_spill] sm:$0xff] %v5343_v21 }
 0x129   :  { %6838 = vst [vmem:[#allocation31_spill] sm:$0xff] %v5346_v22 }
 0x12a   :  { %6839 = vst [vmem:[#allocation32_spill] sm:$0xff] %v5349_v23 }
 0x12b   :  { %6840 = vst [vmem:[#allocation33_spill] sm:$0xff] %v5352_v58 }
 0x12c   :  { %v850_v60 = vld [vmem:[#allocation1] sm:$0xff]  ;;  %6841 = vst [vmem:[#allocation34_spill] sm:$0xff] %v5355_v25 }
 0x12d   :  { %868 = vmatmul.f32.vlgmr.msra.gmra.mxu0 %v850_v60  ;;  %888 = vmatmul.f32.vlgmr.msra.gmra.mxu1 %v850_v60  ;;  %6842 = vst [vmem:[#allocation35_spill] sm:$0xff] %v5358_v26 }
 0x12e   :  { %908 = vmatmul.f32.vlgmr.msra.gmra.mxu2 %v850_v60  ;;  %928 = vmatmul.f32.vlgmr.msra.gmra.mxu3 %v850_v60  ;;  %6843 = vst [vmem:[#allocation36_spill] sm:$0xff] %v5361_v9  ;;  %v5448_v60 = vld [vmem:[#allocation13 + $0x58] sm:$0xff] }
 0x12f   :  { %1618 = vmatpush.msra.mxu0 %v5283_v62  ;;  %1638 = vmatpush.msra.mxu1 %v5286_v63  ;;  %6844 = vst [vmem:[#allocation37_spill] sm:$0xff] %v5364_v27 }
 0x130   :  { %1658 = vmatpush.msra.mxu2 %v5289_v0  ;;  %1678 = vmatpush.msra.mxu3 %v5292_v2  ;;  %6845 = vst [vmem:[#allocation38_spill] sm:$0xff] %v5367_v28 }
 0x131   :  { %1619 = vmatpush.msra.mxu0 %v5295_v4  ;;  %1639 = vmatpush.msra.mxu1 %v5298_v43  ;;  %6846 = vst [vmem:[#allocation39_spill] sm:$0xff] %v5370_v29 }
 0x132   :  { %1659 = vmatpush.msra.mxu2 %v5301_v53  ;;  %1679 = vmatpush.msra.mxu3 %v5304_v7  ;;  %6847 = vst [vmem:[#allocation40_spill] sm:$0xff] %v5373_v31 }
 0x133   :  { %1620 = vmatpush.msra.mxu0 %v5307_v5  ;;  %1640 = vmatpush.msra.mxu1 %v5310_v15  ;;  %6848 = vst [vmem:[#allocation41_spill] sm:$0xff] %v5376_v56 }
 0x134   :  { %1660 = vmatpush.msra.mxu2 %v5313_v18  ;;  %1680 = vmatpush.msra.mxu3 %v5316_v49  ;;  %6849 = vst [vmem:[#allocation42_spill] sm:$0xff] %v5379_v32 }
 0x135   :  { %1621 = vmatpush.msra.mxu0 %v5319_v19  ;;  %1641 = vmatpush.msra.mxu1 %v5322_v6  ;;  %6850 = vst [vmem:[#allocation43_spill] sm:$0xff] %v5382_v33 }
 0x136   :  { %1661 = vmatpush.msra.mxu2 %v5325_v8  ;;  %1681 = vmatpush.msra.mxu3 %v5328_v20  ;;  %6851 = vst [vmem:[#allocation44_spill] sm:$0xff] %v5385_v34 }
 0x137   :  { %1622 = vmatpush.msra.mxu0 %v5331_v11  ;;  %1642 = vmatpush.msra.mxu1 %v5334_v13  ;;  %6852 = vst [vmem:[#allocation45_spill] sm:$0xff] %v5388_v35 }
 0x138   :  { %1662 = vmatpush.msra.mxu2 %v5337_v12  ;;  %1682 = vmatpush.msra.mxu3 %v5340_v3  ;;  %6853 = vst [vmem:[#allocation46_spill] sm:$0xff] %v5391_v36 }
 0x139   :  { %1623 = vmatpush.msra.mxu0 %v5343_v21  ;;  %1643 = vmatpush.msra.mxu1 %v5346_v22  ;;  %6854 = vst [vmem:[#allocation47_spill] sm:$0xff] %v5394_v37 }
 0x13a   :  { %1663 = vmatpush.msra.mxu2 %v5349_v23  ;;  %1683 = vmatpush.msra.mxu3 %v5352_v58  ;;  %6855 = vst [vmem:[#allocation48_spill] sm:$0xff] %v5397_v38 }
 0x13b   :  { %1624 = vmatpush.msra.mxu0 %v5355_v25  ;;  %1644 = vmatpush.msra.mxu1 %v5358_v26  ;;  %6856 = vst [vmem:[#allocation49_spill] sm:$0xff] %v5400_v41 }
 0x13c   :  { %1664 = vmatpush.msra.mxu2 %v5361_v9  ;;  %1684 = vmatpush.msra.mxu3 %v5364_v27  ;;  %6857 = vst [vmem:[#allocation50_spill] sm:$0xff] %v5403_v39 }
 0x13d   :  { %1625 = vmatpush.msra.mxu0 %v5367_v28  ;;  %1645 = vmatpush.msra.mxu1 %v5370_v29  ;;  %6858 = vst [vmem:[#allocation51_spill] sm:$0xff] %v5406_v42 }
 0x13e   :  { %1665 = vmatpush.msra.mxu2 %v5373_v31  ;;  %1685 = vmatpush.msra.mxu3 %v5376_v56  ;;  %6859 = vst [vmem:[#allocation52_spill] sm:$0xff] %v5409_v40  ;;  %v816_v56 = vld [vmem:[#allocation2 + $0x41] ss:$8 sm:$0xf] }
 0x13f   :  { %1626 = vmatpush.msra.mxu0 %v5379_v32  ;;  %1646 = vmatpush.msra.mxu1 %v5382_v33  ;;  %6860 = vst [vmem:[#allocation53_spill] sm:$0xff] %v5412_v46  ;;  %v814_v32 = vld [vmem:[#allocation2 + $0x21] ss:$8 sm:$0xf] }
 0x140   :  { %1666 = vmatpush.msra.mxu2 %v5385_v34  ;;  %1686 = vmatpush.msra.mxu3 %v5388_v35  ;;  %6861 = vst [vmem:[#allocation54_spill] sm:$0xff] %v5415_v47  ;;  %v812_v35 = vld [vmem:[#allocation2 + $0x1] ss:$8 sm:$0xf] }
 0x141   :  { %1627 = vmatpush.msra.mxu0 %v5391_v36  ;;  %1647 = vmatpush.msra.mxu1 %v5394_v37  ;;  %6862 = vst [vmem:[#allocation55_spill] sm:$0xff] %v5418_v44  ;;  %v818_v31 = vld [vmem:[#allocation2 + $0x61] ss:$8 sm:$0xf] }
 0x142   :  { %1667 = vmatpush.msra.mxu2 %v5397_v38  ;;  %1687 = vmatpush.msra.mxu3 %v5400_v41  ;;  %6863 = vst [vmem:[#allocation56_spill] sm:$0xff] %v5421_v48 }
 0x143   :  { %1628 = vmatpush.msra.mxu0 %v5403_v39  ;;  %1648 = vmatpush.msra.mxu1 %v5406_v42  ;;  %6864 = vst [vmem:[#allocation57_spill] sm:$0xff] %v5424_v50 }
 0x144   :  { %1668 = vmatpush.msra.mxu2 %v5409_v40  ;;  %1688 = vmatpush.msra.mxu3 %v5412_v46  ;;  %6865 = vst [vmem:[#allocation58_spill] sm:$0xff] %v5427_v51 }
 0x145   :  { %1629 = vmatpush.msra.mxu0 %v5415_v47  ;;  %1649 = vmatpush.msra.mxu1 %v5418_v44  ;;  %6866 = vst [vmem:[#allocation59_spill] sm:$0xff] %v5430_v30 }
 0x146   :  { %1669 = vmatpush.msra.mxu2 %v5421_v48  ;;  %1689 = vmatpush.msra.mxu3 %v5424_v50  ;;  %6867 = vst [vmem:[#allocation60_spill] sm:$0xff] %v5433_v45 }
 0x147   :  { %1630 = vmatpush.msra.mxu0 %v5427_v51  ;;  %1650 = vmatpush.msra.mxu1 %v5430_v30  ;;  %6868 = vst [vmem:[#allocation61_spill] sm:$0xff] %v5436_v55 }
 0x148   :  { %1670 = vmatpush.msra.mxu2 %v5433_v45  ;;  %1690 = vmatpush.msra.mxu3 %v5436_v55  ;;  %6869 = vst [vmem:[#allocation62_spill] sm:$0xff] %v5439_v52  ;;  %v5451_v45 = vld [vmem:[#allocation13 + $0x20] sm:$0xff]  ;;  %v5454_v55 = vld [vmem:[#allocation13 + $0x28] sm:$0xff] }
 0x149   :  { %1631 = vmatpush.msra.mxu0 %v5439_v52  ;;  %6870 = vst [vmem:[#allocation63_spill] sm:$0xff] %v5442_v57  ;;  %1651 = vmatpush.msra.mxu1 %v5442_v57  ;;  %v5457_v52 = vld [vmem:[#allocation13 + $0x30] sm:$0xff]  ;;  %v5460_v57 = vld [vmem:[#allocation13 + $0x38] sm:$0xff] }
 0x14a   :  { %6871 = vst [vmem:[#allocation64_spill] sm:$0xff] %v5445_v59  ;;  %1671 = vmatpush.msra.mxu2 %v5445_v59  ;;  %1691 = vmatpush.msra.mxu3 %v5448_v60  ;;  %v5463_v59 = vld [vmem:[#allocation13] sm:$0xff] }
 0x14b   :  { %6872 = vst [vmem:[#allocation65_spill] sm:$0xff] %v5448_v60  ;;  %1632 = vmatpush.msra.mxu0 %v5451_v45  ;;  %1652 = vmatpush.msra.mxu1 %v5454_v55  ;;  %v5466_v60 = vld [vmem:[#allocation13 + $0x8] sm:$0xff] }
 0x14c   :  { %6873 = vst [vmem:[#allocation66_spill] sm:$0xff] %v5451_v45  ;;  %1672 = vmatpush.msra.mxu2 %v5457_v52  ;;  %1692 = vmatpush.msra.mxu3 %v5460_v57  ;;  %v5469_v45 = vld [vmem:[#allocation13 + $0x10] sm:$0xff] }
 0x14d   :  { %6874 = vst [vmem:[#allocation67_spill] sm:$0xff] %v5454_v55  ;;  %1633 = vmatpush.msra.mxu0 %v5463_v59  ;;  %1653 = vmatpush.msra.mxu1 %v5466_v60  ;;  %v5472_v55 = vld [vmem:[#allocation13 + $0x18] sm:$0xff] }
 0x14e   :  { %6875 = vst [vmem:[#allocation68_spill] sm:$0xff] %v5457_v52  ;;  %1673 = vmatpush.msra.mxu2 %v5469_v45  ;;  %1693 = vmatpush.msra.mxu3 %v5472_v55 }
 0x14f   :  { %6876 = vst [vmem:[#allocation69_spill] sm:$0xff] %v5460_v57 }
 0x150   :  { %6877 = vst [vmem:[#allocation70_spill] sm:$0xff] %v5463_v59 }
 0x151   :  { %6878 = vst [vmem:[#allocation71_spill] sm:$0xff] %v5466_v60 }
 0x152   :  { %6879 = vst [vmem:[#allocation72_spill] sm:$0xff] %v5469_v45 }
 0x153   :  { %6880 = vst [vmem:[#allocation73_spill] sm:$0xff] %v5472_v55 }
 0x1aa   :  { %v889_v52 = vpop.f32.mrf.mxu1  ;;  %v869_v51 = vpop.f32.mrf.mxu0 }
 0x1ab   :  { %v936_v30 = vrot.slane %v889_v52, 7 }
 0x1ad   :  { %v939_v57 = vsel %vm525_vm1, %v869_v51, %v936_v30  ;;  %v942_v50 = vsel %vm531_vm4, %v869_v51, %v936_v30  ;;  %v946_v44 = vsel %vm527_vm2, %v869_v51, %v936_v30  ;;  %v950_v60 = vsel %vm533_vm5, %v869_v51, %v936_v30 }
 0x1ae   :  { %v954_v45 = vsel %vm539_vm7, %v869_v51, %v936_v30  ;;  %v958_v40 = vsel %vm545_vm9, %v869_v51, %v936_v30  ;;  %v962_v55 = vsel %vm551_vm11, %v869_v51, %v936_v30  ;;  %v966_v52 = vsel %vm557_vm13, %v936_v30, %v869_v51 }
 0x1b1   :  { %v909_v59 = vpop.f32.mrf.mxu2  ;;  %v929_v48 = vpop.f32.mrf.mxu3 }
 0x1b2   :  { %v937_v47 = vrot.slane %v909_v59, 6  ;;  %v938_v46 = vrot.slane %v929_v48, 5 }
 0x1b4   :  { %v940_v42 = vsel %vm527_vm2, %v937_v47, %v938_v46  ;;  %v943_v39 = vsel %vm533_vm5, %v937_v47, %v938_v46  ;;  %v947_v41 = vsel %vm539_vm7, %v937_v47, %v938_v46  ;;  %v951_v38 = vsel %vm545_vm9, %v937_v47, %v938_v46 }
 0x1b5   :  { %v941_v37 = vsel %vm529_vm3, %v939_v57, %v940_v42  ;;  %v944_v48 = vsel %vm535_vm6, %v942_v50, %v943_v39  ;;  %v948_v59 = vsel %vm541_vm8, %v946_v44, %v947_v41  ;;  %v952_v36 = vsel %vm547_vm10, %v950_v60, %v951_v38  ;;  %v820_v41 = vld [vmem:[#allocation2 + $0x81] ss:$8 sm:$0xf] }
 0x1b6   :  { %v945_v34 = vrot.slane %v944_v48, 1  ;;  %v949_v33 = vrot.slane %v948_v59, 2  ;;  %v953_v51 = vrot.slane %v952_v36, 3  ;;  %v955_v30 = vsel %vm551_vm11, %v937_v47, %v938_v46  ;;  %v822_v57 = vld [vmem:[#allocation2 + $0xa1] ss:$8 sm:$0xf] }
 0x1b7   :  { %v956_v29 = vsel %vm553_vm12, %v954_v45, %v955_v30  ;;  %v959_v28 = vsel %vm557_vm13, %v938_v46, %v937_v47  ;;  %v963_v42 = vsel %vm525_vm1, %v937_v47, %v938_v46  ;;  %v967_v39 = vsel %vm531_vm4, %v937_v47, %v938_v46  ;;  %v824_v45 = vld [vmem:[#allocation2 + $0xc1] ss:$8 sm:$0xf] }
 0x1b8   :  { %v957_v44 = vrot.slane %v956_v29, 4  ;;  %v960_v38 = vsel %vm559_vm14, %v958_v40, %v959_v28  ;;  %v964_v50 = vsel %vm564_vm15, %v963_v42, %v962_v55  ;;  %v968_v36 = vsel %vm569_vm0, %v967_v39, %v966_v52  ;;  %v826_v30 = vld [vmem:[#allocation2 + $0xe1] ss:$8 sm:$0xf] }
 0x1b9   :  { %v961_v60 = vrot.slane %v960_v38, 5  ;;  %v965_v48 = vrot.slane %v964_v50, 6  ;;  %v969_v59 = vrot.slane %v968_v36, 7  ;;  %v5499_v27 = vadd.f32 %v941_v37, %v812_v35 }
 0x1ba   :  { %v5501_v9 = vadd.f32 %v945_v34, %v814_v32  ;;  %v5503_v26 = vadd.f32 %v949_v33, %v816_v56  ;;  %v5505_v46 = vadd.f32 %v953_v51, %v818_v31  ;;  %v5507_v29 = vadd.f32 %v957_v44, %v820_v41 }
 0x1bb   :  { %v5509_v28 = vadd.f32 %v961_v60, %v822_v57  ;;  %v5511_v40 = vadd.f32 %v965_v48, %v824_v45  ;;  %v5513_v47 = vadd.f32 %v969_v59, %v826_v30  ;;  %v986_v55 = vmul.f32 0.5, %v5499_v27 }
 0x1bc   :  { %v987_v35 = vmul.f32 0.5, %v5501_v9  ;;  %v988_v37 = vmul.f32 0.5, %v5503_v26  ;;  %v989_v32 = vmul.f32 0.5, %v5505_v46  ;;  %v990_v56 = vmul.f32 0.5, %v5507_v29 }
 0x1bd   :  { %3727 = vtanh.f32 %v986_v55  ;;  %v991_v31 = vmul.f32 0.5, %v5509_v28  ;;  %v1026_v33 = vrot.slane %v5499_v27, 1  ;;  %v1027_v34 = vrot.slane %v5501_v9, 1 }
 0x1be   :  { %3729 = vtanh.f32 %v987_v35  ;;  %v992_v52 = vmul.f32 0.5, %v5511_v40  ;;  %v993_v51 = vmul.f32 0.5, %v5513_v47  ;;  %v1028_v42 = vrot.slane %v5503_v26, 1 }
 0x1bf   :  { %3731 = vtanh.f32 %v988_v37  ;;  %v1029_v39 = vrot.slane %v5505_v46, 1  ;;  %v1030_v41 = vrot.slane %v5507_v29, 1  ;;  %v1031_v44 = vrot.slane %v5509_v28, 1 }
 0x1c0   :  { %3733 = vtanh.f32 %v989_v32  ;;  %v1032_v38 = vrot.slane %v5511_v40, 1  ;;  %v1033_v50 = vrot.slane %v5513_v47, 1  ;;  %v1042_v36 = vmul.f32 0.5, %v1026_v33 }
 0x1c1   :  { %3735 = vtanh.f32 %v990_v56  ;;  %v1043_v57 = vmul.f32 0.5, %v1027_v34  ;;  %v1044_v48 = vmul.f32 0.5, %v1028_v42  ;;  %v1045_v45 = vmul.f32 0.5, %v1029_v39 }
 0x1c2   :  { %3737 = vtanh.f32 %v991_v31  ;;  %v1046_v30 = vmul.f32 0.5, %v1030_v41  ;;  %v1047_v55 = vmul.f32 0.5, %v1031_v44  ;;  %v1048_v32 = vmul.f32 0.5, %v1032_v38 }
 0x1c3   :  { %v3728_v60 = vpop.eup %3727  ;;  %3739 = vtanh.f32 %v992_v52  ;;  %v1049_v25 = vmul.f32 0.5, %v1033_v50  ;;  %v1074_v33 = vrot.slane %v5499_v27, 2  ;;  %v1075_v31 = vrot.slane %v5501_v9, 2 }
 0x1c4   :  { %v3730_v59 = vpop.eup %3729  ;;  %3741 = vtanh.f32 %v993_v51  ;;  %v1002_v37 = vmul.f32 0.5, %v3728_v60  ;;  %v1076_v51 = vrot.slane %v5503_v26, 2  ;;  %v1077_v42 = vrot.slane %v5505_v46, 2 }
 0x1c5   :  { %v3732_v35 = vpop.eup %3731  ;;  %3743 = vtanh.f32 %v1042_v36  ;;  %v1003_v58 = vmul.f32 0.5, %v3730_v59  ;;  %v1078_v44 = vrot.slane %v5507_v29, 2  ;;  %v1079_v38 = vrot.slane %v5509_v28, 2 }
 0x1c6   :  { %v3734_v56 = vpop.eup %3733  ;;  %3745 = vtanh.f32 %v1043_v57  ;;  %v1004_v52 = vmul.f32 0.5, %v3732_v35  ;;  %v5537_v60 = vadd.f32 0.5, %v1002_v37  ;;  %v1080_v23 = vrot.slane %v5511_v40, 2 }
 0x1c7   :  { %v3736_v34 = vpop.eup %3735  ;;  %3747 = vtanh.f32 %v1044_v48  ;;  %v1005_v41 = vmul.f32 0.5, %v3734_v56  ;;  %v5539_v48 = vadd.f32 0.5, %v1003_v58  ;;  %v1081_v21 = vrot.slane %v5513_v47, 2 }
 0x1c8   :  { %v3738_v39 = vpop.eup %3737  ;;  %3749 = vtanh.f32 %v1045_v45  ;;  %v1006_v36 = vmul.f32 0.5, %v3736_v34  ;;  %v5542_v45 = vadd.f32 0.5, %v1004_v52  ;;  %v1100_v52 = vrot.slane %v5503_v26, 3 }
 0x1c9   :  { %v3740_v50 = vpop.eup %3739  ;;  %v1007_v57 = vmul.f32 0.5, %v3738_v39  ;;  %3751 = vtanh.f32 %v1046_v30  ;;  %v5545_v34 = vadd.f32 0.5, %v1005_v41  ;;  %v1098_v30 = vrot.slane %v5499_v27, 3 }
 0x1ca   :  { %v3742_v59 = vpop.eup %3741  ;;  %v1008_v35 = vmul.f32 0.5, %v3740_v50  ;;  %3753 = vtanh.f32 %v1047_v55  ;;  %v5548_v58 = vadd.f32 0.5, %v1006_v36  ;;  %v1099_v50 = vrot.slane %v5501_v9, 3 }
 0x1cb   :  { %v3744_v22 = vpop.eup %3743  ;;  %v1009_v56 = vmul.f32 0.5, %v3742_v59  ;;  %3755 = vtanh.f32 %v1048_v32  ;;  %v5550_v55 = vadd.f32 0.5, %v1007_v57  ;;  %v1101_v41 = vrot.slane %v5505_v46, 3 }
 0x1cc   :  { %v3746_v3 = vpop.eup %3745  ;;  %3757 = vtanh.f32 %v1049_v25  ;;  %v1058_v37 = vmul.f32 0.5, %v3744_v22  ;;  %v5554_v32 = vadd.f32 0.5, %v1008_v35  ;;  %v1102_v27 = vrot.slane %v5507_v29, 3 }
 0x1cd   :  { %v3748_v39 = vpop.eup %3747  ;;  %v1059_v12 = vmul.f32 0.5, %v3746_v3  ;;  %3759 = vtanh.f32 %v1074_v33  ;;  %v5557_v22 = vadd.f32 0.5, %v1009_v56  ;;  %v1103_v36 = vrot.slane %v5509_v28, 3 }
 0x1ce   :  { %v3750_v59 = vpop.eup %3749  ;;  %3761 = vtanh.f32 %v1075_v31  ;;  %v1060_v13 = vmul.f32 0.5, %v3748_v39  ;;  %v1066_v11 = vadd.f32 0.5, %v1058_v37  ;;  %v1104_v3 = vrot.slane %v5511_v40, 3 }
 0x1cf   :  { %v3752_v25 = vpop.eup %3751  ;;  %v1061_v9 = vmul.f32 0.5, %v3750_v59  ;;  %3763 = vtanh.f32 %v1076_v51  ;;  %v1067_v56 = vadd.f32 0.5, %v1059_v12  ;;  %v1114_v31 = vmul.f32 0.5, %v1098_v30 }
 0x1d0   :  { %v3754_v57 = vpop.eup %3753  ;;  %v1062_v35 = vmul.f32 0.5, %v3752_v25  ;;  %3765 = vtanh.f32 %v1077_v42  ;;  %v1105_v29 = vrot.slane %v5513_v47, 3  ;;  %v1115_v28 = vmul.f32 0.5, %v1099_v50 }
 0x1d1   :  { %v3756_v26 = vpop.eup %3755  ;;  %v1063_v20 = vmul.f32 0.5, %v3754_v57  ;;  %3767 = vtanh.f32 %v1078_v44  ;;  %v1068_v59 = vadd.f32 0.5, %v1060_v13  ;;  %v1069_v37 = vadd.f32 0.5, %v1061_v9 }
 0x1d2   :  { %v3758_v46 = vpop.eup %3757  ;;  %v1064_v33 = vmul.f32 0.5, %v3756_v26  ;;  %3769 = vtanh.f32 %v1079_v38  ;;  %v1116_v51 = vmul.f32 0.5, %v1100_v52  ;;  %v1070_v57 = vadd.f32 0.5, %v1062_v35 }
 0x1d3   :  { %v1065_v8 = vmul.f32 0.5, %v3758_v46  ;;  %v3760_v39 = vpop.eup %3759  ;;  %3771 = vtanh.f32 %v1080_v23  ;;  %v1071_v42 = vadd.f32 0.5, %v1063_v20  ;;  %v1117_v40 = vmul.f32 0.5, %v1101_v41 }
 0x1d4   :  { %v3762_v25 = vpop.eup %3761  ;;  %3773 = vtanh.f32 %v1081_v21  ;;  %v1072_v26 = vadd.f32 0.5, %v1064_v33  ;;  %v1118_v12 = vmul.f32 0.5, %v1102_v27  ;;  %v1119_v44 = vmul.f32 0.5, %v1103_v36 }
 0x1d5   :  { %v3764_v6 = vpop.eup %3763  ;;  %3775 = vtanh.f32 %v1114_v31  ;;  %v1073_v38 = vadd.f32 0.5, %v1065_v8  ;;  %v1146_v47 = vmul.f32 %v1066_v11, %v5255_v54  ;;  %v1147_v13 = vmul.f32 %v1067_v56, %v5257_v14 }
 0x1d6   :  { %v3766_v30 = vpop.eup %3765  ;;  %3777 = vtanh.f32 %v1115_v28  ;;  %v1120_v23 = vmul.f32 0.5, %v1104_v3  ;;  %v1121_v52 = vmul.f32 0.5, %v1105_v29  ;;  %v1148_v20 = vmul.f32 %v1068_v59, %v5260_v1 }
 0x1d7   :  { %v3768_v50 = vpop.eup %3767  ;;  %3779 = vtanh.f32 %v1116_v51  ;;  %v1149_v41 = vmul.f32 %v1069_v37, %v5263_v61  ;;  %v1154_v27 = vmul.f32 %v3760_v39, %v5537_v60  ;;  %v1155_v36 = vmul.f32 %v3762_v25, %v5539_v48 }
 0x1d8   :  { %v3770_v21 = vpop.eup %3769  ;;  %3781 = vtanh.f32 %v1117_v40  ;;  %v1150_v54 = vmul.f32 %v1070_v57, %v5266_v10  ;;  %v1151_v14 = vmul.f32 %v1071_v42, %v5270_v17  ;;  %v1156_v11 = vmul.f32 %v3764_v6, %v5542_v45 }
 0x1d9   :  { %v3772_v8 = vpop.eup %3771  ;;  %3783 = vtanh.f32 %v1118_v12  ;;  %v1157_v1 = vmul.f32 %v3766_v30, %v5545_v34  ;;  %v5573_v35 = vadd.f32 %v1154_v27, %v1146_v47  ;;  %v5575_v3 = vadd.f32 %v1155_v36, %v1147_v13 }
 0x1da   :  { %v3774_v9 = vpop.eup %3773  ;;  %3785 = vtanh.f32 %v1119_v44  ;;  %v1152_v60 = vmul.f32 %v1072_v26, %v5273_v16  ;;  %v1158_v48 = vmul.f32 %v3768_v50, %v5548_v58  ;;  %v5579_v46 = vadd.f32 %v1156_v11, %v1148_v20 }
 0x1db   :  { %v3776_v61 = vpop.eup %3775  ;;  %3787 = vtanh.f32 %v1120_v23  ;;  %v1153_v17 = vmul.f32 %v1073_v38, %v5276_v24  ;;  %v1159_v6 = vmul.f32 %v3770_v21, %v5550_v55  ;;  %v5583_v45 = vadd.f32 %v1157_v1, %v1149_v41 }
 0x1dc   :  { %v3778_v10 = vpop.eup %3777  ;;  %3789 = vtanh.f32 %v1121_v52  ;;  %v1160_v33 = vmul.f32 %v3772_v8, %v5554_v32  ;;  %v5586_v56 = vadd.f32 %v1158_v48, %v1150_v54  ;;  %v1130_v31 = vmul.f32 0.5, %v3776_v61 }
 0x1dd   :  { %v3780_v34 = vpop.eup %3779  ;;  %3791 = vtanh.f32 %v5573_v35  ;;  %v1161_v58 = vmul.f32 %v3774_v9, %v5557_v22  ;;  %v5590_v29 = vadd.f32 %v1159_v6, %v1151_v14  ;;  %v1131_v28 = vmul.f32 0.5, %v3778_v10  ;;  %v6895_v6 = vld [vmem:[#allocation37_spill] sm:$0xff] }
 0x1de   :  { %v3782_v16 = vpop.eup %3781  ;;  %3793 = vtanh.f32 %v5575_v3  ;;  %v5593_v55 = vadd.f32 %v1160_v33, %v1152_v60  ;;  %v1132_v32 = vmul.f32 0.5, %v3780_v34  ;;  %v1138_v57 = vadd.f32 0.5, %v1130_v31  ;;  %v6896_v34 = vld [vmem:[#allocation38_spill] sm:$0xff]  ;;  %v6897_v33 = vld [vmem:[#allocation39_spill] sm:$0xff]  ;;  %v6899_v31 = vld [vmem:[#allocation41_spill] sm:$0xff] }
 0x1df   :  { %v3784_v24 = vpop.eup %3783  ;;  %3795 = vtanh.f32 %v5579_v46  ;;  %v5596_v59 = vadd.f32 %v1161_v58, %v1153_v17  ;;  %v1133_v51 = vmul.f32 0.5, %v3782_v16  ;;  %v1139_v26 = vadd.f32 0.5, %v1131_v28  ;;  %v6894_v17 = vld [vmem:[#allocation36_spill] sm:$0xff]  ;;  %v6900_v58 = vld [vmem:[#allocation42_spill] sm:$0xff] }
 0x1e0   :  { %v3786_v39 = vpop.eup %3785  ;;  %3797 = vtanh.f32 %v5583_v45  ;;  %v1134_v25 = vmul.f32 0.5, %v3784_v24  ;;  %v1140_v30 = vadd.f32 0.5, %v1132_v32  ;;  %v6898_v16 = vld [vmem:[#allocation40_spill] sm:$0xff]  ;;  %v6901_v24 = vld [vmem:[#allocation43_spill] sm:$0xff]  ;;  %v6904_v32 = vld [vmem:[#allocation46_spill] sm:$0xff] }
 0x1e1   :  { %v3788_v37 = vpop.eup %3787  ;;  %3799 = vtanh.f32 %v5586_v56  ;;  %v1135_v40 = vmul.f32 0.5, %v3786_v39  ;;  %v1141_v50 = vadd.f32 0.5, %v1133_v51  ;;  %v6902_v28 = vld [vmem:[#allocation44_spill] sm:$0xff]  ;;  %v6903_v39 = vld [vmem:[#allocation45_spill] sm:$0xff] }
 0x1e2   :  { %v3790_v22 = vpop.eup %3789  ;;  %3801 = vtanh.f32 %v5590_v29  ;;  %v1136_v44 = vmul.f32 0.5, %v3788_v37  ;;  %v1142_v20 = vadd.f32 0.5, %v1134_v25  ;;  %v6905_v37 = vld [vmem:[#allocation47_spill] sm:$0xff]  ;;  %v6906_v51 = vld [vmem:[#allocation48_spill] sm:$0xff]  ;;  %v6908_v25 = vld [vmem:[#allocation50_spill] sm:$0xff] }
 0x1e3   :  { %v3792_v42 = vpop.eup %3791  ;;  %3803 = vtanh.f32 %v5593_v55  ;;  %v1137_v13 = vmul.f32 0.5, %v3790_v22  ;;  %v1143_v27 = vadd.f32 0.5, %v1135_v40  ;;  %v6907_v22 = vld [vmem:[#allocation49_spill] sm:$0xff] }
 0x1e4   :  { %v3794_v12 = vpop.eup %3793  ;;  %3805 = vtanh.f32 %v5596_v59  ;;  %v1178_v38 = vmul.f32 %v3792_v42, %v1138_v57  ;;  %v1144_v54 = vadd.f32 0.5, %v1136_v44  ;;  %v6909_v57 = vld [vmem:[#allocation51_spill] sm:$0xff]  ;;  %v6910_v42 = vld [vmem:[#allocation52_spill] sm:$0xff]  ;;  %v6911_v40 = vld [vmem:[#allocation53_spill] sm:$0xff] }
 0x1e5   :  { %v3796_v47 = vpop.eup %3795  ;;  %v1179_v23 = vmul.f32 %v3794_v12, %v1139_v26  ;;  %v1145_v9 = vadd.f32 0.5, %v1137_v13  ;;  %v6912_v26 = vld [vmem:[#allocation54_spill] sm:$0xff]  ;;  %v6913_v12 = vld [vmem:[#allocation55_spill] sm:$0xff]  ;;  %v6914_v44 = vld [vmem:[#allocation56_spill] sm:$0xff] }
 0x1e6   :  { %v3798_v52 = vpop.eup %3797  ;;  %v1180_v21 = vmul.f32 %v3796_v47, %v1140_v30  ;;  %1186 = vst [vmem:[#allocation14 + $0x1] sm:$0x1] %v1178_v38  ;;  %v6915_v30 = vld [vmem:[#allocation57_spill] sm:$0xff]  ;;  %v6917_v47 = vld [vmem:[#allocation59_spill] sm:$0xff]  ;;  %v6918_v13 = vld [vmem:[#allocation60_spill] sm:$0xff] }
 0x1e7   :  { %v3800_v41 = vpop.eup %3799  ;;  %v1181_v36 = vmul.f32 %v3798_v52, %v1141_v50  ;;  %1187 = vst [vmem:[#allocation14 + $0x9] sm:$0x1] %v1179_v23  ;;  %v6919_v50 = vld [vmem:[#allocation61_spill] sm:$0xff]  ;;  %v6921_v52 = vld [vmem:[#allocation63_spill] sm:$0xff] }
 0x1e8   :  { %v3802_v8 = vpop.eup %3801  ;;  %v1182_v14 = vmul.f32 %v3800_v41, %v1142_v20  ;;  %1188 = vst [vmem:[#allocation14 + $0x11] sm:$0x1] %v1180_v21  ;;  %v6922_v20 = vld [vmem:[#allocation64_spill] sm:$0xff]  ;;  %v6924_v41 = vld [vmem:[#allocation66_spill] sm:$0xff] }
 0x1e9   :  { %v3804_v11 = vpop.eup %3803  ;;  %v1183_v1 = vmul.f32 %v3802_v8, %v1143_v27  ;;  %1189 = vst [vmem:[#allocation14 + $0x19] sm:$0x1] %v1181_v36  ;;  %v6925_v27 = vld [vmem:[#allocation67_spill] sm:$0xff]  ;;  %v6927_v8 = vld [vmem:[#allocation69_spill] sm:$0xff] }
 0x1ea   :  { %v3806_v61 = vpop.eup %3805  ;;  %v1184_v60 = vmul.f32 %v3804_v11, %v1144_v54  ;;  %1190 = vst [vmem:[#allocation14 + $0x21] sm:$0x1] %v1182_v14  ;;  %v6928_v54 = vld [vmem:[#allocation70_spill] sm:$0xff]  ;;  %v6930_v11 = vld [vmem:[#allocation72_spill] sm:$0xff] }
 0x1eb   :  { %v1185_v48 = vmul.f32 %v3806_v61, %v1145_v9  ;;  %1191 = vst [vmem:[#allocation14 + $0x29] sm:$0x1] %v1183_v1  ;;  %v6931_v9 = vld [vmem:[#allocation73_spill] sm:$0xff] }
 0x1ec   :  { %1192 = vst [vmem:[#allocation14 + $0x31] sm:$0x1] %v1184_v60 }
 0x1ed   :  { %1193 = vst [vmem:[#allocation14 + $0x39] sm:$0x1] %v1185_v48 }
 0x1ee   :  { %1218 = vst [vmem:[#allocation1] ss:$9 sm:$0xff] %v1178_v38  ;;  %v6916_v38 = vld [vmem:[#allocation58_spill] sm:$0xff] }
 0x1ef   :  { %1220 = vst [vmem:[#allocation1 + $0x1] ss:$9 sm:$0xff] %v1179_v23  ;;  %v6920_v23 = vld [vmem:[#allocation62_spill] sm:$0xff] }
 0x1f0   :  { %1222 = vst [vmem:[#allocation1 + $0x2] ss:$9 sm:$0xff] %v1180_v21  ;;  %v6923_v21 = vld [vmem:[#allocation65_spill] sm:$0xff] }
 0x1f1   :  { %1224 = vst [vmem:[#allocation1 + $0x3] ss:$9 sm:$0xff] %v1181_v36  ;;  %v6926_v36 = vld [vmem:[#allocation68_spill] sm:$0xff] }
 0x1f2   :  { %1226 = vst [vmem:[#allocation1 + $0x4] ss:$9 sm:$0xff] %v1182_v14  ;;  %v6929_v14 = vld [vmem:[#allocation71_spill] sm:$0xff] }
 0x1f3   :  { %1228 = vst [vmem:[#allocation1 + $0x5] ss:$9 sm:$0xff] %v1183_v1 }
 0x1f4   :  { %1230 = vst [vmem:[#allocation1 + $0x6] ss:$9 sm:$0xff] %v1184_v60 }
 0x1f5   :  { %1232 = vst [vmem:[#allocation1 + $0x7] ss:$9 sm:$0xff] %v1185_v48 }
 0x1fc   :  { %v1233_v10 = vld [vmem:[#allocation1] sm:$0xff] }
 0x1fd   :  { %1251 = vmatmul.f32.vlgmr.msrb.gmra.mxu0 %v1233_v10  ;;  %1271 = vmatmul.f32.vlgmr.msrb.gmra.mxu1 %v1233_v10 }
 0x1fe   :  { %1291 = vmatmul.f32.vlgmr.msrb.gmra.mxu2 %v1233_v10  ;;  %1311 = vmatmul.f32.vlgmr.msrb.gmra.mxu3 %v1233_v10 }
 0x1ff   :  { %2001 = vmatpush.msrb.mxu0 %v5283_v62  ;;  %2021 = vmatpush.msrb.mxu1 %v5286_v63  ;;  %v6881_v62 = vld [vmem:[#allocation23_spill] sm:$0xff]  ;;  %v6882_v63 = vld [vmem:[#allocation24_spill] sm:$0xff] }
 0x200   :  { %2041 = vmatpush.msrb.mxu2 %v5289_v0  ;;  %2061 = vmatpush.msrb.mxu3 %v5292_v2  ;;  %v6883_v0 = vld [vmem:[#allocation25_spill] sm:$0xff]  ;;  %v6884_v2 = vld [vmem:[#allocation26_spill] sm:$0xff] }
 0x201   :  { %2002 = vmatpush.msrb.mxu0 %v5295_v4  ;;  %2022 = vmatpush.msrb.mxu1 %v5298_v43  ;;  %v6885_v4 = vld [vmem:[#allocation27_spill] sm:$0xff]  ;;  %v6886_v43 = vld [vmem:[#allocation28_spill] sm:$0xff] }
 0x202   :  { %2042 = vmatpush.msrb.mxu2 %v5301_v53  ;;  %2062 = vmatpush.msrb.mxu3 %v5304_v7  ;;  %v6887_v53 = vld [vmem:[#allocation29_spill] sm:$0xff]  ;;  %v6888_v7 = vld [vmem:[#allocation30_spill] sm:$0xff] }
 0x203   :  { %2003 = vmatpush.msrb.mxu0 %v5307_v5  ;;  %2023 = vmatpush.msrb.mxu1 %v5310_v15  ;;  %v6889_v5 = vld [vmem:[#allocation31_spill] sm:$0xff]  ;;  %v6890_v15 = vld [vmem:[#allocation32_spill] sm:$0xff] }
 0x204   :  { %2043 = vmatpush.msrb.mxu2 %v5313_v18  ;;  %2063 = vmatpush.msrb.mxu3 %v5316_v49  ;;  %v6891_v18 = vld [vmem:[#allocation33_spill] sm:$0xff]  ;;  %v6892_v49 = vld [vmem:[#allocation34_spill] sm:$0xff] }
 0x205   :  { %2004 = vmatpush.msrb.mxu0 %v5319_v19  ;;  %2024 = vmatpush.msrb.mxu1 %v6881_v62  ;;  %v6893_v19 = vld [vmem:[#allocation35_spill] sm:$0xff] }
 0x206   :  { %2044 = vmatpush.msrb.mxu2 %v6882_v63  ;;  %2064 = vmatpush.msrb.mxu3 %v6883_v0 }
 0x207   :  { %2005 = vmatpush.msrb.mxu0 %v6884_v2  ;;  %2025 = vmatpush.msrb.mxu1 %v6885_v4 }
 0x208   :  { %2045 = vmatpush.msrb.mxu2 %v6886_v43  ;;  %2065 = vmatpush.msrb.mxu3 %v6887_v53 }
 0x209   :  { %2006 = vmatpush.msrb.mxu0 %v6888_v7  ;;  %2026 = vmatpush.msrb.mxu1 %v6889_v5 }
 0x20a   :  { %2046 = vmatpush.msrb.mxu2 %v6890_v15  ;;  %2066 = vmatpush.msrb.mxu3 %v6891_v18 }
 0x20b   :  { %2007 = vmatpush.msrb.mxu0 %v6892_v49  ;;  %2027 = vmatpush.msrb.mxu1 %v6893_v19 }
 0x20c   :  { %2047 = vmatpush.msrb.mxu2 %v6894_v17  ;;  %2067 = vmatpush.msrb.mxu3 %v6895_v6 }
 0x20d   :  { %2008 = vmatpush.msrb.mxu0 %v6896_v34  ;;  %2028 = vmatpush.msrb.mxu1 %v6897_v33 }
 0x20e   :  { %2048 = vmatpush.msrb.mxu2 %v6898_v16  ;;  %2068 = vmatpush.msrb.mxu3 %v6899_v31  ;;  %v1195_v31 = vld [vmem:[#allocation2 + $0x2] ss:$8 sm:$0xf] }
 0x20f   :  { %2009 = vmatpush.msrb.mxu0 %v6900_v58  ;;  %2029 = vmatpush.msrb.mxu1 %v6901_v24 }
 0x210   :  { %2049 = vmatpush.msrb.mxu2 %v6902_v28  ;;  %2069 = vmatpush.msrb.mxu3 %v6903_v39 }
 0x211   :  { %2010 = vmatpush.msrb.mxu0 %v6904_v32  ;;  %2030 = vmatpush.msrb.mxu1 %v6905_v37  ;;  %v1197_v32 = vld [vmem:[#allocation2 + $0x22] ss:$8 sm:$0xf] }
 0x212   :  { %2050 = vmatpush.msrb.mxu2 %v6906_v51  ;;  %2070 = vmatpush.msrb.mxu3 %v6907_v22  ;;  %v1199_v37 = vld [vmem:[#allocation2 + $0x42] ss:$8 sm:$0xf] }
 0x213   :  { %2011 = vmatpush.msrb.mxu0 %v6908_v25  ;;  %2031 = vmatpush.msrb.mxu1 %v6909_v57  ;;  %v1201_v51 = vld [vmem:[#allocation2 + $0x62] ss:$8 sm:$0xf] }
 0x214   :  { %2051 = vmatpush.msrb.mxu2 %v6910_v42  ;;  %2071 = vmatpush.msrb.mxu3 %v6911_v40  ;;  %v1203_v40 = vld [vmem:[#allocation2 + $0x82] ss:$8 sm:$0xf] }
 0x215   :  { %2012 = vmatpush.msrb.mxu0 %v6912_v26  ;;  %2032 = vmatpush.msrb.mxu1 %v6913_v12 }
 0x216   :  { %2052 = vmatpush.msrb.mxu2 %v6914_v44  ;;  %2072 = vmatpush.msrb.mxu3 %v6915_v30 }
 0x217   :  { %2013 = vmatpush.msrb.mxu0 %v6916_v38  ;;  %2033 = vmatpush.msrb.mxu1 %v6917_v47  ;;  %v1205_v38 = vld [vmem:[#allocation2 + $0xa2] ss:$8 sm:$0xf] }
 0x218   :  { %2053 = vmatpush.msrb.mxu2 %v6918_v13  ;;  %2073 = vmatpush.msrb.mxu3 %v6919_v50 }
 0x219   :  { %2014 = vmatpush.msrb.mxu0 %v6920_v23  ;;  %2034 = vmatpush.msrb.mxu1 %v6921_v52  ;;  %v1207_v52 = vld [vmem:[#allocation2 + $0xc2] ss:$8 sm:$0xf] }
 0x21a   :  { %2054 = vmatpush.msrb.mxu2 %v6922_v20  ;;  %2074 = vmatpush.msrb.mxu3 %v6923_v21  ;;  %v1209_v20 = vld [vmem:[#allocation2 + $0xe2] ss:$8 sm:$0xf] }
 0x21b   :  { %2015 = vmatpush.msrb.mxu0 %v6924_v41  ;;  %2035 = vmatpush.msrb.mxu1 %v6925_v27 }
 0x21c   :  { %2055 = vmatpush.msrb.mxu2 %v6926_v36  ;;  %2075 = vmatpush.msrb.mxu3 %v6927_v8 }
 0x21d   :  { %2016 = vmatpush.msrb.mxu0 %v6928_v54  ;;  %2036 = vmatpush.msrb.mxu1 %v6929_v14 }
 0x21e   :  { %2056 = vmatpush.msrb.mxu2 %v6930_v11  ;;  %2076 = vmatpush.msrb.mxu3 %v6931_v9 }
 0x27a   :  { %v1272_v1 = vpop.f32.mrf.mxu1  ;;  %v1252_v60 = vpop.f32.mrf.mxu0 }
 0x27b   :  { %v1319_v61 = vrot.slane %v1272_v1, 7 }
 0x27d   :  { %v1322_v48 = vsel %vm525_vm1, %v1252_v60, %v1319_v61  ;;  %v1325_v10 = vsel %vm531_vm4, %v1252_v60, %v1319_v61  ;;  %v1329_v0 = vsel %vm527_vm2, %v1252_v60, %v1319_v61  ;;  %v1333_v2 = vsel %vm533_vm5, %v1252_v60, %v1319_v61 }
 0x27e   :  { %v1337_v53 = vsel %vm539_vm7, %v1252_v60, %v1319_v61  ;;  %v1341_v7 = vsel %vm545_vm9, %v1252_v60, %v1319_v61  ;;  %v1345_v5 = vsel %vm551_vm11, %v1252_v60, %v1319_v61  ;;  %v1349_v15 = vsel %vm557_vm13, %v1319_v61, %v1252_v60 }
 0x281   :  { %v1292_v62 = vpop.f32.mrf.mxu2  ;;  %v1312_v63 = vpop.f32.mrf.mxu3 }
 0x282   :  { %v1320_v4 = vrot.slane %v1292_v62, 6  ;;  %v1321_v43 = vrot.slane %v1312_v63, 5 }
 0x284   :  { %v1323_v18 = vsel %vm527_vm2, %v1320_v4, %v1321_v43  ;;  %v1326_v49 = vsel %vm533_vm5, %v1320_v4, %v1321_v43  ;;  %v1330_v19 = vsel %vm539_vm7, %v1320_v4, %v1321_v43  ;;  %v1334_v17 = vsel %vm545_vm9, %v1320_v4, %v1321_v43 }
 0x285   :  { %v1324_v6 = vsel %vm529_vm3, %v1322_v48, %v1323_v18  ;;  %v1327_v34 = vsel %vm535_vm6, %v1325_v10, %v1326_v49  ;;  %v1331_v33 = vsel %vm541_vm8, %v1329_v0, %v1330_v19  ;;  %v1335_v16 = vsel %vm547_vm10, %v1333_v2, %v1334_v17 }
 0x286   :  { %v1328_v58 = vrot.slane %v1327_v34, 1  ;;  %v1332_v24 = vrot.slane %v1331_v33, 2  ;;  %v1336_v28 = vrot.slane %v1335_v16, 3  ;;  %v1338_v39 = vsel %vm551_vm11, %v1320_v4, %v1321_v43 }
 0x287   :  { %v1339_v22 = vsel %vm553_vm12, %v1337_v53, %v1338_v39  ;;  %v1342_v25 = vsel %vm557_vm13, %v1321_v43, %v1320_v4  ;;  %v1346_v57 = vsel %vm525_vm1, %v1320_v4, %v1321_v43  ;;  %v1350_v42 = vsel %vm531_vm4, %v1320_v4, %v1321_v43 }
 0x288   :  { %v1340_v26 = vrot.slane %v1339_v22, 4  ;;  %v1343_v12 = vsel %vm559_vm14, %v1341_v7, %v1342_v25  ;;  %v1347_v44 = vsel %vm564_vm15, %v1346_v57, %v1345_v5  ;;  %v1351_v30 = vsel %vm569_vm0, %v1350_v42, %v1349_v15 }
 0x289   :  { %v1344_v47 = vrot.slane %v1343_v12, 5  ;;  %v1348_v13 = vrot.slane %v1347_v44, 6  ;;  %v1352_v50 = vrot.slane %v1351_v30, 7  ;;  %v5691_v23 = vadd.f32 %v1324_v6, %v1195_v31 }
 0x28a   :  { %v5693_v21 = vadd.f32 %v1328_v58, %v1197_v32  ;;  %v5695_v41 = vadd.f32 %v1332_v24, %v1199_v37  ;;  %v5697_v27 = vadd.f32 %v1336_v28, %v1201_v51  ;;  %v5699_v36 = vadd.f32 %v1340_v26, %v1203_v40 }
 0x28b   :  { %v5701_v8 = vadd.f32 %v1344_v47, %v1205_v38  ;;  %v5703_v54 = vadd.f32 %v1348_v13, %v1207_v52  ;;  %v5705_v14 = vadd.f32 %v1352_v50, %v1209_v20  ;;  %v1369_v11 = vmul.f32 0.5, %v5691_v23 }
 0x28c   :  { %v1370_v9 = vmul.f32 0.5, %v5693_v21  ;;  %v1371_v1 = vmul.f32 0.5, %v5695_v41  ;;  %v1372_v61 = vmul.f32 0.5, %v5697_v27  ;;  %v1373_v60 = vmul.f32 0.5, %v5699_v36 }
 0x28d   :  { %3807 = vtanh.f32 %v1369_v11  ;;  %v1374_v48 = vmul.f32 0.5, %v5701_v8  ;;  %v1409_v10 = vrot.slane %v5691_v23, 1  ;;  %v1410_v62 = vrot.slane %v5693_v21, 1 }
 0x28e   :  { %3809 = vtanh.f32 %v1370_v9  ;;  %v1375_v63 = vmul.f32 0.5, %v5703_v54  ;;  %v1376_v0 = vmul.f32 0.5, %v5705_v14  ;;  %v1411_v2 = vrot.slane %v5695_v41, 1 }
 0x28f   :  { %3811 = vtanh.f32 %v1371_v1  ;;  %v1412_v4 = vrot.slane %v5697_v27, 1  ;;  %v1413_v43 = vrot.slane %v5699_v36, 1  ;;  %v1414_v53 = vrot.slane %v5701_v8, 1 }
 0x290   :  { %3813 = vtanh.f32 %v1372_v61  ;;  %v1415_v7 = vrot.slane %v5703_v54, 1  ;;  %v1416_v5 = vrot.slane %v5705_v14, 1  ;;  %v1425_v15 = vmul.f32 0.5, %v1409_v10 }
 0x291   :  { %3815 = vtanh.f32 %v1373_v60  ;;  %v1426_v18 = vmul.f32 0.5, %v1410_v62  ;;  %v1427_v19 = vmul.f32 0.5, %v1411_v2  ;;  %v1428_v6 = vmul.f32 0.5, %v1412_v4 }
 0x292   :  { %3817 = vtanh.f32 %v1374_v48  ;;  %v1429_v34 = vmul.f32 0.5, %v1413_v43  ;;  %v1430_v33 = vmul.f32 0.5, %v1414_v53  ;;  %v1431_v58 = vmul.f32 0.5, %v1415_v7 }
 0x293   :  { %v3808_v49 = vpop.eup %3807  ;;  %3819 = vtanh.f32 %v1375_v63  ;;  %v1432_v24 = vmul.f32 0.5, %v1416_v5  ;;  %v1457_v32 = vrot.slane %v5691_v23, 2  ;;  %v1458_v37 = vrot.slane %v5693_v21, 2 }
 0x294   :  { %v3810_v17 = vpop.eup %3809  ;;  %3821 = vtanh.f32 %v1376_v0  ;;  %v1385_v31 = vmul.f32 0.5, %v3808_v49  ;;  %v1459_v25 = vrot.slane %v5695_v41, 2  ;;  %v1460_v57 = vrot.slane %v5697_v27, 2 }
 0x295   :  { %v3812_v16 = vpop.eup %3811  ;;  %3823 = vtanh.f32 %v1425_v15  ;;  %v1386_v39 = vmul.f32 0.5, %v3810_v17  ;;  %v1461_v26 = vrot.slane %v5699_v36, 2  ;;  %v1462_v12 = vrot.slane %v5701_v8, 2 }
 0x296   :  { %v3814_v28 = vpop.eup %3813  ;;  %3825 = vtanh.f32 %v1426_v18  ;;  %v1387_v22 = vmul.f32 0.5, %v3812_v16  ;;  %v5729_v47 = vadd.f32 0.5, %v1385_v31  ;;  %v1463_v20 = vrot.slane %v5703_v54, 2 }
 0x297   :  { %v3816_v51 = vpop.eup %3815  ;;  %3827 = vtanh.f32 %v1427_v19  ;;  %v1388_v40 = vmul.f32 0.5, %v3814_v28  ;;  %v5731_v52 = vadd.f32 0.5, %v1386_v39  ;;  %v1464_v61 = vrot.slane %v5705_v14, 2 }
 0x298   :  { %v3818_v42 = vpop.eup %3817  ;;  %3829 = vtanh.f32 %v1428_v6  ;;  %v1389_v30 = vmul.f32 0.5, %v3816_v51  ;;  %v5734_v1 = vadd.f32 0.5, %v1387_v22  ;;  %v1481_v62 = vrot.slane %v5691_v23, 3 }
 0x299   :  { %v3820_v44 = vpop.eup %3819  ;;  %v1390_v38 = vmul.f32 0.5, %v3818_v42  ;;  %3831 = vtanh.f32 %v1429_v34  ;;  %v5737_v48 = vadd.f32 0.5, %v1388_v40  ;;  %v1482_v4 = vrot.slane %v5693_v21, 3 }
 0x29a   :  { %v3822_v13 = vpop.eup %3821  ;;  %v1391_v50 = vmul.f32 0.5, %v3820_v44  ;;  %3833 = vtanh.f32 %v1430_v33  ;;  %v5740_v0 = vadd.f32 0.5, %v1389_v30  ;;  %v1483_v43 = vrot.slane %v5695_v41, 3 }
 0x29b   :  { %v3824_v11 = vpop.eup %3823  ;;  %v1392_v9 = vmul.f32 0.5, %v3822_v13  ;;  %3835 = vtanh.f32 %v1431_v58  ;;  %v5742_v2 = vadd.f32 0.5, %v1390_v38  ;;  %v1484_v15 = vrot.slane %v5697_v27, 3 }
 0x29c   :  { %v3826_v60 = vpop.eup %3825  ;;  %3837 = vtanh.f32 %v1432_v24  ;;  %v1441_v10 = vmul.f32 0.5, %v3824_v11  ;;  %v5746_v7 = vadd.f32 0.5, %v1391_v50  ;;  %v1485_v23 = vrot.slane %v5699_v36, 3 }
 0x29d   :  { %v3828_v63 = vpop.eup %3827  ;;  %v1442_v5 = vmul.f32 0.5, %v3826_v60  ;;  %3839 = vtanh.f32 %v1457_v32  ;;  %v5749_v49 = vadd.f32 0.5, %v1392_v9  ;;  %v1486_v19 = vrot.slane %v5701_v8, 3 }
 0x29e   :  { %v3830_v53 = vpop.eup %3829  ;;  %3841 = vtanh.f32 %v1458_v37  ;;  %v1443_v6 = vmul.f32 0.5, %v3828_v63  ;;  %v1449_v34 = vadd.f32 0.5, %v1441_v10  ;;  %v1487_v31 = vrot.slane %v5703_v54, 3 }
 0x29f   :  { %v3832_v18 = vpop.eup %3831  ;;  %v1444_v21 = vmul.f32 0.5, %v3830_v53  ;;  %3843 = vtanh.f32 %v1459_v25  ;;  %v1450_v24 = vadd.f32 0.5, %v1442_v5  ;;  %v1497_v28 = vmul.f32 0.5, %v1481_v62 }
 0x2a0   :  { %v3834_v17 = vpop.eup %3833  ;;  %v1445_v33 = vmul.f32 0.5, %v3832_v18  ;;  %3845 = vtanh.f32 %v1460_v57  ;;  %v1488_v36 = vrot.slane %v5705_v14, 3  ;;  %v1498_v8 = vmul.f32 0.5, %v1482_v4 }
 0x2a1   :  { %v3836_v41 = vpop.eup %3835  ;;  %v1446_v16 = vmul.f32 0.5, %v3834_v17  ;;  %3847 = vtanh.f32 %v1461_v26  ;;  %v1451_v37 = vadd.f32 0.5, %v1443_v6  ;;  %v1452_v51 = vadd.f32 0.5, %v1444_v21 }
 0x2a2   :  { %v3838_v27 = vpop.eup %3837  ;;  %v1447_v58 = vmul.f32 0.5, %v3836_v41  ;;  %3849 = vtanh.f32 %v1462_v12  ;;  %v1499_v22 = vmul.f32 0.5, %v1483_v43  ;;  %v1453_v42 = vadd.f32 0.5, %v1445_v33 }
 0x2a3   :  { %v1448_v39 = vmul.f32 0.5, %v3838_v27  ;;  %v3840_v32 = vpop.eup %3839  ;;  %3851 = vtanh.f32 %v1463_v20  ;;  %v1454_v57 = vadd.f32 0.5, %v1446_v16  ;;  %v1500_v54 = vmul.f32 0.5, %v1484_v15 }
 0x2a4   :  { %v3842_v25 = vpop.eup %3841  ;;  %3853 = vtanh.f32 %v1464_v61  ;;  %v1455_v44 = vadd.f32 0.5, %v1447_v58  ;;  %v1501_v30 = vmul.f32 0.5, %v1485_v23  ;;  %v1502_v26 = vmul.f32 0.5, %v1486_v19 }
 0x2a5   :  { %v3844_v40 = vpop.eup %3843  ;;  %3855 = vtanh.f32 %v1497_v28  ;;  %v1456_v12 = vadd.f32 0.5, %v1448_v39  ;;  %v1529_v14 = vmul.f32 %v1449_v34, %v5573_v35  ;;  %v1530_v13 = vmul.f32 %v1450_v24, %v5575_v3 }
 0x2a6   :  { %v3846_v38 = vpop.eup %3845  ;;  %3857 = vtanh.f32 %v1498_v8  ;;  %v1503_v20 = vmul.f32 0.5, %v1487_v31  ;;  %v1504_v11 = vmul.f32 0.5, %v1488_v36  ;;  %v1531_v9 = vmul.f32 %v1451_v37, %v5579_v46 }
 0x2a7   :  { %v3848_v50 = vpop.eup %3847  ;;  %3859 = vtanh.f32 %v1499_v22  ;;  %v1532_v60 = vmul.f32 %v1452_v51, %v5583_v45  ;;  %v1537_v10 = vmul.f32 %v3840_v32, %v5729_v47  ;;  %v1538_v62 = vmul.f32 %v3842_v25, %v5731_v52 }
 0x2a8   :  { %v3850_v61 = vpop.eup %3849  ;;  %3861 = vtanh.f32 %v1500_v54  ;;  %v1533_v35 = vmul.f32 %v1453_v42, %v5586_v56  ;;  %v1534_v3 = vmul.f32 %v1454_v57, %v5590_v29  ;;  %v1539_v4 = vmul.f32 %v3844_v40, %v5734_v1 }
 0x2a9   :  { %v3852_v63 = vpop.eup %3851  ;;  %3863 = vtanh.f32 %v1501_v30  ;;  %v1540_v46 = vmul.f32 %v3846_v38, %v5737_v48  ;;  %v5765_v53 = vadd.f32 %v1537_v10, %v1529_v14  ;;  %v5767_v5 = vadd.f32 %v1538_v62, %v1530_v13  ;;  %v5798_v10 = vld [vmem:[#allocation13 + $0x1e8] sm:$0xff]  ;;  %v5801_v62 = vld [vmem:[#allocation13 + $0x1f0] sm:$0xff] }
 0x2aa   :  { %v3854_v43 = vpop.eup %3853  ;;  %3865 = vtanh.f32 %v1502_v26  ;;  %v1535_v47 = vmul.f32 %v1455_v44, %v5593_v55  ;;  %v1541_v52 = vmul.f32 %v3848_v50, %v5740_v0  ;;  %v5771_v15 = vadd.f32 %v1539_v4, %v1531_v9  ;;  %v5813_v4 = vld [vmem:[#allocation13 + $0x1d0] sm:$0xff] }
 0x2ab   :  { %v3856_v45 = vpop.eup %3855  ;;  %3867 = vtanh.f32 %v1503_v20  ;;  %v1536_v29 = vmul.f32 %v1456_v12, %v5596_v59  ;;  %v1542_v1 = vmul.f32 %v3850_v61, %v5742_v2  ;;  %v5775_v18 = vadd.f32 %v1540_v46, %v1532_v60  ;;  %v5795_v60 = vld [vmem:[#allocation13 + $0x1e0] sm:$0xff] }
 0x2ac   :  { %v3858_v56 = vpop.eup %3857  ;;  %3869 = vtanh.f32 %v1504_v11  ;;  %v1543_v23 = vmul.f32 %v3852_v63, %v5746_v7  ;;  %v5778_v19 = vadd.f32 %v1541_v52, %v1533_v35  ;;  %v1513_v17 = vmul.f32 0.5, %v3856_v45  ;;  %v5804_v63 = vld [vmem:[#allocation13 + $0x1f8] sm:$0xff]  ;;  %v5807_v35 = vld [vmem:[#allocation13 + $0x1c0] sm:$0xff]  ;;  %v5822_v45 = vld [vmem:[#allocation13 + $0x1a8] sm:$0xff] }
 0x2ad   :  { %v3860_v48 = vpop.eup %3859  ;;  %3871 = vtanh.f32 %v5765_v53  ;;  %v1544_v0 = vmul.f32 %v3854_v43, %v5749_v49  ;;  %v5782_v6 = vadd.f32 %v1542_v1, %v1534_v3  ;;  %v1514_v21 = vmul.f32 0.5, %v3858_v56  ;;  %v5810_v3 = vld [vmem:[#allocation13 + $0x1c8] sm:$0xff]  ;;  %v5816_v43 = vld [vmem:[#allocation13 + $0x1d8] sm:$0xff]  ;;  %v5819_v46 = vld [vmem:[#allocation13 + $0x1a0] sm:$0xff] }
 0x2ae   :  { %v3862_v55 = vpop.eup %3861  ;;  %3873 = vtanh.f32 %v5767_v5  ;;  %v5785_v2 = vadd.f32 %v1543_v23, %v1535_v47  ;;  %v1515_v7 = vmul.f32 0.5, %v3860_v48  ;;  %v1521_v27 = vadd.f32 0.5, %v1513_v17  ;;  %v5825_v47 = vld [vmem:[#allocation13 + $0x1b0] sm:$0xff]  ;;  %v5828_v52 = vld [vmem:[#allocation13 + $0x1b8] sm:$0xff]  ;;  %v5831_v56 = vld [vmem:[#allocation13 + $0x180] sm:$0xff] }
 0x2af   :  { %v3864_v59 = vpop.eup %3863  ;;  %3875 = vtanh.f32 %v5771_v15  ;;  %v5788_v41 = vadd.f32 %v1544_v0, %v1536_v29  ;;  %v1516_v16 = vmul.f32 0.5, %v3862_v55  ;;  %v1522_v28 = vadd.f32 0.5, %v1514_v21  ;;  %v5834_v29 = vld [vmem:[#allocation13 + $0x188] sm:$0xff]  ;;  %v5837_v1 = vld [vmem:[#allocation13 + $0x190] sm:$0xff]  ;;  %v5840_v48 = vld [vmem:[#allocation13 + $0x198] sm:$0xff] }
 0x2b0   :  { %v3866_v34 = vpop.eup %3865  ;;  %3877 = vtanh.f32 %v5775_v18  ;;  %v1517_v31 = vmul.f32 0.5, %v3864_v59  ;;  %v1523_v8 = vadd.f32 0.5, %v1515_v7  ;;  %6932 = vst [vmem:[#allocation23_spill] sm:$0xff] %v5834_v29  ;;  %v5843_v23 = vld [vmem:[#allocation13 + $0x160] sm:$0xff]  ;;  %v5846_v55 = vld [vmem:[#allocation13 + $0x168] sm:$0xff]  ;;  %v5849_v17 = vld [vmem:[#allocation13 + $0x170] sm:$0xff] }
 0x2b1   :  { %v3868_v33 = vpop.eup %3867  ;;  %3879 = vtanh.f32 %v5778_v19  ;;  %v1518_v24 = vmul.f32 0.5, %v3866_v34  ;;  %v1524_v22 = vadd.f32 0.5, %v1516_v16  ;;  %6933 = vst [vmem:[#allocation24_spill] sm:$0xff] %v5837_v1  ;;  %v5852_v0 = vld [vmem:[#allocation13 + $0x178] sm:$0xff]  ;;  %v5855_v59 = vld [vmem:[#allocation13 + $0x140] sm:$0xff]  ;;  %v5858_v21 = vld [vmem:[#allocation13 + $0x148] sm:$0xff] }
 0x2b2   :  { %v3870_v49 = vpop.eup %3869  ;;  %3881 = vtanh.f32 %v5782_v6  ;;  %v1519_v36 = vmul.f32 0.5, %v3868_v33  ;;  %v1525_v57 = vadd.f32 0.5, %v1517_v31  ;;  %6934 = vst [vmem:[#allocation25_spill] sm:$0xff] %v5840_v48  ;;  %v5861_v34 = vld [vmem:[#allocation13 + $0x150] sm:$0xff]  ;;  %v5864_v7 = vld [vmem:[#allocation13 + $0x158] sm:$0xff]  ;;  %v5867_v33 = vld [vmem:[#allocation13 + $0x120] sm:$0xff] }
 0x2b3   :  { %v3872_v58 = vpop.eup %3871  ;;  %3883 = vtanh.f32 %v5785_v2  ;;  %v1520_v51 = vmul.f32 0.5, %v3870_v49  ;;  %v1526_v44 = vadd.f32 0.5, %v1518_v24  ;;  %6935 = vst [vmem:[#allocation26_spill] sm:$0xff] %v5843_v23  ;;  %v5870_v16 = vld [vmem:[#allocation13 + $0x128] sm:$0xff]  ;;  %v5873_v49 = vld [vmem:[#allocation13 + $0x130] sm:$0xff]  ;;  %v5876_v31 = vld [vmem:[#allocation13 + $0x138] sm:$0xff] }
 0x2b4   :  { %v3874_v39 = vpop.eup %3873  ;;  %3885 = vtanh.f32 %v5788_v41  ;;  %v1561_v32 = vmul.f32 %v3872_v58, %v1521_v27  ;;  %v1527_v38 = vadd.f32 0.5, %v1519_v36  ;;  %6936 = vst [vmem:[#allocation27_spill] sm:$0xff] %v5846_v55  ;;  %v5879_v27 = vld [vmem:[#allocation13 + $0x100] sm:$0xff]  ;;  %v5882_v58 = vld [vmem:[#allocation13 + $0x108] sm:$0xff]  ;;  %v5885_v24 = vld [vmem:[#allocation13 + $0x110] sm:$0xff] }
 0x2b5   :  { %v3876_v37 = vpop.eup %3875  ;;  %v1562_v25 = vmul.f32 %v3874_v39, %v1522_v28  ;;  %v1528_v13 = vadd.f32 0.5, %v1520_v51  ;;  %6937 = vst [vmem:[#allocation28_spill] sm:$0xff] %v5849_v17  ;;  %v5888_v28 = vld [vmem:[#allocation13 + $0x118] sm:$0xff]  ;;  %v5891_v39 = vld [vmem:[#allocation13 + $0xe0] sm:$0xff]  ;;  %v5894_v36 = vld [vmem:[#allocation13 + $0xe8] sm:$0xff] }
 0x2b6   :  { %v3878_v42 = vpop.eup %3877  ;;  %v1563_v54 = vmul.f32 %v3876_v37, %v1523_v8  ;;  %1569 = vst [vmem:[#allocation14 + $0x2] sm:$0x1] %v1561_v32  ;;  %v5897_v8 = vld [vmem:[#allocation13 + $0xf0] sm:$0xff]  ;;  %v5903_v37 = vld [vmem:[#allocation13 + $0xc0] sm:$0xff]  ;;  %v5906_v51 = vld [vmem:[#allocation13 + $0xc8] sm:$0xff] }
 0x2b7   :  { %v3880_v40 = vpop.eup %3879  ;;  %v1564_v30 = vmul.f32 %v3878_v42, %v1524_v22  ;;  %1570 = vst [vmem:[#allocation14 + $0xa] sm:$0x1] %v1562_v25  ;;  %v5909_v22 = vld [vmem:[#allocation13 + $0xd0] sm:$0xff]  ;;  %v5915_v42 = vld [vmem:[#allocation13 + $0xa0] sm:$0xff] }
 0x2b8   :  { %v3882_v26 = vpop.eup %3881  ;;  %v1565_v12 = vmul.f32 %v3880_v40, %v1525_v57  ;;  %1571 = vst [vmem:[#allocation14 + $0x12] sm:$0x1] %v1563_v54  ;;  %v5918_v57 = vld [vmem:[#allocation13 + $0xa8] sm:$0xff]  ;;  %v5924_v40 = vld [vmem:[#allocation13 + $0xb8] sm:$0xff] }
 0x2b9   :  { %v3884_v14 = vpop.eup %3883  ;;  %v1566_v50 = vmul.f32 %v3882_v26, %v1526_v44  ;;  %1572 = vst [vmem:[#allocation14 + $0x1a] sm:$0x1] %v1564_v30  ;;  %v5927_v44 = vld [vmem:[#allocation13 + $0x80] sm:$0xff]  ;;  %v5933_v26 = vld [vmem:[#allocation13 + $0x90] sm:$0xff] }
 0x2ba   :  { %v3886_v20 = vpop.eup %3885  ;;  %v1567_v11 = vmul.f32 %v3884_v14, %v1527_v38  ;;  %1573 = vst [vmem:[#allocation14 + $0x22] sm:$0x1] %v1565_v12  ;;  %v5936_v38 = vld [vmem:[#allocation13 + $0x98] sm:$0xff]  ;;  %v5942_v14 = vld [vmem:[#allocation13 + $0x68] sm:$0xff] }
 0x2bb   :  { %v1568_v9 = vmul.f32 %v3886_v20, %v1528_v13  ;;  %1574 = vst [vmem:[#allocation14 + $0x2a] sm:$0x1] %v1566_v50  ;;  %v5945_v13 = vld [vmem:[#allocation13 + $0x70] sm:$0xff]  ;;  %v5951_v20 = vld [vmem:[#allocation13 + $0x40] sm:$0xff] }
 0x2bc   :  { %1575 = vst [vmem:[#allocation14 + $0x32] sm:$0x1] %v1567_v11 }
 0x2bd   :  { %1576 = vst [vmem:[#allocation14 + $0x3a] sm:$0x1] %v1568_v9 }
 0x2be   :  { %1601 = vst [vmem:[#allocation1] ss:$9 sm:$0xff] %v1561_v32  ;;  %v5900_v32 = vld [vmem:[#allocation13 + $0xf8] sm:$0xff] }
 0x2bf   :  { %1603 = vst [vmem:[#allocation1 + $0x1] ss:$9 sm:$0xff] %v1562_v25  ;;  %v5912_v25 = vld [vmem:[#allocation13 + $0xd8] sm:$0xff] }
 0x2c0   :  { %1605 = vst [vmem:[#allocation1 + $0x2] ss:$9 sm:$0xff] %v1563_v54  ;;  %v5921_v54 = vld [vmem:[#allocation13 + $0xb0] sm:$0xff] }
 0x2c1   :  { %1607 = vst [vmem:[#allocation1 + $0x3] ss:$9 sm:$0xff] %v1564_v30  ;;  %v5930_v30 = vld [vmem:[#allocation13 + $0x88] sm:$0xff] }
 0x2c2   :  { %1609 = vst [vmem:[#allocation1 + $0x4] ss:$9 sm:$0xff] %v1565_v12  ;;  %v5939_v12 = vld [vmem:[#allocation13 + $0x60] sm:$0xff] }
 0x2c3   :  { %1611 = vst [vmem:[#allocation1 + $0x5] ss:$9 sm:$0xff] %v1566_v50  ;;  %v5948_v50 = vld [vmem:[#allocation13 + $0x78] sm:$0xff] }
 0x2c4   :  { %1613 = vst [vmem:[#allocation1 + $0x6] ss:$9 sm:$0xff] %v1567_v11  ;;  %v5954_v11 = vld [vmem:[#allocation13 + $0x48] sm:$0xff] }
 0x2c5   :  { %1615 = vst [vmem:[#allocation1 + $0x7] ss:$9 sm:$0xff] %v1568_v9  ;;  %v5957_v9 = vld [vmem:[#allocation13 + $0x50] sm:$0xff] }
 0x2c6   :  { %6938 = vst [vmem:[#allocation29_spill] sm:$0xff] %v5852_v0 }
 0x2c7   :  { %6939 = vst [vmem:[#allocation30_spill] sm:$0xff] %v5855_v59 }
 0x2c8   :  { %6940 = vst [vmem:[#allocation31_spill] sm:$0xff] %v5858_v21 }
 0x2c9   :  { %6941 = vst [vmem:[#allocation32_spill] sm:$0xff] %v5861_v34 }
 0x2ca   :  { %6942 = vst [vmem:[#allocation33_spill] sm:$0xff] %v5864_v7 }
 0x2cb   :  { %6943 = vst [vmem:[#allocation34_spill] sm:$0xff] %v5867_v33 }
 0x2cc   :  { %v1616_v61 = vld [vmem:[#allocation1] sm:$0xff]  ;;  %6944 = vst [vmem:[#allocation35_spill] sm:$0xff] %v5870_v16 }
 0x2cd   :  { %1634 = vmatmul.f32.vlgmr.msra.gmra.mxu0 %v1616_v61  ;;  %1654 = vmatmul.f32.vlgmr.msra.gmra.mxu1 %v1616_v61  ;;  %6945 = vst [vmem:[#allocation36_spill] sm:$0xff] %v5873_v49 }
 0x2ce   :  { %1674 = vmatmul.f32.vlgmr.msra.gmra.mxu2 %v1616_v61  ;;  %1694 = vmatmul.f32.vlgmr.msra.gmra.mxu3 %v1616_v61  ;;  %6946 = vst [vmem:[#allocation37_spill] sm:$0xff] %v5876_v31  ;;  %v5960_v61 = vld [vmem:[#allocation13 + $0x58] sm:$0xff] }
 0x2cf   :  { %2384 = vmatpush.msra.mxu0 %v5795_v60  ;;  %2404 = vmatpush.msra.mxu1 %v5798_v10  ;;  %6947 = vst [vmem:[#allocation38_spill] sm:$0xff] %v5879_v27 }
 0x2d0   :  { %2424 = vmatpush.msra.mxu2 %v5801_v62  ;;  %2444 = vmatpush.msra.mxu3 %v5804_v63  ;;  %6948 = vst [vmem:[#allocation39_spill] sm:$0xff] %v5882_v58 }
 0x2d1   :  { %2385 = vmatpush.msra.mxu0 %v5807_v35  ;;  %2405 = vmatpush.msra.mxu1 %v5810_v3  ;;  %6949 = vst [vmem:[#allocation40_spill] sm:$0xff] %v5885_v24 }
 0x2d2   :  { %2425 = vmatpush.msra.mxu2 %v5813_v4  ;;  %2445 = vmatpush.msra.mxu3 %v5816_v43  ;;  %6950 = vst [vmem:[#allocation41_spill] sm:$0xff] %v5888_v28 }
 0x2d3   :  { %2386 = vmatpush.msra.mxu0 %v5819_v46  ;;  %2406 = vmatpush.msra.mxu1 %v5822_v45  ;;  %6951 = vst [vmem:[#allocation42_spill] sm:$0xff] %v5891_v39 }
 0x2d4   :  { %2426 = vmatpush.msra.mxu2 %v5825_v47  ;;  %2446 = vmatpush.msra.mxu3 %v5828_v52  ;;  %6952 = vst [vmem:[#allocation43_spill] sm:$0xff] %v5894_v36 }
 0x2d5   :  { %2387 = vmatpush.msra.mxu0 %v5831_v56  ;;  %2407 = vmatpush.msra.mxu1 %v5834_v29  ;;  %6953 = vst [vmem:[#allocation44_spill] sm:$0xff] %v5897_v8 }
 0x2d6   :  { %2427 = vmatpush.msra.mxu2 %v5837_v1  ;;  %2447 = vmatpush.msra.mxu3 %v5840_v48  ;;  %6954 = vst [vmem:[#allocation45_spill] sm:$0xff] %v5900_v32 }
 0x2d7   :  { %2388 = vmatpush.msra.mxu0 %v5843_v23  ;;  %2408 = vmatpush.msra.mxu1 %v5846_v55  ;;  %6955 = vst [vmem:[#allocation46_spill] sm:$0xff] %v5903_v37 }
 0x2d8   :  { %2428 = vmatpush.msra.mxu2 %v5849_v17  ;;  %2448 = vmatpush.msra.mxu3 %v5852_v0  ;;  %6956 = vst [vmem:[#allocation47_spill] sm:$0xff] %v5906_v51 }
 0x2d9   :  { %2389 = vmatpush.msra.mxu0 %v5855_v59  ;;  %2409 = vmatpush.msra.mxu1 %v5858_v21  ;;  %6957 = vst [vmem:[#allocation48_spill] sm:$0xff] %v5909_v22 }
 0x2da   :  { %2429 = vmatpush.msra.mxu2 %v5861_v34  ;;  %2449 = vmatpush.msra.mxu3 %v5864_v7  ;;  %6958 = vst [vmem:[#allocation49_spill] sm:$0xff] %v5912_v25 }
 0x2db   :  { %2390 = vmatpush.msra.mxu0 %v5867_v33  ;;  %2410 = vmatpush.msra.mxu1 %v5870_v16  ;;  %6959 = vst [vmem:[#allocation50_spill] sm:$0xff] %v5915_v42 }
 0x2dc   :  { %2430 = vmatpush.msra.mxu2 %v5873_v49  ;;  %2450 = vmatpush.msra.mxu3 %v5876_v31  ;;  %6960 = vst [vmem:[#allocation51_spill] sm:$0xff] %v5918_v57 }
 0x2dd   :  { %2391 = vmatpush.msra.mxu0 %v5879_v27  ;;  %2411 = vmatpush.msra.mxu1 %v5882_v58  ;;  %6961 = vst [vmem:[#allocation52_spill] sm:$0xff] %v5921_v54 }
 0x2de   :  { %2431 = vmatpush.msra.mxu2 %v5885_v24  ;;  %2451 = vmatpush.msra.mxu3 %v5888_v28  ;;  %6962 = vst [vmem:[#allocation53_spill] sm:$0xff] %v5924_v40  ;;  %v1582_v28 = vld [vmem:[#allocation2 + $0x43] ss:$8 sm:$0xf] }
 0x2df   :  { %2392 = vmatpush.msra.mxu0 %v5891_v39  ;;  %2412 = vmatpush.msra.mxu1 %v5894_v36  ;;  %6963 = vst [vmem:[#allocation54_spill] sm:$0xff] %v5927_v44  ;;  %v1580_v39 = vld [vmem:[#allocation2 + $0x23] ss:$8 sm:$0xf] }
 0x2e0   :  { %2432 = vmatpush.msra.mxu2 %v5897_v8  ;;  %2452 = vmatpush.msra.mxu3 %v5900_v32  ;;  %6964 = vst [vmem:[#allocation55_spill] sm:$0xff] %v5930_v30  ;;  %v1578_v32 = vld [vmem:[#allocation2 + $0x3] ss:$8 sm:$0xf] }
 0x2e1   :  { %2393 = vmatpush.msra.mxu0 %v5903_v37  ;;  %2413 = vmatpush.msra.mxu1 %v5906_v51  ;;  %6965 = vst [vmem:[#allocation56_spill] sm:$0xff] %v5933_v26  ;;  %v1584_v24 = vld [vmem:[#allocation2 + $0x63] ss:$8 sm:$0xf] }
 0x2e2   :  { %2433 = vmatpush.msra.mxu2 %v5909_v22  ;;  %2453 = vmatpush.msra.mxu3 %v5912_v25  ;;  %6966 = vst [vmem:[#allocation57_spill] sm:$0xff] %v5936_v38 }
 0x2e3   :  { %2394 = vmatpush.msra.mxu0 %v5915_v42  ;;  %2414 = vmatpush.msra.mxu1 %v5918_v57  ;;  %6967 = vst [vmem:[#allocation58_spill] sm:$0xff] %v5939_v12 }
 0x2e4   :  { %2434 = vmatpush.msra.mxu2 %v5921_v54  ;;  %2454 = vmatpush.msra.mxu3 %v5924_v40  ;;  %6968 = vst [vmem:[#allocation59_spill] sm:$0xff] %v5942_v14 }
 0x2e5   :  { %2395 = vmatpush.msra.mxu0 %v5927_v44  ;;  %2415 = vmatpush.msra.mxu1 %v5930_v30  ;;  %6969 = vst [vmem:[#allocation60_spill] sm:$0xff] %v5945_v13 }
 0x2e6   :  { %2435 = vmatpush.msra.mxu2 %v5933_v26  ;;  %2455 = vmatpush.msra.mxu3 %v5936_v38  ;;  %6970 = vst [vmem:[#allocation61_spill] sm:$0xff] %v5948_v50 }
 0x2e7   :  { %2396 = vmatpush.msra.mxu0 %v5939_v12  ;;  %2416 = vmatpush.msra.mxu1 %v5942_v14  ;;  %6971 = vst [vmem:[#allocation62_spill] sm:$0xff] %v5951_v20 }
 0x2e8   :  { %2436 = vmatpush.msra.mxu2 %v5945_v13  ;;  %2456 = vmatpush.msra.mxu3 %v5948_v50  ;;  %6972 = vst [vmem:[#allocation63_spill] sm:$0xff] %v5954_v11  ;;  %v5963_v13 = vld [vmem:[#allocation13 + $0x20] sm:$0xff]  ;;  %v5966_v50 = vld [vmem:[#allocation13 + $0x28] sm:$0xff] }
 0x2e9   :  { %2397 = vmatpush.msra.mxu0 %v5951_v20  ;;  %2417 = vmatpush.msra.mxu1 %v5954_v11  ;;  %6973 = vst [vmem:[#allocation64_spill] sm:$0xff] %v5957_v9  ;;  %v5969_v20 = vld [vmem:[#allocation13 + $0x30] sm:$0xff]  ;;  %v5972_v11 = vld [vmem:[#allocation13 + $0x38] sm:$0xff] }
 0x2ea   :  { %2437 = vmatpush.msra.mxu2 %v5957_v9  ;;  %6974 = vst [vmem:[#allocation65_spill] sm:$0xff] %v5960_v61  ;;  %2457 = vmatpush.msra.mxu3 %v5960_v61  ;;  %v5975_v9 = vld [vmem:[#allocation13] sm:$0xff]  ;;  %v5978_v61 = vld [vmem:[#allocation13 + $0x8] sm:$0xff] }
 0x2eb   :  { %6975 = vst [vmem:[#allocation66_spill] sm:$0xff] %v5963_v13  ;;  %2398 = vmatpush.msra.mxu0 %v5963_v13  ;;  %2418 = vmatpush.msra.mxu1 %v5966_v50  ;;  %v5981_v13 = vld [vmem:[#allocation13 + $0x10] sm:$0xff] }
 0x2ec   :  { %6976 = vst [vmem:[#allocation67_spill] sm:$0xff] %v5966_v50  ;;  %2438 = vmatpush.msra.mxu2 %v5969_v20  ;;  %2458 = vmatpush.msra.mxu3 %v5972_v11  ;;  %v5984_v50 = vld [vmem:[#allocation13 + $0x18] sm:$0xff] }
 0x2ed   :  { %6977 = vst [vmem:[#allocation68_spill] sm:$0xff] %v5969_v20  ;;  %2399 = vmatpush.msra.mxu0 %v5975_v9  ;;  %2419 = vmatpush.msra.mxu1 %v5978_v61 }
 0x2ee   :  { %6978 = vst [vmem:[#allocation69_spill] sm:$0xff] %v5972_v11  ;;  %2439 = vmatpush.msra.mxu2 %v5981_v13  ;;  %2459 = vmatpush.msra.mxu3 %v5984_v50 }
 0x2ef   :  { %6979 = vst [vmem:[#allocation70_spill] sm:$0xff] %v5975_v9 }
 0x2f0   :  { %6980 = vst [vmem:[#allocation71_spill] sm:$0xff] %v5978_v61 }
 0x2f1   :  { %6981 = vst [vmem:[#allocation72_spill] sm:$0xff] %v5981_v13 }
 0x2f2   :  { %6982 = vst [vmem:[#allocation73_spill] sm:$0xff] %v5984_v50 }
 0x34a   :  { %v1655_v20 = vpop.f32.mrf.mxu1  ;;  %v1635_v12 = vpop.f32.mrf.mxu0 }
 0x34b   :  { %v1702_v14 = vrot.slane %v1655_v20, 7 }
 0x34d   :  { %v1705_v11 = vsel %vm525_vm1, %v1635_v12, %v1702_v14  ;;  %v1708_v38 = vsel %vm531_vm4, %v1635_v12, %v1702_v14  ;;  %v1712_v30 = vsel %vm527_vm2, %v1635_v12, %v1702_v14  ;;  %v1716_v61 = vsel %vm533_vm5, %v1635_v12, %v1702_v14 }
 0x34e   :  { %v1720_v13 = vsel %vm539_vm7, %v1635_v12, %v1702_v14  ;;  %v1724_v54 = vsel %vm545_vm9, %v1635_v12, %v1702_v14  ;;  %v1728_v50 = vsel %vm551_vm11, %v1635_v12, %v1702_v14  ;;  %v1732_v20 = vsel %vm557_vm13, %v1702_v14, %v1635_v12 }
 0x351   :  { %v1675_v9 = vpop.f32.mrf.mxu2  ;;  %v1695_v26 = vpop.f32.mrf.mxu3 }
 0x352   :  { %v1703_v44 = vrot.slane %v1675_v9, 6  ;;  %v1704_v40 = vrot.slane %v1695_v26, 5 }
 0x354   :  { %v1706_v57 = vsel %vm527_vm2, %v1703_v44, %v1704_v40  ;;  %v1709_v42 = vsel %vm533_vm5, %v1703_v44, %v1704_v40  ;;  %v1713_v25 = vsel %vm539_vm7, %v1703_v44, %v1704_v40  ;;  %v1717_v22 = vsel %vm545_vm9, %v1703_v44, %v1704_v40 }
 0x355   :  { %v1707_v51 = vsel %vm529_vm3, %v1705_v11, %v1706_v57  ;;  %v1710_v26 = vsel %vm535_vm6, %v1708_v38, %v1709_v42  ;;  %v1714_v9 = vsel %vm541_vm8, %v1712_v30, %v1713_v25  ;;  %v1718_v37 = vsel %vm547_vm10, %v1716_v61, %v1717_v22  ;;  %v1586_v25 = vld [vmem:[#allocation2 + $0x83] ss:$8 sm:$0xf] }
 0x356   :  { %v1711_v8 = vrot.slane %v1710_v26, 1  ;;  %v1715_v36 = vrot.slane %v1714_v9, 2  ;;  %v1719_v12 = vrot.slane %v1718_v37, 3  ;;  %v1721_v14 = vsel %vm551_vm11, %v1703_v44, %v1704_v40  ;;  %v1588_v11 = vld [vmem:[#allocation2 + $0xa3] ss:$8 sm:$0xf] }
 0x357   :  { %v1722_v58 = vsel %vm553_vm12, %v1720_v13, %v1721_v14  ;;  %v1725_v27 = vsel %vm557_vm13, %v1704_v40, %v1703_v44  ;;  %v1729_v57 = vsel %vm525_vm1, %v1703_v44, %v1704_v40  ;;  %v1733_v42 = vsel %vm531_vm4, %v1703_v44, %v1704_v40  ;;  %v1590_v13 = vld [vmem:[#allocation2 + $0xc3] ss:$8 sm:$0xf] }
 0x358   :  { %v1723_v30 = vrot.slane %v1722_v58, 4  ;;  %v1726_v22 = vsel %vm559_vm14, %v1724_v54, %v1725_v27  ;;  %v1730_v38 = vsel %vm564_vm15, %v1729_v57, %v1728_v50  ;;  %v1734_v37 = vsel %vm569_vm0, %v1733_v42, %v1732_v20  ;;  %v1592_v14 = vld [vmem:[#allocation2 + $0xe3] ss:$8 sm:$0xf] }
 0x359   :  { %v1727_v61 = vrot.slane %v1726_v22, 5  ;;  %v1731_v26 = vrot.slane %v1730_v38, 6  ;;  %v1735_v9 = vrot.slane %v1734_v37, 7  ;;  %v6011_v31 = vadd.f32 %v1707_v51, %v1578_v32 }
 0x35a   :  { %v6013_v49 = vadd.f32 %v1711_v8, %v1580_v39  ;;  %v6015_v16 = vadd.f32 %v1715_v36, %v1582_v28  ;;  %v6017_v40 = vadd.f32 %v1719_v12, %v1584_v24  ;;  %v6019_v58 = vadd.f32 %v1723_v30, %v1586_v25 }
 0x35b   :  { %v6021_v27 = vadd.f32 %v1727_v61, %v1588_v11  ;;  %v6023_v54 = vadd.f32 %v1731_v26, %v1590_v13  ;;  %v6025_v44 = vadd.f32 %v1735_v9, %v1592_v14  ;;  %v1752_v50 = vmul.f32 0.5, %v6011_v31 }
 0x35c   :  { %v1753_v32 = vmul.f32 0.5, %v6013_v49  ;;  %v1754_v51 = vmul.f32 0.5, %v6015_v16  ;;  %v1755_v39 = vmul.f32 0.5, %v6017_v40  ;;  %v1756_v28 = vmul.f32 0.5, %v6019_v58 }
 0x35d   :  { %3887 = vtanh.f32 %v1752_v50  ;;  %v1757_v24 = vmul.f32 0.5, %v6021_v27  ;;  %v1792_v36 = vrot.slane %v6011_v31, 1  ;;  %v1793_v8 = vrot.slane %v6013_v49, 1 }
 0x35e   :  { %3889 = vtanh.f32 %v1753_v32  ;;  %v1758_v20 = vmul.f32 0.5, %v6023_v54  ;;  %v1759_v12 = vmul.f32 0.5, %v6025_v44  ;;  %v1794_v57 = vrot.slane %v6015_v16, 1 }
 0x35f   :  { %3891 = vtanh.f32 %v1754_v51  ;;  %v1795_v42 = vrot.slane %v6017_v40, 1  ;;  %v1796_v25 = vrot.slane %v6019_v58, 1  ;;  %v1797_v30 = vrot.slane %v6021_v27, 1 }
 0x360   :  { %3893 = vtanh.f32 %v1755_v39  ;;  %v1798_v22 = vrot.slane %v6023_v54, 1  ;;  %v1799_v38 = vrot.slane %v6025_v44, 1  ;;  %v1808_v37 = vmul.f32 0.5, %v1792_v36 }
 0x361   :  { %3895 = vtanh.f32 %v1756_v28  ;;  %v1809_v11 = vmul.f32 0.5, %v1793_v8  ;;  %v1810_v26 = vmul.f32 0.5, %v1794_v57  ;;  %v1811_v13 = vmul.f32 0.5, %v1795_v42 }
 0x362   :  { %3897 = vtanh.f32 %v1757_v24  ;;  %v1812_v14 = vmul.f32 0.5, %v1796_v25  ;;  %v1813_v50 = vmul.f32 0.5, %v1797_v30  ;;  %v1814_v39 = vmul.f32 0.5, %v1798_v22 }
 0x363   :  { %v3888_v61 = vpop.eup %3887  ;;  %3899 = vtanh.f32 %v1758_v20  ;;  %v1815_v33 = vmul.f32 0.5, %v1799_v38  ;;  %v1840_v36 = vrot.slane %v6011_v31, 2  ;;  %v1841_v24 = vrot.slane %v6013_v49, 2 }
 0x364   :  { %v3890_v9 = vpop.eup %3889  ;;  %3901 = vtanh.f32 %v1759_v12  ;;  %v1768_v51 = vmul.f32 0.5, %v3888_v61  ;;  %v1842_v12 = vrot.slane %v6015_v16, 2  ;;  %v1843_v57 = vrot.slane %v6017_v40, 2 }
 0x365   :  { %v3892_v32 = vpop.eup %3891  ;;  %3903 = vtanh.f32 %v1808_v37  ;;  %v1769_v7 = vmul.f32 0.5, %v3890_v9  ;;  %v1844_v30 = vrot.slane %v6019_v58, 2  ;;  %v1845_v22 = vrot.slane %v6021_v27, 2 }
 0x366   :  { %v3894_v28 = vpop.eup %3893  ;;  %3905 = vtanh.f32 %v1809_v11  ;;  %v1770_v20 = vmul.f32 0.5, %v3892_v32  ;;  %v6049_v61 = vadd.f32 0.5, %v1768_v51  ;;  %v1846_v34 = vrot.slane %v6023_v54, 2 }
 0x367   :  { %v3896_v8 = vpop.eup %3895  ;;  %3907 = vtanh.f32 %v1810_v26  ;;  %v1771_v25 = vmul.f32 0.5, %v3894_v28  ;;  %v6051_v26 = vadd.f32 0.5, %v1769_v7  ;;  %v1847_v59 = vrot.slane %v6025_v44, 2 }
 0x368   :  { %v3898_v42 = vpop.eup %3897  ;;  %3909 = vtanh.f32 %v1811_v13  ;;  %v1772_v37 = vmul.f32 0.5, %v3896_v8  ;;  %v6054_v13 = vadd.f32 0.5, %v1770_v20  ;;  %v1866_v20 = vrot.slane %v6015_v16, 3 }
 0x369   :  { %v3900_v38 = vpop.eup %3899  ;;  %v1773_v11 = vmul.f32 0.5, %v3898_v42  ;;  %3911 = vtanh.f32 %v1812_v14  ;;  %v6057_v8 = vadd.f32 0.5, %v1771_v25  ;;  %v1864_v14 = vrot.slane %v6011_v31, 3 }
 0x36a   :  { %v3902_v9 = vpop.eup %3901  ;;  %v1774_v32 = vmul.f32 0.5, %v3900_v38  ;;  %3913 = vtanh.f32 %v1813_v50  ;;  %v6060_v7 = vadd.f32 0.5, %v1772_v37  ;;  %v1865_v38 = vrot.slane %v6013_v49, 3 }
 0x36b   :  { %v3904_v21 = vpop.eup %3903  ;;  %v1775_v28 = vmul.f32 0.5, %v3902_v9  ;;  %3915 = vtanh.f32 %v1814_v39  ;;  %v6062_v50 = vadd.f32 0.5, %v1773_v11  ;;  %v1867_v25 = vrot.slane %v6017_v40, 3 }
 0x36c   :  { %v3906_v0 = vpop.eup %3905  ;;  %3917 = vtanh.f32 %v1815_v33  ;;  %v1824_v51 = vmul.f32 0.5, %v3904_v21  ;;  %v6066_v39 = vadd.f32 0.5, %v1774_v32  ;;  %v1868_v31 = vrot.slane %v6019_v58, 3 }
 0x36d   :  { %v3908_v42 = vpop.eup %3907  ;;  %v1825_v17 = vmul.f32 0.5, %v3906_v0  ;;  %3919 = vtanh.f32 %v1840_v36  ;;  %v6069_v21 = vadd.f32 0.5, %v1775_v28  ;;  %v1869_v37 = vrot.slane %v6021_v27, 3 }
 0x36e   :  { %v3910_v9 = vpop.eup %3909  ;;  %3921 = vtanh.f32 %v1841_v24  ;;  %v1826_v55 = vmul.f32 0.5, %v3908_v42  ;;  %v1832_v23 = vadd.f32 0.5, %v1824_v51  ;;  %v1870_v0 = vrot.slane %v6023_v54, 3 }
 0x36f   :  { %v3912_v33 = vpop.eup %3911  ;;  %v1827_v49 = vmul.f32 0.5, %v3910_v9  ;;  %3923 = vtanh.f32 %v1842_v12  ;;  %v1833_v28 = vadd.f32 0.5, %v1825_v17  ;;  %v1880_v24 = vmul.f32 0.5, %v1864_v14 }
 0x370   :  { %v3914_v11 = vpop.eup %3913  ;;  %v1828_v32 = vmul.f32 0.5, %v3912_v33  ;;  %3925 = vtanh.f32 %v1843_v57  ;;  %v1871_v58 = vrot.slane %v6025_v44, 3  ;;  %v1881_v27 = vmul.f32 0.5, %v1865_v38 }
 0x371   :  { %v3916_v16 = vpop.eup %3915  ;;  %v1829_v48 = vmul.f32 0.5, %v3914_v11  ;;  %3927 = vtanh.f32 %v1844_v30  ;;  %v1834_v9 = vadd.f32 0.5, %v1826_v55  ;;  %v1835_v51 = vadd.f32 0.5, %v1827_v49 }
 0x372   :  { %v3918_v40 = vpop.eup %3917  ;;  %v1830_v36 = vmul.f32 0.5, %v3916_v16  ;;  %3929 = vtanh.f32 %v1845_v22  ;;  %v1882_v12 = vmul.f32 0.5, %v1866_v20  ;;  %v1836_v11 = vadd.f32 0.5, %v1828_v32 }
 0x373   :  { %v1831_v1 = vmul.f32 0.5, %v3918_v40  ;;  %v3920_v42 = vpop.eup %3919  ;;  %3931 = vtanh.f32 %v1846_v34  ;;  %v1837_v57 = vadd.f32 0.5, %v1829_v48  ;;  %v1883_v54 = vmul.f32 0.5, %v1867_v25 }
 0x374   :  { %v3922_v33 = vpop.eup %3921  ;;  %3933 = vtanh.f32 %v1847_v59  ;;  %v1838_v16 = vadd.f32 0.5, %v1830_v36  ;;  %v1884_v17 = vmul.f32 0.5, %v1868_v31  ;;  %v1885_v30 = vmul.f32 0.5, %v1869_v37 }
 0x375   :  { %v3924_v29 = vpop.eup %3923  ;;  %3935 = vtanh.f32 %v1880_v24  ;;  %v1839_v22 = vadd.f32 0.5, %v1831_v1  ;;  %v1912_v44 = vmul.f32 %v1832_v23, %v5765_v53  ;;  %v1913_v55 = vmul.f32 %v1833_v28, %v5767_v5 }
 0x376   :  { %v3926_v14 = vpop.eup %3925  ;;  %3937 = vtanh.f32 %v1881_v27  ;;  %v1886_v34 = vmul.f32 0.5, %v1870_v0  ;;  %v1887_v20 = vmul.f32 0.5, %v1871_v58  ;;  %v1914_v48 = vmul.f32 %v1834_v9, %v5771_v15 }
 0x377   :  { %v3928_v38 = vpop.eup %3927  ;;  %3939 = vtanh.f32 %v1882_v12  ;;  %v1915_v25 = vmul.f32 %v1835_v51, %v5775_v18  ;;  %v1920_v31 = vmul.f32 %v3920_v42, %v6049_v61  ;;  %v1921_v37 = vmul.f32 %v3922_v33, %v6051_v26 }
 0x378   :  { %v3930_v59 = vpop.eup %3929  ;;  %3941 = vtanh.f32 %v1883_v54  ;;  %v1916_v53 = vmul.f32 %v1836_v11, %v5778_v19  ;;  %v1917_v5 = vmul.f32 %v1837_v57, %v5782_v6  ;;  %v1922_v23 = vmul.f32 %v3924_v29, %v6054_v13 }
 0x379   :  { %v3932_v1 = vpop.eup %3931  ;;  %3943 = vtanh.f32 %v1884_v17  ;;  %v1923_v15 = vmul.f32 %v3926_v14, %v6057_v8  ;;  %v6085_v32 = vadd.f32 %v1920_v31, %v1912_v44  ;;  %v6087_v0 = vadd.f32 %v1921_v37, %v1913_v55 }
 0x37a   :  { %v3934_v49 = vpop.eup %3933  ;;  %3945 = vtanh.f32 %v1885_v30  ;;  %v1918_v61 = vmul.f32 %v1838_v16, %v5785_v2  ;;  %v1924_v26 = vmul.f32 %v3928_v38, %v6060_v7  ;;  %v6091_v40 = vadd.f32 %v1922_v23, %v1914_v48 }
 0x37b   :  { %v3936_v18 = vpop.eup %3935  ;;  %3947 = vtanh.f32 %v1886_v34  ;;  %v1919_v6 = vmul.f32 %v1839_v22, %v5788_v41  ;;  %v1925_v29 = vmul.f32 %v3930_v59, %v6062_v50  ;;  %v6095_v13 = vadd.f32 %v1923_v15, %v1915_v25 }
 0x37c   :  { %v3938_v19 = vpop.eup %3937  ;;  %3949 = vtanh.f32 %v1887_v20  ;;  %v1926_v36 = vmul.f32 %v3932_v1, %v6066_v39  ;;  %v6098_v28 = vadd.f32 %v1924_v26, %v1916_v53  ;;  %v1896_v24 = vmul.f32 0.5, %v3936_v18 }
 0x37d   :  { %v3940_v8 = vpop.eup %3939  ;;  %3951 = vtanh.f32 %v6085_v32  ;;  %v1927_v7 = vmul.f32 %v3934_v49, %v6069_v21  ;;  %v6102_v58 = vadd.f32 %v1925_v29, %v1917_v5  ;;  %v1897_v27 = vmul.f32 0.5, %v3938_v19  ;;  %v6997_v29 = vld [vmem:[#allocation37_spill] sm:$0xff] }
 0x37e   :  { %v3942_v2 = vpop.eup %3941  ;;  %3953 = vtanh.f32 %v6087_v0  ;;  %v6105_v50 = vadd.f32 %v1926_v36, %v1918_v61  ;;  %v1898_v39 = vmul.f32 0.5, %v3940_v8  ;;  %v1904_v11 = vadd.f32 0.5, %v1896_v24  ;;  %v6998_v8 = vld [vmem:[#allocation38_spill] sm:$0xff]  ;;  %v6999_v36 = vld [vmem:[#allocation39_spill] sm:$0xff]  ;;  %v7001_v24 = vld [vmem:[#allocation41_spill] sm:$0xff] }
 0x37f   :  { %v3944_v41 = vpop.eup %3943  ;;  %3955 = vtanh.f32 %v6091_v40  ;;  %v6108_v9 = vadd.f32 %v1927_v7, %v1919_v6  ;;  %v1899_v12 = vmul.f32 0.5, %v3942_v2  ;;  %v1905_v16 = vadd.f32 0.5, %v1897_v27  ;;  %v6996_v6 = vld [vmem:[#allocation36_spill] sm:$0xff]  ;;  %v7002_v7 = vld [vmem:[#allocation42_spill] sm:$0xff] }
 0x380   :  { %v3946_v42 = vpop.eup %3945  ;;  %3957 = vtanh.f32 %v6095_v13  ;;  %v1900_v33 = vmul.f32 0.5, %v3944_v41  ;;  %v1906_v14 = vadd.f32 0.5, %v1898_v39  ;;  %v7000_v2 = vld [vmem:[#allocation40_spill] sm:$0xff]  ;;  %v7003_v41 = vld [vmem:[#allocation43_spill] sm:$0xff]  ;;  %v7006_v39 = vld [vmem:[#allocation46_spill] sm:$0xff] }
 0x381   :  { %v3948_v51 = vpop.eup %3947  ;;  %3959 = vtanh.f32 %v6098_v28  ;;  %v1901_v54 = vmul.f32 0.5, %v3946_v42  ;;  %v1907_v38 = vadd.f32 0.5, %v1899_v12  ;;  %v7004_v27 = vld [vmem:[#allocation44_spill] sm:$0xff]  ;;  %v7005_v42 = vld [vmem:[#allocation45_spill] sm:$0xff] }
 0x382   :  { %v3950_v21 = vpop.eup %3949  ;;  %3961 = vtanh.f32 %v6102_v58  ;;  %v1902_v30 = vmul.f32 0.5, %v3948_v51  ;;  %v1908_v48 = vadd.f32 0.5, %v1900_v33  ;;  %v7007_v51 = vld [vmem:[#allocation47_spill] sm:$0xff]  ;;  %v7008_v12 = vld [vmem:[#allocation48_spill] sm:$0xff]  ;;  %v7010_v33 = vld [vmem:[#allocation50_spill] sm:$0xff] }
 0x383   :  { %v3952_v57 = vpop.eup %3951  ;;  %3963 = vtanh.f32 %v6105_v50  ;;  %v1903_v55 = vmul.f32 0.5, %v3950_v21  ;;  %v1909_v31 = vadd.f32 0.5, %v1901_v54  ;;  %v7009_v21 = vld [vmem:[#allocation49_spill] sm:$0xff] }
 0x384   :  { %v3954_v17 = vpop.eup %3953  ;;  %3965 = vtanh.f32 %v6108_v9  ;;  %v1944_v22 = vmul.f32 %v3952_v57, %v1904_v11  ;;  %v1910_v53 = vadd.f32 0.5, %v1902_v30  ;;  %v7011_v11 = vld [vmem:[#allocation51_spill] sm:$0xff]  ;;  %v7012_v57 = vld [vmem:[#allocation52_spill] sm:$0xff]  ;;  %v7013_v54 = vld [vmem:[#allocation53_spill] sm:$0xff] }
 0x385   :  { %v3956_v44 = vpop.eup %3955  ;;  %v1945_v34 = vmul.f32 %v3954_v17, %v1905_v16  ;;  %v1911_v49 = vadd.f32 0.5, %v1903_v55  ;;  %v7014_v16 = vld [vmem:[#allocation54_spill] sm:$0xff]  ;;  %v7015_v17 = vld [vmem:[#allocation55_spill] sm:$0xff]  ;;  %v7016_v30 = vld [vmem:[#allocation56_spill] sm:$0xff] }
 0x386   :  { %v3958_v20 = vpop.eup %3957  ;;  %v1946_v59 = vmul.f32 %v3956_v44, %v1906_v14  ;;  %1952 = vst [vmem:[#allocation14 + $0x3] sm:$0x1] %v1944_v22  ;;  %v7017_v14 = vld [vmem:[#allocation57_spill] sm:$0xff]  ;;  %v7019_v44 = vld [vmem:[#allocation59_spill] sm:$0xff]  ;;  %v7020_v55 = vld [vmem:[#allocation60_spill] sm:$0xff] }
 0x387   :  { %v3960_v25 = vpop.eup %3959  ;;  %v1947_v37 = vmul.f32 %v3958_v20, %v1907_v38  ;;  %1953 = vst [vmem:[#allocation14 + $0xb] sm:$0x1] %v1945_v34  ;;  %v7021_v38 = vld [vmem:[#allocation61_spill] sm:$0xff]  ;;  %v7023_v20 = vld [vmem:[#allocation63_spill] sm:$0xff] }
 0x388   :  { %v3962_v1 = vpop.eup %3961  ;;  %v1948_v5 = vmul.f32 %v3960_v25, %v1908_v48  ;;  %1954 = vst [vmem:[#allocation14 + $0x13] sm:$0x1] %v1946_v59  ;;  %v7024_v48 = vld [vmem:[#allocation64_spill] sm:$0xff]  ;;  %v7026_v25 = vld [vmem:[#allocation66_spill] sm:$0xff] }
 0x389   :  { %v3964_v23 = vpop.eup %3963  ;;  %v1949_v15 = vmul.f32 %v3962_v1, %v1909_v31  ;;  %1955 = vst [vmem:[#allocation14 + $0x1b] sm:$0x1] %v1947_v37  ;;  %v7027_v31 = vld [vmem:[#allocation67_spill] sm:$0xff]  ;;  %v7029_v1 = vld [vmem:[#allocation69_spill] sm:$0xff] }
 0x38a   :  { %v3966_v18 = vpop.eup %3965  ;;  %v1950_v61 = vmul.f32 %v3964_v23, %v1910_v53  ;;  %1956 = vst [vmem:[#allocation14 + $0x23] sm:$0x1] %v1948_v5  ;;  %v7030_v53 = vld [vmem:[#allocation70_spill] sm:$0xff]  ;;  %v7032_v23 = vld [vmem:[#allocation72_spill] sm:$0xff] }
 0x38b   :  { %v1951_v26 = vmul.f32 %v3966_v18, %v1911_v49  ;;  %1957 = vst [vmem:[#allocation14 + $0x2b] sm:$0x1] %v1949_v15  ;;  %v7033_v49 = vld [vmem:[#allocation73_spill] sm:$0xff] }
 0x38c   :  { %1958 = vst [vmem:[#allocation14 + $0x33] sm:$0x1] %v1950_v61 }
 0x38d   :  { %1959 = vst [vmem:[#allocation14 + $0x3b] sm:$0x1] %v1951_v26 }
 0x38e   :  { %1984 = vst [vmem:[#allocation1] ss:$9 sm:$0xff] %v1944_v22  ;;  %v7018_v22 = vld [vmem:[#allocation58_spill] sm:$0xff] }
 0x38f   :  { %1986 = vst [vmem:[#allocation1 + $0x1] ss:$9 sm:$0xff] %v1945_v34  ;;  %v7022_v34 = vld [vmem:[#allocation62_spill] sm:$0xff] }
 0x390   :  { %1988 = vst [vmem:[#allocation1 + $0x2] ss:$9 sm:$0xff] %v1946_v59  ;;  %v7025_v59 = vld [vmem:[#allocation65_spill] sm:$0xff] }
 0x391   :  { %1990 = vst [vmem:[#allocation1 + $0x3] ss:$9 sm:$0xff] %v1947_v37  ;;  %v7028_v37 = vld [vmem:[#allocation68_spill] sm:$0xff] }
 0x392   :  { %1992 = vst [vmem:[#allocation1 + $0x4] ss:$9 sm:$0xff] %v1948_v5  ;;  %v7031_v5 = vld [vmem:[#allocation71_spill] sm:$0xff] }
 0x393   :  { %1994 = vst [vmem:[#allocation1 + $0x5] ss:$9 sm:$0xff] %v1949_v15 }
 0x394   :  { %1996 = vst [vmem:[#allocation1 + $0x6] ss:$9 sm:$0xff] %v1950_v61 }
 0x395   :  { %1998 = vst [vmem:[#allocation1 + $0x7] ss:$9 sm:$0xff] %v1951_v26 }
 0x39c   :  { %v1999_v19 = vld [vmem:[#allocation1] sm:$0xff] }
 0x39d   :  { %2017 = vmatmul.f32.vlgmr.msrb.gmra.mxu0 %v1999_v19  ;;  %2037 = vmatmul.f32.vlgmr.msrb.gmra.mxu1 %v1999_v19 }
 0x39e   :  { %2057 = vmatmul.f32.vlgmr.msrb.gmra.mxu2 %v1999_v19  ;;  %2077 = vmatmul.f32.vlgmr.msrb.gmra.mxu3 %v1999_v19 }
 0x39f   :  { %2767 = vmatpush.msrb.mxu0 %v5795_v60  ;;  %2787 = vmatpush.msrb.mxu1 %v5798_v10  ;;  %v6983_v60 = vld [vmem:[#allocation23_spill] sm:$0xff]  ;;  %v6984_v10 = vld [vmem:[#allocation24_spill] sm:$0xff] }
 0x3a0   :  { %2807 = vmatpush.msrb.mxu2 %v5801_v62  ;;  %2827 = vmatpush.msrb.mxu3 %v5804_v63  ;;  %v6985_v62 = vld [vmem:[#allocation25_spill] sm:$0xff]  ;;  %v6986_v63 = vld [vmem:[#allocation26_spill] sm:$0xff] }
 0x3a1   :  { %2768 = vmatpush.msrb.mxu0 %v5807_v35  ;;  %2788 = vmatpush.msrb.mxu1 %v5810_v3  ;;  %v6987_v35 = vld [vmem:[#allocation27_spill] sm:$0xff]  ;;  %v6988_v3 = vld [vmem:[#allocation28_spill] sm:$0xff] }
 0x3a2   :  { %2808 = vmatpush.msrb.mxu2 %v5813_v4  ;;  %2828 = vmatpush.msrb.mxu3 %v5816_v43  ;;  %v6989_v4 = vld [vmem:[#allocation29_spill] sm:$0xff]  ;;  %v6990_v43 = vld [vmem:[#allocation30_spill] sm:$0xff] }
 0x3a3   :  { %2769 = vmatpush.msrb.mxu0 %v5819_v46  ;;  %2789 = vmatpush.msrb.mxu1 %v5822_v45  ;;  %v6991_v46 = vld [vmem:[#allocation31_spill] sm:$0xff]  ;;  %v6992_v45 = vld [vmem:[#allocation32_spill] sm:$0xff] }
 0x3a4   :  { %2809 = vmatpush.msrb.mxu2 %v5825_v47  ;;  %2829 = vmatpush.msrb.mxu3 %v5828_v52  ;;  %v6993_v47 = vld [vmem:[#allocation33_spill] sm:$0xff]  ;;  %v6994_v52 = vld [vmem:[#allocation34_spill] sm:$0xff] }
 0x3a5   :  { %2770 = vmatpush.msrb.mxu0 %v5831_v56  ;;  %2790 = vmatpush.msrb.mxu1 %v6983_v60  ;;  %v6995_v56 = vld [vmem:[#allocation35_spill] sm:$0xff] }
 0x3a6   :  { %2810 = vmatpush.msrb.mxu2 %v6984_v10  ;;  %2830 = vmatpush.msrb.mxu3 %v6985_v62 }
 0x3a7   :  { %2771 = vmatpush.msrb.mxu0 %v6986_v63  ;;  %2791 = vmatpush.msrb.mxu1 %v6987_v35 }
 0x3a8   :  { %2811 = vmatpush.msrb.mxu2 %v6988_v3  ;;  %2831 = vmatpush.msrb.mxu3 %v6989_v4 }
 0x3a9   :  { %2772 = vmatpush.msrb.mxu0 %v6990_v43  ;;  %2792 = vmatpush.msrb.mxu1 %v6991_v46 }
 0x3aa   :  { %2812 = vmatpush.msrb.mxu2 %v6992_v45  ;;  %2832 = vmatpush.msrb.mxu3 %v6993_v47 }
 0x3ab   :  { %2773 = vmatpush.msrb.mxu0 %v6994_v52  ;;  %2793 = vmatpush.msrb.mxu1 %v6995_v56 }
 0x3ac   :  { %2813 = vmatpush.msrb.mxu2 %v6996_v6  ;;  %2833 = vmatpush.msrb.mxu3 %v6997_v29 }
 0x3ad   :  { %2774 = vmatpush.msrb.mxu0 %v6998_v8  ;;  %2794 = vmatpush.msrb.mxu1 %v6999_v36 }
 0x3ae   :  { %2814 = vmatpush.msrb.mxu2 %v7000_v2  ;;  %2834 = vmatpush.msrb.mxu3 %v7001_v24  ;;  %v1961_v24 = vld [vmem:[#allocation2 + $0x4] ss:$8 sm:$0xf] }
 0x3af   :  { %2775 = vmatpush.msrb.mxu0 %v7002_v7  ;;  %2795 = vmatpush.msrb.mxu1 %v7003_v41 }
 0x3b0   :  { %2815 = vmatpush.msrb.mxu2 %v7004_v27  ;;  %2835 = vmatpush.msrb.mxu3 %v7005_v42 }
 0x3b1   :  { %2776 = vmatpush.msrb.mxu0 %v7006_v39  ;;  %2796 = vmatpush.msrb.mxu1 %v7007_v51  ;;  %v1963_v39 = vld [vmem:[#allocation2 + $0x24] ss:$8 sm:$0xf] }
 0x3b2   :  { %2816 = vmatpush.msrb.mxu2 %v7008_v12  ;;  %2836 = vmatpush.msrb.mxu3 %v7009_v21  ;;  %v1965_v51 = vld [vmem:[#allocation2 + $0x44] ss:$8 sm:$0xf] }
 0x3b3   :  { %2777 = vmatpush.msrb.mxu0 %v7010_v33  ;;  %2797 = vmatpush.msrb.mxu1 %v7011_v11  ;;  %v1967_v12 = vld [vmem:[#allocation2 + $0x64] ss:$8 sm:$0xf] }
 0x3b4   :  { %2817 = vmatpush.msrb.mxu2 %v7012_v57  ;;  %2837 = vmatpush.msrb.mxu3 %v7013_v54  ;;  %v1969_v54 = vld [vmem:[#allocation2 + $0x84] ss:$8 sm:$0xf] }
 0x3b5   :  { %2778 = vmatpush.msrb.mxu0 %v7014_v16  ;;  %2798 = vmatpush.msrb.mxu1 %v7015_v17 }
 0x3b6   :  { %2818 = vmatpush.msrb.mxu2 %v7016_v30  ;;  %2838 = vmatpush.msrb.mxu3 %v7017_v14 }
 0x3b7   :  { %2779 = vmatpush.msrb.mxu0 %v7018_v22  ;;  %2799 = vmatpush.msrb.mxu1 %v7019_v44  ;;  %v1971_v22 = vld [vmem:[#allocation2 + $0xa4] ss:$8 sm:$0xf] }
 0x3b8   :  { %2819 = vmatpush.msrb.mxu2 %v7020_v55  ;;  %2839 = vmatpush.msrb.mxu3 %v7021_v38 }
 0x3b9   :  { %2780 = vmatpush.msrb.mxu0 %v7022_v34  ;;  %2800 = vmatpush.msrb.mxu1 %v7023_v20  ;;  %v1973_v20 = vld [vmem:[#allocation2 + $0xc4] ss:$8 sm:$0xf] }
 0x3ba   :  { %2820 = vmatpush.msrb.mxu2 %v7024_v48  ;;  %2840 = vmatpush.msrb.mxu3 %v7025_v59  ;;  %v1975_v48 = vld [vmem:[#allocation2 + $0xe4] ss:$8 sm:$0xf] }
 0x3bb   :  { %2781 = vmatpush.msrb.mxu0 %v7026_v25  ;;  %2801 = vmatpush.msrb.mxu1 %v7027_v31 }
 0x3bc   :  { %2821 = vmatpush.msrb.mxu2 %v7028_v37  ;;  %2841 = vmatpush.msrb.mxu3 %v7029_v1 }
 0x3bd   :  { %2782 = vmatpush.msrb.mxu0 %v7030_v53  ;;  %2802 = vmatpush.msrb.mxu1 %v7031_v5 }
 0x3be   :  { %2822 = vmatpush.msrb.mxu2 %v7032_v23  ;;  %2842 = vmatpush.msrb.mxu3 %v7033_v49 }
 0x41a   :  { %v2038_v15 = vpop.f32.mrf.mxu1  ;;  %v2018_v61 = vpop.f32.mrf.mxu0 }
 0x41b   :  { %v2085_v18 = vrot.slane %v2038_v15, 7 }
 0x41d   :  { %v2088_v26 = vsel %vm525_vm1, %v2018_v61, %v2085_v18  ;;  %v2091_v19 = vsel %vm531_vm4, %v2018_v61, %v2085_v18  ;;  %v2095_v62 = vsel %vm527_vm2, %v2018_v61, %v2085_v18  ;;  %v2099_v63 = vsel %vm533_vm5, %v2018_v61, %v2085_v18 }
 0x41e   :  { %v2103_v4 = vsel %vm539_vm7, %v2018_v61, %v2085_v18  ;;  %v2107_v43 = vsel %vm545_vm9, %v2018_v61, %v2085_v18  ;;  %v2111_v46 = vsel %vm551_vm11, %v2018_v61, %v2085_v18  ;;  %v2115_v45 = vsel %vm557_vm13, %v2085_v18, %v2018_v61 }
 0x421   :  { %v2058_v60 = vpop.f32.mrf.mxu2  ;;  %v2078_v10 = vpop.f32.mrf.mxu3 }
 0x422   :  { %v2086_v35 = vrot.slane %v2058_v60, 6  ;;  %v2087_v3 = vrot.slane %v2078_v10, 5 }
 0x424   :  { %v2089_v47 = vsel %vm527_vm2, %v2086_v35, %v2087_v3  ;;  %v2092_v52 = vsel %vm533_vm5, %v2086_v35, %v2087_v3  ;;  %v2096_v56 = vsel %vm539_vm7, %v2086_v35, %v2087_v3  ;;  %v2100_v6 = vsel %vm545_vm9, %v2086_v35, %v2087_v3 }
 0x425   :  { %v2090_v29 = vsel %vm529_vm3, %v2088_v26, %v2089_v47  ;;  %v2093_v8 = vsel %vm535_vm6, %v2091_v19, %v2092_v52  ;;  %v2097_v36 = vsel %vm541_vm8, %v2095_v62, %v2096_v56  ;;  %v2101_v2 = vsel %vm547_vm10, %v2099_v63, %v2100_v6 }
 0x426   :  { %v2094_v7 = vrot.slane %v2093_v8, 1  ;;  %v2098_v41 = vrot.slane %v2097_v36, 2  ;;  %v2102_v27 = vrot.slane %v2101_v2, 3  ;;  %v2104_v42 = vsel %vm551_vm11, %v2086_v35, %v2087_v3 }
 0x427   :  { %v2105_v21 = vsel %vm553_vm12, %v2103_v4, %v2104_v42  ;;  %v2108_v33 = vsel %vm557_vm13, %v2087_v3, %v2086_v35  ;;  %v2112_v11 = vsel %vm525_vm1, %v2086_v35, %v2087_v3  ;;  %v2116_v57 = vsel %vm531_vm4, %v2086_v35, %v2087_v3 }
 0x428   :  { %v2106_v16 = vrot.slane %v2105_v21, 4  ;;  %v2109_v17 = vsel %vm559_vm14, %v2107_v43, %v2108_v33  ;;  %v2113_v30 = vsel %vm564_vm15, %v2112_v11, %v2111_v46  ;;  %v2117_v14 = vsel %vm569_vm0, %v2116_v57, %v2115_v45 }
 0x429   :  { %v2110_v44 = vrot.slane %v2109_v17, 5  ;;  %v2114_v55 = vrot.slane %v2113_v30, 6  ;;  %v2118_v38 = vrot.slane %v2117_v14, 7  ;;  %v6203_v34 = vadd.f32 %v2090_v29, %v1961_v24 }
 0x42a   :  { %v6205_v59 = vadd.f32 %v2094_v7, %v1963_v39  ;;  %v6207_v25 = vadd.f32 %v2098_v41, %v1965_v51  ;;  %v6209_v31 = vadd.f32 %v2102_v27, %v1967_v12  ;;  %v6211_v37 = vadd.f32 %v2106_v16, %v1969_v54 }
 0x42b   :  { %v6213_v1 = vadd.f32 %v2110_v44, %v1971_v22  ;;  %v6215_v53 = vadd.f32 %v2114_v55, %v1973_v20  ;;  %v6217_v5 = vadd.f32 %v2118_v38, %v1975_v48  ;;  %v2135_v23 = vmul.f32 0.5, %v6203_v34 }
 0x42c   :  { %v2136_v49 = vmul.f32 0.5, %v6205_v59  ;;  %v2137_v15 = vmul.f32 0.5, %v6207_v25  ;;  %v2138_v18 = vmul.f32 0.5, %v6209_v31  ;;  %v2139_v61 = vmul.f32 0.5, %v6211_v37 }
 0x42d   :  { %3967 = vtanh.f32 %v2135_v23  ;;  %v2140_v26 = vmul.f32 0.5, %v6213_v1  ;;  %v2175_v19 = vrot.slane %v6203_v34, 1  ;;  %v2176_v60 = vrot.slane %v6205_v59, 1 }
 0x42e   :  { %3969 = vtanh.f32 %v2136_v49  ;;  %v2141_v10 = vmul.f32 0.5, %v6215_v53  ;;  %v2142_v62 = vmul.f32 0.5, %v6217_v5  ;;  %v2177_v63 = vrot.slane %v6207_v25, 1 }
 0x42f   :  { %3971 = vtanh.f32 %v2137_v15  ;;  %v2178_v35 = vrot.slane %v6209_v31, 1  ;;  %v2179_v3 = vrot.slane %v6211_v37, 1  ;;  %v2180_v4 = vrot.slane %v6213_v1, 1 }
 0x430   :  { %3973 = vtanh.f32 %v2138_v18  ;;  %v2181_v43 = vrot.slane %v6215_v53, 1  ;;  %v2182_v46 = vrot.slane %v6217_v5, 1  ;;  %v2191_v45 = vmul.f32 0.5, %v2175_v19 }
 0x431   :  { %3975 = vtanh.f32 %v2139_v61  ;;  %v2192_v47 = vmul.f32 0.5, %v2176_v60  ;;  %v2193_v56 = vmul.f32 0.5, %v2177_v63  ;;  %v2194_v29 = vmul.f32 0.5, %v2178_v35 }
 0x432   :  { %3977 = vtanh.f32 %v2140_v26  ;;  %v2195_v8 = vmul.f32 0.5, %v2179_v3  ;;  %v2196_v36 = vmul.f32 0.5, %v2180_v4  ;;  %v2197_v7 = vmul.f32 0.5, %v2181_v43 }
 0x433   :  { %v3968_v52 = vpop.eup %3967  ;;  %3979 = vtanh.f32 %v2141_v10  ;;  %v2198_v41 = vmul.f32 0.5, %v2182_v46  ;;  %v2223_v39 = vrot.slane %v6203_v34, 2  ;;  %v2224_v51 = vrot.slane %v6205_v59, 2 }
 0x434   :  { %v3970_v6 = vpop.eup %3969  ;;  %3981 = vtanh.f32 %v2142_v62  ;;  %v2151_v24 = vmul.f32 0.5, %v3968_v52  ;;  %v2225_v33 = vrot.slane %v6207_v25, 2  ;;  %v2226_v11 = vrot.slane %v6209_v31, 2 }
 0x435   :  { %v3972_v2 = vpop.eup %3971  ;;  %3983 = vtanh.f32 %v2191_v45  ;;  %v2152_v42 = vmul.f32 0.5, %v3970_v6  ;;  %v2227_v16 = vrot.slane %v6211_v37, 2  ;;  %v2228_v17 = vrot.slane %v6213_v1, 2 }
 0x436   :  { %v3974_v27 = vpop.eup %3973  ;;  %3985 = vtanh.f32 %v2192_v47  ;;  %v2153_v21 = vmul.f32 0.5, %v3972_v2  ;;  %v6241_v44 = vadd.f32 0.5, %v2151_v24  ;;  %v2229_v48 = vrot.slane %v6215_v53, 2 }
 0x437   :  { %v3976_v12 = vpop.eup %3975  ;;  %3987 = vtanh.f32 %v2193_v56  ;;  %v2154_v54 = vmul.f32 0.5, %v3974_v27  ;;  %v6243_v20 = vadd.f32 0.5, %v2152_v42  ;;  %v2230_v18 = vrot.slane %v6217_v5, 2 }
 0x438   :  { %v3978_v57 = vpop.eup %3977  ;;  %3989 = vtanh.f32 %v2194_v29  ;;  %v2155_v14 = vmul.f32 0.5, %v3976_v12  ;;  %v6246_v15 = vadd.f32 0.5, %v2153_v21  ;;  %v2247_v60 = vrot.slane %v6203_v34, 3 }
 0x439   :  { %v3980_v30 = vpop.eup %3979  ;;  %v2156_v22 = vmul.f32 0.5, %v3978_v57  ;;  %3991 = vtanh.f32 %v2195_v8  ;;  %v6249_v26 = vadd.f32 0.5, %v2154_v54  ;;  %v2248_v35 = vrot.slane %v6205_v59, 3 }
 0x43a   :  { %v3982_v55 = vpop.eup %3981  ;;  %v2157_v38 = vmul.f32 0.5, %v3980_v30  ;;  %3993 = vtanh.f32 %v2196_v36  ;;  %v6252_v62 = vadd.f32 0.5, %v2155_v14  ;;  %v2249_v3 = vrot.slane %v6207_v25, 3 }
 0x43b   :  { %v3984_v23 = vpop.eup %3983  ;;  %v2158_v49 = vmul.f32 0.5, %v3982_v55  ;;  %3995 = vtanh.f32 %v2197_v7  ;;  %v6254_v63 = vadd.f32 0.5, %v2156_v22  ;;  %v2250_v45 = vrot.slane %v6209_v31, 3 }
 0x43c   :  { %v3986_v61 = vpop.eup %3985  ;;  %3997 = vtanh.f32 %v2198_v41  ;;  %v2207_v19 = vmul.f32 0.5, %v3984_v23  ;;  %v6258_v43 = vadd.f32 0.5, %v2157_v38  ;;  %v2251_v34 = vrot.slane %v6211_v37, 3 }
 0x43d   :  { %v3988_v10 = vpop.eup %3987  ;;  %v2208_v46 = vmul.f32 0.5, %v3986_v61  ;;  %3999 = vtanh.f32 %v2223_v39  ;;  %v6261_v52 = vadd.f32 0.5, %v2158_v49  ;;  %v2252_v56 = vrot.slane %v6213_v1, 3 }
 0x43e   :  { %v3990_v4 = vpop.eup %3989  ;;  %4001 = vtanh.f32 %v2224_v51  ;;  %v2209_v29 = vmul.f32 0.5, %v3988_v10  ;;  %v2215_v8 = vadd.f32 0.5, %v2207_v19  ;;  %v2253_v24 = vrot.slane %v6215_v53, 3 }
 0x43f   :  { %v3992_v47 = vpop.eup %3991  ;;  %v2210_v59 = vmul.f32 0.5, %v3990_v4  ;;  %4003 = vtanh.f32 %v2225_v33  ;;  %v2216_v41 = vadd.f32 0.5, %v2208_v46  ;;  %v2263_v27 = vmul.f32 0.5, %v2247_v60 }
 0x440   :  { %v3994_v6 = vpop.eup %3993  ;;  %v2211_v36 = vmul.f32 0.5, %v3992_v47  ;;  %4005 = vtanh.f32 %v2226_v11  ;;  %v2254_v37 = vrot.slane %v6217_v5, 3  ;;  %v2264_v1 = vmul.f32 0.5, %v2248_v35 }
 0x441   :  { %v3996_v25 = vpop.eup %3995  ;;  %v2212_v2 = vmul.f32 0.5, %v3994_v6  ;;  %4007 = vtanh.f32 %v2227_v16  ;;  %v2217_v51 = vadd.f32 0.5, %v2209_v29  ;;  %v2218_v12 = vadd.f32 0.5, %v2210_v59 }
 0x442   :  { %v3998_v31 = vpop.eup %3997  ;;  %v2213_v7 = vmul.f32 0.5, %v3996_v25  ;;  %4009 = vtanh.f32 %v2228_v17  ;;  %v2265_v21 = vmul.f32 0.5, %v2249_v3  ;;  %v2219_v57 = vadd.f32 0.5, %v2211_v36 }
 0x443   :  { %v2214_v42 = vmul.f32 0.5, %v3998_v31  ;;  %v4000_v39 = vpop.eup %3999  ;;  %4011 = vtanh.f32 %v2229_v48  ;;  %v2220_v11 = vadd.f32 0.5, %v2212_v2  ;;  %v2266_v53 = vmul.f32 0.5, %v2250_v45 }
 0x444   :  { %v4002_v33 = vpop.eup %4001  ;;  %4013 = vtanh.f32 %v2230_v18  ;;  %v2221_v30 = vadd.f32 0.5, %v2213_v7  ;;  %v2267_v14 = vmul.f32 0.5, %v2251_v34  ;;  %v2268_v16 = vmul.f32 0.5, %v2252_v56 }
 0x445   :  { %v4004_v54 = vpop.eup %4003  ;;  %4015 = vtanh.f32 %v2263_v27  ;;  %v2222_v17 = vadd.f32 0.5, %v2214_v42  ;;  %v2295_v5 = vmul.f32 %v2215_v8, %v6085_v32  ;;  %v2296_v55 = vmul.f32 %v2216_v41, %v6087_v0 }
 0x446   :  { %v4006_v22 = vpop.eup %4005  ;;  %4017 = vtanh.f32 %v2264_v1  ;;  %v2269_v48 = vmul.f32 0.5, %v2253_v24  ;;  %v2270_v23 = vmul.f32 0.5, %v2254_v37  ;;  %v2297_v49 = vmul.f32 %v2217_v51, %v6091_v40 }
 0x447   :  { %v4008_v38 = vpop.eup %4007  ;;  %4019 = vtanh.f32 %v2265_v21  ;;  %v2298_v61 = vmul.f32 %v2218_v12, %v6095_v13  ;;  %v2303_v19 = vmul.f32 %v4000_v39, %v6241_v44  ;;  %v2304_v60 = vmul.f32 %v4002_v33, %v6243_v20 }
 0x448   :  { %v4010_v18 = vpop.eup %4009  ;;  %4021 = vtanh.f32 %v2266_v53  ;;  %v2299_v32 = vmul.f32 %v2219_v57, %v6098_v28  ;;  %v2300_v0 = vmul.f32 %v2220_v11, %v6102_v58  ;;  %v2305_v35 = vmul.f32 %v4004_v54, %v6246_v15 }
 0x449   :  { %v4012_v10 = vpop.eup %4011  ;;  %4023 = vtanh.f32 %v2267_v14  ;;  %v2306_v40 = vmul.f32 %v4006_v22, %v6249_v26  ;;  %v6277_v4 = vadd.f32 %v2303_v19, %v2295_v5  ;;  %v6279_v46 = vadd.f32 %v2304_v60, %v2296_v55  ;;  %v4416_v19 = vld [vmem:[#allocation13 + $0x1e8] sm:$0xff]  ;;  %v4417_v60 = vld [vmem:[#allocation13 + $0x1f0] sm:$0xff] }
 0x44a   :  { %v4014_v3 = vpop.eup %4013  ;;  %4025 = vtanh.f32 %v2268_v16  ;;  %v2301_v44 = vmul.f32 %v2221_v30, %v6105_v50  ;;  %v2307_v20 = vmul.f32 %v4008_v38, %v6252_v62  ;;  %v6283_v45 = vadd.f32 %v2305_v35, %v2297_v49  ;;  %v4421_v35 = vld [vmem:[#allocation13 + $0x1d0] sm:$0xff] }
 0x44b   :  { %v4016_v13 = vpop.eup %4015  ;;  %4027 = vtanh.f32 %v2269_v48  ;;  %v2302_v58 = vmul.f32 %v2222_v17, %v6108_v9  ;;  %v2308_v15 = vmul.f32 %v4010_v18, %v6254_v63  ;;  %v6287_v47 = vadd.f32 %v2306_v40, %v2298_v61  ;;  %v4415_v61 = vld [vmem:[#allocation13 + $0x1e0] sm:$0xff] }
 0x44c   :  { %v4018_v28 = vpop.eup %4017  ;;  %4029 = vtanh.f32 %v2270_v23  ;;  %v2309_v34 = vmul.f32 %v4012_v10, %v6258_v43  ;;  %v6290_v56 = vadd.f32 %v2307_v20, %v2299_v32  ;;  %v2279_v6 = vmul.f32 0.5, %v4016_v13  ;;  %v4418_v10 = vld [vmem:[#allocation13 + $0x1f8] sm:$0xff]  ;;  %v4419_v32 = vld [vmem:[#allocation13 + $0x1c0] sm:$0xff]  ;;  %v4424_v13 = vld [vmem:[#allocation13 + $0x1a8] sm:$0xff] }
 0x44d   :  { %v4020_v26 = vpop.eup %4019  ;;  %4031 = vtanh.f32 %v6277_v4  ;;  %v2310_v62 = vmul.f32 %v4014_v3, %v6261_v52  ;;  %v6294_v29 = vadd.f32 %v2308_v15, %v2300_v0  ;;  %v2280_v59 = vmul.f32 0.5, %v4018_v28  ;;  %v4420_v0 = vld [vmem:[#allocation13 + $0x1c8] sm:$0xff]  ;;  %v4422_v3 = vld [vmem:[#allocation13 + $0x1d8] sm:$0xff]  ;;  %v4423_v40 = vld [vmem:[#allocation13 + $0x1a0] sm:$0xff] }
 0x44e   :  { %v4022_v50 = vpop.eup %4021  ;;  %4033 = vtanh.f32 %v6279_v46  ;;  %v6297_v63 = vadd.f32 %v2309_v34, %v2301_v44  ;;  %v2281_v43 = vmul.f32 0.5, %v4020_v26  ;;  %v2287_v31 = vadd.f32 0.5, %v2279_v6  ;;  %v4425_v44 = vld [vmem:[#allocation13 + $0x1b0] sm:$0xff]  ;;  %v4426_v20 = vld [vmem:[#allocation13 + $0x1b8] sm:$0xff]  ;;  %v4427_v28 = vld [vmem:[#allocation13 + $0x180] sm:$0xff] }
 0x44f   :  { %v4024_v9 = vpop.eup %4023  ;;  %4035 = vtanh.f32 %v6283_v45  ;;  %v6300_v25 = vadd.f32 %v2310_v62, %v2302_v58  ;;  %v2282_v2 = vmul.f32 0.5, %v4022_v50  ;;  %v2288_v27 = vadd.f32 0.5, %v2280_v59  ;;  %v4428_v58 = vld [vmem:[#allocation13 + $0x188] sm:$0xff]  ;;  %v4429_v15 = vld [vmem:[#allocation13 + $0x190] sm:$0xff]  ;;  %v4430_v26 = vld [vmem:[#allocation13 + $0x198] sm:$0xff] }
 0x450   :  { %v4026_v8 = vpop.eup %4025  ;;  %4037 = vtanh.f32 %v6287_v47  ;;  %v2283_v24 = vmul.f32 0.5, %v4024_v9  ;;  %v2289_v1 = vadd.f32 0.5, %v2281_v43  ;;  %v4431_v34 = vld [vmem:[#allocation13 + $0x160] sm:$0xff]  ;;  %v4432_v50 = vld [vmem:[#allocation13 + $0x168] sm:$0xff]  ;;  %v4433_v6 = vld [vmem:[#allocation13 + $0x170] sm:$0xff] }
 0x451   :  { %v4028_v36 = vpop.eup %4027  ;;  %4039 = vtanh.f32 %v6290_v56  ;;  %v2284_v41 = vmul.f32 0.5, %v4026_v8  ;;  %v2290_v21 = vadd.f32 0.5, %v2282_v2  ;;  %v4434_v62 = vld [vmem:[#allocation13 + $0x178] sm:$0xff]  ;;  %v4435_v9 = vld [vmem:[#allocation13 + $0x140] sm:$0xff]  ;;  %v4436_v59 = vld [vmem:[#allocation13 + $0x148] sm:$0xff] }
 0x452   :  { %v4030_v52 = vpop.eup %4029  ;;  %4041 = vtanh.f32 %v6294_v29  ;;  %v2285_v37 = vmul.f32 0.5, %v4028_v36  ;;  %v2291_v11 = vadd.f32 0.5, %v2283_v24  ;;  %v4437_v8 = vld [vmem:[#allocation13 + $0x150] sm:$0xff]  ;;  %v4438_v43 = vld [vmem:[#allocation13 + $0x158] sm:$0xff]  ;;  %v4439_v36 = vld [vmem:[#allocation13 + $0x120] sm:$0xff] }
 0x453   :  { %v4032_v7 = vpop.eup %4031  ;;  %4043 = vtanh.f32 %v6297_v63  ;;  %v2286_v12 = vmul.f32 0.5, %v4030_v52  ;;  %v2292_v30 = vadd.f32 0.5, %v2284_v41  ;;  %v4440_v2 = vld [vmem:[#allocation13 + $0x128] sm:$0xff]  ;;  %v4441_v52 = vld [vmem:[#allocation13 + $0x130] sm:$0xff]  ;;  %v4442_v24 = vld [vmem:[#allocation13 + $0x138] sm:$0xff] }
 0x454   :  { %v4034_v42 = vpop.eup %4033  ;;  %4045 = vtanh.f32 %v6300_v25  ;;  %v2327_v39 = vmul.f32 %v4032_v7, %v2287_v31  ;;  %v2293_v22 = vadd.f32 0.5, %v2285_v37  ;;  %v4443_v31 = vld [vmem:[#allocation13 + $0x100] sm:$0xff]  ;;  %v4444_v7 = vld [vmem:[#allocation13 + $0x108] sm:$0xff]  ;;  %v4445_v41 = vld [vmem:[#allocation13 + $0x110] sm:$0xff] }
 0x455   :  { %v4036_v51 = vpop.eup %4035  ;;  %v2328_v33 = vmul.f32 %v4034_v42, %v2288_v27  ;;  %v2294_v55 = vadd.f32 0.5, %v2286_v12  ;;  %v4446_v27 = vld [vmem:[#allocation13 + $0x118] sm:$0xff]  ;;  %v4447_v42 = vld [vmem:[#allocation13 + $0xe0] sm:$0xff]  ;;  %v4448_v37 = vld [vmem:[#allocation13 + $0xe8] sm:$0xff] }
 0x456   :  { %v4038_v57 = vpop.eup %4037  ;;  %v2329_v53 = vmul.f32 %v4036_v51, %v2289_v1  ;;  %2335 = vst [vmem:[#allocation14 + $0x4] sm:$0x1] %v2327_v39  ;;  %v4449_v1 = vld [vmem:[#allocation13 + $0xf0] sm:$0xff]  ;;  %v4451_v51 = vld [vmem:[#allocation13 + $0xc0] sm:$0xff]  ;;  %v4452_v12 = vld [vmem:[#allocation13 + $0xc8] sm:$0xff] }
 0x457   :  { %v4040_v54 = vpop.eup %4039  ;;  %v2330_v14 = vmul.f32 %v4038_v57, %v2290_v21  ;;  %2336 = vst [vmem:[#allocation14 + $0xc] sm:$0x1] %v2328_v33  ;;  %v4453_v21 = vld [vmem:[#allocation13 + $0xd0] sm:$0xff]  ;;  %v4455_v57 = vld [vmem:[#allocation13 + $0xa0] sm:$0xff] }
 0x458   :  { %v4042_v16 = vpop.eup %4041  ;;  %v2331_v17 = vmul.f32 %v4040_v54, %v2291_v11  ;;  %2337 = vst [vmem:[#allocation14 + $0x14] sm:$0x1] %v2329_v53  ;;  %v4456_v11 = vld [vmem:[#allocation13 + $0xa8] sm:$0xff]  ;;  %v4458_v54 = vld [vmem:[#allocation13 + $0xb8] sm:$0xff] }
 0x459   :  { %v4044_v5 = vpop.eup %4043  ;;  %v2332_v38 = vmul.f32 %v4042_v16, %v2292_v30  ;;  %2338 = vst [vmem:[#allocation14 + $0x1c] sm:$0x1] %v2330_v14  ;;  %v4459_v30 = vld [vmem:[#allocation13 + $0x80] sm:$0xff]  ;;  %v4461_v16 = vld [vmem:[#allocation13 + $0x90] sm:$0xff] }
 0x45a   :  { %v4046_v48 = vpop.eup %4045  ;;  %v2333_v23 = vmul.f32 %v4044_v5, %v2293_v22  ;;  %2339 = vst [vmem:[#allocation14 + $0x24] sm:$0x1] %v2331_v17  ;;  %v4462_v22 = vld [vmem:[#allocation13 + $0x98] sm:$0xff]  ;;  %v4464_v5 = vld [vmem:[#allocation13 + $0x68] sm:$0xff] }
 0x45b   :  { %v2334_v49 = vmul.f32 %v4046_v48, %v2294_v55  ;;  %2340 = vst [vmem:[#allocation14 + $0x2c] sm:$0x1] %v2332_v38  ;;  %v4465_v55 = vld [vmem:[#allocation13 + $0x70] sm:$0xff]  ;;  %v4467_v48 = vld [vmem:[#allocation13 + $0x40] sm:$0xff] }
 0x45c   :  { %2341 = vst [vmem:[#allocation14 + $0x34] sm:$0x1] %v2333_v23 }
 0x45d   :  { %2342 = vst [vmem:[#allocation14 + $0x3c] sm:$0x1] %v2334_v49 }
 0x45e   :  { %2367 = vst [vmem:[#allocation1] ss:$9 sm:$0xff] %v2327_v39  ;;  %v4450_v39 = vld [vmem:[#allocation13 + $0xf8] sm:$0xff] }
 0x45f   :  { %2369 = vst [vmem:[#allocation1 + $0x1] ss:$9 sm:$0xff] %v2328_v33  ;;  %v4454_v33 = vld [vmem:[#allocation13 + $0xd8] sm:$0xff] }
 0x460   :  { %2371 = vst [vmem:[#allocation1 + $0x2] ss:$9 sm:$0xff] %v2329_v53  ;;  %v4457_v53 = vld [vmem:[#allocation13 + $0xb0] sm:$0xff] }
 0x461   :  { %2373 = vst [vmem:[#allocation1 + $0x3] ss:$9 sm:$0xff] %v2330_v14  ;;  %v4460_v14 = vld [vmem:[#allocation13 + $0x88] sm:$0xff] }
 0x462   :  { %2375 = vst [vmem:[#allocation1 + $0x4] ss:$9 sm:$0xff] %v2331_v17  ;;  %v4463_v17 = vld [vmem:[#allocation13 + $0x60] sm:$0xff] }
 0x463   :  { %2377 = vst [vmem:[#allocation1 + $0x5] ss:$9 sm:$0xff] %v2332_v38  ;;  %v4466_v38 = vld [vmem:[#allocation13 + $0x78] sm:$0xff] }
 0x464   :  { %2379 = vst [vmem:[#allocation1 + $0x6] ss:$9 sm:$0xff] %v2333_v23  ;;  %v4468_v23 = vld [vmem:[#allocation13 + $0x48] sm:$0xff] }
 0x465   :  { %2381 = vst [vmem:[#allocation1 + $0x7] ss:$9 sm:$0xff] %v2334_v49  ;;  %v4469_v49 = vld [vmem:[#allocation13 + $0x50] sm:$0xff] }
 0x46c   :  { %v2382_v18 = vld [vmem:[#allocation1] sm:$0xff] }
 0x46d   :  { %2400 = vmatmul.f32.vlgmr.msra.gmra.mxu0 %v2382_v18  ;;  %2420 = vmatmul.f32.vlgmr.msra.gmra.mxu1 %v2382_v18 }
 0x46e   :  { %2440 = vmatmul.f32.vlgmr.msra.gmra.mxu2 %v2382_v18  ;;  %2460 = vmatmul.f32.vlgmr.msra.gmra.mxu3 %v2382_v18  ;;  %v4470_v18 = vld [vmem:[#allocation13 + $0x58] sm:$0xff] }
 0x46f   :  { %3150 = vmatpush.msra.mxu0 %v4415_v61  ;;  %3170 = vmatpush.msra.mxu1 %v4416_v19  ;;  %v4471_v61 = vld [vmem:[#allocation13 + $0x20] sm:$0xff]  ;;  %v4472_v19 = vld [vmem:[#allocation13 + $0x28] sm:$0xff] }
 0x470   :  { %3190 = vmatpush.msra.mxu2 %v4417_v60  ;;  %3210 = vmatpush.msra.mxu3 %v4418_v10  ;;  %v4473_v60 = vld [vmem:[#allocation13 + $0x30] sm:$0xff]  ;;  %v4474_v10 = vld [vmem:[#allocation13 + $0x38] sm:$0xff] }
 0x471   :  { %3151 = vmatpush.msra.mxu0 %v4419_v32  ;;  %3171 = vmatpush.msra.mxu1 %v4420_v0  ;;  %v4475_v32 = vld [vmem:[#allocation13] sm:$0xff]  ;;  %v4476_v0 = vld [vmem:[#allocation13 + $0x8] sm:$0xff] }
 0x472   :  { %3191 = vmatpush.msra.mxu2 %v4421_v35  ;;  %3211 = vmatpush.msra.mxu3 %v4422_v3  ;;  %v4477_v35 = vld [vmem:[#allocation13 + $0x10] sm:$0xff]  ;;  %v4478_v3 = vld [vmem:[#allocation13 + $0x18] sm:$0xff] }
 0x473   :  { %3152 = vmatpush.msra.mxu0 %v4423_v40  ;;  %3172 = vmatpush.msra.mxu1 %v4424_v13 }
 0x474   :  { %3192 = vmatpush.msra.mxu2 %v4425_v44  ;;  %3212 = vmatpush.msra.mxu3 %v4426_v20 }
 0x475   :  { %3153 = vmatpush.msra.mxu0 %v4427_v28  ;;  %3173 = vmatpush.msra.mxu1 %v4428_v58 }
 0x476   :  { %3193 = vmatpush.msra.mxu2 %v4429_v15  ;;  %3213 = vmatpush.msra.mxu3 %v4430_v26 }
 0x477   :  { %3154 = vmatpush.msra.mxu0 %v4431_v34  ;;  %3174 = vmatpush.msra.mxu1 %v4432_v50 }
 0x478   :  { %3194 = vmatpush.msra.mxu2 %v4433_v6  ;;  %3214 = vmatpush.msra.mxu3 %v4434_v62 }
 0x479   :  { %3155 = vmatpush.msra.mxu0 %v4435_v9  ;;  %3175 = vmatpush.msra.mxu1 %v4436_v59 }
 0x47a   :  { %3195 = vmatpush.msra.mxu2 %v4437_v8  ;;  %3215 = vmatpush.msra.mxu3 %v4438_v43 }
 0x47b   :  { %3156 = vmatpush.msra.mxu0 %v4439_v36  ;;  %3176 = vmatpush.msra.mxu1 %v4440_v2 }
 0x47c   :  { %3196 = vmatpush.msra.mxu2 %v4441_v52  ;;  %3216 = vmatpush.msra.mxu3 %v4442_v24 }
 0x47d   :  { %3157 = vmatpush.msra.mxu0 %v4443_v31  ;;  %3177 = vmatpush.msra.mxu1 %v4444_v7 }
 0x47e   :  { %3197 = vmatpush.msra.mxu2 %v4445_v41  ;;  %3217 = vmatpush.msra.mxu3 %v4446_v27  ;;  %v2344_v27 = vld [vmem:[#allocation2 + $0x5] ss:$8 sm:$0xf] }
 0x47f   :  { %3158 = vmatpush.msra.mxu0 %v4447_v42  ;;  %3178 = vmatpush.msra.mxu1 %v4448_v37 }
 0x480   :  { %3198 = vmatpush.msra.mxu2 %v4449_v1  ;;  %3218 = vmatpush.msra.mxu3 %v4450_v39 }
 0x481   :  { %3159 = vmatpush.msra.mxu0 %v4451_v51  ;;  %3179 = vmatpush.msra.mxu1 %v4452_v12  ;;  %v2346_v51 = vld [vmem:[#allocation2 + $0x25] ss:$8 sm:$0xf] }
 0x482   :  { %3199 = vmatpush.msra.mxu2 %v4453_v21  ;;  %3219 = vmatpush.msra.mxu3 %v4454_v33  ;;  %v2348_v12 = vld [vmem:[#allocation2 + $0x45] ss:$8 sm:$0xf] }
 0x483   :  { %3160 = vmatpush.msra.mxu0 %v4455_v57  ;;  %3180 = vmatpush.msra.mxu1 %v4456_v11  ;;  %v2350_v21 = vld [vmem:[#allocation2 + $0x65] ss:$8 sm:$0xf] }
 0x484   :  { %3200 = vmatpush.msra.mxu2 %v4457_v53  ;;  %3220 = vmatpush.msra.mxu3 %v4458_v54  ;;  %v2352_v54 = vld [vmem:[#allocation2 + $0x85] ss:$8 sm:$0xf] }
 0x485   :  { %3161 = vmatpush.msra.mxu0 %v4459_v30  ;;  %3181 = vmatpush.msra.mxu1 %v4460_v14 }
 0x486   :  { %3201 = vmatpush.msra.mxu2 %v4461_v16  ;;  %3221 = vmatpush.msra.mxu3 %v4462_v22 }
 0x487   :  { %3162 = vmatpush.msra.mxu0 %v4463_v17  ;;  %3182 = vmatpush.msra.mxu1 %v4464_v5  ;;  %v2354_v17 = vld [vmem:[#allocation2 + $0xa5] ss:$8 sm:$0xf] }
 0x488   :  { %3202 = vmatpush.msra.mxu2 %v4465_v55  ;;  %3222 = vmatpush.msra.mxu3 %v4466_v38 }
 0x489   :  { %3163 = vmatpush.msra.mxu0 %v4467_v48  ;;  %3183 = vmatpush.msra.mxu1 %v4468_v23  ;;  %v2356_v23 = vld [vmem:[#allocation2 + $0xc5] ss:$8 sm:$0xf] }
 0x48a   :  { %3203 = vmatpush.msra.mxu2 %v4469_v49  ;;  %3223 = vmatpush.msra.mxu3 %v4470_v18  ;;  %v2358_v49 = vld [vmem:[#allocation2 + $0xe5] ss:$8 sm:$0xf] }
 0x48b   :  { %3164 = vmatpush.msra.mxu0 %v4471_v61  ;;  %3184 = vmatpush.msra.mxu1 %v4472_v19 }
 0x48c   :  { %3204 = vmatpush.msra.mxu2 %v4473_v60  ;;  %3224 = vmatpush.msra.mxu3 %v4474_v10 }
 0x48d   :  { %3165 = vmatpush.msra.mxu0 %v4475_v32  ;;  %3185 = vmatpush.msra.mxu1 %v4476_v0 }
 0x48e   :  { %3205 = vmatpush.msra.mxu2 %v4477_v35  ;;  %3225 = vmatpush.msra.mxu3 %v4478_v3 }
 0x4ea   :  { %v2421_v40 = vpop.f32.mrf.mxu1  ;;  %v2401_v44 = vpop.f32.mrf.mxu0 }
 0x4eb   :  { %v2468_v13 = vrot.slane %v2421_v40, 7 }
 0x4ed   :  { %v2471_v20 = vsel %vm525_vm1, %v2401_v44, %v2468_v13  ;;  %v2474_v28 = vsel %vm531_vm4, %v2401_v44, %v2468_v13  ;;  %v2478_v26 = vsel %vm527_vm2, %v2401_v44, %v2468_v13  ;;  %v2482_v34 = vsel %vm533_vm5, %v2401_v44, %v2468_v13 }
 0x4ee   :  { %v2486_v62 = vsel %vm539_vm7, %v2401_v44, %v2468_v13  ;;  %v2490_v9 = vsel %vm545_vm9, %v2401_v44, %v2468_v13  ;;  %v2494_v59 = vsel %vm551_vm11, %v2401_v44, %v2468_v13  ;;  %v2498_v8 = vsel %vm557_vm13, %v2468_v13, %v2401_v44 }
 0x4f1   :  { %v2441_v58 = vpop.f32.mrf.mxu2  ;;  %v2461_v15 = vpop.f32.mrf.mxu3 }
 0x4f2   :  { %v2469_v50 = vrot.slane %v2441_v58, 6  ;;  %v2470_v6 = vrot.slane %v2461_v15, 5 }
 0x4f4   :  { %v2472_v43 = vsel %vm527_vm2, %v2469_v50, %v2470_v6  ;;  %v2475_v36 = vsel %vm533_vm5, %v2469_v50, %v2470_v6  ;;  %v2479_v2 = vsel %vm539_vm7, %v2469_v50, %v2470_v6  ;;  %v2483_v52 = vsel %vm545_vm9, %v2469_v50, %v2470_v6 }
 0x4f5   :  { %v2473_v24 = vsel %vm529_vm3, %v2471_v20, %v2472_v43  ;;  %v2476_v31 = vsel %vm535_vm6, %v2474_v28, %v2475_v36  ;;  %v2480_v7 = vsel %vm541_vm8, %v2478_v26, %v2479_v2  ;;  %v2484_v41 = vsel %vm547_vm10, %v2482_v34, %v2483_v52 }
 0x4f6   :  { %v2477_v42 = vrot.slane %v2476_v31, 1  ;;  %v2481_v37 = vrot.slane %v2480_v7, 2  ;;  %v2485_v1 = vrot.slane %v2484_v41, 3  ;;  %v2487_v39 = vsel %vm551_vm11, %v2469_v50, %v2470_v6 }
 0x4f7   :  { %v2488_v33 = vsel %vm553_vm12, %v2486_v62, %v2487_v39  ;;  %v2491_v57 = vsel %vm557_vm13, %v2470_v6, %v2469_v50  ;;  %v2495_v11 = vsel %vm525_vm1, %v2469_v50, %v2470_v6  ;;  %v2499_v53 = vsel %vm531_vm4, %v2469_v50, %v2470_v6 }
 0x4f8   :  { %v2489_v30 = vrot.slane %v2488_v33, 4  ;;  %v2492_v14 = vsel %vm559_vm14, %v2490_v9, %v2491_v57  ;;  %v2496_v16 = vsel %vm564_vm15, %v2495_v11, %v2494_v59  ;;  %v2500_v22 = vsel %vm569_vm0, %v2499_v53, %v2498_v8 }
 0x4f9   :  { %v2493_v5 = vrot.slane %v2492_v14, 5  ;;  %v2497_v55 = vrot.slane %v2496_v16, 6  ;;  %v2501_v38 = vrot.slane %v2500_v22, 7  ;;  %v6331_v48 = vadd.f32 %v2473_v24, %v2344_v27 }
 0x4fa   :  { %v6333_v18 = vadd.f32 %v2477_v42, %v2346_v51  ;;  %v6335_v61 = vadd.f32 %v2481_v37, %v2348_v12  ;;  %v6337_v19 = vadd.f32 %v2485_v1, %v2350_v21  ;;  %v6339_v60 = vadd.f32 %v2489_v30, %v2352_v54 }
 0x4fb   :  { %v6341_v10 = vadd.f32 %v2493_v5, %v2354_v17  ;;  %v6343_v32 = vadd.f32 %v2497_v55, %v2356_v23  ;;  %v6345_v0 = vadd.f32 %v2501_v38, %v2358_v49  ;;  %v2518_v35 = vmul.f32 0.5, %v6331_v48 }
 0x4fc   :  { %v2519_v3 = vmul.f32 0.5, %v6333_v18  ;;  %v2520_v40 = vmul.f32 0.5, %v6335_v61  ;;  %v2521_v13 = vmul.f32 0.5, %v6337_v19  ;;  %v2522_v44 = vmul.f32 0.5, %v6339_v60 }
 0x4fd   :  { %4047 = vtanh.f32 %v2518_v35  ;;  %v2523_v20 = vmul.f32 0.5, %v6341_v10  ;;  %v2558_v28 = vrot.slane %v6331_v48, 1  ;;  %v2559_v58 = vrot.slane %v6333_v18, 1 }
 0x4fe   :  { %4049 = vtanh.f32 %v2519_v3  ;;  %v2524_v15 = vmul.f32 0.5, %v6343_v32  ;;  %v2525_v26 = vmul.f32 0.5, %v6345_v0  ;;  %v2560_v34 = vrot.slane %v6335_v61, 1 }
 0x4ff   :  { %4051 = vtanh.f32 %v2520_v40  ;;  %v2561_v50 = vrot.slane %v6337_v19, 1  ;;  %v2562_v6 = vrot.slane %v6339_v60, 1  ;;  %v2563_v62 = vrot.slane %v6341_v10, 1 }
 0x500   :  { %4053 = vtanh.f32 %v2521_v13  ;;  %v2564_v9 = vrot.slane %v6343_v32, 1  ;;  %v2565_v59 = vrot.slane %v6345_v0, 1  ;;  %v2574_v8 = vmul.f32 0.5, %v2558_v28 }
 0x501   :  { %4055 = vtanh.f32 %v2522_v44  ;;  %v2575_v43 = vmul.f32 0.5, %v2559_v58  ;;  %v2576_v2 = vmul.f32 0.5, %v2560_v34  ;;  %v2577_v24 = vmul.f32 0.5, %v2561_v50 }
 0x502   :  { %4057 = vtanh.f32 %v2523_v20  ;;  %v2578_v31 = vmul.f32 0.5, %v2562_v6  ;;  %v2579_v7 = vmul.f32 0.5, %v2563_v62  ;;  %v2580_v42 = vmul.f32 0.5, %v2564_v9 }
 0x503   :  { %v4048_v36 = vpop.eup %4047  ;;  %4059 = vtanh.f32 %v2524_v15  ;;  %v2581_v37 = vmul.f32 0.5, %v2565_v59  ;;  %v2606_v51 = vrot.slane %v6331_v48, 2  ;;  %v2607_v12 = vrot.slane %v6333_v18, 2 }
 0x504   :  { %v4050_v52 = vpop.eup %4049  ;;  %4061 = vtanh.f32 %v2525_v26  ;;  %v2534_v27 = vmul.f32 0.5, %v4048_v36  ;;  %v2608_v57 = vrot.slane %v6335_v61, 2  ;;  %v2609_v11 = vrot.slane %v6337_v19, 2 }
 0x505   :  { %v4052_v41 = vpop.eup %4051  ;;  %4063 = vtanh.f32 %v2574_v8  ;;  %v2535_v39 = vmul.f32 0.5, %v4050_v52  ;;  %v2610_v30 = vrot.slane %v6339_v60, 2  ;;  %v2611_v14 = vrot.slane %v6341_v10, 2 }
 0x506   :  { %v4054_v1 = vpop.eup %4053  ;;  %4065 = vtanh.f32 %v2575_v43  ;;  %v2536_v33 = vmul.f32 0.5, %v4052_v41  ;;  %v6369_v5 = vadd.f32 0.5, %v2534_v27  ;;  %v2612_v49 = vrot.slane %v6343_v32, 2 }
 0x507   :  { %v4056_v21 = vpop.eup %4055  ;;  %4067 = vtanh.f32 %v2576_v2  ;;  %v2537_v54 = vmul.f32 0.5, %v4054_v1  ;;  %v6371_v23 = vadd.f32 0.5, %v2535_v39  ;;  %v2613_v13 = vrot.slane %v6345_v0, 2 }
 0x508   :  { %v4058_v53 = vpop.eup %4057  ;;  %4069 = vtanh.f32 %v2577_v24  ;;  %v2538_v22 = vmul.f32 0.5, %v4056_v21  ;;  %v6374_v40 = vadd.f32 0.5, %v2536_v33  ;;  %v2630_v58 = vrot.slane %v6331_v48, 3 }
 0x509   :  { %v4060_v16 = vpop.eup %4059  ;;  %v2539_v17 = vmul.f32 0.5, %v4058_v53  ;;  %4071 = vtanh.f32 %v2578_v31  ;;  %v6377_v20 = vadd.f32 0.5, %v2537_v54  ;;  %v2631_v50 = vrot.slane %v6333_v18, 3 }
 0x50a   :  { %v4062_v55 = vpop.eup %4061  ;;  %v2540_v38 = vmul.f32 0.5, %v4060_v16  ;;  %4073 = vtanh.f32 %v2579_v7  ;;  %v6380_v26 = vadd.f32 0.5, %v2538_v22  ;;  %v2632_v6 = vrot.slane %v6335_v61, 3 }
 0x50b   :  { %v4064_v35 = vpop.eup %4063  ;;  %v2541_v3 = vmul.f32 0.5, %v4062_v55  ;;  %4075 = vtanh.f32 %v2580_v42  ;;  %v6382_v34 = vadd.f32 0.5, %v2539_v17  ;;  %v2633_v8 = vrot.slane %v6337_v19, 3 }
 0x50c   :  { %v4066_v44 = vpop.eup %4065  ;;  %4077 = vtanh.f32 %v2581_v37  ;;  %v2590_v28 = vmul.f32 0.5, %v4064_v35  ;;  %v6386_v9 = vadd.f32 0.5, %v2540_v38  ;;  %v2634_v48 = vrot.slane %v6339_v60, 3 }
 0x50d   :  { %v4068_v15 = vpop.eup %4067  ;;  %v2591_v59 = vmul.f32 0.5, %v4066_v44  ;;  %4079 = vtanh.f32 %v2606_v51  ;;  %v6389_v36 = vadd.f32 0.5, %v2541_v3  ;;  %v2635_v2 = vrot.slane %v6341_v10, 3 }
 0x50e   :  { %v4070_v62 = vpop.eup %4069  ;;  %4081 = vtanh.f32 %v2607_v12  ;;  %v2592_v24 = vmul.f32 0.5, %v4068_v15  ;;  %v2598_v31 = vadd.f32 0.5, %v2590_v28  ;;  %v2636_v27 = vrot.slane %v6343_v32, 3 }
 0x50f   :  { %v4072_v43 = vpop.eup %4071  ;;  %v2593_v18 = vmul.f32 0.5, %v4070_v62  ;;  %4083 = vtanh.f32 %v2608_v57  ;;  %v2599_v37 = vadd.f32 0.5, %v2591_v59  ;;  %v2646_v1 = vmul.f32 0.5, %v2630_v58 }
 0x510   :  { %v4074_v52 = vpop.eup %4073  ;;  %v2594_v7 = vmul.f32 0.5, %v4072_v43  ;;  %4085 = vtanh.f32 %v2609_v11  ;;  %v2637_v60 = vrot.slane %v6345_v0, 3  ;;  %v2647_v10 = vmul.f32 0.5, %v2631_v50 }
 0x511   :  { %v4076_v61 = vpop.eup %4075  ;;  %v2595_v41 = vmul.f32 0.5, %v4074_v52  ;;  %4087 = vtanh.f32 %v2610_v30  ;;  %v2600_v12 = vadd.f32 0.5, %v2592_v24  ;;  %v2601_v21 = vadd.f32 0.5, %v2593_v18 }
 0x512   :  { %v4078_v19 = vpop.eup %4077  ;;  %v2596_v42 = vmul.f32 0.5, %v4076_v61  ;;  %4089 = vtanh.f32 %v2611_v14  ;;  %v2648_v33 = vmul.f32 0.5, %v2632_v6  ;;  %v2602_v53 = vadd.f32 0.5, %v2594_v7 }
 0x513   :  { %v2597_v39 = vmul.f32 0.5, %v4078_v19  ;;  %v4080_v51 = vpop.eup %4079  ;;  %4091 = vtanh.f32 %v2612_v49  ;;  %v2603_v11 = vadd.f32 0.5, %v2595_v41  ;;  %v2649_v32 = vmul.f32 0.5, %v2633_v8 }
 0x514   :  { %v4082_v57 = vpop.eup %4081  ;;  %4093 = vtanh.f32 %v2613_v13  ;;  %v2604_v16 = vadd.f32 0.5, %v2596_v42  ;;  %v2650_v22 = vmul.f32 0.5, %v2634_v48  ;;  %v2651_v30 = vmul.f32 0.5, %v2635_v2 }
 0x515   :  { %v4084_v54 = vpop.eup %4083  ;;  %4095 = vtanh.f32 %v2646_v1  ;;  %v2605_v14 = vadd.f32 0.5, %v2597_v39  ;;  %v2678_v0 = vmul.f32 %v2598_v31, %v6277_v4  ;;  %v2679_v55 = vmul.f32 %v2599_v37, %v6279_v46 }
 0x516   :  { %v4086_v17 = vpop.eup %4085  ;;  %4097 = vtanh.f32 %v2647_v10  ;;  %v2652_v49 = vmul.f32 0.5, %v2636_v27  ;;  %v2653_v35 = vmul.f32 0.5, %v2637_v60  ;;  %v2680_v3 = vmul.f32 %v2600_v12, %v6283_v45 }
 0x517   :  { %v4088_v38 = vpop.eup %4087  ;;  %4099 = vtanh.f32 %v2648_v33  ;;  %v2681_v44 = vmul.f32 %v2601_v21, %v6287_v47  ;;  %v2686_v28 = vmul.f32 %v4080_v51, %v6369_v5  ;;  %v2687_v58 = vmul.f32 %v4082_v57, %v6371_v23 }
 0x518   :  { %v4090_v13 = vpop.eup %4089  ;;  %4101 = vtanh.f32 %v2649_v32  ;;  %v2682_v4 = vmul.f32 %v2602_v53, %v6290_v56  ;;  %v2683_v46 = vmul.f32 %v2603_v11, %v6294_v29  ;;  %v2688_v50 = vmul.f32 %v4084_v54, %v6374_v40 }
 0x519   :  { %v4092_v15 = vpop.eup %4091  ;;  %4103 = vtanh.f32 %v2650_v22  ;;  %v2689_v45 = vmul.f32 %v4086_v17, %v6377_v20  ;;  %v6405_v62 = vadd.f32 %v2686_v28, %v2678_v0  ;;  %v6407_v59 = vadd.f32 %v2687_v58, %v2679_v55 }
 0x51a   :  { %v4094_v6 = vpop.eup %4093  ;;  %4105 = vtanh.f32 %v2651_v30  ;;  %v2684_v5 = vmul.f32 %v2604_v16, %v6297_v63  ;;  %v2690_v23 = vmul.f32 %v4088_v38, %v6380_v26  ;;  %v6411_v8 = vadd.f32 %v2688_v50, %v2680_v3 }
 0x51b   :  { %v4096_v47 = vpop.eup %4095  ;;  %4107 = vtanh.f32 %v2652_v49  ;;  %v2685_v29 = vmul.f32 %v2605_v14, %v6300_v25  ;;  %v2691_v40 = vmul.f32 %v4090_v13, %v6382_v34  ;;  %v6415_v43 = vadd.f32 %v2689_v45, %v2681_v44 }
 0x51c   :  { %v4098_v56 = vpop.eup %4097  ;;  %4109 = vtanh.f32 %v2653_v35  ;;  %v2692_v48 = vmul.f32 %v4092_v15, %v6386_v9  ;;  %v6418_v2 = vadd.f32 %v2690_v23, %v2682_v4  ;;  %v2662_v52 = vmul.f32 0.5, %v4096_v47 }
 0x51d   :  { %v4100_v20 = vpop.eup %4099  ;;  %4111 = vtanh.f32 %v6405_v62  ;;  %v2693_v26 = vmul.f32 %v4094_v6, %v6389_v36  ;;  %v6422_v24 = vadd.f32 %v2691_v40, %v2683_v46  ;;  %v2663_v18 = vmul.f32 0.5, %v4098_v56 }
 0x51e   :  { %v4102_v63 = vpop.eup %4101  ;;  %4113 = vtanh.f32 %v6407_v59  ;;  %v6425_v34 = vadd.f32 %v2692_v48, %v2684_v5  ;;  %v2664_v9 = vmul.f32 0.5, %v4100_v20  ;;  %v2670_v19 = vadd.f32 0.5, %v2662_v52 }
 0x51f   :  { %v4104_v25 = vpop.eup %4103  ;;  %4115 = vtanh.f32 %v6411_v8  ;;  %v6428_v61 = vadd.f32 %v2693_v26, %v2685_v29  ;;  %v2665_v41 = vmul.f32 0.5, %v4102_v63  ;;  %v2671_v1 = vadd.f32 0.5, %v2663_v18 }
 0x520   :  { %v4106_v31 = vpop.eup %4105  ;;  %4117 = vtanh.f32 %v6415_v43  ;;  %v2666_v27 = vmul.f32 0.5, %v4104_v25  ;;  %v2672_v10 = vadd.f32 0.5, %v2664_v9  ;;  %v2727_v9 = vld [vmem:[#allocation2 + $0x6] ss:$8 sm:$0xf] }
 0x521   :  { %v4108_v7 = vpop.eup %4107  ;;  %4119 = vtanh.f32 %v6418_v2  ;;  %v2667_v37 = vmul.f32 0.5, %v4106_v31  ;;  %v2673_v33 = vadd.f32 0.5, %v2665_v41 }
 0x522   :  { %v4110_v36 = vpop.eup %4109  ;;  %4121 = vtanh.f32 %v6422_v24  ;;  %v2668_v60 = vmul.f32 0.5, %v4108_v7  ;;  %v2674_v11 = vadd.f32 0.5, %v2666_v27 }
 0x523   :  { %v4112_v42 = vpop.eup %4111  ;;  %4123 = vtanh.f32 %v6425_v34  ;;  %v2669_v21 = vmul.f32 0.5, %v4110_v36  ;;  %v2675_v16 = vadd.f32 0.5, %v2667_v37  ;;  %v2733_v37 = vld [vmem:[#allocation2 + $0x66] ss:$8 sm:$0xf] }
 0x524   :  { %v4114_v39 = vpop.eup %4113  ;;  %4125 = vtanh.f32 %v6428_v61  ;;  %v2710_v51 = vmul.f32 %v4112_v42, %v2670_v19  ;;  %v2676_v17 = vadd.f32 0.5, %v2668_v60  ;;  %v2729_v19 = vld [vmem:[#allocation2 + $0x26] ss:$8 sm:$0xf] }
 0x525   :  { %v4116_v12 = vpop.eup %4115  ;;  %v2711_v57 = vmul.f32 %v4114_v39, %v2671_v1  ;;  %v2677_v55 = vadd.f32 0.5, %v2669_v21  ;;  %v2731_v42 = vld [vmem:[#allocation2 + $0x46] ss:$8 sm:$0xf] }
 0x526   :  { %v4118_v53 = vpop.eup %4117  ;;  %v2712_v32 = vmul.f32 %v4116_v12, %v2672_v10  ;;  %2718 = vst [vmem:[#allocation14 + $0x5] sm:$0x1] %v2710_v51 }
 0x527   :  { %v4120_v54 = vpop.eup %4119  ;;  %v2713_v22 = vmul.f32 %v4118_v53, %v2673_v33  ;;  %2719 = vst [vmem:[#allocation14 + $0xd] sm:$0x1] %v2711_v57  ;;  %v2737_v53 = vld [vmem:[#allocation2 + $0xa6] ss:$8 sm:$0xf] }
 0x528   :  { %v4122_v30 = vpop.eup %4121  ;;  %v2714_v14 = vmul.f32 %v4120_v54, %v2674_v11  ;;  %2720 = vst [vmem:[#allocation14 + $0x15] sm:$0x1] %v2712_v32 }
 0x529   :  { %v4124_v0 = vpop.eup %4123  ;;  %v2715_v38 = vmul.f32 %v4122_v30, %v2675_v16  ;;  %2721 = vst [vmem:[#allocation14 + $0x1d] sm:$0x1] %v2713_v22  ;;  %v2741_v30 = vld [vmem:[#allocation2 + $0xe6] ss:$8 sm:$0xf] }
 0x52a   :  { %v4126_v49 = vpop.eup %4125  ;;  %v2716_v35 = vmul.f32 %v4124_v0, %v2676_v17  ;;  %2722 = vst [vmem:[#allocation14 + $0x25] sm:$0x1] %v2714_v14 }
 0x52b   :  { %v2717_v3 = vmul.f32 %v4126_v49, %v2677_v55  ;;  %2723 = vst [vmem:[#allocation14 + $0x2d] sm:$0x1] %v2715_v38 }
 0x52c   :  { %2724 = vst [vmem:[#allocation14 + $0x35] sm:$0x1] %v2716_v35 }
 0x52d   :  { %2725 = vst [vmem:[#allocation14 + $0x3d] sm:$0x1] %v2717_v3 }
 0x52e   :  { %2750 = vst [vmem:[#allocation1] ss:$9 sm:$0xff] %v2710_v51  ;;  %v2735_v51 = vld [vmem:[#allocation2 + $0x86] ss:$8 sm:$0xf] }
 0x52f   :  { %2752 = vst [vmem:[#allocation1 + $0x1] ss:$9 sm:$0xff] %v2711_v57 }
 0x530   :  { %2754 = vst [vmem:[#allocation1 + $0x2] ss:$9 sm:$0xff] %v2712_v32 }
 0x531   :  { %2756 = vst [vmem:[#allocation1 + $0x3] ss:$9 sm:$0xff] %v2713_v22  ;;  %v2739_v22 = vld [vmem:[#allocation2 + $0xc6] ss:$8 sm:$0xf] }
 0x532   :  { %2758 = vst [vmem:[#allocation1 + $0x4] ss:$9 sm:$0xff] %v2714_v14 }
 0x533   :  { %2760 = vst [vmem:[#allocation1 + $0x5] ss:$9 sm:$0xff] %v2715_v38 }
 0x534   :  { %2762 = vst [vmem:[#allocation1 + $0x6] ss:$9 sm:$0xff] %v2716_v35 }
 0x535   :  { %2764 = vst [vmem:[#allocation1 + $0x7] ss:$9 sm:$0xff] %v2717_v3 }
 0x53c   :  { %v2765_v13 = vld [vmem:[#allocation1] sm:$0xff] }
 0x53d   :  { %2783 = vmatmul.f32.vlgmr.msrb.gmra.mxu0 %v2765_v13  ;;  %2803 = vmatmul.f32.vlgmr.msrb.gmra.mxu1 %v2765_v13 }
 0x53e   :  { %2823 = vmatmul.f32.vlgmr.msrb.gmra.mxu2 %v2765_v13  ;;  %2843 = vmatmul.f32.vlgmr.msrb.gmra.mxu3 %v2765_v13 }
 0x5ba   :  { %v2804_v44 = vpop.f32.mrf.mxu1  ;;  %v2784_v58 = vpop.f32.mrf.mxu0 }
 0x5bb   :  { %v2851_v28 = vrot.slane %v2804_v44, 7 }
 0x5bd   :  { %v2854_v15 = vsel %vm525_vm1, %v2784_v58, %v2851_v28  ;;  %v2857_v4 = vsel %vm531_vm4, %v2784_v58, %v2851_v28  ;;  %v2861_v6 = vsel %vm527_vm2, %v2784_v58, %v2851_v28  ;;  %v2865_v45 = vsel %vm533_vm5, %v2784_v58, %v2851_v28 }
 0x5be   :  { %v2869_v23 = vsel %vm539_vm7, %v2784_v58, %v2851_v28  ;;  %v2873_v56 = vsel %vm545_vm9, %v2784_v58, %v2851_v28  ;;  %v2877_v29 = vsel %vm551_vm11, %v2784_v58, %v2851_v28  ;;  %v2881_v40 = vsel %vm557_vm13, %v2851_v28, %v2784_v58 }
 0x5c1   :  { %v2824_v46 = vpop.f32.mrf.mxu2  ;;  %v2844_v50 = vpop.f32.mrf.mxu3 }
 0x5c2   :  { %v2852_v47 = vrot.slane %v2824_v46, 6  ;;  %v2853_v5 = vrot.slane %v2844_v50, 5 }
 0x5c4   :  { %v2855_v20 = vsel %vm527_vm2, %v2852_v47, %v2853_v5  ;;  %v2858_v48 = vsel %vm533_vm5, %v2852_v47, %v2853_v5  ;;  %v2862_v63 = vsel %vm539_vm7, %v2852_v47, %v2853_v5  ;;  %v2866_v52 = vsel %vm545_vm9, %v2852_v47, %v2853_v5 }
 0x5c5   :  { %v2856_v26 = vsel %vm529_vm3, %v2854_v15, %v2855_v20  ;;  %v2859_v25 = vsel %vm535_vm6, %v2857_v4, %v2858_v48  ;;  %v2863_v18 = vsel %vm541_vm8, %v2861_v6, %v2862_v63  ;;  %v2867_v31 = vsel %vm547_vm10, %v2865_v45, %v2866_v52 }
 0x5c6   :  { %v2860_v7 = vrot.slane %v2859_v25, 1  ;;  %v2864_v41 = vrot.slane %v2863_v18, 2  ;;  %v2868_v36 = vrot.slane %v2867_v31, 3  ;;  %v2870_v27 = vsel %vm551_vm11, %v2852_v47, %v2853_v5 }
 0x5c7   :  { %v2871_v1 = vsel %vm553_vm12, %v2869_v23, %v2870_v27  ;;  %v2874_v39 = vsel %vm557_vm13, %v2853_v5, %v2852_v47  ;;  %v2878_v60 = vsel %vm525_vm1, %v2852_v47, %v2853_v5  ;;  %v2882_v10 = vsel %vm531_vm4, %v2852_v47, %v2853_v5 }
 0x5c8   :  { %v2872_v12 = vrot.slane %v2871_v1, 4  ;;  %v2875_v21 = vsel %vm559_vm14, %v2873_v56, %v2874_v39  ;;  %v2879_v33 = vsel %vm564_vm15, %v2878_v60, %v2877_v29  ;;  %v2883_v57 = vsel %vm569_vm0, %v2882_v10, %v2881_v40 }
 0x5c9   :  { %v2876_v11 = vrot.slane %v2875_v21, 5  ;;  %v2880_v32 = vrot.slane %v2879_v33, 6  ;;  %v2884_v54 = vrot.slane %v2883_v57, 7  ;;  %v6459_v16 = vadd.f32 %v2856_v26, %v2727_v9 }
 0x5ca   :  { %v6461_v17 = vadd.f32 %v2860_v7, %v2729_v19  ;;  %v6463_v14 = vadd.f32 %v2864_v41, %v2731_v42  ;;  %v6465_v0 = vadd.f32 %v2868_v36, %v2733_v37  ;;  %v6467_v55 = vadd.f32 %v2872_v12, %v2735_v51 }
 0x5cb   :  { %v6469_v38 = vadd.f32 %v2876_v11, %v2737_v53  ;;  %v6471_v49 = vadd.f32 %v2880_v32, %v2739_v22  ;;  %v6473_v35 = vadd.f32 %v2884_v54, %v2741_v30  ;;  %v2901_v3 = vmul.f32 0.5, %v6459_v16 }
 0x5cc   :  { %v2902_v13 = vmul.f32 0.5, %v6461_v17  ;;  %v2903_v44 = vmul.f32 0.5, %v6463_v14  ;;  %v2904_v28 = vmul.f32 0.5, %v6465_v0  ;;  %v2905_v58 = vmul.f32 0.5, %v6467_v55 }
 0x5cd   :  { %4127 = vtanh.f32 %v2901_v3  ;;  %v2906_v15 = vmul.f32 0.5, %v6469_v38  ;;  %v2941_v4 = vrot.slane %v6459_v16, 1  ;;  %v2942_v46 = vrot.slane %v6461_v17, 1 }
 0x5ce   :  { %4129 = vtanh.f32 %v2902_v13  ;;  %v2907_v50 = vmul.f32 0.5, %v6471_v49  ;;  %v2908_v6 = vmul.f32 0.5, %v6473_v35  ;;  %v2943_v45 = vrot.slane %v6463_v14, 1 }
 0x5cf   :  { %4131 = vtanh.f32 %v2903_v44  ;;  %v2944_v47 = vrot.slane %v6465_v0, 1  ;;  %v2945_v5 = vrot.slane %v6467_v55, 1  ;;  %v2946_v23 = vrot.slane %v6469_v38, 1 }
 0x5d0   :  { %4133 = vtanh.f32 %v2904_v28  ;;  %v2947_v56 = vrot.slane %v6471_v49, 1  ;;  %v2948_v29 = vrot.slane %v6473_v35, 1  ;;  %v2957_v40 = vmul.f32 0.5, %v2941_v4 }
 0x5d1   :  { %4135 = vtanh.f32 %v2905_v58  ;;  %v2958_v20 = vmul.f32 0.5, %v2942_v46  ;;  %v2959_v63 = vmul.f32 0.5, %v2943_v45  ;;  %v2960_v26 = vmul.f32 0.5, %v2944_v47 }
 0x5d2   :  { %4137 = vtanh.f32 %v2906_v15  ;;  %v2961_v25 = vmul.f32 0.5, %v2945_v5  ;;  %v2962_v18 = vmul.f32 0.5, %v2946_v23  ;;  %v2963_v7 = vmul.f32 0.5, %v2947_v56 }
 0x5d3   :  { %v4128_v48 = vpop.eup %4127  ;;  %4139 = vtanh.f32 %v2907_v50  ;;  %v2964_v41 = vmul.f32 0.5, %v2948_v29  ;;  %v2989_v19 = vrot.slane %v6459_v16, 2  ;;  %v2990_v42 = vrot.slane %v6461_v17, 2 }
 0x5d4   :  { %v4130_v52 = vpop.eup %4129  ;;  %4141 = vtanh.f32 %v2908_v6  ;;  %v2917_v9 = vmul.f32 0.5, %v4128_v48  ;;  %v2991_v39 = vrot.slane %v6463_v14, 2  ;;  %v2992_v60 = vrot.slane %v6465_v0, 2 }
 0x5d5   :  { %v4132_v31 = vpop.eup %4131  ;;  %4143 = vtanh.f32 %v2957_v40  ;;  %v2918_v27 = vmul.f32 0.5, %v4130_v52  ;;  %v2993_v12 = vrot.slane %v6467_v55, 2  ;;  %v2994_v21 = vrot.slane %v6469_v38, 2 }
 0x5d6   :  { %v4134_v36 = vpop.eup %4133  ;;  %4145 = vtanh.f32 %v2958_v20  ;;  %v2919_v1 = vmul.f32 0.5, %v4132_v31  ;;  %v6497_v11 = vadd.f32 0.5, %v2917_v9  ;;  %v2995_v30 = vrot.slane %v6471_v49, 2 }
 0x5d7   :  { %v4136_v37 = vpop.eup %4135  ;;  %4147 = vtanh.f32 %v2959_v63  ;;  %v2920_v51 = vmul.f32 0.5, %v4134_v36  ;;  %v6499_v22 = vadd.f32 0.5, %v2918_v27  ;;  %v2996_v28 = vrot.slane %v6473_v35, 2 }
 0x5d8   :  { %v4138_v10 = vpop.eup %4137  ;;  %4149 = vtanh.f32 %v2960_v26  ;;  %v2921_v57 = vmul.f32 0.5, %v4136_v37  ;;  %v6502_v44 = vadd.f32 0.5, %v2919_v1  ;;  %v3013_v46 = vrot.slane %v6459_v16, 3 }
 0x5d9   :  { %v4140_v33 = vpop.eup %4139  ;;  %v2922_v53 = vmul.f32 0.5, %v4138_v10  ;;  %4151 = vtanh.f32 %v2961_v25  ;;  %v6505_v15 = vadd.f32 0.5, %v2920_v51  ;;  %v3014_v47 = vrot.slane %v6461_v17, 3 }
 0x5da   :  { %v4142_v32 = vpop.eup %4141  ;;  %v2923_v54 = vmul.f32 0.5, %v4140_v33  ;;  %4153 = vtanh.f32 %v2962_v18  ;;  %v6508_v6 = vadd.f32 0.5, %v2921_v57  ;;  %v3015_v5 = vrot.slane %v6463_v14, 3 }
 0x5db   :  { %v4144_v3 = vpop.eup %4143  ;;  %v2924_v13 = vmul.f32 0.5, %v4142_v32  ;;  %4155 = vtanh.f32 %v2963_v7  ;;  %v6510_v45 = vadd.f32 0.5, %v2922_v53  ;;  %v3016_v40 = vrot.slane %v6465_v0, 3 }
 0x5dc   :  { %v4146_v58 = vpop.eup %4145  ;;  %4157 = vtanh.f32 %v2964_v41  ;;  %v2973_v4 = vmul.f32 0.5, %v4144_v3  ;;  %v6514_v56 = vadd.f32 0.5, %v2923_v54  ;;  %v3017_v16 = vrot.slane %v6467_v55, 3 }
 0x5dd   :  { %v4148_v50 = vpop.eup %4147  ;;  %v2974_v29 = vmul.f32 0.5, %v4146_v58  ;;  %4159 = vtanh.f32 %v2989_v19  ;;  %v6517_v48 = vadd.f32 0.5, %v2924_v13  ;;  %v3018_v63 = vrot.slane %v6469_v38, 3 }
 0x5de   :  { %v4150_v23 = vpop.eup %4149  ;;  %4161 = vtanh.f32 %v2990_v42  ;;  %v2975_v26 = vmul.f32 0.5, %v4148_v50  ;;  %v2981_v25 = vadd.f32 0.5, %v2973_v4  ;;  %v3019_v9 = vrot.slane %v6471_v49, 3 }
 0x5df   :  { %v4152_v20 = vpop.eup %4151  ;;  %v2976_v17 = vmul.f32 0.5, %v4150_v23  ;;  %4163 = vtanh.f32 %v2991_v39  ;;  %v2982_v41 = vadd.f32 0.5, %v2974_v29  ;;  %v3029_v36 = vmul.f32 0.5, %v3013_v46 }
 0x5e0   :  { %v4154_v52 = vpop.eup %4153  ;;  %v2977_v18 = vmul.f32 0.5, %v4152_v20  ;;  %4165 = vtanh.f32 %v2992_v60  ;;  %v3020_v55 = vrot.slane %v6473_v35, 3  ;;  %v3030_v38 = vmul.f32 0.5, %v3014_v47 }
 0x5e1   :  { %v4156_v14 = vpop.eup %4155  ;;  %v2978_v31 = vmul.f32 0.5, %v4154_v52  ;;  %4167 = vtanh.f32 %v2993_v12  ;;  %v2983_v42 = vadd.f32 0.5, %v2975_v26  ;;  %v2984_v37 = vadd.f32 0.5, %v2976_v17 }
 0x5e2   :  { %v4158_v0 = vpop.eup %4157  ;;  %v2979_v7 = vmul.f32 0.5, %v4156_v14  ;;  %4169 = vtanh.f32 %v2994_v21  ;;  %v3031_v1 = vmul.f32 0.5, %v3015_v5  ;;  %v2985_v10 = vadd.f32 0.5, %v2977_v18 }
 0x5e3   :  { %v2980_v27 = vmul.f32 0.5, %v4158_v0  ;;  %v4160_v19 = vpop.eup %4159  ;;  %4171 = vtanh.f32 %v2995_v30  ;;  %v2986_v60 = vadd.f32 0.5, %v2978_v31  ;;  %v3032_v49 = vmul.f32 0.5, %v3016_v40 }
 0x5e4   :  { %v4162_v39 = vpop.eup %4161  ;;  %4173 = vtanh.f32 %v2996_v28  ;;  %v2987_v33 = vadd.f32 0.5, %v2979_v7  ;;  %v3033_v57 = vmul.f32 0.5, %v3017_v16  ;;  %v3034_v12 = vmul.f32 0.5, %v3018_v63 }
 0x5e5   :  { %v4164_v51 = vpop.eup %4163  ;;  %4175 = vtanh.f32 %v3029_v36  ;;  %v2988_v21 = vadd.f32 0.5, %v2980_v27  ;;  %v3061_v35 = vmul.f32 %v2981_v25, %v6405_v62  ;;  %v3062_v32 = vmul.f32 %v2982_v41, %v6407_v59 }
 0x5e6   :  { %v4166_v53 = vpop.eup %4165  ;;  %4177 = vtanh.f32 %v3030_v38  ;;  %v3035_v30 = vmul.f32 0.5, %v3019_v9  ;;  %v3036_v3 = vmul.f32 0.5, %v3020_v55  ;;  %v3063_v13 = vmul.f32 %v2983_v42, %v6411_v8 }
 0x5e7   :  { %v4168_v54 = vpop.eup %4167  ;;  %4179 = vtanh.f32 %v3031_v1  ;;  %v3064_v58 = vmul.f32 %v2984_v37, %v6415_v43  ;;  %v3069_v4 = vmul.f32 %v4160_v19, %v6497_v11  ;;  %v3070_v46 = vmul.f32 %v4162_v39, %v6499_v22 }
 0x5e8   :  { %v4170_v28 = vpop.eup %4169  ;;  %4181 = vtanh.f32 %v3032_v49  ;;  %v3065_v62 = vmul.f32 %v2985_v10, %v6418_v2  ;;  %v3066_v59 = vmul.f32 %v2986_v60, %v6422_v24  ;;  %v3071_v47 = vmul.f32 %v4164_v51, %v6502_v44 }
 0x5e9   :  { %v4172_v50 = vpop.eup %4171  ;;  %4183 = vtanh.f32 %v3033_v57  ;;  %v3072_v8 = vmul.f32 %v4166_v53, %v6505_v15  ;;  %v6533_v23 = vadd.f32 %v3069_v4, %v3061_v35  ;;  %v6535_v29 = vadd.f32 %v3070_v46, %v3062_v32 }
 0x5ea   :  { %v4174_v5 = vpop.eup %4173  ;;  %4185 = vtanh.f32 %v3034_v12  ;;  %v3067_v11 = vmul.f32 %v2987_v33, %v6425_v34  ;;  %v3073_v22 = vmul.f32 %v4168_v54, %v6508_v6  ;;  %v6539_v40 = vadd.f32 %v3071_v47, %v3063_v13 }
 0x5eb   :  { %v4176_v43 = vpop.eup %4175  ;;  %4187 = vtanh.f32 %v3035_v30  ;;  %v3068_v24 = vmul.f32 %v2988_v21, %v6428_v61  ;;  %v3074_v44 = vmul.f32 %v4170_v28, %v6510_v45  ;;  %v6543_v20 = vadd.f32 %v3072_v8, %v3064_v58 }
 0x5ec   :  { %v4178_v2 = vpop.eup %4177  ;;  %4189 = vtanh.f32 %v3036_v3  ;;  %v3075_v16 = vmul.f32 %v4172_v50, %v6514_v56  ;;  %v6546_v63 = vadd.f32 %v3073_v22, %v3065_v62  ;;  %v3045_v52 = vmul.f32 0.5, %v4176_v43 }
 0x5ed   :  { %v4180_v15 = vpop.eup %4179  ;;  %4191 = vtanh.f32 %v6533_v23  ;;  %v3076_v6 = vmul.f32 %v4174_v5, %v6517_v48  ;;  %v6550_v26 = vadd.f32 %v3074_v44, %v3066_v59  ;;  %v3046_v17 = vmul.f32 0.5, %v4178_v2 }
 0x5ee   :  { %v4182_v34 = vpop.eup %4181  ;;  %4193 = vtanh.f32 %v6535_v29  ;;  %v6553_v45 = vadd.f32 %v3075_v16, %v3067_v11  ;;  %v3047_v56 = vmul.f32 0.5, %v4180_v15  ;;  %v3053_v0 = vadd.f32 0.5, %v3045_v52 }
 0x5ef   :  { %v4184_v61 = vpop.eup %4183  ;;  %4195 = vtanh.f32 %v6539_v40  ;;  %v6556_v14 = vadd.f32 %v3076_v6, %v3068_v24  ;;  %v3048_v31 = vmul.f32 0.5, %v4182_v34  ;;  %v3054_v36 = vadd.f32 0.5, %v3046_v17 }
 0x5f0   :  { %v4186_v25 = vpop.eup %4185  ;;  %4197 = vtanh.f32 %v6543_v20  ;;  %v3049_v9 = vmul.f32 0.5, %v4184_v61  ;;  %v3055_v38 = vadd.f32 0.5, %v3047_v56  ;;  %v3110_v56 = vld [vmem:[#allocation2 + $0x7] ss:$8 sm:$0xf] }
 0x5f1   :  { %v4188_v18 = vpop.eup %4187  ;;  %4199 = vtanh.f32 %v6546_v63  ;;  %v3050_v41 = vmul.f32 0.5, %v4186_v25  ;;  %v3056_v1 = vadd.f32 0.5, %v3048_v31 }
 0x5f2   :  { %v4190_v48 = vpop.eup %4189  ;;  %4201 = vtanh.f32 %v6550_v26  ;;  %v3051_v55 = vmul.f32 0.5, %v4188_v18  ;;  %v3057_v60 = vadd.f32 0.5, %v3049_v9 }
 0x5f3   :  { %v4192_v7 = vpop.eup %4191  ;;  %4203 = vtanh.f32 %v6553_v45  ;;  %v3052_v37 = vmul.f32 0.5, %v4190_v48  ;;  %v3058_v33 = vadd.f32 0.5, %v3050_v41  ;;  %v3116_v41 = vld [vmem:[#allocation2 + $0x67] ss:$8 sm:$0xf] }
 0x5f4   :  { %v4194_v27 = vpop.eup %4193  ;;  %4205 = vtanh.f32 %v6556_v14  ;;  %v3093_v19 = vmul.f32 %v4192_v7, %v3053_v0  ;;  %v3059_v53 = vadd.f32 0.5, %v3051_v55  ;;  %v3112_v0 = vld [vmem:[#allocation2 + $0x27] ss:$8 sm:$0xf] }
 0x5f5   :  { %v4196_v42 = vpop.eup %4195  ;;  %v3094_v39 = vmul.f32 %v4194_v27, %v3054_v36  ;;  %v3060_v32 = vadd.f32 0.5, %v3052_v37  ;;  %v3114_v7 = vld [vmem:[#allocation2 + $0x47] ss:$8 sm:$0xf] }
 0x5f6   :  { %v4198_v10 = vpop.eup %4197  ;;  %v3095_v49 = vmul.f32 %v4196_v42, %v3055_v38  ;;  %3101 = vst [vmem:[#allocation14 + $0x6] sm:$0x1] %v3093_v19 }
 0x5f7   :  { %v4200_v51 = vpop.eup %4199  ;;  %v3096_v57 = vmul.f32 %v4198_v10, %v3056_v1  ;;  %3102 = vst [vmem:[#allocation14 + $0xe] sm:$0x1] %v3094_v39  ;;  %v3120_v10 = vld [vmem:[#allocation2 + $0xa7] ss:$8 sm:$0xf] }
 0x5f8   :  { %v4202_v12 = vpop.eup %4201  ;;  %v3097_v21 = vmul.f32 %v4200_v51, %v3057_v60  ;;  %3103 = vst [vmem:[#allocation14 + $0x16] sm:$0x1] %v3095_v49 }
 0x5f9   :  { %v4204_v35 = vpop.eup %4203  ;;  %v3098_v54 = vmul.f32 %v4202_v12, %v3058_v33  ;;  %3104 = vst [vmem:[#allocation14 + $0x1e] sm:$0x1] %v3096_v57  ;;  %v3124_v12 = vld [vmem:[#allocation2 + $0xe7] ss:$8 sm:$0xf] }
 0x5fa   :  { %v4206_v30 = vpop.eup %4205  ;;  %v3099_v3 = vmul.f32 %v4204_v35, %v3059_v53  ;;  %3105 = vst [vmem:[#allocation14 + $0x26] sm:$0x1] %v3097_v21 }
 0x5fb   :  { %v3100_v13 = vmul.f32 %v4206_v30, %v3060_v32  ;;  %3106 = vst [vmem:[#allocation14 + $0x2e] sm:$0x1] %v3098_v54 }
 0x5fc   :  { %3107 = vst [vmem:[#allocation14 + $0x36] sm:$0x1] %v3099_v3 }
 0x5fd   :  { %3108 = vst [vmem:[#allocation14 + $0x3e] sm:$0x1] %v3100_v13 }
 0x5fe   :  { %3133 = vst [vmem:[#allocation1] ss:$9 sm:$0xff] %v3093_v19  ;;  %v3118_v19 = vld [vmem:[#allocation2 + $0x87] ss:$8 sm:$0xf] }
 0x5ff   :  { %3135 = vst [vmem:[#allocation1 + $0x1] ss:$9 sm:$0xff] %v3094_v39 }
 0x600   :  { %3137 = vst [vmem:[#allocation1 + $0x2] ss:$9 sm:$0xff] %v3095_v49 }
 0x601   :  { %3139 = vst [vmem:[#allocation1 + $0x3] ss:$9 sm:$0xff] %v3096_v57  ;;  %v3122_v57 = vld [vmem:[#allocation2 + $0xc7] ss:$8 sm:$0xf] }
 0x602   :  { %3141 = vst [vmem:[#allocation1 + $0x4] ss:$9 sm:$0xff] %v3097_v21 }
 0x603   :  { %3143 = vst [vmem:[#allocation1 + $0x5] ss:$9 sm:$0xff] %v3098_v54 }
 0x604   :  { %3145 = vst [vmem:[#allocation1 + $0x6] ss:$9 sm:$0xff] %v3099_v3 }
 0x605   :  { %3147 = vst [vmem:[#allocation1 + $0x7] ss:$9 sm:$0xff] %v3100_v13 }
 0x60c   :  { %v3148_v28 = vld [vmem:[#allocation1] sm:$0xff] }
 0x60d   :  { %3166 = vmatmul.f32.vlgmr.msra.gmra.mxu0 %v3148_v28  ;;  %3186 = vmatmul.f32.vlgmr.msra.gmra.mxu1 %v3148_v28 }
 0x60e   :  { %3206 = vmatmul.f32.vlgmr.msra.gmra.mxu2 %v3148_v28  ;;  %3226 = vmatmul.f32.vlgmr.msra.gmra.mxu3 %v3148_v28 }
 0x68a   :  { %v3187_v58 = vpop.f32.mrf.mxu1  ;;  %v3167_v46 = vpop.f32.mrf.mxu0 }
 0x68b   :  { %v3234_v4 = vrot.slane %v3187_v58, 7 }
 0x68d   :  { %v3237_v50 = vsel %vm525_vm1, %v3167_v46, %v3234_v4  ;;  %v3240_v62 = vsel %vm531_vm4, %v3167_v46, %v3234_v4  ;;  %v3244_v5 = vsel %vm527_vm2, %v3167_v46, %v3234_v4  ;;  %v3248_v8 = vsel %vm533_vm5, %v3167_v46, %v3234_v4 }
 0x68e   :  { %v3252_v22 = vsel %vm539_vm7, %v3167_v46, %v3234_v4  ;;  %v3256_v2 = vsel %vm545_vm9, %v3167_v46, %v3234_v4  ;;  %v3260_v24 = vsel %vm551_vm11, %v3167_v46, %v3234_v4  ;;  %v3264_v44 = vsel %vm557_vm13, %v3234_v4, %v3167_v46 }
 0x691   :  { %v3207_v59 = vpop.f32.mrf.mxu2  ;;  %v3227_v47 = vpop.f32.mrf.mxu3 }
 0x692   :  { %v3235_v43 = vrot.slane %v3207_v59, 6  ;;  %v3236_v11 = vrot.slane %v3227_v47, 5 }
 0x694   :  { %v3238_v15 = vsel %vm527_vm2, %v3235_v43, %v3236_v11  ;;  %v3241_v16 = vsel %vm533_vm5, %v3235_v43, %v3236_v11  ;;  %v3245_v34 = vsel %vm539_vm7, %v3235_v43, %v3236_v11  ;;  %v3249_v52 = vsel %vm545_vm9, %v3235_v43, %v3236_v11 }
 0x695   :  { %v3239_v6 = vsel %vm529_vm3, %v3237_v50, %v3238_v15  ;;  %v3242_v61 = vsel %vm535_vm6, %v3240_v62, %v3241_v16  ;;  %v3246_v17 = vsel %vm541_vm8, %v3244_v5, %v3245_v34  ;;  %v3250_v25 = vsel %vm547_vm10, %v3248_v8, %v3249_v52 }
 0x696   :  { %v3243_v18 = vrot.slane %v3242_v61, 1  ;;  %v3247_v31 = vrot.slane %v3246_v17, 2  ;;  %v3251_v48 = vrot.slane %v3250_v25, 3  ;;  %v3253_v9 = vsel %vm551_vm11, %v3235_v43, %v3236_v11 }
 0x697   :  { %v3254_v36 = vsel %vm553_vm12, %v3252_v22, %v3253_v9  ;;  %v3257_v27 = vsel %vm557_vm13, %v3236_v11, %v3235_v43  ;;  %v3261_v55 = vsel %vm525_vm1, %v3235_v43, %v3236_v11  ;;  %v3265_v38 = vsel %vm531_vm4, %v3235_v43, %v3236_v11 }
 0x698   :  { %v3255_v42 = vrot.slane %v3254_v36, 4  ;;  %v3258_v37 = vsel %vm559_vm14, %v3256_v2, %v3257_v27  ;;  %v3262_v1 = vsel %vm564_vm15, %v3261_v55, %v3260_v24  ;;  %v3266_v39 = vsel %vm569_vm0, %v3265_v38, %v3264_v44 }
 0x699   :  { %v3259_v60 = vrot.slane %v3258_v37, 5  ;;  %v3263_v49 = vrot.slane %v3262_v1, 6  ;;  %v3267_v51 = vrot.slane %v3266_v39, 7  ;;  %v6587_v33 = vadd.f32 %v3239_v6, %v3110_v56 }
 0x69a   :  { %v6589_v53 = vadd.f32 %v3243_v18, %v3112_v0  ;;  %v6591_v21 = vadd.f32 %v3247_v31, %v3114_v7  ;;  %v6593_v35 = vadd.f32 %v3251_v48, %v3116_v41  ;;  %v6595_v32 = vadd.f32 %v3255_v42, %v3118_v19 }
 0x69b   :  { %v6597_v54 = vadd.f32 %v3259_v60, %v3120_v10  ;;  %v6599_v30 = vadd.f32 %v3263_v49, %v3122_v57  ;;  %v6601_v3 = vadd.f32 %v3267_v51, %v3124_v12  ;;  %v3284_v13 = vmul.f32 0.5, %v6587_v33 }
 0x69c   :  { %v3285_v28 = vmul.f32 0.5, %v6589_v53  ;;  %v3286_v58 = vmul.f32 0.5, %v6591_v21  ;;  %v3287_v4 = vmul.f32 0.5, %v6593_v35  ;;  %v3288_v46 = vmul.f32 0.5, %v6595_v32 }
 0x69d   :  { %4207 = vtanh.f32 %v3284_v13  ;;  %v3289_v50 = vmul.f32 0.5, %v6597_v54  ;;  %v3324_v62 = vrot.slane %v6587_v33, 1  ;;  %v3325_v59 = vrot.slane %v6589_v53, 1 }
 0x69e   :  { %4209 = vtanh.f32 %v3285_v28  ;;  %v3290_v47 = vmul.f32 0.5, %v6599_v30  ;;  %v3291_v5 = vmul.f32 0.5, %v6601_v3  ;;  %v3326_v8 = vrot.slane %v6591_v21, 1 }
 0x69f   :  { %4211 = vtanh.f32 %v3286_v58  ;;  %v3327_v43 = vrot.slane %v6593_v35, 1  ;;  %v3328_v11 = vrot.slane %v6595_v32, 1  ;;  %v3329_v22 = vrot.slane %v6597_v54, 1 }
 0x6a0   :  { %4213 = vtanh.f32 %v3287_v4  ;;  %v3330_v2 = vrot.slane %v6599_v30, 1  ;;  %v3331_v24 = vrot.slane %v6601_v3, 1  ;;  %v3340_v44 = vmul.f32 0.5, %v3324_v62 }
 0x6a1   :  { %4215 = vtanh.f32 %v3288_v46  ;;  %v3341_v15 = vmul.f32 0.5, %v3325_v59  ;;  %v3342_v34 = vmul.f32 0.5, %v3326_v8  ;;  %v3343_v6 = vmul.f32 0.5, %v3327_v43 }
 0x6a2   :  { %4217 = vtanh.f32 %v3289_v50  ;;  %v3344_v61 = vmul.f32 0.5, %v3328_v11  ;;  %v3345_v17 = vmul.f32 0.5, %v3329_v22  ;;  %v3346_v18 = vmul.f32 0.5, %v3330_v2 }
 0x6a3   :  { %v4208_v16 = vpop.eup %4207  ;;  %4219 = vtanh.f32 %v3290_v47  ;;  %v3347_v31 = vmul.f32 0.5, %v3331_v24  ;;  %v3372_v0 = vrot.slane %v6587_v33, 2  ;;  %v3373_v7 = vrot.slane %v6589_v53, 2 }
 0x6a4   :  { %v4210_v52 = vpop.eup %4209  ;;  %4221 = vtanh.f32 %v3291_v5  ;;  %v3300_v56 = vmul.f32 0.5, %v4208_v16  ;;  %v3374_v27 = vrot.slane %v6591_v21, 2  ;;  %v3375_v55 = vrot.slane %v6593_v35, 2 }
 0x6a5   :  { %v4212_v25 = vpop.eup %4211  ;;  %4223 = vtanh.f32 %v3340_v44  ;;  %v3301_v9 = vmul.f32 0.5, %v4210_v52  ;;  %v3376_v42 = vrot.slane %v6595_v32, 2  ;;  %v3377_v37 = vrot.slane %v6597_v54, 2 }
 0x6a6   :  { %v4214_v48 = vpop.eup %4213  ;;  %4225 = vtanh.f32 %v3341_v15  ;;  %v3302_v36 = vmul.f32 0.5, %v4212_v25  ;;  %v6625_v60 = vadd.f32 0.5, %v3300_v56  ;;  %v3378_v12 = vrot.slane %v6599_v30, 2 }
 0x6a7   :  { %v4216_v41 = vpop.eup %4215  ;;  %4227 = vtanh.f32 %v3342_v34  ;;  %v3303_v19 = vmul.f32 0.5, %v4214_v48  ;;  %v6627_v57 = vadd.f32 0.5, %v3301_v9  ;;  %v3379_v4 = vrot.slane %v6601_v3, 2 }
 0x6a8   :  { %v4218_v38 = vpop.eup %4217  ;;  %4229 = vtanh.f32 %v3343_v6  ;;  %v3304_v39 = vmul.f32 0.5, %v4216_v41  ;;  %v6630_v58 = vadd.f32 0.5, %v3302_v36  ;;  %v3396_v59 = vrot.slane %v6587_v33, 3 }
 0x6a9   :  { %v4220_v1 = vpop.eup %4219  ;;  %v3305_v10 = vmul.f32 0.5, %v4218_v38  ;;  %4231 = vtanh.f32 %v3344_v61  ;;  %v6633_v50 = vadd.f32 0.5, %v3303_v19  ;;  %v3397_v43 = vrot.slane %v6589_v53, 3 }
 0x6aa   :  { %v4222_v49 = vpop.eup %4221  ;;  %v3306_v51 = vmul.f32 0.5, %v4220_v1  ;;  %4233 = vtanh.f32 %v3345_v17  ;;  %v6636_v5 = vadd.f32 0.5, %v3304_v39  ;;  %v3398_v11 = vrot.slane %v6591_v21, 3 }
 0x6ab   :  { %v4224_v13 = vpop.eup %4223  ;;  %v3307_v28 = vmul.f32 0.5, %v4222_v49  ;;  %4235 = vtanh.f32 %v3346_v18  ;;  %v6638_v8 = vadd.f32 0.5, %v3305_v10  ;;  %v3399_v44 = vrot.slane %v6593_v35, 3 }
 0x6ac   :  { %v4226_v46 = vpop.eup %4225  ;;  %4237 = vtanh.f32 %v3347_v31  ;;  %v3356_v62 = vmul.f32 0.5, %v4224_v13  ;;  %v6642_v2 = vadd.f32 0.5, %v3306_v51  ;;  %v3400_v33 = vrot.slane %v6595_v32, 3 }
 0x6ad   :  { %v4228_v47 = vpop.eup %4227  ;;  %v3357_v24 = vmul.f32 0.5, %v4226_v46  ;;  %4239 = vtanh.f32 %v3372_v0  ;;  %v6645_v16 = vadd.f32 0.5, %v3307_v28  ;;  %v3401_v34 = vrot.slane %v6597_v54, 3 }
 0x6ae   :  { %v4230_v22 = vpop.eup %4229  ;;  %4241 = vtanh.f32 %v3373_v7  ;;  %v3358_v6 = vmul.f32 0.5, %v4228_v47  ;;  %v3364_v61 = vadd.f32 0.5, %v3356_v62  ;;  %v3402_v56 = vrot.slane %v6599_v30, 3 }
 0x6af   :  { %v4232_v15 = vpop.eup %4231  ;;  %v3359_v53 = vmul.f32 0.5, %v4230_v22  ;;  %4243 = vtanh.f32 %v3374_v27  ;;  %v3365_v31 = vadd.f32 0.5, %v3357_v24  ;;  %v3412_v48 = vmul.f32 0.5, %v3396_v59 }
 0x6b0   :  { %v4234_v52 = vpop.eup %4233  ;;  %v3360_v17 = vmul.f32 0.5, %v4232_v15  ;;  %4245 = vtanh.f32 %v3375_v55  ;;  %v3403_v32 = vrot.slane %v6601_v3, 3  ;;  %v3413_v54 = vmul.f32 0.5, %v3397_v43 }
 0x6b1   :  { %v4236_v21 = vpop.eup %4235  ;;  %v3361_v25 = vmul.f32 0.5, %v4234_v52  ;;  %4247 = vtanh.f32 %v3376_v42  ;;  %v3366_v7 = vadd.f32 0.5, %v3358_v6  ;;  %v3367_v41 = vadd.f32 0.5, %v3359_v53 }
 0x6b2   :  { %v4238_v35 = vpop.eup %4237  ;;  %v3362_v18 = vmul.f32 0.5, %v4236_v21  ;;  %4249 = vtanh.f32 %v3377_v37  ;;  %v3414_v36 = vmul.f32 0.5, %v3398_v11  ;;  %v3368_v38 = vadd.f32 0.5, %v3360_v17 }
 0x6b3   :  { %v3363_v9 = vmul.f32 0.5, %v4238_v35  ;;  %v4240_v0 = vpop.eup %4239  ;;  %4251 = vtanh.f32 %v3378_v12  ;;  %v3369_v55 = vadd.f32 0.5, %v3361_v25  ;;  %v3415_v30 = vmul.f32 0.5, %v3399_v44 }
 0x6b4   :  { %v4242_v27 = vpop.eup %4241  ;;  %4253 = vtanh.f32 %v3379_v4  ;;  %v3370_v1 = vadd.f32 0.5, %v3362_v18  ;;  %v3416_v39 = vmul.f32 0.5, %v3400_v33  ;;  %v3417_v42 = vmul.f32 0.5, %v3401_v34 }
 0x6b5   :  { %v4244_v19 = vpop.eup %4243  ;;  %4255 = vtanh.f32 %v3412_v48  ;;  %v3371_v37 = vadd.f32 0.5, %v3363_v9  ;;  %v3444_v3 = vmul.f32 %v3364_v61, %v6533_v23  ;;  %v3445_v49 = vmul.f32 %v3365_v31, %v6535_v29 }
 0x6b6   :  { %v4246_v10 = vpop.eup %4245  ;;  %4257 = vtanh.f32 %v3413_v54  ;;  %v3418_v12 = vmul.f32 0.5, %v3402_v56  ;;  %v3419_v13 = vmul.f32 0.5, %v3403_v32  ;;  %v3446_v28 = vmul.f32 %v3366_v7, %v6539_v40 }
 0x6b7   :  { %v4248_v51 = vpop.eup %4247  ;;  %4259 = vtanh.f32 %v3414_v36  ;;  %v3447_v46 = vmul.f32 %v3367_v41, %v6543_v20  ;;  %v3452_v62 = vmul.f32 %v4240_v0, %v6625_v60  ;;  %v3453_v59 = vmul.f32 %v4242_v27, %v6627_v57 }
 0x6b8   :  { %v4250_v4 = vpop.eup %4249  ;;  %4261 = vtanh.f32 %v3415_v30  ;;  %v3448_v23 = vmul.f32 %v3368_v38, %v6546_v63  ;;  %v3449_v29 = vmul.f32 %v3369_v55, %v6550_v26  ;;  %v3454_v43 = vmul.f32 %v4244_v19, %v6630_v58 }
 0x6b9   :  { %v4252_v47 = vpop.eup %4251  ;;  %4263 = vtanh.f32 %v3416_v39  ;;  %v3455_v40 = vmul.f32 %v4246_v10, %v6633_v50  ;;  %v6661_v22 = vadd.f32 %v3452_v62, %v3444_v3  ;;  %v6663_v24 = vadd.f32 %v3453_v59, %v3445_v49 }
 0x6ba   :  { %v4254_v11 = vpop.eup %4253  ;;  %4265 = vtanh.f32 %v3417_v42  ;;  %v3450_v60 = vmul.f32 %v3370_v1, %v6553_v45  ;;  %v3456_v57 = vmul.f32 %v4248_v51, %v6636_v5  ;;  %v6667_v44 = vadd.f32 %v3454_v43, %v3446_v28 }
 0x6bb   :  { %v4256_v20 = vpop.eup %4255  ;;  %4267 = vtanh.f32 %v3418_v12  ;;  %v3451_v26 = vmul.f32 %v3371_v37, %v6556_v14  ;;  %v3457_v58 = vmul.f32 %v4250_v4, %v6638_v8  ;;  %v6671_v15 = vadd.f32 %v3455_v40, %v3447_v46 }
 0x6bc   :  { %v4258_v63 = vpop.eup %4257  ;;  %4269 = vtanh.f32 %v3419_v13  ;;  %v3458_v33 = vmul.f32 %v4252_v47, %v6642_v2  ;;  %v6674_v34 = vadd.f32 %v3456_v57, %v3448_v23  ;;  %v3428_v52 = vmul.f32 0.5, %v4256_v20 }
 0x6bd   :  { %v4260_v50 = vpop.eup %4259  ;;  %4271 = vtanh.f32 %v6661_v22  ;;  %v3459_v5 = vmul.f32 %v4254_v11, %v6645_v16  ;;  %v6678_v6 = vadd.f32 %v3457_v58, %v3449_v29  ;;  %v3429_v53 = vmul.f32 0.5, %v4258_v63 }
 0x6be   :  { %v4262_v45 = vpop.eup %4261  ;;  %4273 = vtanh.f32 %v6663_v24  ;;  %v6681_v8 = vadd.f32 %v3458_v33, %v3450_v60  ;;  %v3430_v2 = vmul.f32 0.5, %v4260_v50  ;;  %v3436_v35 = vadd.f32 0.5, %v3428_v52 }
 0x6bf   :  { %v4264_v14 = vpop.eup %4263  ;;  %4275 = vtanh.f32 %v6667_v44  ;;  %v6684_v21 = vadd.f32 %v3459_v5, %v3451_v26  ;;  %v3431_v25 = vmul.f32 0.5, %v4262_v45  ;;  %v3437_v48 = vadd.f32 0.5, %v3429_v53 }
 0x6c0   :  { %v4266_v61 = vpop.eup %4265  ;;  %4277 = vtanh.f32 %v6671_v15  ;;  %v3432_v56 = vmul.f32 0.5, %v4264_v14  ;;  %v3438_v54 = vadd.f32 0.5, %v3430_v2 }
 0x6c1   :  { %v4268_v17 = vpop.eup %4267  ;;  %4279 = vtanh.f32 %v6674_v34  ;;  %v3433_v31 = vmul.f32 0.5, %v4266_v61  ;;  %v3439_v36 = vadd.f32 0.5, %v3431_v25 }
 0x6c2   :  { %v4270_v16 = vpop.eup %4269  ;;  %4281 = vtanh.f32 %v6678_v6  ;;  %v3434_v32 = vmul.f32 0.5, %v4268_v17  ;;  %v3440_v55 = vadd.f32 0.5, %v3432_v56 }
 0x6c3   :  { %v4272_v18 = vpop.eup %4271  ;;  %4283 = vtanh.f32 %v6681_v8  ;;  %v3435_v41 = vmul.f32 0.5, %v4270_v16  ;;  %v3441_v1 = vadd.f32 0.5, %v3433_v31 }
 0x6c4   :  { %v4274_v9 = vpop.eup %4273  ;;  %4285 = vtanh.f32 %v6684_v21  ;;  %v3476_v0 = vmul.f32 %v4272_v18, %v3436_v35  ;;  %v3442_v10 = vadd.f32 0.5, %v3434_v32 }
 0x6c5   :  { %v4276_v7 = vpop.eup %4275  ;;  %v3477_v27 = vmul.f32 %v4274_v9, %v3437_v48  ;;  %v3443_v49 = vadd.f32 0.5, %v3435_v41 }
 0x6c6   :  { %v4278_v38 = vpop.eup %4277  ;;  %v3478_v30 = vmul.f32 %v4276_v7, %v3438_v54  ;;  %3484 = vst [vmem:[#allocation14 + $0x7] sm:$0x1] %v3476_v0 }
 0x6c7   :  { %v4280_v19 = vpop.eup %4279  ;;  %v3479_v39 = vmul.f32 %v4278_v38, %v3439_v36  ;;  %3485 = vst [vmem:[#allocation14 + $0xf] sm:$0x1] %v3477_v27 }
 0x6c8   :  { %v4282_v42 = vpop.eup %4281  ;;  %v3480_v37 = vmul.f32 %v4280_v19, %v3440_v55  ;;  %3486 = vst [vmem:[#allocation14 + $0x17] sm:$0x1] %v3478_v30 }
 0x6c9   :  { %v4284_v3 = vpop.eup %4283  ;;  %v3481_v51 = vmul.f32 %v4282_v42, %v3441_v1  ;;  %3487 = vst [vmem:[#allocation14 + $0x1f] sm:$0x1] %v3479_v39 }
 0x6ca   :  { %v4286_v12 = vpop.eup %4285  ;;  %v3482_v13 = vmul.f32 %v4284_v3, %v3442_v10  ;;  %3488 = vst [vmem:[#allocation14 + $0x27] sm:$0x1] %v3480_v37 }
 0x6cb   :  { %v3483_v28 = vmul.f32 %v4286_v12, %v3443_v49  ;;  %3489 = vst [vmem:[#allocation14 + $0x2f] sm:$0x1] %v3481_v51 }
 0x6cc   :  { %3490 = vst [vmem:[#allocation14 + $0x37] sm:$0x1] %v3482_v13 }
 0x6cd   :  { %3491 = vst [vmem:[#allocation14 + $0x3f] sm:$0x1] %v3483_v28 }
 0x6ce   :  { %3500 = vst [vmem:[#allocation1] ss:$9 sm:$0xff] %v3476_v0  ;;  %3563 = dma.vmem_to_hbm [thread:$0]  %s3556_s9, 1024, %s3558_s12, [#allocation7], %s4686_s23, %s4686_s23, %s4687_s24  }
 0x6cf   :  { %3502 = vst [vmem:[#allocation1 + $0x1] ss:$9 sm:$0xff] %v3477_v27 }
 0x6d0   :  { %3504 = vst [vmem:[#allocation1 + $0x2] ss:$9 sm:$0xff] %v3478_v30 }
 0x6d1   :  { %3506 = vst [vmem:[#allocation1 + $0x3] ss:$9 sm:$0xff] %v3479_v39 }
 0x6d2   :  { %3508 = vst [vmem:[#allocation1 + $0x4] ss:$9 sm:$0xff] %v3480_v37 }
 0x6d3   :  { %3510 = vst [vmem:[#allocation1 + $0x5] ss:$9 sm:$0xff] %v3481_v51 }
 0x6d4   :  { %3512 = vst [vmem:[#allocation1 + $0x6] ss:$9 sm:$0xff] %v3482_v13 }
 0x6d5   :  { %3514 = vst [vmem:[#allocation1 + $0x7] ss:$9 sm:$0xff] %v3483_v28 }
 0x6dc   :  { %v3515_v4 = vld [vmem:[#allocation1] sm:$0xff] }
 0x6dd   :  { %3548 = vst [vmem:[#allocation15] sm:$0xff] %v3515_v4 }
 0x6de   :  { %3574 = dma.vmem_to_hbm [thread:$0]  %s3570_s13, 128, %s3572_s16, [#allocation16]   ;;  %3526 = vst [vmem:[#allocation1] ss:$9 sm:$0xff] %v6661_v22 }
 0x6df   :  { %3528 = vst [vmem:[#allocation1 + $0x1] ss:$9 sm:$0xff] %v6663_v24 }
 0x6e0   :  { %3530 = vst [vmem:[#allocation1 + $0x2] ss:$9 sm:$0xff] %v6667_v44 }
 0x6e1   :  { %3532 = vst [vmem:[#allocation1 + $0x3] ss:$9 sm:$0xff] %v6671_v15 }
 0x6e2   :  { %3534 = vst [vmem:[#allocation1 + $0x4] ss:$9 sm:$0xff] %v6674_v34 }
 0x6e3   :  { %3536 = vst [vmem:[#allocation1 + $0x5] ss:$9 sm:$0xff] %v6678_v6 }
 0x6e4   :  { %3538 = vst [vmem:[#allocation1 + $0x6] ss:$9 sm:$0xff] %v6681_v8 }
 0x6e5   :  { %3540 = vst [vmem:[#allocation1 + $0x7] ss:$9 sm:$0xff] %v6684_v21 }
 0x6ec   :  { %v3541_v46 = vld [vmem:[#allocation1] sm:$0xff] }
 0x6ed   :  { %3550 = vst [vmem:[#allocation17] sm:$0xff] %v3541_v46 }
 0x6ee   :  { %3585 = dma.vmem_to_hbm [thread:$0]  %s3581_s17, 128, %s3583_s19, [#allocation16]  }
 0x6ef   :  { %4677 = dma.done.wait [#allocation7], 1024  }
 0x6f0   :  { %4678 = vsyncadd [#allocation7], 4294966272 }
 0x6f1   :  { %4679 = dma.done.wait [#allocation16], 256  }
 0x6f2   :  { %4680 = vsyncadd [#allocation16], 4294967040 }
 0x6f3   :  { %3598 = vsyncpa [#allocation6], 1 }
 0x6f4   :  { %3599 = vsyncpa [#allocation9], 1 }
 0x6f5   :  { %3600 = vsyncpa [#allocation12], 1 }
 0x6f6   :  { %3601 = vsyncpa [#allocation7], 1 }
 0x6f7   :  { %3602 = vsyncpa [#allocation16], 1 }

// kernel: tpu_custom_call.1
= control target key start
LH: loop header
LB: loop body
LE: loop exit
PB: predicated region body
PF: predicated region fallthrough
CT: control target
= control target key end

     0   :  { %14 = vsyncpa [#allocation6], 0  ;;  %s6711_s0 = inlined_call_operand.hbm [shape: f32[8,8,16], index: 0, kind: input, shape index: {}]   ;;  %s6712_s1 = inlined_call_operand.hbm [shape: f32[8,128], index: 1, kind: input, shape index: {}]   ;;  %s6713_s2 = inlined_call_operand.hbm [shape: f32[8,128], index: 2, kind: input, shape index: {}]   ;;  %s6714_s3 = inlined_call_operand.hbm [shape: f32[16,512], index: 3, kind: input, shape index: {}]   ;;  %s6715_s4 = inlined_call_operand.hbm [shape: f32[128,512], index: 4, kind: input, shape index: {}]   ;;  %s6716_s5 = inlined_call_operand.vmem [shape: f32[1,512], index: 5, kind: input, shape index: {}]   ;;  %s6717_s6 = inlined_call_operand.hbm [shape: f32[8,8,128], index: 6, kind: output, shape index: {0}]   ;;  %s6718_s7 = inlined_call_operand.hbm [shape: f32[8,128], index: 7, kind: output, shape index: {1}]   ;;  %s6719_s8 = inlined_call_operand.hbm [shape: f32[8,128], index: 8, kind: output, shape index: {2}]  }
   0x1   :  { %15 = vsyncpa [#allocation9], 0 }
   0x2   :  { %16 = vsyncpa [#allocation12], 0 }
   0x3   :  { %17 = vsyncpa [#allocation7], 0  ;;  %s37_s29 = sshll.u32 %s6712_s1, 4  ;;  %s38_s29 = int_to_ptr.hbm [resolvable:$true] %s37_s29 }
   0x4   :  { %18 = vsyncpa [#allocation16], 0  ;;  %s4681_s30 = smov [#allocation8]   ;;  %s58_s12 = sshll.u32 %s6714_s3, 4  ;;  %s59_s12 = int_to_ptr.hbm [resolvable:$true] %s58_s12 }
   0x5   :  { %s39_s9 = sshll.u32 %s4681_s30, 4  ;;  %s4682_s13 = smov [#allocation11]   ;;  %s40_s9 = int_to_ptr.vmem [resolvable:$true] %s39_s9 }
   0x6   :  { %42 = dma.hbm_to_vmem [thread:$0]  %s38_s29, 128, %s40_s9, [#allocation9]  }
   0x7   :  { %s60_s14 = sshll.u32 %s4682_s13, 4  ;;  %s4683_s15 = smov 512   ;;  %s61_s14 = int_to_ptr.vmem [resolvable:$true] %s60_s14 }
   0x8   :  { %s4684_s16 = smov 32   ;;  %s23_s1 = sshll.u32 %s6711_s0, 4  ;;  %s24_s1 = int_to_ptr.hbm [resolvable:$true] %s23_s1 }
   0x9   :  { %66 = dma.hbm_to_vmem [thread:$0]  %s59_s12, 1024, %s61_s14, [#allocation12], %s4683_s15, %s4683_s15, %s4684_s16  }
   0xa   :  { %s4685_s19 = smov [#allocation5]   ;;  %s48_s3 = sshll.u32 %s6713_s2, 4  ;;  %s49_s3 = int_to_ptr.hbm [resolvable:$true] %s48_s3 }
   0xb   :  { %s25_s20 = sshll.u32 %s4685_s19, 4  ;;  %s4686_s23 = smov 128   ;;  %s26_s20 = int_to_ptr.vmem [resolvable:$true] %s25_s20 }
   0xc   :  { %s4687_s24 = smov 8   ;;  %s4688_s25 = smov [#allocation10]  }
   0xd   :  { %31 = dma.hbm_to_vmem [thread:$0]  %s24_s1, 1024, %s26_s20, [#allocation6], %s4686_s23, %s4686_s23, %s4687_s24  }
   0xe   :  { %s50_s26 = sshll.u32 %s4688_s25, 4  ;;  %s71_s0 = sshll.u32 %s6715_s4, 4  ;;  %s51_s26 = int_to_ptr.vmem [resolvable:$true] %s50_s26  ;;  %s72_s0 = int_to_ptr.hbm [resolvable:$true] %s71_s0 }
   0xf   :  { %53 = dma.hbm_to_vmem [thread:$0]  %s49_s3, 128, %s51_s26, [#allocation9]  }
  0x10   :  { %s4689_s29 = smov [#allocation13]  }
  0x11   :  { %s73_s30 = sshll.u32 %s4689_s29, 4  ;;  %s74_s30 = int_to_ptr.vmem [resolvable:$true] %s73_s30 }
  0x12   :  { %79 = dma.hbm_to_vmem [thread:$0]  %s72_s0, 8192, %s74_s30, [#allocation12], %s4683_s15, %s4683_s15, %s4684_s16  }
  0x13   :  { %4671 = dma.done.wait [#allocation6], 1024  }
  0x14   :  { %4672 = vsyncadd [#allocation6], 4294966272 }
  0x15   :  { %4673 = dma.done.wait [#allocation9], 256  }
  0x16   :  { %4674 = vsyncadd [#allocation9], 4294967040 }
  0x17   :  { %4675 = dma.done.wait [#allocation12], 9216  }
  0x18   :  { %4676 = vsyncadd [#allocation12], 4294958080  ;;  %v124_v0 = vld [vmem:[#allocation11 + $0x30] sm:$0xff]  ;;  %v125_v1 = vld [vmem:[#allocation11 + $0x38] sm:$0xff]  ;;  %vm136_vm0 = vcmask 130048   ;;  %vm525_vm1 = vcmask 1040384  }
  0x19   :  { %v120_v2 = vld [vmem:[#allocation11 + $0x10] sm:$0xff]  ;;  %257 = vmatpush.msra.mxu2 %v124_v0  ;;  %298 = vmatpush.msra.mxu3 %v125_v1  ;;  %v121_v3 = vld [vmem:[#allocation11 + $0x18] sm:$0xff]  ;;  %v122_v7 = vld [vmem:[#allocation11 + $0x20] sm:$0xff]  ;;  %vm527_vm2 = vcmask 1042434   ;;  %vm529_vm3 = vcmask 1041408   ;;  %vm531_vm4 = vcmask 1041409  }
  0x1a   :  { %v110_v4 = vld [vmem:[#allocation5] sm:$0xff]  ;;  %v4758_v6 = vld [vmem:[#allocation13 + $0x1f8] sm:$0xff]  ;;  %v123_v8 = vld [vmem:[#allocation11 + $0x28] sm:$0xff]  ;;  %175 = vmatpush.msra.mxu0 %v122_v7  ;;  %vm533_vm5 = vcmask 1043459   ;;  %vm535_vm6 = vcmask 1042433   ;;  %vm539_vm7 = vcmask 1044484  }
  0x1b   :  { %v4756_v5 = vld [vmem:[#allocation13 + $0x1f0] sm:$0xff]  ;;  %258 = vmatpush.msra.mxu2 %v120_v2  ;;  %299 = vmatpush.msra.mxu3 %v121_v3  ;;  %v4764_v10 = vld [vmem:[#allocation13 + $0x1d8] sm:$0xff]  ;;  %v118_v11 = vld [vmem:[#allocation11] sm:$0xff]  ;;  %vm541_vm8 = vcmask 1043458   ;;  %vm545_vm9 = vcmask 1045509   ;;  %vm547_vm10 = vcmask 1044483  }
  0x1c   :  { %3619 = vmatmul.msk.f32.vlgmr.msra.gmra.mxu2 %vm136_vm0, %v110_v4  ;;  %3627 = vmatmul.msk.f32.vlgmr.msra.gmra.mxu3 %vm136_vm0, %v110_v4  ;;  %v4762_v9 = vld [vmem:[#allocation13 + $0x1d0] sm:$0xff]  ;;  %v119_v12 = vld [vmem:[#allocation11 + $0x8] sm:$0xff]  ;;  %v4772_v14 = vld [vmem:[#allocation13 + $0x1e0] sm:$0xff]  ;;  %vm551_vm11 = vcmask 1046534   ;;  %vm553_vm12 = vcmask 1045508   ;;  %vm557_vm13 = vcmask 1046528  }
  0x1d   :  { %478 = vmatpush.msrb.mxu2 %v4756_v5  ;;  %498 = vmatpush.msrb.mxu3 %v4758_v6  ;;  %v4770_v13 = vld [vmem:[#allocation13 + $0x1e8] sm:$0xff]  ;;  %v4774_v15 = vld [vmem:[#allocation13 + $0x1b0] sm:$0xff]  ;;  %v4776_v16 = vld [vmem:[#allocation13 + $0x1b8] sm:$0xff]  ;;  %vm559_vm14 = vcmask 1046533   ;;  %vm564_vm15 = vcmask 1045504   ;;  %s3557_s12 = sshll.u32 %s6717_s6, 4  ;;  %s3558_s12 = int_to_ptr.hbm [resolvable:$true] %s3557_s12 }
  0x1e   :  { %216 = vmatpush.msra.mxu1 %v123_v8  ;;  %176 = vmatpush.msra.mxu0 %v118_v11  ;;  %v111_v17 = vld [vmem:[#allocation5 + $0x8] sm:$0xff]  ;;  %v4782_v18 = vld [vmem:[#allocation13 + $0x1c8] sm:$0xff]  ;;  %v4784_v19 = vld [vmem:[#allocation13 + $0x1c0] sm:$0xff]  ;;  %s4691_s6 = smov [#allocation15]   ;;  %s3571_s16 = sshll.u32 %s6718_s7, 4  ;;  %s3572_s16 = int_to_ptr.hbm [resolvable:$true] %s3571_s16 }
  0x1f   :  { %479 = vmatpush.msrb.mxu2 %v4762_v9  ;;  %499 = vmatpush.msrb.mxu3 %v4764_v10  ;;  %v4788_v20 = vld [vmem:[#allocation13 + $0x190] sm:$0xff]  ;;  %v4790_v21 = vld [vmem:[#allocation13 + $0x198] sm:$0xff]  ;;  %v4794_v22 = vld [vmem:[#allocation13 + $0x1a8] sm:$0xff]  ;;  %s3569_s13 = sshll.u32 %s4691_s6, 4  ;;  %s4692_s7 = smov [#allocation17]   ;;  %s3570_s13 = int_to_ptr.vmem [resolvable:$true] %s3569_s13 }
  0x20   :  { %217 = vmatpush.msra.mxu1 %v119_v12  ;;  %3603 = vmatmul.msk.f32.vlgmr.msra.gmra.mxu0 %vm136_vm0, %v110_v4  ;;  %v4796_v23 = vld [vmem:[#allocation13 + $0x1a0] sm:$0xff]  ;;  %v4800_v24 = vld [vmem:[#allocation13 + $0x170] sm:$0xff]  ;;  %v4802_v25 = vld [vmem:[#allocation13 + $0x178] sm:$0xff]  ;;  %s3580_s17 = sshll.u32 %s4692_s7, 4  ;;  %s3582_s19 = sshll.u32 %s6719_s8, 4  ;;  %s3581_s17 = int_to_ptr.vmem [resolvable:$true] %s3580_s17  ;;  %s3583_s19 = int_to_ptr.hbm [resolvable:$true] %s3582_s19 }
  0x21   :  { %3611 = vmatmul.msk.f32.vlgmr.msra.gmra.mxu1 %vm136_vm0, %v110_v4  ;;  %438 = vmatpush.msrb.mxu0 %v4772_v14  ;;  %v4808_v26 = vld [vmem:[#allocation13 + $0x188] sm:$0xff]  ;;  %v4810_v27 = vld [vmem:[#allocation13 + $0x180] sm:$0xff]  ;;  %v4814_v28 = vld [vmem:[#allocation13 + $0x150] sm:$0xff] }
  0x22   :  { %458 = vmatpush.msrb.mxu1 %v4770_v13  ;;  %480 = vmatpush.msrb.mxu2 %v4774_v15  ;;  %v4816_v29 = vld [vmem:[#allocation13 + $0x158] sm:$0xff]  ;;  %v112_v30 = vld [vmem:[#allocation5 + $0x10] sm:$0xff]  ;;  %v4822_v31 = vld [vmem:[#allocation13 + $0x168] sm:$0xff] }
  0x23   :  { %500 = vmatpush.msrb.mxu3 %v4776_v16  ;;  %439 = vmatpush.msrb.mxu0 %v4784_v19  ;;  %v4824_v32 = vld [vmem:[#allocation13 + $0x160] sm:$0xff]  ;;  %v4828_v33 = vld [vmem:[#allocation13 + $0x130] sm:$0xff]  ;;  %v4830_v34 = vld [vmem:[#allocation13 + $0x138] sm:$0xff] }
  0x24   :  { %3620 = vmatmul.msk.f32.gmra.mxu2 %vm136_vm0, %v111_v17  ;;  %3628 = vmatmul.msk.f32.gmra.mxu3 %vm136_vm0, %v111_v17  ;;  %v4834_v35 = vld [vmem:[#allocation13 + $0x148] sm:$0xff]  ;;  %v4836_v36 = vld [vmem:[#allocation13 + $0x140] sm:$0xff]  ;;  %v4840_v37 = vld [vmem:[#allocation13 + $0x110] sm:$0xff] }
  0x25   :  { %459 = vmatpush.msrb.mxu1 %v4782_v18  ;;  %481 = vmatpush.msrb.mxu2 %v4788_v20  ;;  %v4842_v38 = vld [vmem:[#allocation13 + $0x118] sm:$0xff]  ;;  %v4848_v39 = vld [vmem:[#allocation13 + $0x128] sm:$0xff]  ;;  %v4850_v40 = vld [vmem:[#allocation13 + $0x120] sm:$0xff] }
  0x26   :  { %501 = vmatpush.msrb.mxu3 %v4790_v21  ;;  %440 = vmatpush.msrb.mxu0 %v4796_v23  ;;  %v4854_v41 = vld [vmem:[#allocation13 + $0xf0] sm:$0xff]  ;;  %v4856_v42 = vld [vmem:[#allocation13 + $0xf8] sm:$0xff]  ;;  %v113_v43 = vld [vmem:[#allocation5 + $0x18] sm:$0xff] }
  0x27   :  { %460 = vmatpush.msrb.mxu1 %v4794_v22  ;;  %482 = vmatpush.msrb.mxu2 %v4800_v24  ;;  %v4862_v44 = vld [vmem:[#allocation13 + $0x108] sm:$0xff]  ;;  %v4864_v45 = vld [vmem:[#allocation13 + $0x100] sm:$0xff]  ;;  %v4868_v46 = vld [vmem:[#allocation13 + $0xd0] sm:$0xff] }
  0x28   :  { %502 = vmatpush.msrb.mxu3 %v4802_v25  ;;  %3604 = vmatmul.msk.f32.gmra.mxu0 %vm136_vm0, %v111_v17  ;;  %v4870_v47 = vld [vmem:[#allocation13 + $0xd8] sm:$0xff]  ;;  %v4874_v48 = vld [vmem:[#allocation13 + $0xe8] sm:$0xff]  ;;  %v4876_v49 = vld [vmem:[#allocation13 + $0xe0] sm:$0xff] }
  0x29   :  { %3612 = vmatmul.msk.f32.gmra.mxu1 %vm136_vm0, %v111_v17  ;;  %441 = vmatpush.msrb.mxu0 %v4810_v27  ;;  %v4880_v50 = vld [vmem:[#allocation13 + $0xb0] sm:$0xff]  ;;  %v4882_v51 = vld [vmem:[#allocation13 + $0xb8] sm:$0xff]  ;;  %v4888_v52 = vld [vmem:[#allocation13 + $0xc8] sm:$0xff] }
  0x2a   :  { %461 = vmatpush.msrb.mxu1 %v4808_v26  ;;  %483 = vmatpush.msrb.mxu2 %v4814_v28  ;;  %v4890_v53 = vld [vmem:[#allocation13 + $0xc0] sm:$0xff]  ;;  %v4894_v54 = vld [vmem:[#allocation13 + $0x90] sm:$0xff]  ;;  %v4896_v55 = vld [vmem:[#allocation13 + $0x98] sm:$0xff] }
  0x2b   :  { %503 = vmatpush.msrb.mxu3 %v4816_v29  ;;  %442 = vmatpush.msrb.mxu0 %v4824_v32  ;;  %v114_v56 = vld [vmem:[#allocation5 + $0x20] sm:$0xff]  ;;  %v4902_v57 = vld [vmem:[#allocation13 + $0xa8] sm:$0xff]  ;;  %v4904_v58 = vld [vmem:[#allocation13 + $0xa0] sm:$0xff] }
  0x2c   :  { %3621 = vmatmul.msk.f32.gmra.mxu2 %vm136_vm0, %v112_v30  ;;  %3629 = vmatmul.msk.f32.gmra.mxu3 %vm136_vm0, %v112_v30  ;;  %v4908_v59 = vld [vmem:[#allocation13 + $0x70] sm:$0xff]  ;;  %v4910_v60 = vld [vmem:[#allocation13 + $0x78] sm:$0xff]  ;;  %v4914_v61 = vld [vmem:[#allocation13 + $0x88] sm:$0xff] }
  0x2d   :  { %462 = vmatpush.msrb.mxu1 %v4822_v31  ;;  %484 = vmatpush.msrb.mxu2 %v4828_v33  ;;  %v4916_v62 = vld [vmem:[#allocation13 + $0x80] sm:$0xff]  ;;  %v4920_v63 = vld [vmem:[#allocation13 + $0x50] sm:$0xff]  ;;  %v4922_v0 = vld [vmem:[#allocation13 + $0x58] sm:$0xff] }
  0x2e   :  { %504 = vmatpush.msrb.mxu3 %v4830_v34  ;;  %443 = vmatpush.msrb.mxu0 %v4836_v36  ;;  %v4928_v1 = vld [vmem:[#allocation13 + $0x68] sm:$0xff]  ;;  %v4930_v2 = vld [vmem:[#allocation13 + $0x60] sm:$0xff]  ;;  %v4934_v3 = vld [vmem:[#allocation13 + $0x30] sm:$0xff] }
  0x2f   :  { %463 = vmatpush.msrb.mxu1 %v4834_v35  ;;  %485 = vmatpush.msrb.mxu2 %v4840_v37  ;;  %6826 = vst [vmem:[#allocation23_spill] sm:$0xff] %v4934_v3  ;;  %v4936_v4 = vld [vmem:[#allocation13 + $0x38] sm:$0xff]  ;;  %v4942_v8 = vld [vmem:[#allocation13 + $0x48] sm:$0xff]  ;;  %v4944_v11 = vld [vmem:[#allocation13 + $0x40] sm:$0xff] }
  0x30   :  { %505 = vmatpush.msrb.mxu3 %v4842_v38  ;;  %3605 = vmatmul.msk.f32.gmra.mxu0 %vm136_vm0, %v112_v30  ;;  %6827 = vst [vmem:[#allocation24_spill] sm:$0xff] %v4936_v4  ;;  %v115_v7 = vld [vmem:[#allocation5 + $0x28] sm:$0xff]  ;;  %v4948_v12 = vld [vmem:[#allocation13 + $0x10] sm:$0xff] }
  0x31   :  { %3613 = vmatmul.msk.f32.gmra.mxu1 %vm136_vm0, %v112_v30  ;;  %444 = vmatpush.msrb.mxu0 %v4850_v40  ;;  %v4950_v17 = vld [vmem:[#allocation13 + $0x18] sm:$0xff]  ;;  %v4954_v30 = vld [vmem:[#allocation13 + $0x28] sm:$0xff] }
  0x32   :  { %464 = vmatpush.msrb.mxu1 %v4848_v39  ;;  %486 = vmatpush.msrb.mxu2 %v4854_v41 }
  0x33   :  { %506 = vmatpush.msrb.mxu3 %v4856_v42  ;;  %445 = vmatpush.msrb.mxu0 %v4864_v45 }
  0x34   :  { %3622 = vmatmul.msk.f32.gmra.mxu2 %vm136_vm0, %v113_v43  ;;  %3630 = vmatmul.msk.f32.gmra.mxu3 %vm136_vm0, %v113_v43 }
  0x35   :  { %465 = vmatpush.msrb.mxu1 %v4862_v44  ;;  %487 = vmatpush.msrb.mxu2 %v4868_v46 }
  0x36   :  { %507 = vmatpush.msrb.mxu3 %v4870_v47  ;;  %446 = vmatpush.msrb.mxu0 %v4876_v49 }
  0x37   :  { %466 = vmatpush.msrb.mxu1 %v4874_v48  ;;  %488 = vmatpush.msrb.mxu2 %v4880_v50 }
  0x38   :  { %508 = vmatpush.msrb.mxu3 %v4882_v51  ;;  %3606 = vmatmul.msk.f32.gmra.mxu0 %vm136_vm0, %v113_v43 }
  0x39   :  { %3614 = vmatmul.msk.f32.gmra.mxu1 %vm136_vm0, %v113_v43  ;;  %447 = vmatpush.msrb.mxu0 %v4890_v53  ;;  %v4956_v43 = vld [vmem:[#allocation13 + $0x20] sm:$0xff] }
  0x3a   :  { %467 = vmatpush.msrb.mxu1 %v4888_v52  ;;  %489 = vmatpush.msrb.mxu2 %v4894_v54 }
  0x3b   :  { %509 = vmatpush.msrb.mxu3 %v4896_v55  ;;  %448 = vmatpush.msrb.mxu0 %v4904_v58 }
  0x3c   :  { %3623 = vmatmul.msk.f32.gmra.mxu2 %vm136_vm0, %v114_v56  ;;  %3631 = vmatmul.msk.f32.gmra.mxu3 %vm136_vm0, %v114_v56 }
  0x3d   :  { %468 = vmatpush.msrb.mxu1 %v4902_v57  ;;  %490 = vmatpush.msrb.mxu2 %v4908_v59 }
  0x3e   :  { %510 = vmatpush.msrb.mxu3 %v4910_v60  ;;  %449 = vmatpush.msrb.mxu0 %v4916_v62 }
  0x3f   :  { %469 = vmatpush.msrb.mxu1 %v4914_v61  ;;  %491 = vmatpush.msrb.mxu2 %v4920_v63 }
  0x40   :  { %511 = vmatpush.msrb.mxu3 %v4922_v0  ;;  %3607 = vmatmul.msk.f32.gmra.mxu0 %vm136_vm0, %v114_v56 }
  0x41   :  { %3615 = vmatmul.msk.f32.gmra.mxu1 %vm136_vm0, %v114_v56  ;;  %450 = vmatpush.msrb.mxu0 %v4930_v2  ;;  %v4964_v56 = vld [vmem:[#allocation13 + $0x8] sm:$0xff] }
  0x42   :  { %470 = vmatpush.msrb.mxu1 %v4928_v1  ;;  %492 = vmatpush.msrb.mxu2 %v4934_v3  ;;  %v116_v3 = vld [vmem:[#allocation5 + $0x30] sm:$0xff] }
  0x43   :  { %512 = vmatpush.msrb.mxu3 %v4936_v4  ;;  %451 = vmatpush.msrb.mxu0 %v4944_v11  ;;  %v4966_v4 = vld [vmem:[#allocation13] sm:$0xff] }
  0x44   :  { %3624 = vmatmul.msk.f32.gmra.mxu2 %vm136_vm0, %v115_v7  ;;  %3632 = vmatmul.msk.f32.gmra.mxu3 %vm136_vm0, %v115_v7 }
  0x45   :  { %471 = vmatpush.msrb.mxu1 %v4942_v8  ;;  %493 = vmatpush.msrb.mxu2 %v4948_v12 }
  0x46   :  { %513 = vmatpush.msrb.mxu3 %v4950_v17  ;;  %452 = vmatpush.msrb.mxu0 %v4956_v43 }
  0x47   :  { %472 = vmatpush.msrb.mxu1 %v4954_v30  ;;  %892 = vmatpush.msra.mxu2 %v4756_v5 }
  0x48   :  { %912 = vmatpush.msra.mxu3 %v4758_v6  ;;  %3608 = vmatmul.msk.f32.gmra.mxu0 %vm136_vm0, %v115_v7 }
  0x49   :  { %3616 = vmatmul.msk.f32.gmra.mxu1 %vm136_vm0, %v115_v7  ;;  %453 = vmatpush.msrb.mxu0 %v4966_v4  ;;  %v117_v7 = vld [vmem:[#allocation5 + $0x38] sm:$0xff] }
  0x4a   :  { %473 = vmatpush.msrb.mxu1 %v4964_v56  ;;  %893 = vmatpush.msra.mxu2 %v4762_v9 }
  0x4b   :  { %852 = vmatpush.msra.mxu0 %v4772_v14  ;;  %913 = vmatpush.msra.mxu3 %v4764_v10 }
  0x4c   :  { %872 = vmatpush.msra.mxu1 %v4770_v13  ;;  %3625 = vmatmul.msk.f32.gmra.mxu2 %vm136_vm0, %v116_v3 }
  0x4d   :  { %3633 = vmatmul.msk.f32.gmra.mxu3 %vm136_vm0, %v116_v3  ;;  %853 = vmatpush.msra.mxu0 %v4784_v19 }
  0x4e   :  { %873 = vmatpush.msra.mxu1 %v4782_v18  ;;  %894 = vmatpush.msra.mxu2 %v4774_v15 }
  0x4f   :  { %854 = vmatpush.msra.mxu0 %v4796_v23  ;;  %914 = vmatpush.msra.mxu3 %v4776_v16 }
  0x50   :  { %874 = vmatpush.msra.mxu1 %v4794_v22  ;;  %3609 = vmatmul.msk.f32.gmra.mxu0 %vm136_vm0, %v116_v3 }
  0x51   :  { %3617 = vmatmul.msk.f32.gmra.mxu1 %vm136_vm0, %v116_v3  ;;  %855 = vmatpush.msra.mxu0 %v4810_v27  ;;  %v106_v3 = vld [vmem:[#allocation8] sm:$0xff] }
  0x52   :  { %875 = vmatpush.msra.mxu1 %v4808_v26  ;;  %895 = vmatpush.msra.mxu2 %v4788_v20 }
  0x53   :  { %915 = vmatpush.msra.mxu3 %v4790_v21  ;;  %856 = vmatpush.msra.mxu0 %v4824_v32 }
  0x54   :  { %3626 = vmatmul.msk.f32.gmra.mxu2 %vm136_vm0, %v117_v7  ;;  %876 = vmatpush.msra.mxu1 %v4822_v31 }
  0x55   :  { %3634 = vmatmul.msk.f32.gmra.mxu3 %vm136_vm0, %v117_v7  ;;  %896 = vmatpush.msra.mxu2 %v4800_v24 }
  0x56   :  { %916 = vmatpush.msra.mxu3 %v4802_v25  ;;  %857 = vmatpush.msra.mxu0 %v4836_v36 }
  0x57   :  { %877 = vmatpush.msra.mxu1 %v4834_v35  ;;  %897 = vmatpush.msra.mxu2 %v4814_v28 }
  0x58   :  { %917 = vmatpush.msra.mxu3 %v4816_v29  ;;  %3610 = vmatmul.msk.f32.gmra.mxu0 %vm136_vm0, %v117_v7 }
  0x59   :  { %3618 = vmatmul.msk.f32.gmra.mxu1 %vm136_vm0, %v117_v7  ;;  %858 = vmatpush.msra.mxu0 %v4850_v40  ;;  %v6828_v7 = vld [vmem:[#allocation23_spill] sm:$0xff]  ;;  %vm569_vm0 = vcmask 1046529  }
  0x5a   :  { %878 = vmatpush.msra.mxu1 %v4848_v39  ;;  %898 = vmatpush.msra.mxu2 %v4828_v33 }
  0x5b   :  { %918 = vmatpush.msra.mxu3 %v4830_v34  ;;  %859 = vmatpush.msra.mxu0 %v4864_v45 }
  0x5c   :  { %494 = vmatmul.f32.vlgmr.msrb.gmra.mxu2 %v106_v3  ;;  %879 = vmatpush.msra.mxu1 %v4862_v44 }
  0x5d   :  { %514 = vmatmul.f32.vlgmr.msrb.gmra.mxu3 %v106_v3  ;;  %899 = vmatpush.msra.mxu2 %v4840_v37 }
  0x5e   :  { %919 = vmatpush.msra.mxu3 %v4842_v38  ;;  %860 = vmatpush.msra.mxu0 %v4876_v49 }
  0x5f   :  { %880 = vmatpush.msra.mxu1 %v4874_v48  ;;  %900 = vmatpush.msra.mxu2 %v4854_v41 }
  0x60   :  { %920 = vmatpush.msra.mxu3 %v4856_v42  ;;  %454 = vmatmul.f32.vlgmr.msrb.gmra.mxu0 %v106_v3 }
  0x61   :  { %474 = vmatmul.f32.vlgmr.msrb.gmra.mxu1 %v106_v3  ;;  %861 = vmatpush.msra.mxu0 %v4890_v53  ;;  %v6829_v3 = vld [vmem:[#allocation24_spill] sm:$0xff] }
  0x62   :  { %881 = vmatpush.msra.mxu1 %v4888_v52  ;;  %901 = vmatpush.msra.mxu2 %v4868_v46 }
  0x63   :  { %921 = vmatpush.msra.mxu3 %v4870_v47  ;;  %862 = vmatpush.msra.mxu0 %v4904_v58 }
  0x64   :  { %882 = vmatpush.msra.mxu1 %v4902_v57  ;;  %902 = vmatpush.msra.mxu2 %v4880_v50 }
  0x65   :  { %922 = vmatpush.msra.mxu3 %v4882_v51  ;;  %863 = vmatpush.msra.mxu0 %v4916_v62 }
  0x66   :  { %883 = vmatpush.msra.mxu1 %v4914_v61  ;;  %903 = vmatpush.msra.mxu2 %v4894_v54 }
  0x67   :  { %923 = vmatpush.msra.mxu3 %v4896_v55  ;;  %864 = vmatpush.msra.mxu0 %v4930_v2 }
  0x68   :  { %884 = vmatpush.msra.mxu1 %v4928_v1  ;;  %904 = vmatpush.msra.mxu2 %v4908_v59 }
  0x69   :  { %924 = vmatpush.msra.mxu3 %v4910_v60  ;;  %865 = vmatpush.msra.mxu0 %v4944_v11 }
  0x6a   :  { %885 = vmatpush.msra.mxu1 %v4942_v8  ;;  %905 = vmatpush.msra.mxu2 %v4920_v63 }
  0x6b   :  { %925 = vmatpush.msra.mxu3 %v4922_v0  ;;  %866 = vmatpush.msra.mxu0 %v4956_v43 }
  0x6c   :  { %886 = vmatpush.msra.mxu1 %v4954_v30  ;;  %906 = vmatpush.msra.mxu2 %v6828_v7 }
  0x6d   :  { %926 = vmatpush.msra.mxu3 %v6829_v3  ;;  %867 = vmatpush.msra.mxu0 %v4966_v4 }
  0x6e   :  { %887 = vmatpush.msra.mxu1 %v4964_v56  ;;  %907 = vmatpush.msra.mxu2 %v4948_v12 }
  0x6f   :  { %927 = vmatpush.msra.mxu3 %v4950_v17  ;;  %1235 = vmatpush.msrb.mxu0 %v4772_v14 }
  0x70   :  { %1255 = vmatpush.msrb.mxu1 %v4770_v13  ;;  %1275 = vmatpush.msrb.mxu2 %v4756_v5  ;;  %v126_v5 = vld [vmem:[%s6716_s5] sm:$0xf]  ;;  %s4690_s5 = smov [#allocation14]  }
  0x71   :  { %1295 = vmatpush.msrb.mxu3 %v4758_v6  ;;  %1236 = vmatpush.msrb.mxu0 %v4784_v19  ;;  %v5111_v6 = vperm.slane %v126_v5, 0  ;;  %v5117_v13 = vperm.slane %v126_v5, 3  ;;  %s3555_s9 = sshll.u32 %s4690_s5, 4  ;;  %s3556_s9 = int_to_ptr.vmem [resolvable:$true] %s3555_s9 }
  0x72   :  { %1256 = vmatpush.msrb.mxu1 %v4782_v18  ;;  %1276 = vmatpush.msrb.mxu2 %v4762_v9  ;;  %v5113_v9 = vperm.slane %v126_v5, 1 }
  0x73   :  { %1296 = vmatpush.msrb.mxu3 %v4764_v10  ;;  %1237 = vmatpush.msrb.mxu0 %v4796_v23  ;;  %v5115_v10 = vperm.slane %v126_v5, 2 }
  0x74   :  { %1257 = vmatpush.msrb.mxu1 %v4794_v22  ;;  %1277 = vmatpush.msrb.mxu2 %v4774_v15 }
  0x75   :  { %1297 = vmatpush.msrb.mxu3 %v4776_v16  ;;  %1238 = vmatpush.msrb.mxu0 %v4810_v27 }
  0x76   :  { %1258 = vmatpush.msrb.mxu1 %v4808_v26  ;;  %1278 = vmatpush.msrb.mxu2 %v4788_v20 }
  0x77   :  { %1298 = vmatpush.msrb.mxu3 %v4790_v21  ;;  %1239 = vmatpush.msrb.mxu0 %v4824_v32 }
  0x78   :  { %1259 = vmatpush.msrb.mxu1 %v4822_v31  ;;  %1279 = vmatpush.msrb.mxu2 %v4800_v24 }
  0x79   :  { %1299 = vmatpush.msrb.mxu3 %v4802_v25  ;;  %1240 = vmatpush.msrb.mxu0 %v4836_v36 }
  0x7a   :  { %1260 = vmatpush.msrb.mxu1 %v4834_v35  ;;  %1280 = vmatpush.msrb.mxu2 %v4814_v28 }
  0x7b   :  { %1300 = vmatpush.msrb.mxu3 %v4816_v29  ;;  %1241 = vmatpush.msrb.mxu0 %v4850_v40 }
  0x7c   :  { %1261 = vmatpush.msrb.mxu1 %v4848_v39  ;;  %1281 = vmatpush.msrb.mxu2 %v4828_v33 }
  0x7d   :  { %1301 = vmatpush.msrb.mxu3 %v4830_v34  ;;  %1242 = vmatpush.msrb.mxu0 %v4864_v45 }
  0x7e   :  { %1262 = vmatpush.msrb.mxu1 %v4862_v44  ;;  %1282 = vmatpush.msrb.mxu2 %v4840_v37 }
  0x7f   :  { %1302 = vmatpush.msrb.mxu3 %v4842_v38  ;;  %1243 = vmatpush.msrb.mxu0 %v4876_v49 }
  0x80   :  { %1263 = vmatpush.msrb.mxu1 %v4874_v48  ;;  %1283 = vmatpush.msrb.mxu2 %v4854_v41 }
  0x81   :  { %1303 = vmatpush.msrb.mxu3 %v4856_v42  ;;  %1244 = vmatpush.msrb.mxu0 %v4890_v53 }
  0x82   :  { %1264 = vmatpush.msrb.mxu1 %v4888_v52  ;;  %1284 = vmatpush.msrb.mxu2 %v4868_v46 }
  0x83   :  { %1304 = vmatpush.msrb.mxu3 %v4870_v47  ;;  %1245 = vmatpush.msrb.mxu0 %v4904_v58 }
  0x84   :  { %1265 = vmatpush.msrb.mxu1 %v4902_v57  ;;  %1285 = vmatpush.msrb.mxu2 %v4880_v50 }
  0x85   :  { %1305 = vmatpush.msrb.mxu3 %v4882_v51  ;;  %1246 = vmatpush.msrb.mxu0 %v4916_v62 }
  0x86   :  { %1266 = vmatpush.msrb.mxu1 %v4914_v61  ;;  %1286 = vmatpush.msrb.mxu2 %v4894_v54 }
  0x87   :  { %1306 = vmatpush.msrb.mxu3 %v4896_v55  ;;  %1247 = vmatpush.msrb.mxu0 %v4930_v2 }
  0x88   :  { %1267 = vmatpush.msrb.mxu1 %v4928_v1  ;;  %1287 = vmatpush.msrb.mxu2 %v4908_v59 }
  0x89   :  { %1307 = vmatpush.msrb.mxu3 %v4910_v60  ;;  %1248 = vmatpush.msrb.mxu0 %v4944_v11 }
  0x8a   :  { %1268 = vmatpush.msrb.mxu1 %v4942_v8  ;;  %1288 = vmatpush.msrb.mxu2 %v4920_v63 }
  0x8b   :  { %1308 = vmatpush.msrb.mxu3 %v4922_v0  ;;  %1249 = vmatpush.msrb.mxu0 %v4956_v43 }
  0x8c   :  { %1269 = vmatpush.msrb.mxu1 %v4954_v30  ;;  %1289 = vmatpush.msrb.mxu2 %v6828_v7 }
  0x8d   :  { %1309 = vmatpush.msrb.mxu3 %v6829_v3  ;;  %1250 = vmatpush.msrb.mxu0 %v4966_v4 }
  0x8e   :  { %1270 = vmatpush.msrb.mxu1 %v4964_v56  ;;  %1290 = vmatpush.msrb.mxu2 %v4948_v12 }
  0x8f   :  { %1310 = vmatpush.msrb.mxu3 %v4950_v17 }
  0x9d   :  { %v178_v14 = vpop.f32.mrf.mxu0 }
  0x9e   :  { %v219_v15 = vpop.f32.mrf.mxu1  ;;  %v179_v16 = vadd.f32 %v178_v14, %v5111_v6 }
  0x9f   :  { %v220_v18 = vadd.f32 %v219_v15, %v5113_v9  ;;  %v260_v19 = vpop.f32.mrf.mxu2  ;;  %v301_v20 = vpop.f32.mrf.mxu3 }
  0xa0   :  { %v261_v21 = vadd.f32 %v260_v19, %v5115_v10  ;;  %v302_v22 = vadd.f32 %v301_v20, %v5117_v13  ;;  %325 = vst [vmem:[#allocation2] sm:$0xff] %v179_v16 }
  0xa1   :  { %326 = vst [vmem:[#allocation2 + $0x8] sm:$0xff] %v220_v18 }
  0xa2   :  { %327 = vst [vmem:[#allocation2 + $0x10] sm:$0xff] %v261_v21 }
  0xa3   :  { %328 = vst [vmem:[#allocation2 + $0x18] sm:$0xff] %v302_v22 }
  0xa5   :  { %v181_v23 = vpop.f32.mrf.mxu0 }
  0xa6   :  { %v222_v24 = vpop.f32.mrf.mxu1  ;;  %v182_v25 = vadd.f32 %v181_v23, %v5111_v6 }
  0xa7   :  { %v223_v26 = vadd.f32 %v222_v24, %v5113_v9  ;;  %v263_v27 = vpop.f32.mrf.mxu2  ;;  %v304_v28 = vpop.f32.mrf.mxu3 }
  0xa8   :  { %329 = vst [vmem:[#allocation2 + $0x20] sm:$0xff] %v182_v25  ;;  %v264_v29 = vadd.f32 %v263_v27, %v5115_v10  ;;  %v305_v31 = vadd.f32 %v304_v28, %v5117_v13 }
  0xa9   :  { %330 = vst [vmem:[#allocation2 + $0x28] sm:$0xff] %v223_v26 }
  0xaa   :  { %331 = vst [vmem:[#allocation2 + $0x30] sm:$0xff] %v264_v29 }
  0xab   :  { %332 = vst [vmem:[#allocation2 + $0x38] sm:$0xff] %v305_v31 }
  0xad   :  { %v184_v32 = vpop.f32.mrf.mxu0 }
  0xae   :  { %v225_v33 = vpop.f32.mrf.mxu1  ;;  %v185_v34 = vadd.f32 %v184_v32, %v5111_v6 }
  0xaf   :  { %v226_v35 = vadd.f32 %v225_v33, %v5113_v9  ;;  %v266_v36 = vpop.f32.mrf.mxu2  ;;  %v307_v37 = vpop.f32.mrf.mxu3 }
  0xb0   :  { %v267_v38 = vadd.f32 %v266_v36, %v5115_v10  ;;  %v308_v39 = vadd.f32 %v307_v37, %v5117_v13  ;;  %333 = vst [vmem:[#allocation2 + $0x40] sm:$0xff] %v185_v34 }
  0xb1   :  { %334 = vst [vmem:[#allocation2 + $0x48] sm:$0xff] %v226_v35 }
  0xb2   :  { %335 = vst [vmem:[#allocation2 + $0x50] sm:$0xff] %v267_v38 }
  0xb3   :  { %336 = vst [vmem:[#allocation2 + $0x58] sm:$0xff] %v308_v39 }
  0xb5   :  { %v187_v40 = vpop.f32.mrf.mxu0 }
  0xb6   :  { %v228_v41 = vpop.f32.mrf.mxu1  ;;  %v188_v42 = vadd.f32 %v187_v40, %v5111_v6 }
  0xb7   :  { %v229_v44 = vadd.f32 %v228_v41, %v5113_v9  ;;  %v269_v45 = vpop.f32.mrf.mxu2  ;;  %v310_v46 = vpop.f32.mrf.mxu3 }
  0xb8   :  { %337 = vst [vmem:[#allocation2 + $0x60] sm:$0xff] %v188_v42  ;;  %v270_v47 = vadd.f32 %v269_v45, %v5115_v10  ;;  %v311_v48 = vadd.f32 %v310_v46, %v5117_v13  ;;  %v425_v45 = vld [vmem:[#allocation2 + $0x20] ss:$8 sm:$0xf] }
  0xb9   :  { %338 = vst [vmem:[#allocation2 + $0x68] sm:$0xff] %v229_v44  ;;  %v423_v44 = vld [vmem:[#allocation2] ss:$8 sm:$0xf] }
  0xba   :  { %339 = vst [vmem:[#allocation2 + $0x70] sm:$0xff] %v270_v47 }
  0xbb   :  { %340 = vst [vmem:[#allocation2 + $0x78] sm:$0xff] %v311_v48 }
  0xbd   :  { %v190_v49 = vpop.f32.mrf.mxu0 }
  0xbe   :  { %v231_v50 = vpop.f32.mrf.mxu1  ;;  %v191_v51 = vadd.f32 %v190_v49, %v5111_v6 }
  0xbf   :  { %v232_v52 = vadd.f32 %v231_v50, %v5113_v9  ;;  %v272_v53 = vpop.f32.mrf.mxu2  ;;  %v313_v54 = vpop.f32.mrf.mxu3  ;;  %v427_v50 = vld [vmem:[#allocation2 + $0x40] ss:$8 sm:$0xf] }
  0xc0   :  { %v273_v55 = vadd.f32 %v272_v53, %v5115_v10  ;;  %v314_v57 = vadd.f32 %v313_v54, %v5117_v13  ;;  %341 = vst [vmem:[#allocation2 + $0x80] sm:$0xff] %v191_v51 }
  0xc1   :  { %342 = vst [vmem:[#allocation2 + $0x88] sm:$0xff] %v232_v52 }
  0xc2   :  { %343 = vst [vmem:[#allocation2 + $0x90] sm:$0xff] %v273_v55  ;;  %v429_v55 = vld [vmem:[#allocation2 + $0x60] ss:$8 sm:$0xf] }
  0xc3   :  { %344 = vst [vmem:[#allocation2 + $0x98] sm:$0xff] %v314_v57 }
  0xc5   :  { %v193_v58 = vpop.f32.mrf.mxu0 }
  0xc6   :  { %v234_v59 = vpop.f32.mrf.mxu1  ;;  %v194_v60 = vadd.f32 %v193_v58, %v5111_v6 }
  0xc7   :  { %v235_v61 = vadd.f32 %v234_v59, %v5113_v9  ;;  %v275_v62 = vpop.f32.mrf.mxu2  ;;  %v316_v63 = vpop.f32.mrf.mxu3 }
  0xc8   :  { %345 = vst [vmem:[#allocation2 + $0xa0] sm:$0xff] %v194_v60  ;;  %v276_v0 = vadd.f32 %v275_v62, %v5115_v10  ;;  %v317_v1 = vadd.f32 %v316_v63, %v5117_v13 }
  0xc9   :  { %346 = vst [vmem:[#allocation2 + $0xa8] sm:$0xff] %v235_v61 }
  0xca   :  { %347 = vst [vmem:[#allocation2 + $0xb0] sm:$0xff] %v276_v0  ;;  %v431_v59 = vld [vmem:[#allocation2 + $0x80] ss:$8 sm:$0xf] }
  0xcb   :  { %348 = vst [vmem:[#allocation2 + $0xb8] sm:$0xff] %v317_v1 }
  0xcd   :  { %v196_v2 = vpop.f32.mrf.mxu0 }
  0xce   :  { %v237_v4 = vpop.f32.mrf.mxu1  ;;  %v197_v8 = vadd.f32 %v196_v2, %v5111_v6 }
  0xcf   :  { %v238_v11 = vadd.f32 %v237_v4, %v5113_v9  ;;  %v278_v12 = vpop.f32.mrf.mxu2 }
  0xd0   :  { %v319_v17 = vpop.f32.mrf.mxu3  ;;  %v279_v30 = vadd.f32 %v278_v12, %v5115_v10  ;;  %349 = vst [vmem:[#allocation2 + $0xc0] sm:$0xff] %v197_v8 }
  0xd1   :  { %v320_v43 = vadd.f32 %v319_v17, %v5117_v13  ;;  %350 = vst [vmem:[#allocation2 + $0xc8] sm:$0xff] %v238_v11 }
  0xd2   :  { %351 = vst [vmem:[#allocation2 + $0xd0] sm:$0xff] %v279_v30  ;;  %v433_v60 = vld [vmem:[#allocation2 + $0xa0] ss:$8 sm:$0xf] }
  0xd3   :  { %352 = vst [vmem:[#allocation2 + $0xd8] sm:$0xff] %v320_v43 }
  0xd5   :  { %v199_v56 = vpop.f32.mrf.mxu0 }
  0xd6   :  { %v240_v7 = vpop.f32.mrf.mxu1  ;;  %v200_v3 = vadd.f32 %v199_v56, %v5111_v6 }
  0xd7   :  { %v241_v5 = vadd.f32 %v240_v7, %v5113_v9  ;;  %v281_v14 = vpop.f32.mrf.mxu2 }
  0xd8   :  { %v322_v15 = vpop.f32.mrf.mxu3  ;;  %353 = vst [vmem:[#allocation2 + $0xe0] sm:$0xff] %v200_v3  ;;  %v282_v16 = vadd.f32 %v281_v14, %v5115_v10 }
  0xd9   :  { %354 = vst [vmem:[#allocation2 + $0xe8] sm:$0xff] %v241_v5  ;;  %v323_v18 = vadd.f32 %v322_v15, %v5117_v13 }
  0xda   :  { %355 = vst [vmem:[#allocation2 + $0xf0] sm:$0xff] %v282_v16  ;;  %v435_v2 = vld [vmem:[#allocation2 + $0xc0] ss:$8 sm:$0xf] }
  0xdb   :  { %356 = vst [vmem:[#allocation2 + $0xf8] sm:$0xff] %v323_v18 }
  0xdd   :  { %v455_v6 = vpop.f32.mrf.mxu0 }
  0xde   :  { %v475_v19 = vpop.f32.mrf.mxu1 }
  0xdf   :  { %v522_v9 = vrot.slane %v475_v19, 7  ;;  %v495_v20 = vpop.f32.mrf.mxu2 }
  0xe0   :  { %v515_v10 = vpop.f32.mrf.mxu3  ;;  %v523_v13 = vrot.slane %v495_v20, 6 }
  0xe1   :  { %v524_v21 = vrot.slane %v515_v10, 5  ;;  %v526_v22 = vsel %vm525_vm1, %v455_v6, %v522_v9  ;;  %v532_v23 = vsel %vm531_vm4, %v455_v6, %v522_v9  ;;  %v538_v24 = vsel %vm527_vm2, %v455_v6, %v522_v9 }
  0xe2   :  { %v544_v25 = vsel %vm533_vm5, %v455_v6, %v522_v9  ;;  %v550_v38 = vsel %vm539_vm7, %v455_v6, %v522_v9  ;;  %v556_v40 = vsel %vm545_vm9, %v455_v6, %v522_v9  ;;  %v562_v42 = vsel %vm551_vm11, %v455_v6, %v522_v9  ;;  %v437_v11 = vld [vmem:[#allocation2 + $0xe0] ss:$8 sm:$0xf] }
  0xe3   :  { %v528_v26 = vsel %vm527_vm2, %v523_v13, %v524_v21  ;;  %v534_v27 = vsel %vm533_vm5, %v523_v13, %v524_v21  ;;  %v540_v28 = vsel %vm539_vm7, %v523_v13, %v524_v21  ;;  %v546_v29 = vsel %vm545_vm9, %v523_v13, %v524_v21 }
  0xe4   :  { %v530_v31 = vsel %vm529_vm3, %v526_v22, %v528_v26  ;;  %v536_v32 = vsel %vm535_vm6, %v532_v23, %v534_v27  ;;  %v542_v33 = vsel %vm541_vm8, %v538_v24, %v540_v28  ;;  %v548_v34 = vsel %vm547_vm10, %v544_v25, %v546_v29 }
  0xe5   :  { %v537_v35 = vrot.slane %v536_v32, 1  ;;  %v543_v36 = vrot.slane %v542_v33, 2  ;;  %v549_v37 = vrot.slane %v548_v34, 3  ;;  %v552_v39 = vsel %vm551_vm11, %v523_v13, %v524_v21 }
  0xe6   :  { %v558_v41 = vsel %vm557_vm13, %v524_v21, %v523_v13  ;;  %v554_v46 = vsel %vm553_vm12, %v550_v38, %v552_v39  ;;  %v563_v48 = vsel %vm525_vm1, %v523_v13, %v524_v21  ;;  %v567_v49 = vsel %vm557_vm13, %v522_v9, %v455_v6 }
  0xe7   :  { %v560_v47 = vsel %vm559_vm14, %v556_v40, %v558_v41  ;;  %v565_v51 = vsel %vm564_vm15, %v563_v48, %v562_v42  ;;  %v568_v52 = vsel %vm531_vm4, %v523_v13, %v524_v21  ;;  %v5174_v53 = vadd.f32 %v530_v31, %v423_v44 }
  0xe8   :  { %v5176_v54 = vadd.f32 %v537_v35, %v425_v45  ;;  %v570_v57 = vsel %vm569_vm0, %v568_v52, %v567_v49  ;;  %v5179_v58 = vadd.f32 %v543_v36, %v427_v50  ;;  %v5181_v61 = vadd.f32 %v549_v37, %v429_v55 }
  0xe9   :  { %v555_v62 = vrot.slane %v554_v46, 4  ;;  %v561_v63 = vrot.slane %v560_v47, 5  ;;  %v566_v0 = vrot.slane %v565_v51, 6  ;;  %v571_v1 = vrot.slane %v570_v57, 7 }
  0xea   :  { %v588_v4 = vmul.f32 0.5, %v5174_v53  ;;  %v589_v8 = vmul.f32 0.5, %v5176_v54  ;;  %v590_v43 = vmul.f32 0.5, %v5179_v58  ;;  %v591_v7 = vmul.f32 0.5, %v5181_v61 }
  0xeb   :  { %v5185_v12 = vadd.f32 %v555_v62, %v431_v59  ;;  %v5187_v17 = vadd.f32 %v561_v63, %v433_v60  ;;  %v5189_v30 = vadd.f32 %v566_v0, %v435_v2  ;;  %v5192_v56 = vadd.f32 %v571_v1, %v437_v11 }
  0xec   :  { %3647 = vtanh.f32 %v588_v4  ;;  %v628_v5 = vrot.slane %v5174_v53, 1  ;;  %v629_v15 = vrot.slane %v5176_v54, 1  ;;  %v630_v18 = vrot.slane %v5179_v58, 1 }
  0xed   :  { %v592_v3 = vmul.f32 0.5, %v5185_v12  ;;  %v593_v14 = vmul.f32 0.5, %v5187_v17  ;;  %3649 = vtanh.f32 %v589_v8  ;;  %v594_v16 = vmul.f32 0.5, %v5189_v30 }
  0xee   :  { %3651 = vtanh.f32 %v590_v43  ;;  %v595_v19 = vmul.f32 0.5, %v5192_v56  ;;  %v631_v6 = vrot.slane %v5181_v61, 1  ;;  %v632_v9 = vrot.slane %v5185_v12, 1 }
  0xef   :  { %3653 = vtanh.f32 %v591_v7  ;;  %v633_v20 = vrot.slane %v5187_v17, 1  ;;  %v634_v10 = vrot.slane %v5189_v30, 1  ;;  %v644_v13 = vmul.f32 0.5, %v628_v5 }
  0xf0   :  { %3655 = vtanh.f32 %v592_v3  ;;  %v635_v22 = vrot.slane %v5192_v56, 1  ;;  %v645_v23 = vmul.f32 0.5, %v629_v15  ;;  %v646_v24 = vmul.f32 0.5, %v630_v18 }
  0xf1   :  { %3657 = vtanh.f32 %v593_v14  ;;  %v647_v26 = vmul.f32 0.5, %v631_v6  ;;  %v648_v27 = vmul.f32 0.5, %v632_v9  ;;  %v649_v31 = vmul.f32 0.5, %v633_v20 }
  0xf2   :  { %v3648_v21 = vpop.eup %3647  ;;  %3659 = vtanh.f32 %v594_v16  ;;  %v650_v32 = vmul.f32 0.5, %v634_v10  ;;  %v651_v34 = vmul.f32 0.5, %v635_v22  ;;  %v676_v35 = vrot.slane %v5174_v53, 2  ;;  %v5239_v22 = vld [vmem:[#allocation10] sm:$0xff] }
  0xf3   :  { %v3650_v25 = vpop.eup %3649  ;;  %3661 = vtanh.f32 %v595_v19  ;;  %v604_v29 = vmul.f32 0.5, %v3648_v21  ;;  %v677_v36 = vrot.slane %v5176_v54, 2  ;;  %v678_v38 = vrot.slane %v5179_v58, 2 }
  0xf4   :  { %v3652_v28 = vpop.eup %3651  ;;  %3663 = vtanh.f32 %v644_v13  ;;  %v679_v39 = vrot.slane %v5181_v61, 2  ;;  %v680_v40 = vrot.slane %v5185_v12, 2  ;;  %v605_v42 = vmul.f32 0.5, %v3650_v25 }
  0xf5   :  { %v3654_v33 = vpop.eup %3653  ;;  %3665 = vtanh.f32 %v645_v23  ;;  %v681_v44 = vrot.slane %v5187_v17, 2  ;;  %v682_v45 = vrot.slane %v5189_v30, 2  ;;  %v606_v47 = vmul.f32 0.5, %v3652_v28 }
  0xf6   :  { %v3656_v37 = vpop.eup %3655  ;;  %3667 = vtanh.f32 %v646_v24  ;;  %v607_v48 = vmul.f32 0.5, %v3654_v33  ;;  %v5214_v49 = vadd.f32 0.5, %v604_v29  ;;  %v683_v52 = vrot.slane %v5192_v56, 2 }
  0xf7   :  { %v3658_v41 = vpop.eup %3657  ;;  %3669 = vtanh.f32 %v647_v26  ;;  %v608_v51 = vmul.f32 0.5, %v3656_v37  ;;  %v700_v55 = vrot.slane %v5174_v53, 3  ;;  %v701_v62 = vrot.slane %v5176_v54, 3 }
  0xf8   :  { %v3660_v46 = vpop.eup %3659  ;;  %3671 = vtanh.f32 %v648_v27  ;;  %v609_v59 = vmul.f32 0.5, %v3658_v41  ;;  %v5219_v1 = vadd.f32 0.5, %v605_v42  ;;  %v702_v2 = vrot.slane %v5179_v58, 3 }
  0xf9   :  { %v3662_v50 = vpop.eup %3661  ;;  %3673 = vtanh.f32 %v649_v31  ;;  %v610_v60 = vmul.f32 0.5, %v3660_v46  ;;  %v5222_v8 = vadd.f32 0.5, %v606_v47  ;;  %v5224_v11 = vadd.f32 0.5, %v607_v48 }
  0xfa   :  { %v3664_v57 = vpop.eup %3663  ;;  %3675 = vtanh.f32 %v650_v32  ;;  %v611_v0 = vmul.f32 0.5, %v3662_v50  ;;  %v703_v53 = vrot.slane %v5181_v61, 3  ;;  %v5227_v3 = vadd.f32 0.5, %v608_v51 }
  0xfb   :  { %v3666_v63 = vpop.eup %3665  ;;  %3677 = vtanh.f32 %v651_v34  ;;  %v660_v43 = vmul.f32 0.5, %v3664_v57  ;;  %v704_v54 = vrot.slane %v5185_v12, 3  ;;  %v705_v14 = vrot.slane %v5187_v17, 3 }
  0xfc   :  { %v3668_v4 = vpop.eup %3667  ;;  %v661_v5 = vmul.f32 0.5, %v3666_v63  ;;  %v5231_v16 = vadd.f32 0.5, %v609_v59  ;;  %v5233_v58 = vadd.f32 0.5, %v610_v60  ;;  %v706_v19 = vrot.slane %v5189_v30, 3 }
  0xfd   :  { %v3670_v7 = vpop.eup %3669  ;;  %v662_v18 = vmul.f32 0.5, %v3668_v4  ;;  %v5236_v9 = vadd.f32 0.5, %v611_v0  ;;  %3679 = vtanh.f32 %v676_v35  ;;  %v707_v20 = vrot.slane %v5192_v56, 3 }
  0xfe   :  { %v3672_v15 = vpop.eup %3671  ;;  %v663_v61 = vmul.f32 0.5, %v3670_v7  ;;  %v668_v12 = vadd.f32 0.5, %v660_v43  ;;  %3681 = vtanh.f32 %v677_v36  ;;  %v716_v17 = vmul.f32 0.5, %v700_v55 }
  0xff   :  { %v3674_v6 = vpop.eup %3673  ;;  %v664_v13 = vmul.f32 0.5, %v3672_v15  ;;  %v669_v24 = vadd.f32 0.5, %v661_v5  ;;  %3683 = vtanh.f32 %v678_v38  ;;  %v717_v25 = vmul.f32 0.5, %v701_v62 }
 0x100   :  { %v3676_v10 = vpop.eup %3675  ;;  %v665_v23 = vmul.f32 0.5, %v3674_v6  ;;  %v670_v27 = vadd.f32 0.5, %v662_v18  ;;  %3685 = vtanh.f32 %v679_v39  ;;  %v718_v28 = vmul.f32 0.5, %v702_v2 }
 0x101   :  { %v3678_v21 = vpop.eup %3677  ;;  %v666_v26 = vmul.f32 0.5, %v3676_v10  ;;  %v671_v29 = vadd.f32 0.5, %v663_v61  ;;  %3687 = vtanh.f32 %v680_v40  ;;  %v719_v31 = vmul.f32 0.5, %v703_v53 }
 0x102   :  { %v720_v56 = vmul.f32 0.5, %v704_v54  ;;  %v667_v32 = vmul.f32 0.5, %v3678_v21  ;;  %v672_v33 = vadd.f32 0.5, %v664_v13  ;;  %3689 = vtanh.f32 %v681_v44 }
 0x103   :  { %v749_v34 = vrot.slane %v5239_v22, 1  ;;  %v3680_v35 = vpop.eup %3679  ;;  %v673_v36 = vadd.f32 0.5, %v665_v23  ;;  %3691 = vtanh.f32 %v682_v45  ;;  %v721_v37 = vmul.f32 0.5, %v705_v14 }
 0x104   :  { %v750_v38 = vrot.slane %v5239_v22, 2  ;;  %v3682_v41 = vpop.eup %3681  ;;  %v674_v39 = vadd.f32 0.5, %v666_v26  ;;  %3693 = vtanh.f32 %v683_v52  ;;  %v722_v42 = vmul.f32 0.5, %v706_v19 }
 0x105   :  { %v751_v40 = vrot.slane %v5239_v22, 3  ;;  %v3684_v46 = vpop.eup %3683  ;;  %v723_v47 = vmul.f32 0.5, %v707_v20  ;;  %3695 = vtanh.f32 %v716_v17  ;;  %v752_v44 = vrot.slane %v5239_v22, 4 }
 0x106   :  { %v753_v48 = vrot.slane %v5239_v22, 5  ;;  %v3686_v50 = vpop.eup %3685  ;;  %v675_v51 = vadd.f32 0.5, %v667_v32  ;;  %3697 = vtanh.f32 %v717_v25  ;;  %v763_v30 = vmul.f32 %v668_v12, %v5239_v22 }
 0x107   :  { %v764_v45 = vmul.f32 %v749_v34, %v669_v24  ;;  %v3688_v55 = vpop.eup %3687  ;;  %3699 = vtanh.f32 %v718_v28  ;;  %v754_v52 = vrot.slane %v5239_v22, 6  ;;  %v755_v57 = vrot.slane %v5239_v22, 7 }
 0x108   :  { %v765_v59 = vmul.f32 %v750_v38, %v670_v27  ;;  %v3690_v60 = vpop.eup %3689  ;;  %3701 = vtanh.f32 %v719_v31  ;;  %v766_v62 = vmul.f32 %v751_v40, %v671_v29  ;;  %v771_v63 = vmul.f32 %v3680_v35, %v5214_v49 }
 0x109   :  { %v772_v0 = vmul.f32 %v3682_v41, %v5219_v1  ;;  %v3692_v2 = vpop.eup %3691  ;;  %3703 = vtanh.f32 %v720_v56  ;;  %v767_v4 = vmul.f32 %v752_v44, %v672_v33  ;;  %v768_v43 = vmul.f32 %v753_v48, %v673_v36 }
 0x10a   :  { %v773_v53 = vmul.f32 %v3684_v46, %v5222_v8  ;;  %v3694_v7 = vpop.eup %3693  ;;  %3705 = vtanh.f32 %v721_v37  ;;  %v774_v5 = vmul.f32 %v3686_v50, %v5224_v11  ;;  %v5255_v54 = vadd.f32 %v771_v63, %v763_v30  ;;  %v5286_v63 = vld [vmem:[#allocation13 + $0x1e8] sm:$0xff] }
 0x10b   :  { %v5257_v14 = vadd.f32 %v772_v0, %v764_v45  ;;  %v3696_v15 = vpop.eup %3695  ;;  %3707 = vtanh.f32 %v722_v42  ;;  %v769_v18 = vmul.f32 %v754_v52, %v674_v39  ;;  %v775_v49 = vmul.f32 %v3688_v55, %v5227_v3  ;;  %v5289_v0 = vld [vmem:[#allocation13 + $0x1f0] sm:$0xff] }
 0x10c   :  { %v5260_v1 = vadd.f32 %v773_v53, %v765_v59  ;;  %v3698_v19 = vpop.eup %3697  ;;  %3709 = vtanh.f32 %v723_v47  ;;  %v770_v6 = vmul.f32 %v755_v57, %v675_v51  ;;  %v776_v8 = vmul.f32 %v3690_v60, %v5231_v16  ;;  %v5301_v53 = vld [vmem:[#allocation13 + $0x1d0] sm:$0xff] }
 0x10d   :  { %v5263_v61 = vadd.f32 %v774_v5, %v766_v62  ;;  %v3700_v20 = vpop.eup %3699  ;;  %v777_v11 = vmul.f32 %v3692_v2, %v5233_v58  ;;  %v5266_v10 = vadd.f32 %v775_v49, %v767_v4  ;;  %3711 = vtanh.f32 %v5255_v54  ;;  %v5283_v62 = vld [vmem:[#allocation13 + $0x1e0] sm:$0xff]  ;;  %v5292_v2 = vld [vmem:[#allocation13 + $0x1f8] sm:$0xff] }
 0x10e   :  { %v3702_v13 = vpop.eup %3701  ;;  %v732_v12 = vmul.f32 0.5, %v3696_v15  ;;  %v778_v3 = vmul.f32 %v3694_v7, %v5236_v9  ;;  %v5270_v17 = vadd.f32 %v776_v8, %v768_v43  ;;  %3713 = vtanh.f32 %v5257_v14  ;;  %v5295_v4 = vld [vmem:[#allocation13 + $0x1c0] sm:$0xff]  ;;  %v5298_v43 = vld [vmem:[#allocation13 + $0x1c8] sm:$0xff]  ;;  %v5304_v7 = vld [vmem:[#allocation13 + $0x1d8] sm:$0xff] }
 0x10f   :  { %v3704_v21 = vpop.eup %3703  ;;  %v733_v22 = vmul.f32 0.5, %v3698_v19  ;;  %v5273_v16 = vadd.f32 %v777_v11, %v769_v18  ;;  %3715 = vtanh.f32 %v5260_v1  ;;  %v734_v58 = vmul.f32 0.5, %v3700_v20  ;;  %v5307_v5 = vld [vmem:[#allocation13 + $0x1a0] sm:$0xff]  ;;  %v5310_v15 = vld [vmem:[#allocation13 + $0x1a8] sm:$0xff]  ;;  %v5313_v18 = vld [vmem:[#allocation13 + $0x1b0] sm:$0xff] }
 0x110   :  { %v3706_v23 = vpop.eup %3705  ;;  %v5276_v24 = vadd.f32 %v778_v3, %v770_v6  ;;  %3717 = vtanh.f32 %v5263_v61  ;;  %v735_v26 = vmul.f32 0.5, %v3702_v13  ;;  %v736_v27 = vmul.f32 0.5, %v3704_v21  ;;  %v5316_v49 = vld [vmem:[#allocation13 + $0x1b8] sm:$0xff]  ;;  %v5319_v19 = vld [vmem:[#allocation13 + $0x180] sm:$0xff]  ;;  %v5322_v6 = vld [vmem:[#allocation13 + $0x188] sm:$0xff] }
 0x111   :  { %v3708_v25 = vpop.eup %3707  ;;  %3719 = vtanh.f32 %v5266_v10  ;;  %v740_v28 = vadd.f32 0.5, %v732_v12  ;;  %v737_v31 = vmul.f32 0.5, %v3706_v23  ;;  %v741_v56 = vadd.f32 0.5, %v733_v22  ;;  %6830 = vst [vmem:[#allocation23_spill] sm:$0xff] %v5322_v6  ;;  %v5325_v8 = vld [vmem:[#allocation13 + $0x190] sm:$0xff]  ;;  %v5328_v20 = vld [vmem:[#allocation13 + $0x198] sm:$0xff] }
 0x112   :  { %v3710_v9 = vpop.eup %3709  ;;  %3721 = vtanh.f32 %v5270_v17  ;;  %v738_v33 = vmul.f32 0.5, %v3708_v25  ;;  %v742_v34 = vadd.f32 0.5, %v734_v58  ;;  %v743_v38 = vadd.f32 0.5, %v735_v26  ;;  %6831 = vst [vmem:[#allocation24_spill] sm:$0xff] %v5325_v8  ;;  %v5331_v11 = vld [vmem:[#allocation13 + $0x160] sm:$0xff]  ;;  %v5334_v13 = vld [vmem:[#allocation13 + $0x168] sm:$0xff] }
 0x113   :  { %v3712_v29 = vpop.eup %3711  ;;  %3723 = vtanh.f32 %v5273_v16  ;;  %v739_v37 = vmul.f32 0.5, %v3710_v9  ;;  %v744_v42 = vadd.f32 0.5, %v736_v27  ;;  %v745_v47 = vadd.f32 0.5, %v737_v31  ;;  %6832 = vst [vmem:[#allocation25_spill] sm:$0xff] %v5328_v20  ;;  %v5337_v12 = vld [vmem:[#allocation13 + $0x170] sm:$0xff]  ;;  %v5340_v3 = vld [vmem:[#allocation13 + $0x178] sm:$0xff] }
 0x114   :  { %v3714_v32 = vpop.eup %3713  ;;  %3725 = vtanh.f32 %v5276_v24  ;;  %v795_v35 = vmul.f32 %v3712_v29, %v740_v28  ;;  %v746_v50 = vadd.f32 0.5, %v738_v33  ;;  %6833 = vst [vmem:[#allocation26_spill] sm:$0xff] %v5331_v11  ;;  %v5343_v21 = vld [vmem:[#allocation13 + $0x140] sm:$0xff]  ;;  %v5346_v22 = vld [vmem:[#allocation13 + $0x148] sm:$0xff]  ;;  %v5349_v23 = vld [vmem:[#allocation13 + $0x150] sm:$0xff] }
 0x115   :  { %v3716_v36 = vpop.eup %3715  ;;  %v796_v41 = vmul.f32 %v3714_v32, %v741_v56  ;;  %v747_v45 = vadd.f32 0.5, %v739_v37  ;;  %6834 = vst [vmem:[#allocation27_spill] sm:$0xff] %v5334_v13  ;;  %v5352_v58 = vld [vmem:[#allocation13 + $0x158] sm:$0xff]  ;;  %v5355_v25 = vld [vmem:[#allocation13 + $0x120] sm:$0xff]  ;;  %v5358_v26 = vld [vmem:[#allocation13 + $0x128] sm:$0xff] }
 0x116   :  { %v3718_v39 = vpop.eup %3717  ;;  %v797_v40 = vmul.f32 %v3716_v36, %v742_v34  ;;  %803 = vst [vmem:[#allocation14] sm:$0x1] %v795_v35  ;;  %v5361_v9 = vld [vmem:[#allocation13 + $0x130] sm:$0xff]  ;;  %v5364_v27 = vld [vmem:[#allocation13 + $0x138] sm:$0xff]  ;;  %v5367_v28 = vld [vmem:[#allocation13 + $0x100] sm:$0xff] }
 0x117   :  { %v3720_v46 = vpop.eup %3719  ;;  %v798_v44 = vmul.f32 %v3718_v39, %v743_v38  ;;  %804 = vst [vmem:[#allocation14 + $0x8] sm:$0x1] %v796_v41  ;;  %v5370_v29 = vld [vmem:[#allocation13 + $0x108] sm:$0xff]  ;;  %v5373_v31 = vld [vmem:[#allocation13 + $0x110] sm:$0xff]  ;;  %v5376_v56 = vld [vmem:[#allocation13 + $0x118] sm:$0xff] }
 0x118   :  { %v3722_v48 = vpop.eup %3721  ;;  %v799_v51 = vmul.f32 %v3720_v46, %v744_v42  ;;  %805 = vst [vmem:[#allocation14 + $0x10] sm:$0x1] %v797_v40  ;;  %v5379_v32 = vld [vmem:[#allocation13 + $0xe0] sm:$0xff]  ;;  %v5382_v33 = vld [vmem:[#allocation13 + $0xe8] sm:$0xff]  ;;  %v5385_v34 = vld [vmem:[#allocation13 + $0xf0] sm:$0xff] }
 0x119   :  { %v3724_v30 = vpop.eup %3723  ;;  %v800_v55 = vmul.f32 %v3722_v48, %v745_v47  ;;  %806 = vst [vmem:[#allocation14 + $0x18] sm:$0x1] %v798_v44  ;;  %v5391_v36 = vld [vmem:[#allocation13 + $0xc0] sm:$0xff]  ;;  %v5394_v37 = vld [vmem:[#allocation13 + $0xc8] sm:$0xff]  ;;  %v5397_v38 = vld [vmem:[#allocation13 + $0xd0] sm:$0xff] }
 0x11a   :  { %v3726_v52 = vpop.eup %3725  ;;  %v801_v57 = vmul.f32 %v3724_v30, %v746_v50  ;;  %807 = vst [vmem:[#allocation14 + $0x20] sm:$0x1] %v799_v51  ;;  %v5403_v39 = vld [vmem:[#allocation13 + $0xa0] sm:$0xff]  ;;  %v5406_v42 = vld [vmem:[#allocation13 + $0xa8] sm:$0xff]  ;;  %v5412_v46 = vld [vmem:[#allocation13 + $0xb8] sm:$0xff] }
 0x11b   :  { %v802_v59 = vmul.f32 %v3726_v52, %v747_v45  ;;  %808 = vst [vmem:[#allocation14 + $0x28] sm:$0x1] %v800_v55  ;;  %v5415_v47 = vld [vmem:[#allocation13 + $0x80] sm:$0xff]  ;;  %v5421_v48 = vld [vmem:[#allocation13 + $0x90] sm:$0xff]  ;;  %v5424_v50 = vld [vmem:[#allocation13 + $0x98] sm:$0xff] }
 0x11c   :  { %809 = vst [vmem:[#allocation14 + $0x30] sm:$0x1] %v801_v57  ;;  %v5430_v30 = vld [vmem:[#allocation13 + $0x68] sm:$0xff]  ;;  %v5433_v45 = vld [vmem:[#allocation13 + $0x70] sm:$0xff]  ;;  %v5439_v52 = vld [vmem:[#allocation13 + $0x40] sm:$0xff] }
 0x11d   :  { %810 = vst [vmem:[#allocation14 + $0x38] sm:$0x1] %v802_v59 }
 0x11e   :  { %835 = vst [vmem:[#allocation1] ss:$9 sm:$0xff] %v795_v35  ;;  %v5388_v35 = vld [vmem:[#allocation13 + $0xf8] sm:$0xff] }
 0x11f   :  { %837 = vst [vmem:[#allocation1 + $0x1] ss:$9 sm:$0xff] %v796_v41  ;;  %v5400_v41 = vld [vmem:[#allocation13 + $0xd8] sm:$0xff] }
 0x120   :  { %839 = vst [vmem:[#allocation1 + $0x2] ss:$9 sm:$0xff] %v797_v40  ;;  %v5409_v40 = vld [vmem:[#allocation13 + $0xb0] sm:$0xff] }
 0x121   :  { %841 = vst [vmem:[#allocation1 + $0x3] ss:$9 sm:$0xff] %v798_v44  ;;  %v5418_v44 = vld [vmem:[#allocation13 + $0x88] sm:$0xff] }
 0x122   :  { %843 = vst [vmem:[#allocation1 + $0x4] ss:$9 sm:$0xff] %v799_v51  ;;  %v5427_v51 = vld [vmem:[#allocation13 + $0x60] sm:$0xff] }
 0x123   :  { %845 = vst [vmem:[#allocation1 + $0x5] ss:$9 sm:$0xff] %v800_v55  ;;  %v5436_v55 = vld [vmem:[#allocation13 + $0x78] sm:$0xff] }
 0x124   :  { %847 = vst [vmem:[#allocation1 + $0x6] ss:$9 sm:$0xff] %v801_v57  ;;  %v5442_v57 = vld [vmem:[#allocation13 + $0x48] sm:$0xff] }
 0x125   :  { %849 = vst [vmem:[#allocation1 + $0x7] ss:$9 sm:$0xff] %v802_v59  ;;  %v5445_v59 = vld [vmem:[#allocation13 + $0x50] sm:$0xff] }
 0x126   :  { %6835 = vst [vmem:[#allocation28_spill] sm:$0xff] %v5337_v12 }
 0x127   :  { %6836 = vst [vmem:[#allocation29_spill] sm:$0xff] %v5340_v3 }
 0x128   :  { %6837 = vst [vmem:[#allocation30_spill] sm:$0xff] %v5343_v21 }
 0x129   :  { %6838 = vst [vmem:[#allocation31_spill] sm:$0xff] %v5346_v22 }
 0x12a   :  { %6839 = vst [vmem:[#allocation32_spill] sm:$0xff] %v5349_v23 }
 0x12b   :  { %6840 = vst [vmem:[#allocation33_spill] sm:$0xff] %v5352_v58 }
 0x12c   :  { %v850_v60 = vld [vmem:[#allocation1] sm:$0xff]  ;;  %6841 = vst [vmem:[#allocation34_spill] sm:$0xff] %v5355_v25 }
 0x12d   :  { %868 = vmatmul.f32.vlgmr.msra.gmra.mxu0 %v850_v60  ;;  %888 = vmatmul.f32.vlgmr.msra.gmra.mxu1 %v850_v60  ;;  %6842 = vst [vmem:[#allocation35_spill] sm:$0xff] %v5358_v26 }
 0x12e   :  { %908 = vmatmul.f32.vlgmr.msra.gmra.mxu2 %v850_v60  ;;  %928 = vmatmul.f32.vlgmr.msra.gmra.mxu3 %v850_v60  ;;  %6843 = vst [vmem:[#allocation36_spill] sm:$0xff] %v5361_v9  ;;  %v5448_v60 = vld [vmem:[#allocation13 + $0x58] sm:$0xff] }
 0x12f   :  { %1618 = vmatpush.msra.mxu0 %v5283_v62  ;;  %1638 = vmatpush.msra.mxu1 %v5286_v63  ;;  %6844 = vst [vmem:[#allocation37_spill] sm:$0xff] %v5364_v27 }
 0x130   :  { %1658 = vmatpush.msra.mxu2 %v5289_v0  ;;  %1678 = vmatpush.msra.mxu3 %v5292_v2  ;;  %6845 = vst [vmem:[#allocation38_spill] sm:$0xff] %v5367_v28 }
 0x131   :  { %1619 = vmatpush.msra.mxu0 %v5295_v4  ;;  %1639 = vmatpush.msra.mxu1 %v5298_v43  ;;  %6846 = vst [vmem:[#allocation39_spill] sm:$0xff] %v5370_v29 }
 0x132   :  { %1659 = vmatpush.msra.mxu2 %v5301_v53  ;;  %1679 = vmatpush.msra.mxu3 %v5304_v7  ;;  %6847 = vst [vmem:[#allocation40_spill] sm:$0xff] %v5373_v31 }
 0x133   :  { %1620 = vmatpush.msra.mxu0 %v5307_v5  ;;  %1640 = vmatpush.msra.mxu1 %v5310_v15  ;;  %6848 = vst [vmem:[#allocation41_spill] sm:$0xff] %v5376_v56 }
 0x134   :  { %1660 = vmatpush.msra.mxu2 %v5313_v18  ;;  %1680 = vmatpush.msra.mxu3 %v5316_v49  ;;  %6849 = vst [vmem:[#allocation42_spill] sm:$0xff] %v5379_v32 }
 0x135   :  { %1621 = vmatpush.msra.mxu0 %v5319_v19  ;;  %1641 = vmatpush.msra.mxu1 %v5322_v6  ;;  %6850 = vst [vmem:[#allocation43_spill] sm:$0xff] %v5382_v33 }
 0x136   :  { %1661 = vmatpush.msra.mxu2 %v5325_v8  ;;  %1681 = vmatpush.msra.mxu3 %v5328_v20  ;;  %6851 = vst [vmem:[#allocation44_spill] sm:$0xff] %v5385_v34 }
 0x137   :  { %1622 = vmatpush.msra.mxu0 %v5331_v11  ;;  %1642 = vmatpush.msra.mxu1 %v5334_v13  ;;  %6852 = vst [vmem:[#allocation45_spill] sm:$0xff] %v5388_v35 }
 0x138   :  { %1662 = vmatpush.msra.mxu2 %v5337_v12  ;;  %1682 = vmatpush.msra.mxu3 %v5340_v3  ;;  %6853 = vst [vmem:[#allocation46_spill] sm:$0xff] %v5391_v36 }
 0x139   :  { %1623 = vmatpush.msra.mxu0 %v5343_v21  ;;  %1643 = vmatpush.msra.mxu1 %v5346_v22  ;;  %6854 = vst [vmem:[#allocation47_spill] sm:$0xff] %v5394_v37 }
 0x13a   :  { %1663 = vmatpush.msra.mxu2 %v5349_v23  ;;  %1683 = vmatpush.msra.mxu3 %v5352_v58  ;;  %6855 = vst [vmem:[#allocation48_spill] sm:$0xff] %v5397_v38 }
 0x13b   :  { %1624 = vmatpush.msra.mxu0 %v5355_v25  ;;  %1644 = vmatpush.msra.mxu1 %v5358_v26  ;;  %6856 = vst [vmem:[#allocation49_spill] sm:$0xff] %v5400_v41 }
 0x13c   :  { %1664 = vmatpush.msra.mxu2 %v5361_v9  ;;  %1684 = vmatpush.msra.mxu3 %v5364_v27  ;;  %6857 = vst [vmem:[#allocation50_spill] sm:$0xff] %v5403_v39 }
 0x13d   :  { %1625 = vmatpush.msra.mxu0 %v5367_v28  ;;  %1645 = vmatpush.msra.mxu1 %v5370_v29  ;;  %6858 = vst [vmem:[#allocation51_spill] sm:$0xff] %v5406_v42 }
 0x13e   :  { %1665 = vmatpush.msra.mxu2 %v5373_v31  ;;  %1685 = vmatpush.msra.mxu3 %v5376_v56  ;;  %6859 = vst [vmem:[#allocation52_spill] sm:$0xff] %v5409_v40  ;;  %v816_v56 = vld [vmem:[#allocation2 + $0x41] ss:$8 sm:$0xf] }
 0x13f   :  { %1626 = vmatpush.msra.mxu0 %v5379_v32  ;;  %1646 = vmatpush.msra.mxu1 %v5382_v33  ;;  %6860 = vst [vmem:[#allocation53_spill] sm:$0xff] %v5412_v46  ;;  %v814_v32 = vld [vmem:[#allocation2 + $0x21] ss:$8 sm:$0xf] }
 0x140   :  { %1666 = vmatpush.msra.mxu2 %v5385_v34  ;;  %1686 = vmatpush.msra.mxu3 %v5388_v35  ;;  %6861 = vst [vmem:[#allocation54_spill] sm:$0xff] %v5415_v47  ;;  %v812_v35 = vld [vmem:[#allocation2 + $0x1] ss:$8 sm:$0xf] }
 0x141   :  { %1627 = vmatpush.msra.mxu0 %v5391_v36  ;;  %1647 = vmatpush.msra.mxu1 %v5394_v37  ;;  %6862 = vst [vmem:[#allocation55_spill] sm:$0xff] %v5418_v44  ;;  %v818_v31 = vld [vmem:[#allocation2 + $0x61] ss:$8 sm:$0xf] }
 0x142   :  { %1667 = vmatpush.msra.mxu2 %v5397_v38  ;;  %1687 = vmatpush.msra.mxu3 %v5400_v41  ;;  %6863 = vst [vmem:[#allocation56_spill] sm:$0xff] %v5421_v48 }
 0x143   :  { %1628 = vmatpush.msra.mxu0 %v5403_v39  ;;  %1648 = vmatpush.msra.mxu1 %v5406_v42  ;;  %6864 = vst [vmem:[#allocation57_spill] sm:$0xff] %v5424_v50 }
 0x144   :  { %1668 = vmatpush.msra.mxu2 %v5409_v40  ;;  %1688 = vmatpush.msra.mxu3 %v5412_v46  ;;  %6865 = vst [vmem:[#allocation58_spill] sm:$0xff] %v5427_v51 }
 0x145   :  { %1629 = vmatpush.msra.mxu0 %v5415_v47  ;;  %1649 = vmatpush.msra.mxu1 %v5418_v44  ;;  %6866 = vst [vmem:[#allocation59_spill] sm:$0xff] %v5430_v30 }
 0x146   :  { %1669 = vmatpush.msra.mxu2 %v5421_v48  ;;  %1689 = vmatpush.msra.mxu3 %v5424_v50  ;;  %6867 = vst [vmem:[#allocation60_spill] sm:$0xff] %v5433_v45 }
 0x147   :  { %1630 = vmatpush.msra.mxu0 %v5427_v51  ;;  %1650 = vmatpush.msra.mxu1 %v5430_v30  ;;  %6868 = vst [vmem:[#allocation61_spill] sm:$0xff] %v5436_v55 }
 0x148   :  { %1670 = vmatpush.msra.mxu2 %v5433_v45  ;;  %1690 = vmatpush.msra.mxu3 %v5436_v55  ;;  %6869 = vst [vmem:[#allocation62_spill] sm:$0xff] %v5439_v52  ;;  %v5451_v45 = vld [vmem:[#allocation13 + $0x20] sm:$0xff]  ;;  %v5454_v55 = vld [vmem:[#allocation13 + $0x28] sm:$0xff] }
 0x149   :  { %1631 = vmatpush.msra.mxu0 %v5439_v52  ;;  %6870 = vst [vmem:[#allocation63_spill] sm:$0xff] %v5442_v57  ;;  %1651 = vmatpush.msra.mxu1 %v5442_v57  ;;  %v5457_v52 = vld [vmem:[#allocation13 + $0x30] sm:$0xff]  ;;  %v5460_v57 = vld [vmem:[#allocation13 + $0x38] sm:$0xff] }
 0x14a   :  { %6871 = vst [vmem:[#allocation64_spill] sm:$0xff] %v5445_v59  ;;  %1671 = vmatpush.msra.mxu2 %v5445_v59  ;;  %1691 = vmatpush.msra.mxu3 %v5448_v60  ;;  %v5463_v59 = vld [vmem:[#allocation13] sm:$0xff] }
 0x14b   :  { %6872 = vst [vmem:[#allocation65_spill] sm:$0xff] %v5448_v60  ;;  %1632 = vmatpush.msra.mxu0 %v5451_v45  ;;  %1652 = vmatpush.msra.mxu1 %v5454_v55  ;;  %v5466_v60 = vld [vmem:[#allocation13 + $0x8] sm:$0xff] }
 0x14c   :  { %6873 = vst [vmem:[#allocation66_spill] sm:$0xff] %v5451_v45  ;;  %1672 = vmatpush.msra.mxu2 %v5457_v52  ;;  %1692 = vmatpush.msra.mxu3 %v5460_v57  ;;  %v5469_v45 = vld [vmem:[#allocation13 + $0x10] sm:$0xff] }
 0x14d   :  { %6874 = vst [vmem:[#allocation67_spill] sm:$0xff] %v5454_v55  ;;  %1633 = vmatpush.msra.mxu0 %v5463_v59  ;;  %1653 = vmatpush.msra.mxu1 %v5466_v60  ;;  %v5472_v55 = vld [vmem:[#allocation13 + $0x18] sm:$0xff] }
 0x14e   :  { %6875 = vst [vmem:[#allocation68_spill] sm:$0xff] %v5457_v52  ;;  %1673 = vmatpush.msra.mxu2 %v5469_v45  ;;  %1693 = vmatpush.msra.mxu3 %v5472_v55 }
 0x14f   :  { %6876 = vst [vmem:[#allocation69_spill] sm:$0xff] %v5460_v57 }
 0x150   :  { %6877 = vst [vmem:[#allocation70_spill] sm:$0xff] %v5463_v59 }
 0x151   :  { %6878 = vst [vmem:[#allocation71_spill] sm:$0xff] %v5466_v60 }
 0x152   :  { %6879 = vst [vmem:[#allocation72_spill] sm:$0xff] %v5469_v45 }
 0x153   :  { %6880 = vst [vmem:[#allocation73_spill] sm:$0xff] %v5472_v55 }
 0x1aa   :  { %v889_v52 = vpop.f32.mrf.mxu1  ;;  %v869_v51 = vpop.f32.mrf.mxu0 }
 0x1ab   :  { %v936_v30 = vrot.slane %v889_v52, 7 }
 0x1ad   :  { %v939_v57 = vsel %vm525_vm1, %v869_v51, %v936_v30  ;;  %v942_v50 = vsel %vm531_vm4, %v869_v51, %v936_v30  ;;  %v946_v44 = vsel %vm527_vm2, %v869_v51, %v936_v30  ;;  %v950_v60 = vsel %vm533_vm5, %v869_v51, %v936_v30 }
 0x1ae   :  { %v954_v45 = vsel %vm539_vm7, %v869_v51, %v936_v30  ;;  %v958_v40 = vsel %vm545_vm9, %v869_v51, %v936_v30  ;;  %v962_v55 = vsel %vm551_vm11, %v869_v51, %v936_v30  ;;  %v966_v52 = vsel %vm557_vm13, %v936_v30, %v869_v51 }
 0x1b1   :  { %v909_v59 = vpop.f32.mrf.mxu2  ;;  %v929_v48 = vpop.f32.mrf.mxu3 }
 0x1b2   :  { %v937_v47 = vrot.slane %v909_v59, 6  ;;  %v938_v46 = vrot.slane %v929_v48, 5 }
 0x1b4   :  { %v940_v42 = vsel %vm527_vm2, %v937_v47, %v938_v46  ;;  %v943_v39 = vsel %vm533_vm5, %v937_v47, %v938_v46  ;;  %v947_v41 = vsel %vm539_vm7, %v937_v47, %v938_v46  ;;  %v951_v38 = vsel %vm545_vm9, %v937_v47, %v938_v46 }
 0x1b5   :  { %v941_v37 = vsel %vm529_vm3, %v939_v57, %v940_v42  ;;  %v944_v48 = vsel %vm535_vm6, %v942_v50, %v943_v39  ;;  %v948_v59 = vsel %vm541_vm8, %v946_v44, %v947_v41  ;;  %v952_v36 = vsel %vm547_vm10, %v950_v60, %v951_v38  ;;  %v820_v41 = vld [vmem:[#allocation2 + $0x81] ss:$8 sm:$0xf] }
 0x1b6   :  { %v945_v34 = vrot.slane %v944_v48, 1  ;;  %v949_v33 = vrot.slane %v948_v59, 2  ;;  %v953_v51 = vrot.slane %v952_v36, 3  ;;  %v955_v30 = vsel %vm551_vm11, %v937_v47, %v938_v46  ;;  %v822_v57 = vld [vmem:[#allocation2 + $0xa1] ss:$8 sm:$0xf] }
 0x1b7   :  { %v956_v29 = vsel %vm553_vm12, %v954_v45, %v955_v30  ;;  %v959_v28 = vsel %vm557_vm13, %v938_v46, %v937_v47  ;;  %v963_v42 = vsel %vm525_vm1, %v937_v47, %v938_v46  ;;  %v967_v39 = vsel %vm531_vm4, %v937_v47, %v938_v46  ;;  %v824_v45 = vld [vmem:[#allocation2 + $0xc1] ss:$8 sm:$0xf] }
 0x1b8   :  { %v957_v44 = vrot.slane %v956_v29, 4  ;;  %v960_v38 = vsel %vm559_vm14, %v958_v40, %v959_v28  ;;  %v964_v50 = vsel %vm564_vm15, %v963_v42, %v962_v55  ;;  %v968_v36 = vsel %vm569_vm0, %v967_v39, %v966_v52  ;;  %v826_v30 = vld [vmem:[#allocation2 + $0xe1] ss:$8 sm:$0xf] }
 0x1b9   :  { %v961_v60 = vrot.slane %v960_v38, 5  ;;  %v965_v48 = vrot.slane %v964_v50, 6  ;;  %v969_v59 = vrot.slane %v968_v36, 7  ;;  %v5499_v27 = vadd.f32 %v941_v37, %v812_v35 }
 0x1ba   :  { %v5501_v9 = vadd.f32 %v945_v34, %v814_v32  ;;  %v5503_v26 = vadd.f32 %v949_v33, %v816_v56  ;;  %v5505_v46 = vadd.f32 %v953_v51, %v818_v31  ;;  %v5507_v29 = vadd.f32 %v957_v44, %v820_v41 }
 0x1bb   :  { %v5509_v28 = vadd.f32 %v961_v60, %v822_v57  ;;  %v5511_v40 = vadd.f32 %v965_v48, %v824_v45  ;;  %v5513_v47 = vadd.f32 %v969_v59, %v826_v30  ;;  %v986_v55 = vmul.f32 0.5, %v5499_v27 }
 0x1bc   :  { %v987_v35 = vmul.f32 0.5, %v5501_v9  ;;  %v988_v37 = vmul.f32 0.5, %v5503_v26  ;;  %v989_v32 = vmul.f32 0.5, %v5505_v46  ;;  %v990_v56 = vmul.f32 0.5, %v5507_v29 }
 0x1bd   :  { %3727 = vtanh.f32 %v986_v55  ;;  %v991_v31 = vmul.f32 0.5, %v5509_v28  ;;  %v1026_v33 = vrot.slane %v5499_v27, 1  ;;  %v1027_v34 = vrot.slane %v5501_v9, 1 }
 0x1be   :  { %3729 = vtanh.f32 %v987_v35  ;;  %v992_v52 = vmul.f32 0.5, %v5511_v40  ;;  %v993_v51 = vmul.f32 0.5, %v5513_v47  ;;  %v1028_v42 = vrot.slane %v5503_v26, 1 }
 0x1bf   :  { %3731 = vtanh.f32 %v988_v37  ;;  %v1029_v39 = vrot.slane %v5505_v46, 1  ;;  %v1030_v41 = vrot.slane %v5507_v29, 1  ;;  %v1031_v44 = vrot.slane %v5509_v28, 1 }
 0x1c0   :  { %3733 = vtanh.f32 %v989_v32  ;;  %v1032_v38 = vrot.slane %v5511_v40, 1  ;;  %v1033_v50 = vrot.slane %v5513_v47, 1  ;;  %v1042_v36 = vmul.f32 0.5, %v1026_v33 }
 0x1c1   :  { %3735 = vtanh.f32 %v990_v56  ;;  %v1043_v57 = vmul.f32 0.5, %v1027_v34  ;;  %v1044_v48 = vmul.f32 0.5, %v1028_v42  ;;  %v1045_v45 = vmul.f32 0.5, %v1029_v39 }
 0x1c2   :  { %3737 = vtanh.f32 %v991_v31  ;;  %v1046_v30 = vmul.f32 0.5, %v1030_v41  ;;  %v1047_v55 = vmul.f32 0.5, %v1031_v44  ;;  %v1048_v32 = vmul.f32 0.5, %v1032_v38 }
 0x1c3   :  { %v3728_v60 = vpop.eup %3727  ;;  %3739 = vtanh.f32 %v992_v52  ;;  %v1049_v25 = vmul.f32 0.5, %v1033_v50  ;;  %v1074_v33 = vrot.slane %v5499_v27, 2  ;;  %v1075_v31 = vrot.slane %v5501_v9, 2 }
 0x1c4   :  { %v3730_v59 = vpop.eup %3729  ;;  %3741 = vtanh.f32 %v993_v51  ;;  %v1002_v37 = vmul.f32 0.5, %v3728_v60  ;;  %v1076_v51 = vrot.slane %v5503_v26, 2  ;;  %v1077_v42 = vrot.slane %v5505_v46, 2 }
 0x1c5   :  { %v3732_v35 = vpop.eup %3731  ;;  %3743 = vtanh.f32 %v1042_v36  ;;  %v1003_v58 = vmul.f32 0.5, %v3730_v59  ;;  %v1078_v44 = vrot.slane %v5507_v29, 2  ;;  %v1079_v38 = vrot.slane %v5509_v28, 2 }
 0x1c6   :  { %v3734_v56 = vpop.eup %3733  ;;  %3745 = vtanh.f32 %v1043_v57  ;;  %v1004_v52 = vmul.f32 0.5, %v3732_v35  ;;  %v5537_v60 = vadd.f32 0.5, %v1002_v37  ;;  %v1080_v23 = vrot.slane %v5511_v40, 2 }
 0x1c7   :  { %v3736_v34 = vpop.eup %3735  ;;  %3747 = vtanh.f32 %v1044_v48  ;;  %v1005_v41 = vmul.f32 0.5, %v3734_v56  ;;  %v5539_v48 = vadd.f32 0.5, %v1003_v58  ;;  %v1081_v21 = vrot.slane %v5513_v47, 2 }
 0x1c8   :  { %v3738_v39 = vpop.eup %3737  ;;  %3749 = vtanh.f32 %v1045_v45  ;;  %v1006_v36 = vmul.f32 0.5, %v3736_v34  ;;  %v5542_v45 = vadd.f32 0.5, %v1004_v52  ;;  %v1100_v52 = vrot.slane %v5503_v26, 3 }
 0x1c9   :  { %v3740_v50 = vpop.eup %3739  ;;  %v1007_v57 = vmul.f32 0.5, %v3738_v39  ;;  %3751 = vtanh.f32 %v1046_v30  ;;  %v5545_v34 = vadd.f32 0.5, %v1005_v41  ;;  %v1098_v30 = vrot.slane %v5499_v27, 3 }
 0x1ca   :  { %v3742_v59 = vpop.eup %3741  ;;  %v1008_v35 = vmul.f32 0.5, %v3740_v50  ;;  %3753 = vtanh.f32 %v1047_v55  ;;  %v5548_v58 = vadd.f32 0.5, %v1006_v36  ;;  %v1099_v50 = vrot.slane %v5501_v9, 3 }
 0x1cb   :  { %v3744_v22 = vpop.eup %3743  ;;  %v1009_v56 = vmul.f32 0.5, %v3742_v59  ;;  %3755 = vtanh.f32 %v1048_v32  ;;  %v5550_v55 = vadd.f32 0.5, %v1007_v57  ;;  %v1101_v41 = vrot.slane %v5505_v46, 3 }
 0x1cc   :  { %v3746_v3 = vpop.eup %3745  ;;  %3757 = vtanh.f32 %v1049_v25  ;;  %v1058_v37 = vmul.f32 0.5, %v3744_v22  ;;  %v5554_v32 = vadd.f32 0.5, %v1008_v35  ;;  %v1102_v27 = vrot.slane %v5507_v29, 3 }
 0x1cd   :  { %v3748_v39 = vpop.eup %3747  ;;  %v1059_v12 = vmul.f32 0.5, %v3746_v3  ;;  %3759 = vtanh.f32 %v1074_v33  ;;  %v5557_v22 = vadd.f32 0.5, %v1009_v56  ;;  %v1103_v36 = vrot.slane %v5509_v28, 3 }
 0x1ce   :  { %v3750_v59 = vpop.eup %3749  ;;  %3761 = vtanh.f32 %v1075_v31  ;;  %v1060_v13 = vmul.f32 0.5, %v3748_v39  ;;  %v1066_v11 = vadd.f32 0.5, %v1058_v37  ;;  %v1104_v3 = vrot.slane %v5511_v40, 3 }
 0x1cf   :  { %v3752_v25 = vpop.eup %3751  ;;  %v1061_v9 = vmul.f32 0.5, %v3750_v59  ;;  %3763 = vtanh.f32 %v1076_v51  ;;  %v1067_v56 = vadd.f32 0.5, %v1059_v12  ;;  %v1114_v31 = vmul.f32 0.5, %v1098_v30 }
 0x1d0   :  { %v3754_v57 = vpop.eup %3753  ;;  %v1062_v35 = vmul.f32 0.5, %v3752_v25  ;;  %3765 = vtanh.f32 %v1077_v42  ;;  %v1105_v29 = vrot.slane %v5513_v47, 3  ;;  %v1115_v28 = vmul.f32 0.5, %v1099_v50 }
 0x1d1   :  { %v3756_v26 = vpop.eup %3755  ;;  %v1063_v20 = vmul.f32 0.5, %v3754_v57  ;;  %3767 = vtanh.f32 %v1078_v44  ;;  %v1068_v59 = vadd.f32 0.5, %v1060_v13  ;;  %v1069_v37 = vadd.f32 0.5, %v1061_v9 }
 0x1d2   :  { %v3758_v46 = vpop.eup %3757  ;;  %v1064_v33 = vmul.f32 0.5, %v3756_v26  ;;  %3769 = vtanh.f32 %v1079_v38  ;;  %v1116_v51 = vmul.f32 0.5, %v1100_v52  ;;  %v1070_v57 = vadd.f32 0.5, %v1062_v35 }
 0x1d3   :  { %v1065_v8 = vmul.f32 0.5, %v3758_v46  ;;  %v3760_v39 = vpop.eup %3759  ;;  %3771 = vtanh.f32 %v1080_v23  ;;  %v1071_v42 = vadd.f32 0.5, %v1063_v20  ;;  %v1117_v40 = vmul.f32 0.5, %v1101_v41 }
 0x1d4   :  { %v3762_v25 = vpop.eup %3761  ;;  %3773 = vtanh.f32 %v1081_v21  ;;  %v1072_v26 = vadd.f32 0.5, %v1064_v33  ;;  %v1118_v12 = vmul.f32 0.5, %v1102_v27  ;;  %v1119_v44 = vmul.f32 0.5, %v1103_v36 }
 0x1d5   :  { %v3764_v6 = vpop.eup %3763  ;;  %3775 = vtanh.f32 %v1114_v31  ;;  %v1073_v38 = vadd.f32 0.5, %v1065_v8  ;;  %v1146_v47 = vmul.f32 %v1066_v11, %v5255_v54  ;;  %v1147_v13 = vmul.f32 %v1067_v56, %v5257_v14 }
 0x1d6   :  { %v3766_v30 = vpop.eup %3765  ;;  %3777 = vtanh.f32 %v1115_v28  ;;  %v1120_v23 = vmul.f32 0.5, %v1104_v3  ;;  %v1121_v52 = vmul.f32 0.5, %v1105_v29  ;;  %v1148_v20 = vmul.f32 %v1068_v59, %v5260_v1 }
 0x1d7   :  { %v3768_v50 = vpop.eup %3767  ;;  %3779 = vtanh.f32 %v1116_v51  ;;  %v1149_v41 = vmul.f32 %v1069_v37, %v5263_v61  ;;  %v1154_v27 = vmul.f32 %v3760_v39, %v5537_v60  ;;  %v1155_v36 = vmul.f32 %v3762_v25, %v5539_v48 }
 0x1d8   :  { %v3770_v21 = vpop.eup %3769  ;;  %3781 = vtanh.f32 %v1117_v40  ;;  %v1150_v54 = vmul.f32 %v1070_v57, %v5266_v10  ;;  %v1151_v14 = vmul.f32 %v1071_v42, %v5270_v17  ;;  %v1156_v11 = vmul.f32 %v3764_v6, %v5542_v45 }
 0x1d9   :  { %v3772_v8 = vpop.eup %3771  ;;  %3783 = vtanh.f32 %v1118_v12  ;;  %v1157_v1 = vmul.f32 %v3766_v30, %v5545_v34  ;;  %v5573_v35 = vadd.f32 %v1154_v27, %v1146_v47  ;;  %v5575_v3 = vadd.f32 %v1155_v36, %v1147_v13 }
 0x1da   :  { %v3774_v9 = vpop.eup %3773  ;;  %3785 = vtanh.f32 %v1119_v44  ;;  %v1152_v60 = vmul.f32 %v1072_v26, %v5273_v16  ;;  %v1158_v48 = vmul.f32 %v3768_v50, %v5548_v58  ;;  %v5579_v46 = vadd.f32 %v1156_v11, %v1148_v20 }
 0x1db   :  { %v3776_v61 = vpop.eup %3775  ;;  %3787 = vtanh.f32 %v1120_v23  ;;  %v1153_v17 = vmul.f32 %v1073_v38, %v5276_v24  ;;  %v1159_v6 = vmul.f32 %v3770_v21, %v5550_v55  ;;  %v5583_v45 = vadd.f32 %v1157_v1, %v1149_v41 }
 0x1dc   :  { %v3778_v10 = vpop.eup %3777  ;;  %3789 = vtanh.f32 %v1121_v52  ;;  %v1160_v33 = vmul.f32 %v3772_v8, %v5554_v32  ;;  %v5586_v56 = vadd.f32 %v1158_v48, %v1150_v54  ;;  %v1130_v31 = vmul.f32 0.5, %v3776_v61 }
 0x1dd   :  { %v3780_v34 = vpop.eup %3779  ;;  %3791 = vtanh.f32 %v5573_v35  ;;  %v1161_v58 = vmul.f32 %v3774_v9, %v5557_v22  ;;  %v5590_v29 = vadd.f32 %v1159_v6, %v1151_v14  ;;  %v1131_v28 = vmul.f32 0.5, %v3778_v10  ;;  %v6895_v6 = vld [vmem:[#allocation37_spill] sm:$0xff] }
 0x1de   :  { %v3782_v16 = vpop.eup %3781  ;;  %3793 = vtanh.f32 %v5575_v3  ;;  %v5593_v55 = vadd.f32 %v1160_v33, %v1152_v60  ;;  %v1132_v32 = vmul.f32 0.5, %v3780_v34  ;;  %v1138_v57 = vadd.f32 0.5, %v1130_v31  ;;  %v6896_v34 = vld [vmem:[#allocation38_spill] sm:$0xff]  ;;  %v6897_v33 = vld [vmem:[#allocation39_spill] sm:$0xff]  ;;  %v6899_v31 = vld [vmem:[#allocation41_spill] sm:$0xff] }
 0x1df   :  { %v3784_v24 = vpop.eup %3783  ;;  %3795 = vtanh.f32 %v5579_v46  ;;  %v5596_v59 = vadd.f32 %v1161_v58, %v1153_v17  ;;  %v1133_v51 = vmul.f32 0.5, %v3782_v16  ;;  %v1139_v26 = vadd.f32 0.5, %v1131_v28  ;;  %v6894_v17 = vld [vmem:[#allocation36_spill] sm:$0xff]  ;;  %v6900_v58 = vld [vmem:[#allocation42_spill] sm:$0xff] }
 0x1e0   :  { %v3786_v39 = vpop.eup %3785  ;;  %3797 = vtanh.f32 %v5583_v45  ;;  %v1134_v25 = vmul.f32 0.5, %v3784_v24  ;;  %v1140_v30 = vadd.f32 0.5, %v1132_v32  ;;  %v6898_v16 = vld [vmem:[#allocation40_spill] sm:$0xff]  ;;  %v6901_v24 = vld [vmem:[#allocation43_spill] sm:$0xff]  ;;  %v6904_v32 = vld [vmem:[#allocation46_spill] sm:$0xff] }
 0x1e1   :  { %v3788_v37 = vpop.eup %3787  ;;  %3799 = vtanh.f32 %v5586_v56  ;;  %v1135_v40 = vmul.f32 0.5, %v3786_v39  ;;  %v1141_v50 = vadd.f32 0.5, %v1133_v51  ;;  %v6902_v28 = vld [vmem:[#allocation44_spill] sm:$0xff]  ;;  %v6903_v39 = vld [vmem:[#allocation45_spill] sm:$0xff] }
 0x1e2   :  { %v3790_v22 = vpop.eup %3789  ;;  %3801 = vtanh.f32 %v5590_v29  ;;  %v1136_v44 = vmul.f32 0.5, %v3788_v37  ;;  %v1142_v20 = vadd.f32 0.5, %v1134_v25  ;;  %v6905_v37 = vld [vmem:[#allocation47_spill] sm:$0xff]  ;;  %v6906_v51 = vld [vmem:[#allocation48_spill] sm:$0xff]  ;;  %v6908_v25 = vld [vmem:[#allocation50_spill] sm:$0xff] }
 0x1e3   :  { %v3792_v42 = vpop.eup %3791  ;;  %3803 = vtanh.f32 %v5593_v55  ;;  %v1137_v13 = vmul.f32 0.5, %v3790_v22  ;;  %v1143_v27 = vadd.f32 0.5, %v1135_v40  ;;  %v6907_v22 = vld [vmem:[#allocation49_spill] sm:$0xff] }
 0x1e4   :  { %v3794_v12 = vpop.eup %3793  ;;  %3805 = vtanh.f32 %v5596_v59  ;;  %v1178_v38 = vmul.f32 %v3792_v42, %v1138_v57  ;;  %v1144_v54 = vadd.f32 0.5, %v1136_v44  ;;  %v6909_v57 = vld [vmem:[#allocation51_spill] sm:$0xff]  ;;  %v6910_v42 = vld [vmem:[#allocation52_spill] sm:$0xff]  ;;  %v6911_v40 = vld [vmem:[#allocation53_spill] sm:$0xff] }
 0x1e5   :  { %v3796_v47 = vpop.eup %3795  ;;  %v1179_v23 = vmul.f32 %v3794_v12, %v1139_v26  ;;  %v1145_v9 = vadd.f32 0.5, %v1137_v13  ;;  %v6912_v26 = vld [vmem:[#allocation54_spill] sm:$0xff]  ;;  %v6913_v12 = vld [vmem:[#allocation55_spill] sm:$0xff]  ;;  %v6914_v44 = vld [vmem:[#allocation56_spill] sm:$0xff] }
 0x1e6   :  { %v3798_v52 = vpop.eup %3797  ;;  %v1180_v21 = vmul.f32 %v3796_v47, %v1140_v30  ;;  %1186 = vst [vmem:[#allocation14 + $0x1] sm:$0x1] %v1178_v38  ;;  %v6915_v30 = vld [vmem:[#allocation57_spill] sm:$0xff]  ;;  %v6917_v47 = vld [vmem:[#allocation59_spill] sm:$0xff]  ;;  %v6918_v13 = vld [vmem:[#allocation60_spill] sm:$0xff] }
 0x1e7   :  { %v3800_v41 = vpop.eup %3799  ;;  %v1181_v36 = vmul.f32 %v3798_v52, %v1141_v50  ;;  %1187 = vst [vmem:[#allocation14 + $0x9] sm:$0x1] %v1179_v23  ;;  %v6919_v50 = vld [vmem:[#allocation61_spill] sm:$0xff]  ;;  %v6921_v52 = vld [vmem:[#allocation63_spill] sm:$0xff] }
 0x1e8   :  { %v3802_v8 = vpop.eup %3801  ;;  %v1182_v14 = vmul.f32 %v3800_v41, %v1142_v20  ;;  %1188 = vst [vmem:[#allocation14 + $0x11] sm:$0x1] %v1180_v21  ;;  %v6922_v20 = vld [vmem:[#allocation64_spill] sm:$0xff]  ;;  %v6924_v41 = vld [vmem:[#allocation66_spill] sm:$0xff] }
 0x1e9   :  { %v3804_v11 = vpop.eup %3803  ;;  %v1183_v1 = vmul.f32 %v3802_v8, %v1143_v27  ;;  %1189 = vst [vmem:[#allocation14 + $0x19] sm:$0x1] %v1181_v36  ;;  %v6925_v27 = vld [vmem:[#allocation67_spill] sm:$0xff]  ;;  %v6927_v8 = vld [vmem:[#allocation69_spill] sm:$0xff] }
 0x1ea   :  { %v3806_v61 = vpop.eup %3805  ;;  %v1184_v60 = vmul.f32 %v3804_v11, %v1144_v54  ;;  %1190 = vst [vmem:[#allocation14 + $0x21] sm:$0x1] %v1182_v14  ;;  %v6928_v54 = vld [vmem:[#allocation70_spill] sm:$0xff]  ;;  %v6930_v11 = vld [vmem:[#allocation72_spill] sm:$0xff] }
 0x1eb   :  { %v1185_v48 = vmul.f32 %v3806_v61, %v1145_v9  ;;  %1191 = vst [vmem:[#allocation14 + $0x29] sm:$0x1] %v1183_v1  ;;  %v6931_v9 = vld [vmem:[#allocation73_spill] sm:$0xff] }
 0x1ec   :  { %1192 = vst [vmem:[#allocation14 + $0x31] sm:$0x1] %v1184_v60 }
 0x1ed   :  { %1193 = vst [vmem:[#allocation14 + $0x39] sm:$0x1] %v1185_v48 }
 0x1ee   :  { %1218 = vst [vmem:[#allocation1] ss:$9 sm:$0xff] %v1178_v38  ;;  %v6916_v38 = vld [vmem:[#allocation58_spill] sm:$0xff] }
 0x1ef   :  { %1220 = vst [vmem:[#allocation1 + $0x1] ss:$9 sm:$0xff] %v1179_v23  ;;  %v6920_v23 = vld [vmem:[#allocation62_spill] sm:$0xff] }
 0x1f0   :  { %1222 = vst [vmem:[#allocation1 + $0x2] ss:$9 sm:$0xff] %v1180_v21  ;;  %v6923_v21 = vld [vmem:[#allocation65_spill] sm:$0xff] }
 0x1f1   :  { %1224 = vst [vmem:[#allocation1 + $0x3] ss:$9 sm:$0xff] %v1181_v36  ;;  %v6926_v36 = vld [vmem:[#allocation68_spill] sm:$0xff] }
 0x1f2   :  { %1226 = vst [vmem:[#allocation1 + $0x4] ss:$9 sm:$0xff] %v1182_v14  ;;  %v6929_v14 = vld [vmem:[#allocation71_spill] sm:$0xff] }
 0x1f3   :  { %1228 = vst [vmem:[#allocation1 + $0x5] ss:$9 sm:$0xff] %v1183_v1 }
 0x1f4   :  { %1230 = vst [vmem:[#allocation1 + $0x6] ss:$9 sm:$0xff] %v1184_v60 }
 0x1f5   :  { %1232 = vst [vmem:[#allocation1 + $0x7] ss:$9 sm:$0xff] %v1185_v48 }
 0x1fc   :  { %v1233_v10 = vld [vmem:[#allocation1] sm:$0xff] }
 0x1fd   :  { %1251 = vmatmul.f32.vlgmr.msrb.gmra.mxu0 %v1233_v10  ;;  %1271 = vmatmul.f32.vlgmr.msrb.gmra.mxu1 %v1233_v10 }
 0x1fe   :  { %1291 = vmatmul.f32.vlgmr.msrb.gmra.mxu2 %v1233_v10  ;;  %1311 = vmatmul.f32.vlgmr.msrb.gmra.mxu3 %v1233_v10 }
 0x1ff   :  { %2001 = vmatpush.msrb.mxu0 %v5283_v62  ;;  %2021 = vmatpush.msrb.mxu1 %v5286_v63  ;;  %v6881_v62 = vld [vmem:[#allocation23_spill] sm:$0xff]  ;;  %v6882_v63 = vld [vmem:[#allocation24_spill] sm:$0xff] }
 0x200   :  { %2041 = vmatpush.msrb.mxu2 %v5289_v0  ;;  %2061 = vmatpush.msrb.mxu3 %v5292_v2  ;;  %v6883_v0 = vld [vmem:[#allocation25_spill] sm:$0xff]  ;;  %v6884_v2 = vld [vmem:[#allocation26_spill] sm:$0xff] }
 0x201   :  { %2002 = vmatpush.msrb.mxu0 %v5295_v4  ;;  %2022 = vmatpush.msrb.mxu1 %v5298_v43  ;;  %v6885_v4 = vld [vmem:[#allocation27_spill] sm:$0xff]  ;;  %v6886_v43 = vld [vmem:[#allocation28_spill] sm:$0xff] }
 0x202   :  { %2042 = vmatpush.msrb.mxu2 %v5301_v53  ;;  %2062 = vmatpush.msrb.mxu3 %v5304_v7  ;;  %v6887_v53 = vld [vmem:[#allocation29_spill] sm:$0xff]  ;;  %v6888_v7 = vld [vmem:[#allocation30_spill] sm:$0xff] }
 0x203   :  { %2003 = vmatpush.msrb.mxu0 %v5307_v5  ;;  %2023 = vmatpush.msrb.mxu1 %v5310_v15  ;;  %v6889_v5 = vld [vmem:[#allocation31_spill] sm:$0xff]  ;;  %v6890_v15 = vld [vmem:[#allocation32_spill] sm:$0xff] }
 0x204   :  { %2043 = vmatpush.msrb.mxu2 %v5313_v18  ;;  %2063 = vmatpush.msrb.mxu3 %v5316_v49  ;;  %v6891_v18 = vld [vmem:[#allocation33_spill] sm:$0xff]  ;;  %v6892_v49 = vld [vmem:[#allocation34_spill] sm:$0xff] }
 0x205   :  { %2004 = vmatpush.msrb.mxu0 %v5319_v19  ;;  %2024 = vmatpush.msrb.mxu1 %v6881_v62  ;;  %v6893_v19 = vld [vmem:[#allocation35_spill] sm:$0xff] }
 0x206   :  { %2044 = vmatpush.msrb.mxu2 %v6882_v63  ;;  %2064 = vmatpush.msrb.mxu3 %v6883_v0 }
 0x207   :  { %2005 = vmatpush.msrb.mxu0 %v6884_v2  ;;  %2025 = vmatpush.msrb.mxu1 %v6885_v4 }
 0x208   :  { %2045 = vmatpush.msrb.mxu2 %v6886_v43  ;;  %2065 = vmatpush.msrb.mxu3 %v6887_v53 }
 0x209   :  { %2006 = vmatpush.msrb.mxu0 %v6888_v7  ;;  %2026 = vmatpush.msrb.mxu1 %v6889_v5 }
 0x20a   :  { %2046 = vmatpush.msrb.mxu2 %v6890_v15  ;;  %2066 = vmatpush.msrb.mxu3 %v6891_v18 }
 0x20b   :  { %2007 = vmatpush.msrb.mxu0 %v6892_v49  ;;  %2027 = vmatpush.msrb.mxu1 %v6893_v19 }
 0x20c   :  { %2047 = vmatpush.msrb.mxu2 %v6894_v17  ;;  %2067 = vmatpush.msrb.mxu3 %v6895_v6 }
 0x20d   :  { %2008 = vmatpush.msrb.mxu0 %v6896_v34  ;;  %2028 = vmatpush.msrb.mxu1 %v6897_v33 }
 0x20e   :  { %2048 = vmatpush.msrb.mxu2 %v6898_v16  ;;  %2068 = vmatpush.msrb.mxu3 %v6899_v31  ;;  %v1195_v31 = vld [vmem:[#allocation2 + $0x2] ss:$8 sm:$0xf] }
 0x20f   :  { %2009 = vmatpush.msrb.mxu0 %v6900_v58  ;;  %2029 = vmatpush.msrb.mxu1 %v6901_v24 }
 0x210   :  { %2049 = vmatpush.msrb.mxu2 %v6902_v28  ;;  %2069 = vmatpush.msrb.mxu3 %v6903_v39 }
 0x211   :  { %2010 = vmatpush.msrb.mxu0 %v6904_v32  ;;  %2030 = vmatpush.msrb.mxu1 %v6905_v37  ;;  %v1197_v32 = vld [vmem:[#allocation2 + $0x22] ss:$8 sm:$0xf] }
 0x212   :  { %2050 = vmatpush.msrb.mxu2 %v6906_v51  ;;  %2070 = vmatpush.msrb.mxu3 %v6907_v22  ;;  %v1199_v37 = vld [vmem:[#allocation2 + $0x42] ss:$8 sm:$0xf] }
 0x213   :  { %2011 = vmatpush.msrb.mxu0 %v6908_v25  ;;  %2031 = vmatpush.msrb.mxu1 %v6909_v57  ;;  %v1201_v51 = vld [vmem:[#allocation2 + $0x62] ss:$8 sm:$0xf] }
 0x214   :  { %2051 = vmatpush.msrb.mxu2 %v6910_v42  ;;  %2071 = vmatpush.msrb.mxu3 %v6911_v40  ;;  %v1203_v40 = vld [vmem:[#allocation2 + $0x82] ss:$8 sm:$0xf] }
 0x215   :  { %2012 = vmatpush.msrb.mxu0 %v6912_v26  ;;  %2032 = vmatpush.msrb.mxu1 %v6913_v12 }
 0x216   :  { %2052 = vmatpush.msrb.mxu2 %v6914_v44  ;;  %2072 = vmatpush.msrb.mxu3 %v6915_v30 }
 0x217   :  { %2013 = vmatpush.msrb.mxu0 %v6916_v38  ;;  %2033 = vmatpush.msrb.mxu1 %v6917_v47  ;;  %v1205_v38 = vld [vmem:[#allocation2 + $0xa2] ss:$8 sm:$0xf] }
 0x218   :  { %2053 = vmatpush.msrb.mxu2 %v6918_v13  ;;  %2073 = vmatpush.msrb.mxu3 %v6919_v50 }
 0x219   :  { %2014 = vmatpush.msrb.mxu0 %v6920_v23  ;;  %2034 = vmatpush.msrb.mxu1 %v6921_v52  ;;  %v1207_v52 = vld [vmem:[#allocation2 + $0xc2] ss:$8 sm:$0xf] }
 0x21a   :  { %2054 = vmatpush.msrb.mxu2 %v6922_v20  ;;  %2074 = vmatpush.msrb.mxu3 %v6923_v21  ;;  %v1209_v20 = vld [vmem:[#allocation2 + $0xe2] ss:$8 sm:$0xf] }
 0x21b   :  { %2015 = vmatpush.msrb.mxu0 %v6924_v41  ;;  %2035 = vmatpush.msrb.mxu1 %v6925_v27 }
 0x21c   :  { %2055 = vmatpush.msrb.mxu2 %v6926_v36  ;;  %2075 = vmatpush.msrb.mxu3 %v6927_v8 }
 0x21d   :  { %2016 = vmatpush.msrb.mxu0 %v6928_v54  ;;  %2036 = vmatpush.msrb.mxu1 %v6929_v14 }
 0x21e   :  { %2056 = vmatpush.msrb.mxu2 %v6930_v11  ;;  %2076 = vmatpush.msrb.mxu3 %v6931_v9 }
 0x27a   :  { %v1272_v1 = vpop.f32.mrf.mxu1  ;;  %v1252_v60 = vpop.f32.mrf.mxu0 }
 0x27b   :  { %v1319_v61 = vrot.slane %v1272_v1, 7 }
 0x27d   :  { %v1322_v48 = vsel %vm525_vm1, %v1252_v60, %v1319_v61  ;;  %v1325_v10 = vsel %vm531_vm4, %v1252_v60, %v1319_v61  ;;  %v1329_v0 = vsel %vm527_vm2, %v1252_v60, %v1319_v61  ;;  %v1333_v2 = vsel %vm533_vm5, %v1252_v60, %v1319_v61 }
 0x27e   :  { %v1337_v53 = vsel %vm539_vm7, %v1252_v60, %v1319_v61  ;;  %v1341_v7 = vsel %vm545_vm9, %v1252_v60, %v1319_v61  ;;  %v1345_v5 = vsel %vm551_vm11, %v1252_v60, %v1319_v61  ;;  %v1349_v15 = vsel %vm557_vm13, %v1319_v61, %v1252_v60 }
 0x281   :  { %v1292_v62 = vpop.f32.mrf.mxu2  ;;  %v1312_v63 = vpop.f32.mrf.mxu3 }
 0x282   :  { %v1320_v4 = vrot.slane %v1292_v62, 6  ;;  %v1321_v43 = vrot.slane %v1312_v63, 5 }
 0x284   :  { %v1323_v18 = vsel %vm527_vm2, %v1320_v4, %v1321_v43  ;;  %v1326_v49 = vsel %vm533_vm5, %v1320_v4, %v1321_v43  ;;  %v1330_v19 = vsel %vm539_vm7, %v1320_v4, %v1321_v43  ;;  %v1334_v17 = vsel %vm545_vm9, %v1320_v4, %v1321_v43 }
 0x285   :  { %v1324_v6 = vsel %vm529_vm3, %v1322_v48, %v1323_v18  ;;  %v1327_v34 = vsel %vm535_vm6, %v1325_v10, %v1326_v49  ;;  %v1331_v33 = vsel %vm541_vm8, %v1329_v0, %v1330_v19  ;;  %v1335_v16 = vsel %vm547_vm10, %v1333_v2, %v1334_v17 }
 0x286   :  { %v1328_v58 = vrot.slane %v1327_v34, 1  ;;  %v1332_v24 = vrot.slane %v1331_v33, 2  ;;  %v1336_v28 = vrot.slane %v1335_v16, 3  ;;  %v1338_v39 = vsel %vm551_vm11, %v1320_v4, %v1321_v43 }
 0x287   :  { %v1339_v22 = vsel %vm553_vm12, %v1337_v53, %v1338_v39  ;;  %v1342_v25 = vsel %vm557_vm13, %v1321_v43, %v1320_v4  ;;  %v1346_v57 = vsel %vm525_vm1, %v1320_v4, %v1321_v43  ;;  %v1350_v42 = vsel %vm531_vm4, %v1320_v4, %v1321_v43 }
 0x288   :  { %v1340_v26 = vrot.slane %v1339_v22, 4  ;;  %v1343_v12 = vsel %vm559_vm14, %v1341_v7, %v1342_v25  ;;  %v1347_v44 = vsel %vm564_vm15, %v1346_v57, %v1345_v5  ;;  %v1351_v30 = vsel %vm569_vm0, %v1350_v42, %v1349_v15 }
 0x289   :  { %v1344_v47 = vrot.slane %v1343_v12, 5  ;;  %v1348_v13 = vrot.slane %v1347_v44, 6  ;;  %v1352_v50 = vrot.slane %v1351_v30, 7  ;;  %v5691_v23 = vadd.f32 %v1324_v6, %v1195_v31 }
 0x28a   :  { %v5693_v21 = vadd.f32 %v1328_v58, %v1197_v32  ;;  %v5695_v41 = vadd.f32 %v1332_v24, %v1199_v37  ;;  %v5697_v27 = vadd.f32 %v1336_v28, %v1201_v51  ;;  %v5699_v36 = vadd.f32 %v1340_v26, %v1203_v40 }
 0x28b   :  { %v5701_v8 = vadd.f32 %v1344_v47, %v1205_v38  ;;  %v5703_v54 = vadd.f32 %v1348_v13, %v1207_v52  ;;  %v5705_v14 = vadd.f32 %v1352_v50, %v1209_v20  ;;  %v1369_v11 = vmul.f32 0.5, %v5691_v23 }
 0x28c   :  { %v1370_v9 = vmul.f32 0.5, %v5693_v21  ;;  %v1371_v1 = vmul.f32 0.5, %v5695_v41  ;;  %v1372_v61 = vmul.f32 0.5, %v5697_v27  ;;  %v1373_v60 = vmul.f32 0.5, %v5699_v36 }
 0x28d   :  { %3807 = vtanh.f32 %v1369_v11  ;;  %v1374_v48 = vmul.f32 0.5, %v5701_v8  ;;  %v1409_v10 = vrot.slane %v5691_v23, 1  ;;  %v1410_v62 = vrot.slane %v5693_v21, 1 }
 0x28e   :  { %3809 = vtanh.f32 %v1370_v9  ;;  %v1375_v63 = vmul.f32 0.5, %v5703_v54  ;;  %v1376_v0 = vmul.f32 0.5, %v5705_v14  ;;  %v1411_v2 = vrot.slane %v5695_v41, 1 }
 0x28f   :  { %3811 = vtanh.f32 %v1371_v1  ;;  %v1412_v4 = vrot.slane %v5697_v27, 1  ;;  %v1413_v43 = vrot.slane %v5699_v36, 1  ;;  %v1414_v53 = vrot.slane %v5701_v8, 1 }
 0x290   :  { %3813 = vtanh.f32 %v1372_v61  ;;  %v1415_v7 = vrot.slane %v5703_v54, 1  ;;  %v1416_v5 = vrot.slane %v5705_v14, 1  ;;  %v1425_v15 = vmul.f32 0.5, %v1409_v10 }
 0x291   :  { %3815 = vtanh.f32 %v1373_v60  ;;  %v1426_v18 = vmul.f32 0.5, %v1410_v62  ;;  %v1427_v19 = vmul.f32 0.5, %v1411_v2  ;;  %v1428_v6 = vmul.f32 0.5, %v1412_v4 }
 0x292   :  { %3817 = vtanh.f32 %v1374_v48  ;;  %v1429_v34 = vmul.f32 0.5, %v1413_v43  ;;  %v1430_v33 = vmul.f32 0.5, %v1414_v53  ;;  %v1431_v58 = vmul.f32 0.5, %v1415_v7 }
 0x293   :  { %v3808_v49 = vpop.eup %3807  ;;  %3819 = vtanh.f32 %v1375_v63  ;;  %v1432_v24 = vmul.f32 0.5, %v1416_v5  ;;  %v1457_v32 = vrot.slane %v5691_v23, 2  ;;  %v1458_v37 = vrot.slane %v5693_v21, 2 }
 0x294   :  { %v3810_v17 = vpop.eup %3809  ;;  %3821 = vtanh.f32 %v1376_v0  ;;  %v1385_v31 = vmul.f32 0.5, %v3808_v49  ;;  %v1459_v25 = vrot.slane %v5695_v41, 2  ;;  %v1460_v57 = vrot.slane %v5697_v27, 2 }
 0x295   :  { %v3812_v16 = vpop.eup %3811  ;;  %3823 = vtanh.f32 %v1425_v15  ;;  %v1386_v39 = vmul.f32 0.5, %v3810_v17  ;;  %v1461_v26 = vrot.slane %v5699_v36, 2  ;;  %v1462_v12 = vrot.slane %v5701_v8, 2 }
 0x296   :  { %v3814_v28 = vpop.eup %3813  ;;  %3825 = vtanh.f32 %v1426_v18  ;;  %v1387_v22 = vmul.f32 0.5, %v3812_v16  ;;  %v5729_v47 = vadd.f32 0.5, %v1385_v31  ;;  %v1463_v20 = vrot.slane %v5703_v54, 2 }
 0x297   :  { %v3816_v51 = vpop.eup %3815  ;;  %3827 = vtanh.f32 %v1427_v19  ;;  %v1388_v40 = vmul.f32 0.5, %v3814_v28  ;;  %v5731_v52 = vadd.f32 0.5, %v1386_v39  ;;  %v1464_v61 = vrot.slane %v5705_v14, 2 }
 0x298   :  { %v3818_v42 = vpop.eup %3817  ;;  %3829 = vtanh.f32 %v1428_v6  ;;  %v1389_v30 = vmul.f32 0.5, %v3816_v51  ;;  %v5734_v1 = vadd.f32 0.5, %v1387_v22  ;;  %v1481_v62 = vrot.slane %v5691_v23, 3 }
 0x299   :  { %v3820_v44 = vpop.eup %3819  ;;  %v1390_v38 = vmul.f32 0.5, %v3818_v42  ;;  %3831 = vtanh.f32 %v1429_v34  ;;  %v5737_v48 = vadd.f32 0.5, %v1388_v40  ;;  %v1482_v4 = vrot.slane %v5693_v21, 3 }
 0x29a   :  { %v3822_v13 = vpop.eup %3821  ;;  %v1391_v50 = vmul.f32 0.5, %v3820_v44  ;;  %3833 = vtanh.f32 %v1430_v33  ;;  %v5740_v0 = vadd.f32 0.5, %v1389_v30  ;;  %v1483_v43 = vrot.slane %v5695_v41, 3 }
 0x29b   :  { %v3824_v11 = vpop.eup %3823  ;;  %v1392_v9 = vmul.f32 0.5, %v3822_v13  ;;  %3835 = vtanh.f32 %v1431_v58  ;;  %v5742_v2 = vadd.f32 0.5, %v1390_v38  ;;  %v1484_v15 = vrot.slane %v5697_v27, 3 }
 0x29c   :  { %v3826_v60 = vpop.eup %3825  ;;  %3837 = vtanh.f32 %v1432_v24  ;;  %v1441_v10 = vmul.f32 0.5, %v3824_v11  ;;  %v5746_v7 = vadd.f32 0.5, %v1391_v50  ;;  %v1485_v23 = vrot.slane %v5699_v36, 3 }
 0x29d   :  { %v3828_v63 = vpop.eup %3827  ;;  %v1442_v5 = vmul.f32 0.5, %v3826_v60  ;;  %3839 = vtanh.f32 %v1457_v32  ;;  %v5749_v49 = vadd.f32 0.5, %v1392_v9  ;;  %v1486_v19 = vrot.slane %v5701_v8, 3 }
 0x29e   :  { %v3830_v53 = vpop.eup %3829  ;;  %3841 = vtanh.f32 %v1458_v37  ;;  %v1443_v6 = vmul.f32 0.5, %v3828_v63  ;;  %v1449_v34 = vadd.f32 0.5, %v1441_v10  ;;  %v1487_v31 = vrot.slane %v5703_v54, 3 }
 0x29f   :  { %v3832_v18 = vpop.eup %3831  ;;  %v1444_v21 = vmul.f32 0.5, %v3830_v53  ;;  %3843 = vtanh.f32 %v1459_v25  ;;  %v1450_v24 = vadd.f32 0.5, %v1442_v5  ;;  %v1497_v28 = vmul.f32 0.5, %v1481_v62 }
 0x2a0   :  { %v3834_v17 = vpop.eup %3833  ;;  %v1445_v33 = vmul.f32 0.5, %v3832_v18  ;;  %3845 = vtanh.f32 %v1460_v57  ;;  %v1488_v36 = vrot.slane %v5705_v14, 3  ;;  %v1498_v8 = vmul.f32 0.5, %v1482_v4 }
 0x2a1   :  { %v3836_v41 = vpop.eup %3835  ;;  %v1446_v16 = vmul.f32 0.5, %v3834_v17  ;;  %3847 = vtanh.f32 %v1461_v26  ;;  %v1451_v37 = vadd.f32 0.5, %v1443_v6  ;;  %v1452_v51 = vadd.f32 0.5, %v1444_v21 }
 0x2a2   :  { %v3838_v27 = vpop.eup %3837  ;;  %v1447_v58 = vmul.f32 0.5, %v3836_v41  ;;  %3849 = vtanh.f32 %v1462_v12  ;;  %v1499_v22 = vmul.f32 0.5, %v1483_v43  ;;  %v1453_v42 = vadd.f32 0.5, %v1445_v33 }
 0x2a3   :  { %v1448_v39 = vmul.f32 0.5, %v3838_v27  ;;  %v3840_v32 = vpop.eup %3839  ;;  %3851 = vtanh.f32 %v1463_v20  ;;  %v1454_v57 = vadd.f32 0.5, %v1446_v16  ;;  %v1500_v54 = vmul.f32 0.5, %v1484_v15 }
 0x2a4   :  { %v3842_v25 = vpop.eup %3841  ;;  %3853 = vtanh.f32 %v1464_v61  ;;  %v1455_v44 = vadd.f32 0.5, %v1447_v58  ;;  %v1501_v30 = vmul.f32 0.5, %v1485_v23  ;;  %v1502_v26 = vmul.f32 0.5, %v1486_v19 }
 0x2a5   :  { %v3844_v40 = vpop.eup %3843  ;;  %3855 = vtanh.f32 %v1497_v28  ;;  %v1456_v12 = vadd.f32 0.5, %v1448_v39  ;;  %v1529_v14 = vmul.f32 %v1449_v34, %v5573_v35  ;;  %v1530_v13 = vmul.f32 %v1450_v24, %v5575_v3 }
 0x2a6   :  { %v3846_v38 = vpop.eup %3845  ;;  %3857 = vtanh.f32 %v1498_v8  ;;  %v1503_v20 = vmul.f32 0.5, %v1487_v31  ;;  %v1504_v11 = vmul.f32 0.5, %v1488_v36  ;;  %v1531_v9 = vmul.f32 %v1451_v37, %v5579_v46 }
 0x2a7   :  { %v3848_v50 = vpop.eup %3847  ;;  %3859 = vtanh.f32 %v1499_v22  ;;  %v1532_v60 = vmul.f32 %v1452_v51, %v5583_v45  ;;  %v1537_v10 = vmul.f32 %v3840_v32, %v5729_v47  ;;  %v1538_v62 = vmul.f32 %v3842_v25, %v5731_v52 }
 0x2a8   :  { %v3850_v61 = vpop.eup %3849  ;;  %3861 = vtanh.f32 %v1500_v54  ;;  %v1533_v35 = vmul.f32 %v1453_v42, %v5586_v56  ;;  %v1534_v3 = vmul.f32 %v1454_v57, %v5590_v29  ;;  %v1539_v4 = vmul.f32 %v3844_v40, %v5734_v1 }
 0x2a9   :  { %v3852_v63 = vpop.eup %3851  ;;  %3863 = vtanh.f32 %v1501_v30  ;;  %v1540_v46 = vmul.f32 %v3846_v38, %v5737_v48  ;;  %v5765_v53 = vadd.f32 %v1537_v10, %v1529_v14  ;;  %v5767_v5 = vadd.f32 %v1538_v62, %v1530_v13  ;;  %v5798_v10 = vld [vmem:[#allocation13 + $0x1e8] sm:$0xff]  ;;  %v5801_v62 = vld [vmem:[#allocation13 + $0x1f0] sm:$0xff] }
 0x2aa   :  { %v3854_v43 = vpop.eup %3853  ;;  %3865 = vtanh.f32 %v1502_v26  ;;  %v1535_v47 = vmul.f32 %v1455_v44, %v5593_v55  ;;  %v1541_v52 = vmul.f32 %v3848_v50, %v5740_v0  ;;  %v5771_v15 = vadd.f32 %v1539_v4, %v1531_v9  ;;  %v5813_v4 = vld [vmem:[#allocation13 + $0x1d0] sm:$0xff] }
 0x2ab   :  { %v3856_v45 = vpop.eup %3855  ;;  %3867 = vtanh.f32 %v1503_v20  ;;  %v1536_v29 = vmul.f32 %v1456_v12, %v5596_v59  ;;  %v1542_v1 = vmul.f32 %v3850_v61, %v5742_v2  ;;  %v5775_v18 = vadd.f32 %v1540_v46, %v1532_v60  ;;  %v5795_v60 = vld [vmem:[#allocation13 + $0x1e0] sm:$0xff] }
 0x2ac   :  { %v3858_v56 = vpop.eup %3857  ;;  %3869 = vtanh.f32 %v1504_v11  ;;  %v1543_v23 = vmul.f32 %v3852_v63, %v5746_v7  ;;  %v5778_v19 = vadd.f32 %v1541_v52, %v1533_v35  ;;  %v1513_v17 = vmul.f32 0.5, %v3856_v45  ;;  %v5804_v63 = vld [vmem:[#allocation13 + $0x1f8] sm:$0xff]  ;;  %v5807_v35 = vld [vmem:[#allocation13 + $0x1c0] sm:$0xff]  ;;  %v5822_v45 = vld [vmem:[#allocation13 + $0x1a8] sm:$0xff] }
 0x2ad   :  { %v3860_v48 = vpop.eup %3859  ;;  %3871 = vtanh.f32 %v5765_v53  ;;  %v1544_v0 = vmul.f32 %v3854_v43, %v5749_v49  ;;  %v5782_v6 = vadd.f32 %v1542_v1, %v1534_v3  ;;  %v1514_v21 = vmul.f32 0.5, %v3858_v56  ;;  %v5810_v3 = vld [vmem:[#allocation13 + $0x1c8] sm:$0xff]  ;;  %v5816_v43 = vld [vmem:[#allocation13 + $0x1d8] sm:$0xff]  ;;  %v5819_v46 = vld [vmem:[#allocation13 + $0x1a0] sm:$0xff] }
 0x2ae   :  { %v3862_v55 = vpop.eup %3861  ;;  %3873 = vtanh.f32 %v5767_v5  ;;  %v5785_v2 = vadd.f32 %v1543_v23, %v1535_v47  ;;  %v1515_v7 = vmul.f32 0.5, %v3860_v48  ;;  %v1521_v27 = vadd.f32 0.5, %v1513_v17  ;;  %v5825_v47 = vld [vmem:[#allocation13 + $0x1b0] sm:$0xff]  ;;  %v5828_v52 = vld [vmem:[#allocation13 + $0x1b8] sm:$0xff]  ;;  %v5831_v56 = vld [vmem:[#allocation13 + $0x180] sm:$0xff] }
 0x2af   :  { %v3864_v59 = vpop.eup %3863  ;;  %3875 = vtanh.f32 %v5771_v15  ;;  %v5788_v41 = vadd.f32 %v1544_v0, %v1536_v29  ;;  %v1516_v16 = vmul.f32 0.5, %v3862_v55  ;;  %v1522_v28 = vadd.f32 0.5, %v1514_v21  ;;  %v5834_v29 = vld [vmem:[#allocation13 + $0x188] sm:$0xff]  ;;  %v5837_v1 = vld [vmem:[#allocation13 + $0x190] sm:$0xff]  ;;  %v5840_v48 = vld [vmem:[#allocation13 + $0x198] sm:$0xff] }
 0x2b0   :  { %v3866_v34 = vpop.eup %3865  ;;  %3877 = vtanh.f32 %v5775_v18  ;;  %v1517_v31 = vmul.f32 0.5, %v3864_v59  ;;  %v1523_v8 = vadd.f32 0.5, %v1515_v7  ;;  %6932 = vst [vmem:[#allocation23_spill] sm:$0xff] %v5834_v29  ;;  %v5843_v23 = vld [vmem:[#allocation13 + $0x160] sm:$0xff]  ;;  %v5846_v55 = vld [vmem:[#allocation13 + $0x168] sm:$0xff]  ;;  %v5849_v17 = vld [vmem:[#allocation13 + $0x170] sm:$0xff] }
 0x2b1   :  { %v3868_v33 = vpop.eup %3867  ;;  %3879 = vtanh.f32 %v5778_v19  ;;  %v1518_v24 = vmul.f32 0.5, %v3866_v34  ;;  %v1524_v22 = vadd.f32 0.5, %v1516_v16  ;;  %6933 = vst [vmem:[#allocation24_spill] sm:$0xff] %v5837_v1  ;;  %v5852_v0 = vld [vmem:[#allocation13 + $0x178] sm:$0xff]  ;;  %v5855_v59 = vld [vmem:[#allocation13 + $0x140] sm:$0xff]  ;;  %v5858_v21 = vld [vmem:[#allocation13 + $0x148] sm:$0xff] }
 0x2b2   :  { %v3870_v49 = vpop.eup %3869  ;;  %3881 = vtanh.f32 %v5782_v6  ;;  %v1519_v36 = vmul.f32 0.5, %v3868_v33  ;;  %v1525_v57 = vadd.f32 0.5, %v1517_v31  ;;  %6934 = vst [vmem:[#allocation25_spill] sm:$0xff] %v5840_v48  ;;  %v5861_v34 = vld [vmem:[#allocation13 + $0x150] sm:$0xff]  ;;  %v5864_v7 = vld [vmem:[#allocation13 + $0x158] sm:$0xff]  ;;  %v5867_v33 = vld [vmem:[#allocation13 + $0x120] sm:$0xff] }
 0x2b3   :  { %v3872_v58 = vpop.eup %3871  ;;  %3883 = vtanh.f32 %v5785_v2  ;;  %v1520_v51 = vmul.f32 0.5, %v3870_v49  ;;  %v1526_v44 = vadd.f32 0.5, %v1518_v24  ;;  %6935 = vst [vmem:[#allocation26_spill] sm:$0xff] %v5843_v23  ;;  %v5870_v16 = vld [vmem:[#allocation13 + $0x128] sm:$0xff]  ;;  %v5873_v49 = vld [vmem:[#allocation13 + $0x130] sm:$0xff]  ;;  %v5876_v31 = vld [vmem:[#allocation13 + $0x138] sm:$0xff] }
 0x2b4   :  { %v3874_v39 = vpop.eup %3873  ;;  %3885 = vtanh.f32 %v5788_v41  ;;  %v1561_v32 = vmul.f32 %v3872_v58, %v1521_v27  ;;  %v1527_v38 = vadd.f32 0.5, %v1519_v36  ;;  %6936 = vst [vmem:[#allocation27_spill] sm:$0xff] %v5846_v55  ;;  %v5879_v27 = vld [vmem:[#allocation13 + $0x100] sm:$0xff]  ;;  %v5882_v58 = vld [vmem:[#allocation13 + $0x108] sm:$0xff]  ;;  %v5885_v24 = vld [vmem:[#allocation13 + $0x110] sm:$0xff] }
 0x2b5   :  { %v3876_v37 = vpop.eup %3875  ;;  %v1562_v25 = vmul.f32 %v3874_v39, %v1522_v28  ;;  %v1528_v13 = vadd.f32 0.5, %v1520_v51  ;;  %6937 = vst [vmem:[#allocation28_spill] sm:$0xff] %v5849_v17  ;;  %v5888_v28 = vld [vmem:[#allocation13 + $0x118] sm:$0xff]  ;;  %v5891_v39 = vld [vmem:[#allocation13 + $0xe0] sm:$0xff]  ;;  %v5894_v36 = vld [vmem:[#allocation13 + $0xe8] sm:$0xff] }
 0x2b6   :  { %v3878_v42 = vpop.eup %3877  ;;  %v1563_v54 = vmul.f32 %v3876_v37, %v1523_v8  ;;  %1569 = vst [vmem:[#allocation14 + $0x2] sm:$0x1] %v1561_v32  ;;  %v5897_v8 = vld [vmem:[#allocation13 + $0xf0] sm:$0xff]  ;;  %v5903_v37 = vld [vmem:[#allocation13 + $0xc0] sm:$0xff]  ;;  %v5906_v51 = vld [vmem:[#allocation13 + $0xc8] sm:$0xff] }
 0x2b7   :  { %v3880_v40 = vpop.eup %3879  ;;  %v1564_v30 = vmul.f32 %v3878_v42, %v1524_v22  ;;  %1570 = vst [vmem:[#allocation14 + $0xa] sm:$0x1] %v1562_v25  ;;  %v5909_v22 = vld [vmem:[#allocation13 + $0xd0] sm:$0xff]  ;;  %v5915_v42 = vld [vmem:[#allocation13 + $0xa0] sm:$0xff] }
 0x2b8   :  { %v3882_v26 = vpop.eup %3881  ;;  %v1565_v12 = vmul.f32 %v3880_v40, %v1525_v57  ;;  %1571 = vst [vmem:[#allocation14 + $0x12] sm:$0x1] %v1563_v54  ;;  %v5918_v57 = vld [vmem:[#allocation13 + $0xa8] sm:$0xff]  ;;  %v5924_v40 = vld [vmem:[#allocation13 + $0xb8] sm:$0xff] }
 0x2b9   :  { %v3884_v14 = vpop.eup %3883  ;;  %v1566_v50 = vmul.f32 %v3882_v26, %v1526_v44  ;;  %1572 = vst [vmem:[#allocation14 + $0x1a] sm:$0x1] %v1564_v30  ;;  %v5927_v44 = vld [vmem:[#allocation13 + $0x80] sm:$0xff]  ;;  %v5933_v26 = vld [vmem:[#allocation13 + $0x90] sm:$0xff] }
 0x2ba   :  { %v3886_v20 = vpop.eup %3885  ;;  %v1567_v11 = vmul.f32 %v3884_v14, %v1527_v38  ;;  %1573 = vst [vmem:[#allocation14 + $0x22] sm:$0x1] %v1565_v12  ;;  %v5936_v38 = vld [vmem:[#allocation13 + $0x98] sm:$0xff]  ;;  %v5942_v14 = vld [vmem:[#allocation13 + $0x68] sm:$0xff] }
 0x2bb   :  { %v1568_v9 = vmul.f32 %v3886_v20, %v1528_v13  ;;  %1574 = vst [vmem:[#allocation14 + $0x2a] sm:$0x1] %v1566_v50  ;;  %v5945_v13 = vld [vmem:[#allocation13 + $0x70] sm:$0xff]  ;;  %v5951_v20 = vld [vmem:[#allocation13 + $0x40] sm:$0xff] }
 0x2bc   :  { %1575 = vst [vmem:[#allocation14 + $0x32] sm:$0x1] %v1567_v11 }
 0x2bd   :  { %1576 = vst [vmem:[#allocation14 + $0x3a] sm:$0x1] %v1568_v9 }
 0x2be   :  { %1601 = vst [vmem:[#allocation1] ss:$9 sm:$0xff] %v1561_v32  ;;  %v5900_v32 = vld [vmem:[#allocation13 + $0xf8] sm:$0xff] }
 0x2bf   :  { %1603 = vst [vmem:[#allocation1 + $0x1] ss:$9 sm:$0xff] %v1562_v25  ;;  %v5912_v25 = vld [vmem:[#allocation13 + $0xd8] sm:$0xff] }
 0x2c0   :  { %1605 = vst [vmem:[#allocation1 + $0x2] ss:$9 sm:$0xff] %v1563_v54  ;;  %v5921_v54 = vld [vmem:[#allocation13 + $0xb0] sm:$0xff] }
 0x2c1   :  { %1607 = vst [vmem:[#allocation1 + $0x3] ss:$9 sm:$0xff] %v1564_v30  ;;  %v5930_v30 = vld [vmem:[#allocation13 + $0x88] sm:$0xff] }
 0x2c2   :  { %1609 = vst [vmem:[#allocation1 + $0x4] ss:$9 sm:$0xff] %v1565_v12  ;;  %v5939_v12 = vld [vmem:[#allocation13 + $0x60] sm:$0xff] }
 0x2c3   :  { %1611 = vst [vmem:[#allocation1 + $0x5] ss:$9 sm:$0xff] %v1566_v50  ;;  %v5948_v50 = vld [vmem:[#allocation13 + $0x78] sm:$0xff] }
 0x2c4   :  { %1613 = vst [vmem:[#allocation1 + $0x6] ss:$9 sm:$0xff] %v1567_v11  ;;  %v5954_v11 = vld [vmem:[#allocation13 + $0x48] sm:$0xff] }
 0x2c5   :  { %1615 = vst [vmem:[#allocation1 + $0x7] ss:$9 sm:$0xff] %v1568_v9  ;;  %v5957_v9 = vld [vmem:[#allocation13 + $0x50] sm:$0xff] }
 0x2c6   :  { %6938 = vst [vmem:[#allocation29_spill] sm:$0xff] %v5852_v0 }
 0x2c7   :  { %6939 = vst [vmem:[#allocation30_spill] sm:$0xff] %v5855_v59 }
 0x2c8   :  { %6940 = vst [vmem:[#allocation31_spill] sm:$0xff] %v5858_v21 }
 0x2c9   :  { %6941 = vst [vmem:[#allocation32_spill] sm:$0xff] %v5861_v34 }
 0x2ca   :  { %6942 = vst [vmem:[#allocation33_spill] sm:$0xff] %v5864_v7 }
 0x2cb   :  { %6943 = vst [vmem:[#allocation34_spill] sm:$0xff] %v5867_v33 }
 0x2cc   :  { %v1616_v61 = vld [vmem:[#allocation1] sm:$0xff]  ;;  %6944 = vst [vmem:[#allocation35_spill] sm:$0xff] %v5870_v16 }
 0x2cd   :  { %1634 = vmatmul.f32.vlgmr.msra.gmra.mxu0 %v1616_v61  ;;  %1654 = vmatmul.f32.vlgmr.msra.gmra.mxu1 %v1616_v61  ;;  %6945 = vst [vmem:[#allocation36_spill] sm:$0xff] %v5873_v49 }
 0x2ce   :  { %1674 = vmatmul.f32.vlgmr.msra.gmra.mxu2 %v1616_v61  ;;  %1694 = vmatmul.f32.vlgmr.msra.gmra.mxu3 %v1616_v61  ;;  %6946 = vst [vmem:[#allocation37_spill] sm:$0xff] %v5876_v31  ;;  %v5960_v61 = vld [vmem:[#allocation13 + $0x58] sm:$0xff] }
 0x2cf   :  { %2384 = vmatpush.msra.mxu0 %v5795_v60  ;;  %2404 = vmatpush.msra.mxu1 %v5798_v10  ;;  %6947 = vst [vmem:[#allocation38_spill] sm:$0xff] %v5879_v27 }
 0x2d0   :  { %2424 = vmatpush.msra.mxu2 %v5801_v62  ;;  %2444 = vmatpush.msra.mxu3 %v5804_v63  ;;  %6948 = vst [vmem:[#allocation39_spill] sm:$0xff] %v5882_v58 }
 0x2d1   :  { %2385 = vmatpush.msra.mxu0 %v5807_v35  ;;  %2405 = vmatpush.msra.mxu1 %v5810_v3  ;;  %6949 = vst [vmem:[#allocation40_spill] sm:$0xff] %v5885_v24 }
 0x2d2   :  { %2425 = vmatpush.msra.mxu2 %v5813_v4  ;;  %2445 = vmatpush.msra.mxu3 %v5816_v43  ;;  %6950 = vst [vmem:[#allocation41_spill] sm:$0xff] %v5888_v28 }
 0x2d3   :  { %2386 = vmatpush.msra.mxu0 %v5819_v46  ;;  %2406 = vmatpush.msra.mxu1 %v5822_v45  ;;  %6951 = vst [vmem:[#allocation42_spill] sm:$0xff] %v5891_v39 }
 0x2d4   :  { %2426 = vmatpush.msra.mxu2 %v5825_v47  ;;  %2446 = vmatpush.msra.mxu3 %v5828_v52  ;;  %6952 = vst [vmem:[#allocation43_spill] sm:$0xff] %v5894_v36 }
 0x2d5   :  { %2387 = vmatpush.msra.mxu0 %v5831_v56  ;;  %2407 = vmatpush.msra.mxu1 %v5834_v29  ;;  %6953 = vst [vmem:[#allocation44_spill] sm:$0xff] %v5897_v8 }
 0x2d6   :  { %2427 = vmatpush.msra.mxu2 %v5837_v1  ;;  %2447 = vmatpush.msra.mxu3 %v5840_v48  ;;  %6954 = vst [vmem:[#allocation45_spill] sm:$0xff] %v5900_v32 }
 0x2d7   :  { %2388 = vmatpush.msra.mxu0 %v5843_v23  ;;  %2408 = vmatpush.msra.mxu1 %v5846_v55  ;;  %6955 = vst [vmem:[#allocation46_spill] sm:$0xff] %v5903_v37 }
 0x2d8   :  { %2428 = vmatpush.msra.mxu2 %v5849_v17  ;;  %2448 = vmatpush.msra.mxu3 %v5852_v0  ;;  %6956 = vst [vmem:[#allocation47_spill] sm:$0xff] %v5906_v51 }
 0x2d9   :  { %2389 = vmatpush.msra.mxu0 %v5855_v59  ;;  %2409 = vmatpush.msra.mxu1 %v5858_v21  ;;  %6957 = vst [vmem:[#allocation48_spill] sm:$0xff] %v5909_v22 }
 0x2da   :  { %2429 = vmatpush.msra.mxu2 %v5861_v34  ;;  %2449 = vmatpush.msra.mxu3 %v5864_v7  ;;  %6958 = vst [vmem:[#allocation49_spill] sm:$0xff] %v5912_v25 }
 0x2db   :  { %2390 = vmatpush.msra.mxu0 %v5867_v33  ;;  %2410 = vmatpush.msra.mxu1 %v5870_v16  ;;  %6959 = vst [vmem:[#allocation50_spill] sm:$0xff] %v5915_v42 }
 0x2dc   :  { %2430 = vmatpush.msra.mxu2 %v5873_v49  ;;  %2450 = vmatpush.msra.mxu3 %v5876_v31  ;;  %6960 = vst [vmem:[#allocation51_spill] sm:$0xff] %v5918_v57 }
 0x2dd   :  { %2391 = vmatpush.msra.mxu0 %v5879_v27  ;;  %2411 = vmatpush.msra.mxu1 %v5882_v58  ;;  %6961 = vst [vmem:[#allocation52_spill] sm:$0xff] %v5921_v54 }
 0x2de   :  { %2431 = vmatpush.msra.mxu2 %v5885_v24  ;;  %2451 = vmatpush.msra.mxu3 %v5888_v28  ;;  %6962 = vst [vmem:[#allocation53_spill] sm:$0xff] %v5924_v40  ;;  %v1582_v28 = vld [vmem:[#allocation2 + $0x43] ss:$8 sm:$0xf] }
 0x2df   :  { %2392 = vmatpush.msra.mxu0 %v5891_v39  ;;  %2412 = vmatpush.msra.mxu1 %v5894_v36  ;;  %6963 = vst [vmem:[#allocation54_spill] sm:$0xff] %v5927_v44  ;;  %v1580_v39 = vld [vmem:[#allocation2 + $0x23] ss:$8 sm:$0xf] }
 0x2e0   :  { %2432 = vmatpush.msra.mxu2 %v5897_v8  ;;  %2452 = vmatpush.msra.mxu3 %v5900_v32  ;;  %6964 = vst [vmem:[#allocation55_spill] sm:$0xff] %v5930_v30  ;;  %v1578_v32 = vld [vmem:[#allocation2 + $0x3] ss:$8 sm:$0xf] }
 0x2e1   :  { %2393 = vmatpush.msra.mxu0 %v5903_v37  ;;  %2413 = vmatpush.msra.mxu1 %v5906_v51  ;;  %6965 = vst [vmem:[#allocation56_spill] sm:$0xff] %v5933_v26  ;;  %v1584_v24 = vld [vmem:[#allocation2 + $0x63] ss:$8 sm:$0xf] }
 0x2e2   :  { %2433 = vmatpush.msra.mxu2 %v5909_v22  ;;  %2453 = vmatpush.msra.mxu3 %v5912_v25  ;;  %6966 = vst [vmem:[#allocation57_spill] sm:$0xff] %v5936_v38 }
 0x2e3   :  { %2394 = vmatpush.msra.mxu0 %v5915_v42  ;;  %2414 = vmatpush.msra.mxu1 %v5918_v57  ;;  %6967 = vst [vmem:[#allocation58_spill] sm:$0xff] %v5939_v12 }
 0x2e4   :  { %2434 = vmatpush.msra.mxu2 %v5921_v54  ;;  %2454 = vmatpush.msra.mxu3 %v5924_v40  ;;  %6968 = vst [vmem:[#allocation59_spill] sm:$0xff] %v5942_v14 }
 0x2e5   :  { %2395 = vmatpush.msra.mxu0 %v5927_v44  ;;  %2415 = vmatpush.msra.mxu1 %v5930_v30  ;;  %6969 = vst [vmem:[#allocation60_spill] sm:$0xff] %v5945_v13 }
 0x2e6   :  { %2435 = vmatpush.msra.mxu2 %v5933_v26  ;;  %2455 = vmatpush.msra.mxu3 %v5936_v38  ;;  %6970 = vst [vmem:[#allocation61_spill] sm:$0xff] %v5948_v50 }
 0x2e7   :  { %2396 = vmatpush.msra.mxu0 %v5939_v12  ;;  %2416 = vmatpush.msra.mxu1 %v5942_v14  ;;  %6971 = vst [vmem:[#allocation62_spill] sm:$0xff] %v5951_v20 }
 0x2e8   :  { %2436 = vmatpush.msra.mxu2 %v5945_v13  ;;  %2456 = vmatpush.msra.mxu3 %v5948_v50  ;;  %6972 = vst [vmem:[#allocation63_spill] sm:$0xff] %v5954_v11  ;;  %v5963_v13 = vld [vmem:[#allocation13 + $0x20] sm:$0xff]  ;;  %v5966_v50 = vld [vmem:[#allocation13 + $0x28] sm:$0xff] }
 0x2e9   :  { %2397 = vmatpush.msra.mxu0 %v5951_v20  ;;  %2417 = vmatpush.msra.mxu1 %v5954_v11  ;;  %6973 = vst [vmem:[#allocation64_spill] sm:$0xff] %v5957_v9  ;;  %v5969_v20 = vld [vmem:[#allocation13 + $0x30] sm:$0xff]  ;;  %v5972_v11 = vld [vmem:[#allocation13 + $0x38] sm:$0xff] }
 0x2ea   :  { %2437 = vmatpush.msra.mxu2 %v5957_v9  ;;  %6974 = vst [vmem:[#allocation65_spill] sm:$0xff] %v5960_v61  ;;  %2457 = vmatpush.msra.mxu3 %v5960_v61  ;;  %v5975_v9 = vld [vmem:[#allocation13] sm:$0xff]  ;;  %v5978_v61 = vld [vmem:[#allocation13 + $0x8] sm:$0xff] }
 0x2eb   :  { %6975 = vst [vmem:[#allocation66_spill] sm:$0xff] %v5963_v13  ;;  %2398 = vmatpush.msra.mxu0 %v5963_v13  ;;  %2418 = vmatpush.msra.mxu1 %v5966_v50  ;;  %v5981_v13 = vld [vmem:[#allocation13 + $0x10] sm:$0xff] }
 0x2ec   :  { %6976 = vst [vmem:[#allocation67_spill] sm:$0xff] %v5966_v50  ;;  %2438 = vmatpush.msra.mxu2 %v5969_v20  ;;  %2458 = vmatpush.msra.mxu3 %v5972_v11  ;;  %v5984_v50 = vld [vmem:[#allocation13 + $0x18] sm:$0xff] }
 0x2ed   :  { %6977 = vst [vmem:[#allocation68_spill] sm:$0xff] %v5969_v20  ;;  %2399 = vmatpush.msra.mxu0 %v5975_v9  ;;  %2419 = vmatpush.msra.mxu1 %v5978_v61 }
 0x2ee   :  { %6978 = vst [vmem:[#allocation69_spill] sm:$0xff] %v5972_v11  ;;  %2439 = vmatpush.msra.mxu2 %v5981_v13  ;;  %2459 = vmatpush.msra.mxu3 %v5984_v50 }
 0x2ef   :  { %6979 = vst [vmem:[#allocation70_spill] sm:$0xff] %v5975_v9 }
 0x2f0   :  { %6980 = vst [vmem:[#allocation71_spill] sm:$0xff] %v5978_v61 }
 0x2f1   :  { %6981 = vst [vmem:[#allocation72_spill] sm:$0xff] %v5981_v13 }
 0x2f2   :  { %6982 = vst [vmem:[#allocation73_spill] sm:$0xff] %v5984_v50 }
 0x34a   :  { %v1655_v20 = vpop.f32.mrf.mxu1  ;;  %v1635_v12 = vpop.f32.mrf.mxu0 }
 0x34b   :  { %v1702_v14 = vrot.slane %v1655_v20, 7 }
 0x34d   :  { %v1705_v11 = vsel %vm525_vm1, %v1635_v12, %v1702_v14  ;;  %v1708_v38 = vsel %vm531_vm4, %v1635_v12, %v1702_v14  ;;  %v1712_v30 = vsel %vm527_vm2, %v1635_v12, %v1702_v14  ;;  %v1716_v61 = vsel %vm533_vm5, %v1635_v12, %v1702_v14 }
 0x34e   :  { %v1720_v13 = vsel %vm539_vm7, %v1635_v12, %v1702_v14  ;;  %v1724_v54 = vsel %vm545_vm9, %v1635_v12, %v1702_v14  ;;  %v1728_v50 = vsel %vm551_vm11, %v1635_v12, %v1702_v14  ;;  %v1732_v20 = vsel %vm557_vm13, %v1702_v14, %v1635_v12 }
 0x351   :  { %v1675_v9 = vpop.f32.mrf.mxu2  ;;  %v1695_v26 = vpop.f32.mrf.mxu3 }
 0x352   :  { %v1703_v44 = vrot.slane %v1675_v9, 6  ;;  %v1704_v40 = vrot.slane %v1695_v26, 5 }
 0x354   :  { %v1706_v57 = vsel %vm527_vm2, %v1703_v44, %v1704_v40  ;;  %v1709_v42 = vsel %vm533_vm5, %v1703_v44, %v1704_v40  ;;  %v1713_v25 = vsel %vm539_vm7, %v1703_v44, %v1704_v40  ;;  %v1717_v22 = vsel %vm545_vm9, %v1703_v44, %v1704_v40 }
 0x355   :  { %v1707_v51 = vsel %vm529_vm3, %v1705_v11, %v1706_v57  ;;  %v1710_v26 = vsel %vm535_vm6, %v1708_v38, %v1709_v42  ;;  %v1714_v9 = vsel %vm541_vm8, %v1712_v30, %v1713_v25  ;;  %v1718_v37 = vsel %vm547_vm10, %v1716_v61, %v1717_v22  ;;  %v1586_v25 = vld [vmem:[#allocation2 + $0x83] ss:$8 sm:$0xf] }
 0x356   :  { %v1711_v8 = vrot.slane %v1710_v26, 1  ;;  %v1715_v36 = vrot.slane %v1714_v9, 2  ;;  %v1719_v12 = vrot.slane %v1718_v37, 3  ;;  %v1721_v14 = vsel %vm551_vm11, %v1703_v44, %v1704_v40  ;;  %v1588_v11 = vld [vmem:[#allocation2 + $0xa3] ss:$8 sm:$0xf] }
 0x357   :  { %v1722_v58 = vsel %vm553_vm12, %v1720_v13, %v1721_v14  ;;  %v1725_v27 = vsel %vm557_vm13, %v1704_v40, %v1703_v44  ;;  %v1729_v57 = vsel %vm525_vm1, %v1703_v44, %v1704_v40  ;;  %v1733_v42 = vsel %vm531_vm4, %v1703_v44, %v1704_v40  ;;  %v1590_v13 = vld [vmem:[#allocation2 + $0xc3] ss:$8 sm:$0xf] }
 0x358   :  { %v1723_v30 = vrot.slane %v1722_v58, 4  ;;  %v1726_v22 = vsel %vm559_vm14, %v1724_v54, %v1725_v27  ;;  %v1730_v38 = vsel %vm564_vm15, %v1729_v57, %v1728_v50  ;;  %v1734_v37 = vsel %vm569_vm0, %v1733_v42, %v1732_v20  ;;  %v1592_v14 = vld [vmem:[#allocation2 + $0xe3] ss:$8 sm:$0xf] }
 0x359   :  { %v1727_v61 = vrot.slane %v1726_v22, 5  ;;  %v1731_v26 = vrot.slane %v1730_v38, 6  ;;  %v1735_v9 = vrot.slane %v1734_v37, 7  ;;  %v6011_v31 = vadd.f32 %v1707_v51, %v1578_v32 }
 0x35a   :  { %v6013_v49 = vadd.f32 %v1711_v8, %v1580_v39  ;;  %v6015_v16 = vadd.f32 %v1715_v36, %v1582_v28  ;;  %v6017_v40 = vadd.f32 %v1719_v12, %v1584_v24  ;;  %v6019_v58 = vadd.f32 %v1723_v30, %v1586_v25 }
 0x35b   :  { %v6021_v27 = vadd.f32 %v1727_v61, %v1588_v11  ;;  %v6023_v54 = vadd.f32 %v1731_v26, %v1590_v13  ;;  %v6025_v44 = vadd.f32 %v1735_v9, %v1592_v14  ;;  %v1752_v50 = vmul.f32 0.5, %v6011_v31 }
 0x35c   :  { %v1753_v32 = vmul.f32 0.5, %v6013_v49  ;;  %v1754_v51 = vmul.f32 0.5, %v6015_v16  ;;  %v1755_v39 = vmul.f32 0.5, %v6017_v40  ;;  %v1756_v28 = vmul.f32 0.5, %v6019_v58 }
 0x35d   :  { %3887 = vtanh.f32 %v1752_v50  ;;  %v1757_v24 = vmul.f32 0.5, %v6021_v27  ;;  %v1792_v36 = vrot.slane %v6011_v31, 1  ;;  %v1793_v8 = vrot.slane %v6013_v49, 1 }
 0x35e   :  { %3889 = vtanh.f32 %v1753_v32  ;;  %v1758_v20 = vmul.f32 0.5, %v6023_v54  ;;  %v1759_v12 = vmul.f32 0.5, %v6025_v44  ;;  %v1794_v57 = vrot.slane %v6015_v16, 1 }
 0x35f   :  { %3891 = vtanh.f32 %v1754_v51  ;;  %v1795_v42 = vrot.slane %v6017_v40, 1  ;;  %v1796_v25 = vrot.slane %v6019_v58, 1  ;;  %v1797_v30 = vrot.slane %v6021_v27, 1 }
 0x360   :  { %3893 = vtanh.f32 %v1755_v39  ;;  %v1798_v22 = vrot.slane %v6023_v54, 1  ;;  %v1799_v38 = vrot.slane %v6025_v44, 1  ;;  %v1808_v37 = vmul.f32 0.5, %v1792_v36 }
 0x361   :  { %3895 = vtanh.f32 %v1756_v28  ;;  %v1809_v11 = vmul.f32 0.5, %v1793_v8  ;;  %v1810_v26 = vmul.f32 0.5, %v1794_v57  ;;  %v1811_v13 = vmul.f32 0.5, %v1795_v42 }
 0x362   :  { %3897 = vtanh.f32 %v1757_v24  ;;  %v1812_v14 = vmul.f32 0.5, %v1796_v25  ;;  %v1813_v50 = vmul.f32 0.5, %v1797_v30  ;;  %v1814_v39 = vmul.f32 0.5, %v1798_v22 }
 0x363   :  { %v3888_v61 = vpop.eup %3887  ;;  %3899 = vtanh.f32 %v1758_v20  ;;  %v1815_v33 = vmul.f32 0.5, %v1799_v38  ;;  %v1840_v36 = vrot.slane %v6011_v31, 2  ;;  %v1841_v24 = vrot.slane %v6013_v49, 2 }
 0x364   :  { %v3890_v9 = vpop.eup %3889  ;;  %3901 = vtanh.f32 %v1759_v12  ;;  %v1768_v51 = vmul.f32 0.5, %v3888_v61  ;;  %v1842_v12 = vrot.slane %v6015_v16, 2  ;;  %v1843_v57 = vrot.slane %v6017_v40, 2 }
 0x365   :  { %v3892_v32 = vpop.eup %3891  ;;  %3903 = vtanh.f32 %v1808_v37  ;;  %v1769_v7 = vmul.f32 0.5, %v3890_v9  ;;  %v1844_v30 = vrot.slane %v6019_v58, 2  ;;  %v1845_v22 = vrot.slane %v6021_v27, 2 }
 0x366   :  { %v3894_v28 = vpop.eup %3893  ;;  %3905 = vtanh.f32 %v1809_v11  ;;  %v1770_v20 = vmul.f32 0.5, %v3892_v32  ;;  %v6049_v61 = vadd.f32 0.5, %v1768_v51  ;;  %v1846_v34 = vrot.slane %v6023_v54, 2 }
 0x367   :  { %v3896_v8 = vpop.eup %3895  ;;  %3907 = vtanh.f32 %v1810_v26  ;;  %v1771_v25 = vmul.f32 0.5, %v3894_v28  ;;  %v6051_v26 = vadd.f32 0.5, %v1769_v7  ;;  %v1847_v59 = vrot.slane %v6025_v44, 2 }
 0x368   :  { %v3898_v42 = vpop.eup %3897  ;;  %3909 = vtanh.f32 %v1811_v13  ;;  %v1772_v37 = vmul.f32 0.5, %v3896_v8  ;;  %v6054_v13 = vadd.f32 0.5, %v1770_v20  ;;  %v1866_v20 = vrot.slane %v6015_v16, 3 }
 0x369   :  { %v3900_v38 = vpop.eup %3899  ;;  %v1773_v11 = vmul.f32 0.5, %v3898_v42  ;;  %3911 = vtanh.f32 %v1812_v14  ;;  %v6057_v8 = vadd.f32 0.5, %v1771_v25  ;;  %v1864_v14 = vrot.slane %v6011_v31, 3 }
 0x36a   :  { %v3902_v9 = vpop.eup %3901  ;;  %v1774_v32 = vmul.f32 0.5, %v3900_v38  ;;  %3913 = vtanh.f32 %v1813_v50  ;;  %v6060_v7 = vadd.f32 0.5, %v1772_v37  ;;  %v1865_v38 = vrot.slane %v6013_v49, 3 }
 0x36b   :  { %v3904_v21 = vpop.eup %3903  ;;  %v1775_v28 = vmul.f32 0.5, %v3902_v9  ;;  %3915 = vtanh.f32 %v1814_v39  ;;  %v6062_v50 = vadd.f32 0.5, %v1773_v11  ;;  %v1867_v25 = vrot.slane %v6017_v40, 3 }
 0x36c   :  { %v3906_v0 = vpop.eup %3905  ;;  %3917 = vtanh.f32 %v1815_v33  ;;  %v1824_v51 = vmul.f32 0.5, %v3904_v21  ;;  %v6066_v39 = vadd.f32 0.5, %v1774_v32  ;;  %v1868_v31 = vrot.slane %v6019_v58, 3 }
 0x36d   :  { %v3908_v42 = vpop.eup %3907  ;;  %v1825_v17 = vmul.f32 0.5, %v3906_v0  ;;  %3919 = vtanh.f32 %v1840_v36  ;;  %v6069_v21 = vadd.f32 0.5, %v1775_v28  ;;  %v1869_v37 = vrot.slane %v6021_v27, 3 }
 0x36e   :  { %v3910_v9 = vpop.eup %3909  ;;  %3921 = vtanh.f32 %v1841_v24  ;;  %v1826_v55 = vmul.f32 0.5, %v3908_v42  ;;  %v1832_v23 = vadd.f32 0.5, %v1824_v51  ;;  %v1870_v0 = vrot.slane %v6023_v54, 3 }
 0x36f   :  { %v3912_v33 = vpop.eup %3911  ;;  %v1827_v49 = vmul.f32 0.5, %v3910_v9  ;;  %3923 = vtanh.f32 %v1842_v12  ;;  %v1833_v28 = vadd.f32 0.5, %v1825_v17  ;;  %v1880_v24 = vmul.f32 0.5, %v1864_v14 }
 0x370   :  { %v3914_v11 = vpop.eup %3913  ;;  %v1828_v32 = vmul.f32 0.5, %v3912_v33  ;;  %3925 = vtanh.f32 %v1843_v57  ;;  %v1871_v58 = vrot.slane %v6025_v44, 3  ;;  %v1881_v27 = vmul.f32 0.5, %v1865_v38 }
 0x371   :  { %v3916_v16 = vpop.eup %3915  ;;  %v1829_v48 = vmul.f32 0.5, %v3914_v11  ;;  %3927 = vtanh.f32 %v1844_v30  ;;  %v1834_v9 = vadd.f32 0.5, %v1826_v55  ;;  %v1835_v51 = vadd.f32 0.5, %v1827_v49 }
 0x372   :  { %v3918_v40 = vpop.eup %3917  ;;  %v1830_v36 = vmul.f32 0.5, %v3916_v16  ;;  %3929 = vtanh.f32 %v1845_v22  ;;  %v1882_v12 = vmul.f32 0.5, %v1866_v20  ;;  %v1836_v11 = vadd.f32 0.5, %v1828_v32 }
 0x373   :  { %v1831_v1 = vmul.f32 0.5, %v3918_v40  ;;  %v3920_v42 = vpop.eup %3919  ;;  %3931 = vtanh.f32 %v1846_v34  ;;  %v1837_v57 = vadd.f32 0.5, %v1829_v48  ;;  %v1883_v54 = vmul.f32 0.5, %v1867_v25 }
 0x374   :  { %v3922_v33 = vpop.eup %3921  ;;  %3933 = vtanh.f32 %v1847_v59  ;;  %v1838_v16 = vadd.f32 0.5, %v1830_v36  ;;  %v1884_v17 = vmul.f32 0.5, %v1868_v31  ;;  %v1885_v30 = vmul.f32 0.5, %v1869_v37 }
 0x375   :  { %v3924_v29 = vpop.eup %3923  ;;  %3935 = vtanh.f32 %v1880_v24  ;;  %v1839_v22 = vadd.f32 0.5, %v1831_v1  ;;  %v1912_v44 = vmul.f32 %v1832_v23, %v5765_v53  ;;  %v1913_v55 = vmul.f32 %v1833_v28, %v5767_v5 }
 0x376   :  { %v3926_v14 = vpop.eup %3925  ;;  %3937 = vtanh.f32 %v1881_v27  ;;  %v1886_v34 = vmul.f32 0.5, %v1870_v0  ;;  %v1887_v20 = vmul.f32 0.5, %v1871_v58  ;;  %v1914_v48 = vmul.f32 %v1834_v9, %v5771_v15 }
 0x377   :  { %v3928_v38 = vpop.eup %3927  ;;  %3939 = vtanh.f32 %v1882_v12  ;;  %v1915_v25 = vmul.f32 %v1835_v51, %v5775_v18  ;;  %v1920_v31 = vmul.f32 %v3920_v42, %v6049_v61  ;;  %v1921_v37 = vmul.f32 %v3922_v33, %v6051_v26 }
 0x378   :  { %v3930_v59 = vpop.eup %3929  ;;  %3941 = vtanh.f32 %v1883_v54  ;;  %v1916_v53 = vmul.f32 %v1836_v11, %v5778_v19  ;;  %v1917_v5 = vmul.f32 %v1837_v57, %v5782_v6  ;;  %v1922_v23 = vmul.f32 %v3924_v29, %v6054_v13 }
 0x379   :  { %v3932_v1 = vpop.eup %3931  ;;  %3943 = vtanh.f32 %v1884_v17  ;;  %v1923_v15 = vmul.f32 %v3926_v14, %v6057_v8  ;;  %v6085_v32 = vadd.f32 %v1920_v31, %v1912_v44  ;;  %v6087_v0 = vadd.f32 %v1921_v37, %v1913_v55 }
 0x37a   :  { %v3934_v49 = vpop.eup %3933  ;;  %3945 = vtanh.f32 %v1885_v30  ;;  %v1918_v61 = vmul.f32 %v1838_v16, %v5785_v2  ;;  %v1924_v26 = vmul.f32 %v3928_v38, %v6060_v7  ;;  %v6091_v40 = vadd.f32 %v1922_v23, %v1914_v48 }
 0x37b   :  { %v3936_v18 = vpop.eup %3935  ;;  %3947 = vtanh.f32 %v1886_v34  ;;  %v1919_v6 = vmul.f32 %v1839_v22, %v5788_v41  ;;  %v1925_v29 = vmul.f32 %v3930_v59, %v6062_v50  ;;  %v6095_v13 = vadd.f32 %v1923_v15, %v1915_v25 }
 0x37c   :  { %v3938_v19 = vpop.eup %3937  ;;  %3949 = vtanh.f32 %v1887_v20  ;;  %v1926_v36 = vmul.f32 %v3932_v1, %v6066_v39  ;;  %v6098_v28 = vadd.f32 %v1924_v26, %v1916_v53  ;;  %v1896_v24 = vmul.f32 0.5, %v3936_v18 }
 0x37d   :  { %v3940_v8 = vpop.eup %3939  ;;  %3951 = vtanh.f32 %v6085_v32  ;;  %v1927_v7 = vmul.f32 %v3934_v49, %v6069_v21  ;;  %v6102_v58 = vadd.f32 %v1925_v29, %v1917_v5  ;;  %v1897_v27 = vmul.f32 0.5, %v3938_v19  ;;  %v6997_v29 = vld [vmem:[#allocation37_spill] sm:$0xff] }
 0x37e   :  { %v3942_v2 = vpop.eup %3941  ;;  %3953 = vtanh.f32 %v6087_v0  ;;  %v6105_v50 = vadd.f32 %v1926_v36, %v1918_v61  ;;  %v1898_v39 = vmul.f32 0.5, %v3940_v8  ;;  %v1904_v11 = vadd.f32 0.5, %v1896_v24  ;;  %v6998_v8 = vld [vmem:[#allocation38_spill] sm:$0xff]  ;;  %v6999_v36 = vld [vmem:[#allocation39_spill] sm:$0xff]  ;;  %v7001_v24 = vld [vmem:[#allocation41_spill] sm:$0xff] }
 0x37f   :  { %v3944_v41 = vpop.eup %3943  ;;  %3955 = vtanh.f32 %v6091_v40  ;;  %v6108_v9 = vadd.f32 %v1927_v7, %v1919_v6  ;;  %v1899_v12 = vmul.f32 0.5, %v3942_v2  ;;  %v1905_v16 = vadd.f32 0.5, %v1897_v27  ;;  %v6996_v6 = vld [vmem:[#allocation36_spill] sm:$0xff]  ;;  %v7002_v7 = vld [vmem:[#allocation42_spill] sm:$0xff] }
 0x380   :  { %v3946_v42 = vpop.eup %3945  ;;  %3957 = vtanh.f32 %v6095_v13  ;;  %v1900_v33 = vmul.f32 0.5, %v3944_v41  ;;  %v1906_v14 = vadd.f32 0.5, %v1898_v39  ;;  %v7000_v2 = vld [vmem:[#allocation40_spill] sm:$0xff]  ;;  %v7003_v41 = vld [vmem:[#allocation43_spill] sm:$0xff]  ;;  %v7006_v39 = vld [vmem:[#allocation46_spill] sm:$0xff] }
 0x381   :  { %v3948_v51 = vpop.eup %3947  ;;  %3959 = vtanh.f32 %v6098_v28  ;;  %v1901_v54 = vmul.f32 0.5, %v3946_v42  ;;  %v1907_v38 = vadd.f32 0.5, %v1899_v12  ;;  %v7004_v27 = vld [vmem:[#allocation44_spill] sm:$0xff]  ;;  %v7005_v42 = vld [vmem:[#allocation45_spill] sm:$0xff] }
 0x382   :  { %v3950_v21 = vpop.eup %3949  ;;  %3961 = vtanh.f32 %v6102_v58  ;;  %v1902_v30 = vmul.f32 0.5, %v3948_v51  ;;  %v1908_v48 = vadd.f32 0.5, %v1900_v33  ;;  %v7007_v51 = vld [vmem:[#allocation47_spill] sm:$0xff]  ;;  %v7008_v12 = vld [vmem:[#allocation48_spill] sm:$0xff]  ;;  %v7010_v33 = vld [vmem:[#allocation50_spill] sm:$0xff] }
 0x383   :  { %v3952_v57 = vpop.eup %3951  ;;  %3963 = vtanh.f32 %v6105_v50  ;;  %v1903_v55 = vmul.f32 0.5, %v3950_v21  ;;  %v1909_v31 = vadd.f32 0.5, %v1901_v54  ;;  %v7009_v21 = vld [vmem:[#allocation49_spill] sm:$0xff] }
 0x384   :  { %v3954_v17 = vpop.eup %3953  ;;  %3965 = vtanh.f32 %v6108_v9  ;;  %v1944_v22 = vmul.f32 %v3952_v57, %v1904_v11  ;;  %v1910_v53 = vadd.f32 0.5, %v1902_v30  ;;  %v7011_v11 = vld [vmem:[#allocation51_spill] sm:$0xff]  ;;  %v7012_v57 = vld [vmem:[#allocation52_spill] sm:$0xff]  ;;  %v7013_v54 = vld [vmem:[#allocation53_spill] sm:$0xff] }
 0x385   :  { %v3956_v44 = vpop.eup %3955  ;;  %v1945_v34 = vmul.f32 %v3954_v17, %v1905_v16  ;;  %v1911_v49 = vadd.f32 0.5, %v1903_v55  ;;  %v7014_v16 = vld [vmem:[#allocation54_spill] sm:$0xff]  ;;  %v7015_v17 = vld [vmem:[#allocation55_spill] sm:$0xff]  ;;  %v7016_v30 = vld [vmem:[#allocation56_spill] sm:$0xff] }
 0x386   :  { %v3958_v20 = vpop.eup %3957  ;;  %v1946_v59 = vmul.f32 %v3956_v44, %v1906_v14  ;;  %1952 = vst [vmem:[#allocation14 + $0x3] sm:$0x1] %v1944_v22  ;;  %v7017_v14 = vld [vmem:[#allocation57_spill] sm:$0xff]  ;;  %v7019_v44 = vld [vmem:[#allocation59_spill] sm:$0xff]  ;;  %v7020_v55 = vld [vmem:[#allocation60_spill] sm:$0xff] }
 0x387   :  { %v3960_v25 = vpop.eup %3959  ;;  %v1947_v37 = vmul.f32 %v3958_v20, %v1907_v38  ;;  %1953 = vst [vmem:[#allocation14 + $0xb] sm:$0x1] %v1945_v34  ;;  %v7021_v38 = vld [vmem:[#allocation61_spill] sm:$0xff]  ;;  %v7023_v20 = vld [vmem:[#allocation63_spill] sm:$0xff] }
 0x388   :  { %v3962_v1 = vpop.eup %3961  ;;  %v1948_v5 = vmul.f32 %v3960_v25, %v1908_v48  ;;  %1954 = vst [vmem:[#allocation14 + $0x13] sm:$0x1] %v1946_v59  ;;  %v7024_v48 = vld [vmem:[#allocation64_spill] sm:$0xff]  ;;  %v7026_v25 = vld [vmem:[#allocation66_spill] sm:$0xff] }
 0x389   :  { %v3964_v23 = vpop.eup %3963  ;;  %v1949_v15 = vmul.f32 %v3962_v1, %v1909_v31  ;;  %1955 = vst [vmem:[#allocation14 + $0x1b] sm:$0x1] %v1947_v37  ;;  %v7027_v31 = vld [vmem:[#allocation67_spill] sm:$0xff]  ;;  %v7029_v1 = vld [vmem:[#allocation69_spill] sm:$0xff] }
 0x38a   :  { %v3966_v18 = vpop.eup %3965  ;;  %v1950_v61 = vmul.f32 %v3964_v23, %v1910_v53  ;;  %1956 = vst [vmem:[#allocation14 + $0x23] sm:$0x1] %v1948_v5  ;;  %v7030_v53 = vld [vmem:[#allocation70_spill] sm:$0xff]  ;;  %v7032_v23 = vld [vmem:[#allocation72_spill] sm:$0xff] }
 0x38b   :  { %v1951_v26 = vmul.f32 %v3966_v18, %v1911_v49  ;;  %1957 = vst [vmem:[#allocation14 + $0x2b] sm:$0x1] %v1949_v15  ;;  %v7033_v49 = vld [vmem:[#allocation73_spill] sm:$0xff] }
 0x38c   :  { %1958 = vst [vmem:[#allocation14 + $0x33] sm:$0x1] %v1950_v61 }
 0x38d   :  { %1959 = vst [vmem:[#allocation14 + $0x3b] sm:$0x1] %v1951_v26 }
 0x38e   :  { %1984 = vst [vmem:[#allocation1] ss:$9 sm:$0xff] %v1944_v22  ;;  %v7018_v22 = vld [vmem:[#allocation58_spill] sm:$0xff] }
 0x38f   :  { %1986 = vst [vmem:[#allocation1 + $0x1] ss:$9 sm:$0xff] %v1945_v34  ;;  %v7022_v34 = vld [vmem:[#allocation62_spill] sm:$0xff] }
 0x390   :  { %1988 = vst [vmem:[#allocation1 + $0x2] ss:$9 sm:$0xff] %v1946_v59  ;;  %v7025_v59 = vld [vmem:[#allocation65_spill] sm:$0xff] }
 0x391   :  { %1990 = vst [vmem:[#allocation1 + $0x3] ss:$9 sm:$0xff] %v1947_v37  ;;  %v7028_v37 = vld [vmem:[#allocation68_spill] sm:$0xff] }
 0x392   :  { %1992 = vst [vmem:[#allocation1 + $0x4] ss:$9 sm:$0xff] %v1948_v5  ;;  %v7031_v5 = vld [vmem:[#allocation71_spill] sm:$0xff] }
 0x393   :  { %1994 = vst [vmem:[#allocation1 + $0x5] ss:$9 sm:$0xff] %v1949_v15 }
 0x394   :  { %1996 = vst [vmem:[#allocation1 + $0x6] ss:$9 sm:$0xff] %v1950_v61 }
 0x395   :  { %1998 = vst [vmem:[#allocation1 + $0x7] ss:$9 sm:$0xff] %v1951_v26 }
 0x39c   :  { %v1999_v19 = vld [vmem:[#allocation1] sm:$0xff] }
 0x39d   :  { %2017 = vmatmul.f32.vlgmr.msrb.gmra.mxu0 %v1999_v19  ;;  %2037 = vmatmul.f32.vlgmr.msrb.gmra.mxu1 %v1999_v19 }
 0x39e   :  { %2057 = vmatmul.f32.vlgmr.msrb.gmra.mxu2 %v1999_v19  ;;  %2077 = vmatmul.f32.vlgmr.msrb.gmra.mxu3 %v1999_v19 }
 0x39f   :  { %2767 = vmatpush.msrb.mxu0 %v5795_v60  ;;  %2787 = vmatpush.msrb.mxu1 %v5798_v10  ;;  %v6983_v60 = vld [vmem:[#allocation23_spill] sm:$0xff]  ;;  %v6984_v10 = vld [vmem:[#allocation24_spill] sm:$0xff] }
 0x3a0   :  { %2807 = vmatpush.msrb.mxu2 %v5801_v62  ;;  %2827 = vmatpush.msrb.mxu3 %v5804_v63  ;;  %v6985_v62 = vld [vmem:[#allocation25_spill] sm:$0xff]  ;;  %v6986_v63 = vld [vmem:[#allocation26_spill] sm:$0xff] }
 0x3a1   :  { %2768 = vmatpush.msrb.mxu0 %v5807_v35  ;;  %2788 = vmatpush.msrb.mxu1 %v5810_v3  ;;  %v6987_v35 = vld [vmem:[#allocation27_spill] sm:$0xff]  ;;  %v6988_v3 = vld [vmem:[#allocation28_spill] sm:$0xff] }
 0x3a2   :  { %2808 = vmatpush.msrb.mxu2 %v5813_v4  ;;  %2828 = vmatpush.msrb.mxu3 %v5816_v43  ;;  %v6989_v4 = vld [vmem:[#allocation29_spill] sm:$0xff]  ;;  %v6990_v43 = vld [vmem:[#allocation30_spill] sm:$0xff] }
 0x3a3   :  { %2769 = vmatpush.msrb.mxu0 %v5819_v46  ;;  %2789 = vmatpush.msrb.mxu1 %v5822_v45  ;;  %v6991_v46 = vld [vmem:[#allocation31_spill] sm:$0xff]  ;;  %v6992_v45 = vld [vmem:[#allocation32_spill] sm:$0xff] }
 0x3a4   :  { %2809 = vmatpush.msrb.mxu2 %v5825_v47  ;;  %2829 = vmatpush.msrb.mxu3 %v5828_v52  ;;  %v6993_v47 = vld [vmem:[#allocation33_spill] sm:$0xff]  ;;  %v6994_v52 = vld [vmem:[#allocation34_spill] sm:$0xff] }
 0x3a5   :  { %2770 = vmatpush.msrb.mxu0 %v5831_v56  ;;  %2790 = vmatpush.msrb.mxu1 %v6983_v60  ;;  %v6995_v56 = vld [vmem:[#allocation35_spill] sm:$0xff] }
 0x3a6   :  { %2810 = vmatpush.msrb.mxu2 %v6984_v10  ;;  %2830 = vmatpush.msrb.mxu3 %v6985_v62 }
 0x3a7   :  { %2771 = vmatpush.msrb.mxu0 %v6986_v63  ;;  %2791 = vmatpush.msrb.mxu1 %v6987_v35 }
 0x3a8   :  { %2811 = vmatpush.msrb.mxu2 %v6988_v3  ;;  %2831 = vmatpush.msrb.mxu3 %v6989_v4 }
 0x3a9   :  { %2772 = vmatpush.msrb.mxu0 %v6990_v43  ;;  %2792 = vmatpush.msrb.mxu1 %v6991_v46 }
 0x3aa   :  { %2812 = vmatpush.msrb.mxu2 %v6992_v45  ;;  %2832 = vmatpush.msrb.mxu3 %v6993_v47 }
 0x3ab   :  { %2773 = vmatpush.msrb.mxu0 %v6994_v52  ;;  %2793 = vmatpush.msrb.mxu1 %v6995_v56 }
 0x3ac   :  { %2813 = vmatpush.msrb.mxu2 %v6996_v6  ;;  %2833 = vmatpush.msrb.mxu3 %v6997_v29 }
 0x3ad   :  { %2774 = vmatpush.msrb.mxu0 %v6998_v8  ;;  %2794 = vmatpush.msrb.mxu1 %v6999_v36 }
 0x3ae   :  { %2814 = vmatpush.msrb.mxu2 %v7000_v2  ;;  %2834 = vmatpush.msrb.mxu3 %v7001_v24  ;;  %v1961_v24 = vld [vmem:[#allocation2 + $0x4] ss:$8 sm:$0xf] }
 0x3af   :  { %2775 = vmatpush.msrb.mxu0 %v7002_v7  ;;  %2795 = vmatpush.msrb.mxu1 %v7003_v41 }
 0x3b0   :  { %2815 = vmatpush.msrb.mxu2 %v7004_v27  ;;  %2835 = vmatpush.msrb.mxu3 %v7005_v42 }
 0x3b1   :  { %2776 = vmatpush.msrb.mxu0 %v7006_v39  ;;  %2796 = vmatpush.msrb.mxu1 %v7007_v51  ;;  %v1963_v39 = vld [vmem:[#allocation2 + $0x24] ss:$8 sm:$0xf] }
 0x3b2   :  { %2816 = vmatpush.msrb.mxu2 %v7008_v12  ;;  %2836 = vmatpush.msrb.mxu3 %v7009_v21  ;;  %v1965_v51 = vld [vmem:[#allocation2 + $0x44] ss:$8 sm:$0xf] }
 0x3b3   :  { %2777 = vmatpush.msrb.mxu0 %v7010_v33  ;;  %2797 = vmatpush.msrb.mxu1 %v7011_v11  ;;  %v1967_v12 = vld [vmem:[#allocation2 + $0x64] ss:$8 sm:$0xf] }
 0x3b4   :  { %2817 = vmatpush.msrb.mxu2 %v7012_v57  ;;  %2837 = vmatpush.msrb.mxu3 %v7013_v54  ;;  %v1969_v54 = vld [vmem:[#allocation2 + $0x84] ss:$8 sm:$0xf] }
 0x3b5   :  { %2778 = vmatpush.msrb.mxu0 %v7014_v16  ;;  %2798 = vmatpush.msrb.mxu1 %v7015_v17 }
 0x3b6   :  { %2818 = vmatpush.msrb.mxu2 %v7016_v30  ;;  %2838 = vmatpush.msrb.mxu3 %v7017_v14 }
 0x3b7   :  { %2779 = vmatpush.msrb.mxu0 %v7018_v22  ;;  %2799 = vmatpush.msrb.mxu1 %v7019_v44  ;;  %v1971_v22 = vld [vmem:[#allocation2 + $0xa4] ss:$8 sm:$0xf] }
 0x3b8   :  { %2819 = vmatpush.msrb.mxu2 %v7020_v55  ;;  %2839 = vmatpush.msrb.mxu3 %v7021_v38 }
 0x3b9   :  { %2780 = vmatpush.msrb.mxu0 %v7022_v34  ;;  %2800 = vmatpush.msrb.mxu1 %v7023_v20  ;;  %v1973_v20 = vld [vmem:[#allocation2 + $0xc4] ss:$8 sm:$0xf] }
 0x3ba   :  { %2820 = vmatpush.msrb.mxu2 %v7024_v48  ;;  %2840 = vmatpush.msrb.mxu3 %v7025_v59  ;;  %v1975_v48 = vld [vmem:[#allocation2 + $0xe4] ss:$8 sm:$0xf] }
 0x3bb   :  { %2781 = vmatpush.msrb.mxu0 %v7026_v25  ;;  %2801 = vmatpush.msrb.mxu1 %v7027_v31 }
 0x3bc   :  { %2821 = vmatpush.msrb.mxu2 %v7028_v37  ;;  %2841 = vmatpush.msrb.mxu3 %v7029_v1 }
 0x3bd   :  { %2782 = vmatpush.msrb.mxu0 %v7030_v53  ;;  %2802 = vmatpush.msrb.mxu1 %v7031_v5 }
 0x3be   :  { %2822 = vmatpush.msrb.mxu2 %v7032_v23  ;;  %2842 = vmatpush.msrb.mxu3 %v7033_v49 }
 0x41a   :  { %v2038_v15 = vpop.f32.mrf.mxu1  ;;  %v2018_v61 = vpop.f32.mrf.mxu0 }
 0x41b   :  { %v2085_v18 = vrot.slane %v2038_v15, 7 }
 0x41d   :  { %v2088_v26 = vsel %vm525_vm1, %v2018_v61, %v2085_v18  ;;  %v2091_v19 = vsel %vm531_vm4, %v2018_v61, %v2085_v18  ;;  %v2095_v62 = vsel %vm527_vm2, %v2018_v61, %v2085_v18  ;;  %v2099_v63 = vsel %vm533_vm5, %v2018_v61, %v2085_v18 }
 0x41e   :  { %v2103_v4 = vsel %vm539_vm7, %v2018_v61, %v2085_v18  ;;  %v2107_v43 = vsel %vm545_vm9, %v2018_v61, %v2085_v18  ;;  %v2111_v46 = vsel %vm551_vm11, %v2018_v61, %v2085_v18  ;;  %v2115_v45 = vsel %vm557_vm13, %v2085_v18, %v2018_v61 }
 0x421   :  { %v2058_v60 = vpop.f32.mrf.mxu2  ;;  %v2078_v10 = vpop.f32.mrf.mxu3 }
 0x422   :  { %v2086_v35 = vrot.slane %v2058_v60, 6  ;;  %v2087_v3 = vrot.slane %v2078_v10, 5 }
 0x424   :  { %v2089_v47 = vsel %vm527_vm2, %v2086_v35, %v2087_v3  ;;  %v2092_v52 = vsel %vm533_vm5, %v2086_v35, %v2087_v3  ;;  %v2096_v56 = vsel %vm539_vm7, %v2086_v35, %v2087_v3  ;;  %v2100_v6 = vsel %vm545_vm9, %v2086_v35, %v2087_v3 }
 0x425   :  { %v2090_v29 = vsel %vm529_vm3, %v2088_v26, %v2089_v47  ;;  %v2093_v8 = vsel %vm535_vm6, %v2091_v19, %v2092_v52  ;;  %v2097_v36 = vsel %vm541_vm8, %v2095_v62, %v2096_v56  ;;  %v2101_v2 = vsel %vm547_vm10, %v2099_v63, %v2100_v6 }
 0x426   :  { %v2094_v7 = vrot.slane %v2093_v8, 1  ;;  %v2098_v41 = vrot.slane %v2097_v36, 2  ;;  %v2102_v27 = vrot.slane %v2101_v2, 3  ;;  %v2104_v42 = vsel %vm551_vm11, %v2086_v35, %v2087_v3 }
 0x427   :  { %v2105_v21 = vsel %vm553_vm12, %v2103_v4, %v2104_v42  ;;  %v2108_v33 = vsel %vm557_vm13, %v2087_v3, %v2086_v35  ;;  %v2112_v11 = vsel %vm525_vm1, %v2086_v35, %v2087_v3  ;;  %v2116_v57 = vsel %vm531_vm4, %v2086_v35, %v2087_v3 }
 0x428   :  { %v2106_v16 = vrot.slane %v2105_v21, 4  ;;  %v2109_v17 = vsel %vm559_vm14, %v2107_v43, %v2108_v33  ;;  %v2113_v30 = vsel %vm564_vm15, %v2112_v11, %v2111_v46  ;;  %v2117_v14 = vsel %vm569_vm0, %v2116_v57, %v2115_v45 }
 0x429   :  { %v2110_v44 = vrot.slane %v2109_v17, 5  ;;  %v2114_v55 = vrot.slane %v2113_v30, 6  ;;  %v2118_v38 = vrot.slane %v2117_v14, 7  ;;  %v6203_v34 = vadd.f32 %v2090_v29, %v1961_v24 }
 0x42a   :  { %v6205_v59 = vadd.f32 %v2094_v7, %v1963_v39  ;;  %v6207_v25 = vadd.f32 %v2098_v41, %v1965_v51  ;;  %v6209_v31 = vadd.f32 %v2102_v27, %v1967_v12  ;;  %v6211_v37 = vadd.f32 %v2106_v16, %v1969_v54 }
 0x42b   :  { %v6213_v1 = vadd.f32 %v2110_v44, %v1971_v22  ;;  %v6215_v53 = vadd.f32 %v2114_v55, %v1973_v20  ;;  %v6217_v5 = vadd.f32 %v2118_v38, %v1975_v48  ;;  %v2135_v23 = vmul.f32 0.5, %v6203_v34 }
 0x42c   :  { %v2136_v49 = vmul.f32 0.5, %v6205_v59  ;;  %v2137_v15 = vmul.f32 0.5, %v6207_v25  ;;  %v2138_v18 = vmul.f32 0.5, %v6209_v31  ;;  %v2139_v61 = vmul.f32 0.5, %v6211_v37 }
 0x42d   :  { %3967 = vtanh.f32 %v2135_v23  ;;  %v2140_v26 = vmul.f32 0.5, %v6213_v1  ;;  %v2175_v19 = vrot.slane %v6203_v34, 1  ;;  %v2176_v60 = vrot.slane %v6205_v59, 1 }
 0x42e   :  { %3969 = vtanh.f32 %v2136_v49  ;;  %v2141_v10 = vmul.f32 0.5, %v6215_v53  ;;  %v2142_v62 = vmul.f32 0.5, %v6217_v5  ;;  %v2177_v63 = vrot.slane %v6207_v25, 1 }
 0x42f   :  { %3971 = vtanh.f32 %v2137_v15  ;;  %v2178_v35 = vrot.slane %v6209_v31, 1  ;;  %v2179_v3 = vrot.slane %v6211_v37, 1  ;;  %v2180_v4 = vrot.slane %v6213_v1, 1 }
 0x430   :  { %3973 = vtanh.f32 %v2138_v18  ;;  %v2181_v43 = vrot.slane %v6215_v53, 1  ;;  %v2182_v46 = vrot.slane %v6217_v5, 1  ;;  %v2191_v45 = vmul.f32 0.5, %v2175_v19 }
 0x431   :  { %3975 = vtanh.f32 %v2139_v61  ;;  %v2192_v47 = vmul.f32 0.5, %v2176_v60  ;;  %v2193_v56 = vmul.f32 0.5, %v2177_v63  ;;  %v2194_v29 = vmul.f32 0.5, %v2178_v35 }
 0x432   :  { %3977 = vtanh.f32 %v2140_v26  ;;  %v2195_v8 = vmul.f32 0.5, %v2179_v3  ;;  %v2196_v36 = vmul.f32 0.5, %v2180_v4  ;;  %v2197_v7 = vmul.f32 0.5, %v2181_v43 }
 0x433   :  { %v3968_v52 = vpop.eup %3967  ;;  %3979 = vtanh.f32 %v2141_v10  ;;  %v2198_v41 = vmul.f32 0.5, %v2182_v46  ;;  %v2223_v39 = vrot.slane %v6203_v34, 2  ;;  %v2224_v51 = vrot.slane %v6205_v59, 2 }
 0x434   :  { %v3970_v6 = vpop.eup %3969  ;;  %3981 = vtanh.f32 %v2142_v62  ;;  %v2151_v24 = vmul.f32 0.5, %v3968_v52  ;;  %v2225_v33 = vrot.slane %v6207_v25, 2  ;;  %v2226_v11 = vrot.slane %v6209_v31, 2 }
 0x435   :  { %v3972_v2 = vpop.eup %3971  ;;  %3983 = vtanh.f32 %v2191_v45  ;;  %v2152_v42 = vmul.f32 0.5, %v3970_v6  ;;  %v2227_v16 = vrot.slane %v6211_v37, 2  ;;  %v2228_v17 = vrot.slane %v6213_v1, 2 }
 0x436   :  { %v3974_v27 = vpop.eup %3973  ;;  %3985 = vtanh.f32 %v2192_v47  ;;  %v2153_v21 = vmul.f32 0.5, %v3972_v2  ;;  %v6241_v44 = vadd.f32 0.5, %v2151_v24  ;;  %v2229_v48 = vrot.slane %v6215_v53, 2 }
 0x437   :  { %v3976_v12 = vpop.eup %3975  ;;  %3987 = vtanh.f32 %v2193_v56  ;;  %v2154_v54 = vmul.f32 0.5, %v3974_v27  ;;  %v6243_v20 = vadd.f32 0.5, %v2152_v42  ;;  %v2230_v18 = vrot.slane %v6217_v5, 2 }
 0x438   :  { %v3978_v57 = vpop.eup %3977  ;;  %3989 = vtanh.f32 %v2194_v29  ;;  %v2155_v14 = vmul.f32 0.5, %v3976_v12  ;;  %v6246_v15 = vadd.f32 0.5, %v2153_v21  ;;  %v2247_v60 = vrot.slane %v6203_v34, 3 }
 0x439   :  { %v3980_v30 = vpop.eup %3979  ;;  %v2156_v22 = vmul.f32 0.5, %v3978_v57  ;;  %3991 = vtanh.f32 %v2195_v8  ;;  %v6249_v26 = vadd.f32 0.5, %v2154_v54  ;;  %v2248_v35 = vrot.slane %v6205_v59, 3 }
 0x43a   :  { %v3982_v55 = vpop.eup %3981  ;;  %v2157_v38 = vmul.f32 0.5, %v3980_v30  ;;  %3993 = vtanh.f32 %v2196_v36  ;;  %v6252_v62 = vadd.f32 0.5, %v2155_v14  ;;  %v2249_v3 = vrot.slane %v6207_v25, 3 }
 0x43b   :  { %v3984_v23 = vpop.eup %3983  ;;  %v2158_v49 = vmul.f32 0.5, %v3982_v55  ;;  %3995 = vtanh.f32 %v2197_v7  ;;  %v6254_v63 = vadd.f32 0.5, %v2156_v22  ;;  %v2250_v45 = vrot.slane %v6209_v31, 3 }
 0x43c   :  { %v3986_v61 = vpop.eup %3985  ;;  %3997 = vtanh.f32 %v2198_v41  ;;  %v2207_v19 = vmul.f32 0.5, %v3984_v23  ;;  %v6258_v43 = vadd.f32 0.5, %v2157_v38  ;;  %v2251_v34 = vrot.slane %v6211_v37, 3 }
 0x43d   :  { %v3988_v10 = vpop.eup %3987  ;;  %v2208_v46 = vmul.f32 0.5, %v3986_v61  ;;  %3999 = vtanh.f32 %v2223_v39  ;;  %v6261_v52 = vadd.f32 0.5, %v2158_v49  ;;  %v2252_v56 = vrot.slane %v6213_v1, 3 }
 0x43e   :  { %v3990_v4 = vpop.eup %3989  ;;  %4001 = vtanh.f32 %v2224_v51  ;;  %v2209_v29 = vmul.f32 0.5, %v3988_v10  ;;  %v2215_v8 = vadd.f32 0.5, %v2207_v19  ;;  %v2253_v24 = vrot.slane %v6215_v53, 3 }
 0x43f   :  { %v3992_v47 = vpop.eup %3991  ;;  %v2210_v59 = vmul.f32 0.5, %v3990_v4  ;;  %4003 = vtanh.f32 %v2225_v33  ;;  %v2216_v41 = vadd.f32 0.5, %v2208_v46  ;;  %v2263_v27 = vmul.f32 0.5, %v2247_v60 }
 0x440   :  { %v3994_v6 = vpop.eup %3993  ;;  %v2211_v36 = vmul.f32 0.5, %v3992_v47  ;;  %4005 = vtanh.f32 %v2226_v11  ;;  %v2254_v37 = vrot.slane %v6217_v5, 3  ;;  %v2264_v1 = vmul.f32 0.5, %v2248_v35 }
 0x441   :  { %v3996_v25 = vpop.eup %3995  ;;  %v2212_v2 = vmul.f32 0.5, %v3994_v6  ;;  %4007 = vtanh.f32 %v2227_v16  ;;  %v2217_v51 = vadd.f32 0.5, %v2209_v29  ;;  %v2218_v12 = vadd.f32 0.5, %v2210_v59 }
 0x442   :  { %v3998_v31 = vpop.eup %3997  ;;  %v2213_v7 = vmul.f32 0.5, %v3996_v25  ;;  %4009 = vtanh.f32 %v2228_v17  ;;  %v2265_v21 = vmul.f32 0.5, %v2249_v3  ;;  %v2219_v57 = vadd.f32 0.5, %v2211_v36 }
 0x443   :  { %v2214_v42 = vmul.f32 0.5, %v3998_v31  ;;  %v4000_v39 = vpop.eup %3999  ;;  %4011 = vtanh.f32 %v2229_v48  ;;  %v2220_v11 = vadd.f32 0.5, %v2212_v2  ;;  %v2266_v53 = vmul.f32 0.5, %v2250_v45 }
 0x444   :  { %v4002_v33 = vpop.eup %4001  ;;  %4013 = vtanh.f32 %v2230_v18  ;;  %v2221_v30 = vadd.f32 0.5, %v2213_v7  ;;  %v2267_v14 = vmul.f32 0.5, %v2251_v34  ;;  %v2268_v16 = vmul.f32 0.5, %v2252_v56 }
 0x445   :  { %v4004_v54 = vpop.eup %4003  ;;  %4015 = vtanh.f32 %v2263_v27  ;;  %v2222_v17 = vadd.f32 0.5, %v2214_v42  ;;  %v2295_v5 = vmul.f32 %v2215_v8, %v6085_v32  ;;  %v2296_v55 = vmul.f32 %v2216_v41, %v6087_v0 }
 0x446   :  { %v4006_v22 = vpop.eup %4005  ;;  %4017 = vtanh.f32 %v2264_v1  ;;  %v2269_v48 = vmul.f32 0.5, %v2253_v24  ;;  %v2270_v23 = vmul.f32 0.5, %v2254_v37  ;;  %v2297_v49 = vmul.f32 %v2217_v51, %v6091_v40 }
 0x447   :  { %v4008_v38 = vpop.eup %4007  ;;  %4019 = vtanh.f32 %v2265_v21  ;;  %v2298_v61 = vmul.f32 %v2218_v12, %v6095_v13  ;;  %v2303_v19 = vmul.f32 %v4000_v39, %v6241_v44  ;;  %v2304_v60 = vmul.f32 %v4002_v33, %v6243_v20 }
 0x448   :  { %v4010_v18 = vpop.eup %4009  ;;  %4021 = vtanh.f32 %v2266_v53  ;;  %v2299_v32 = vmul.f32 %v2219_v57, %v6098_v28  ;;  %v2300_v0 = vmul.f32 %v2220_v11, %v6102_v58  ;;  %v2305_v35 = vmul.f32 %v4004_v54, %v6246_v15 }
 0x449   :  { %v4012_v10 = vpop.eup %4011  ;;  %4023 = vtanh.f32 %v2267_v14  ;;  %v2306_v40 = vmul.f32 %v4006_v22, %v6249_v26  ;;  %v6277_v4 = vadd.f32 %v2303_v19, %v2295_v5  ;;  %v6279_v46 = vadd.f32 %v2304_v60, %v2296_v55  ;;  %v4416_v19 = vld [vmem:[#allocation13 + $0x1e8] sm:$0xff]  ;;  %v4417_v60 = vld [vmem:[#allocation13 + $0x1f0] sm:$0xff] }
 0x44a   :  { %v4014_v3 = vpop.eup %4013  ;;  %4025 = vtanh.f32 %v2268_v16  ;;  %v2301_v44 = vmul.f32 %v2221_v30, %v6105_v50  ;;  %v2307_v20 = vmul.f32 %v4008_v38, %v6252_v62  ;;  %v6283_v45 = vadd.f32 %v2305_v35, %v2297_v49  ;;  %v4421_v35 = vld [vmem:[#allocation13 + $0x1d0] sm:$0xff] }
 0x44b   :  { %v4016_v13 = vpop.eup %4015  ;;  %4027 = vtanh.f32 %v2269_v48  ;;  %v2302_v58 = vmul.f32 %v2222_v17, %v6108_v9  ;;  %v2308_v15 = vmul.f32 %v4010_v18, %v6254_v63  ;;  %v6287_v47 = vadd.f32 %v2306_v40, %v2298_v61  ;;  %v4415_v61 = vld [vmem:[#allocation13 + $0x1e0] sm:$0xff] }
 0x44c   :  { %v4018_v28 = vpop.eup %4017  ;;  %4029 = vtanh.f32 %v2270_v23  ;;  %v2309_v34 = vmul.f32 %v4012_v10, %v6258_v43  ;;  %v6290_v56 = vadd.f32 %v2307_v20, %v2299_v32  ;;  %v2279_v6 = vmul.f32 0.5, %v4016_v13  ;;  %v4418_v10 = vld [vmem:[#allocation13 + $0x1f8] sm:$0xff]  ;;  %v4419_v32 = vld [vmem:[#allocation13 + $0x1c0] sm:$0xff]  ;;  %v4424_v13 = vld [vmem:[#allocation13 + $0x1a8] sm:$0xff] }
 0x44d   :  { %v4020_v26 = vpop.eup %4019  ;;  %4031 = vtanh.f32 %v6277_v4  ;;  %v2310_v62 = vmul.f32 %v4014_v3, %v6261_v52  ;;  %v6294_v29 = vadd.f32 %v2308_v15, %v2300_v0  ;;  %v2280_v59 = vmul.f32 0.5, %v4018_v28  ;;  %v4420_v0 = vld [vmem:[#allocation13 + $0x1c8] sm:$0xff]  ;;  %v4422_v3 = vld [vmem:[#allocation13 + $0x1d8] sm:$0xff]  ;;  %v4423_v40 = vld [vmem:[#allocation13 + $0x1a0] sm:$0xff] }
 0x44e   :  { %v4022_v50 = vpop.eup %4021  ;;  %4033 = vtanh.f32 %v6279_v46  ;;  %v6297_v63 = vadd.f32 %v2309_v34, %v2301_v44  ;;  %v2281_v43 = vmul.f32 0.5, %v4020_v26  ;;  %v2287_v31 = vadd.f32 0.5, %v2279_v6  ;;  %v4425_v44 = vld [vmem:[#allocation13 + $0x1b0] sm:$0xff]  ;;  %v4426_v20 = vld [vmem:[#allocation13 + $0x1b8] sm:$0xff]  ;;  %v4427_v28 = vld [vmem:[#allocation13 + $0x180] sm:$0xff] }
 0x44f   :  { %v4024_v9 = vpop.eup %4023  ;;  %4035 = vtanh.f32 %v6283_v45  ;;  %v6300_v25 = vadd.f32 %v2310_v62, %v2302_v58  ;;  %v2282_v2 = vmul.f32 0.5, %v4022_v50  ;;  %v2288_v27 = vadd.f32 0.5, %v2280_v59  ;;  %v4428_v58 = vld [vmem:[#allocation13 + $0x188] sm:$0xff]  ;;  %v4429_v15 = vld [vmem:[#allocation13 + $0x190] sm:$0xff]  ;;  %v4430_v26 = vld [vmem:[#allocation13 + $0x198] sm:$0xff] }
 0x450   :  { %v4026_v8 = vpop.eup %4025  ;;  %4037 = vtanh.f32 %v6287_v47  ;;  %v2283_v24 = vmul.f32 0.5, %v4024_v9  ;;  %v2289_v1 = vadd.f32 0.5, %v2281_v43  ;;  %v4431_v34 = vld [vmem:[#allocation13 + $0x160] sm:$0xff]  ;;  %v4432_v50 = vld [vmem:[#allocation13 + $0x168] sm:$0xff]  ;;  %v4433_v6 = vld [vmem:[#allocation13 + $0x170] sm:$0xff] }
 0x451   :  { %v4028_v36 = vpop.eup %4027  ;;  %4039 = vtanh.f32 %v6290_v56  ;;  %v2284_v41 = vmul.f32 0.5, %v4026_v8  ;;  %v2290_v21 = vadd.f32 0.5, %v2282_v2  ;;  %v4434_v62 = vld [vmem:[#allocation13 + $0x178] sm:$0xff]  ;;  %v4435_v9 = vld [vmem:[#allocation13 + $0x140] sm:$0xff]  ;;  %v4436_v59 = vld [vmem:[#allocation13 + $0x148] sm:$0xff] }
 0x452   :  { %v4030_v52 = vpop.eup %4029  ;;  %4041 = vtanh.f32 %v6294_v29  ;;  %v2285_v37 = vmul.f32 0.5, %v4028_v36  ;;  %v2291_v11 = vadd.f32 0.5, %v2283_v24  ;;  %v4437_v8 = vld [vmem:[#allocation13 + $0x150] sm:$0xff]  ;;  %v4438_v43 = vld [vmem:[#allocation13 + $0x158] sm:$0xff]  ;;  %v4439_v36 = vld [vmem:[#allocation13 + $0x120] sm:$0xff] }
 0x453   :  { %v4032_v7 = vpop.eup %4031  ;;  %4043 = vtanh.f32 %v6297_v63  ;;  %v2286_v12 = vmul.f32 0.5, %v4030_v52  ;;  %v2292_v30 = vadd.f32 0.5, %v2284_v41  ;;  %v4440_v2 = vld [vmem:[#allocation13 + $0x128] sm:$0xff]  ;;  %v4441_v52 = vld [vmem:[#allocation13 + $0x130] sm:$0xff]  ;;  %v4442_v24 = vld [vmem:[#allocation13 + $0x138] sm:$0xff] }
 0x454   :  { %v4034_v42 = vpop.eup %4033  ;;  %4045 = vtanh.f32 %v6300_v25  ;;  %v2327_v39 = vmul.f32 %v4032_v7, %v2287_v31  ;;  %v2293_v22 = vadd.f32 0.5, %v2285_v37  ;;  %v4443_v31 = vld [vmem:[#allocation13 + $0x100] sm:$0xff]  ;;  %v4444_v7 = vld [vmem:[#allocation13 + $0x108] sm:$0xff]  ;;  %v4445_v41 = vld [vmem:[#allocation13 + $0x110] sm:$0xff] }
 0x455   :  { %v4036_v51 = vpop.eup %4035  ;;  %v2328_v33 = vmul.f32 %v4034_v42, %v2288_v27  ;;  %v2294_v55 = vadd.f32 0.5, %v2286_v12  ;;  %v4446_v27 = vld [vmem:[#allocation13 + $0x118] sm:$0xff]  ;;  %v4447_v42 = vld [vmem:[#allocation13 + $0xe0] sm:$0xff]  ;;  %v4448_v37 = vld [vmem:[#allocation13 + $0xe8] sm:$0xff] }
 0x456   :  { %v4038_v57 = vpop.eup %4037  ;;  %v2329_v53 = vmul.f32 %v4036_v51, %v2289_v1  ;;  %2335 = vst [vmem:[#allocation14 + $0x4] sm:$0x1] %v2327_v39  ;;  %v4449_v1 = vld [vmem:[#allocation13 + $0xf0] sm:$0xff]  ;;  %v4451_v51 = vld [vmem:[#allocation13 + $0xc0] sm:$0xff]  ;;  %v4452_v12 = vld [vmem:[#allocation13 + $0xc8] sm:$0xff] }
 0x457   :  { %v4040_v54 = vpop.eup %4039  ;;  %v2330_v14 = vmul.f32 %v4038_v57, %v2290_v21  ;;  %2336 = vst [vmem:[#allocation14 + $0xc] sm:$0x1] %v2328_v33  ;;  %v4453_v21 = vld [vmem:[#allocation13 + $0xd0] sm:$0xff]  ;;  %v4455_v57 = vld [vmem:[#allocation13 + $0xa0] sm:$0xff] }
 0x458   :  { %v4042_v16 = vpop.eup %4041  ;;  %v2331_v17 = vmul.f32 %v4040_v54, %v2291_v11  ;;  %2337 = vst [vmem:[#allocation14 + $0x14] sm:$0x1] %v2329_v53  ;;  %v4456_v11 = vld [vmem:[#allocation13 + $0xa8] sm:$0xff]  ;;  %v4458_v54 = vld [vmem:[#allocation13 + $0xb8] sm:$0xff] }
 0x459   :  { %v4044_v5 = vpop.eup %4043  ;;  %v2332_v38 = vmul.f32 %v4042_v16, %v2292_v30  ;;  %2338 = vst [vmem:[#allocation14 + $0x1c] sm:$0x1] %v2330_v14  ;;  %v4459_v30 = vld [vmem:[#allocation13 + $0x80] sm:$0xff]  ;;  %v4461_v16 = vld [vmem:[#allocation13 + $0x90] sm:$0xff] }
 0x45a   :  { %v4046_v48 = vpop.eup %4045  ;;  %v2333_v23 = vmul.f32 %v4044_v5, %v2293_v22  ;;  %2339 = vst [vmem:[#allocation14 + $0x24] sm:$0x1] %v2331_v17  ;;  %v4462_v22 = vld [vmem:[#allocation13 + $0x98] sm:$0xff]  ;;  %v4464_v5 = vld [vmem:[#allocation13 + $0x68] sm:$0xff] }
 0x45b   :  { %v2334_v49 = vmul.f32 %v4046_v48, %v2294_v55  ;;  %2340 = vst [vmem:[#allocation14 + $0x2c] sm:$0x1] %v2332_v38  ;;  %v4465_v55 = vld [vmem:[#allocation13 + $0x70] sm:$0xff]  ;;  %v4467_v48 = vld [vmem:[#allocation13 + $0x40] sm:$0xff] }
 0x45c   :  { %2341 = vst [vmem:[#allocation14 + $0x34] sm:$0x1] %v2333_v23 }
 0x45d   :  { %2342 = vst [vmem:[#allocation14 + $0x3c] sm:$0x1] %v2334_v49 }
 0x45e   :  { %2367 = vst [vmem:[#allocation1] ss:$9 sm:$0xff] %v2327_v39  ;;  %v4450_v39 = vld [vmem:[#allocation13 + $0xf8] sm:$0xff] }
 0x45f   :  { %2369 = vst [vmem:[#allocation1 + $0x1] ss:$9 sm:$0xff] %v2328_v33  ;;  %v4454_v33 = vld [vmem:[#allocation13 + $0xd8] sm:$0xff] }
 0x460   :  { %2371 = vst [vmem:[#allocation1 + $0x2] ss:$9 sm:$0xff] %v2329_v53  ;;  %v4457_v53 = vld [vmem:[#allocation13 + $0xb0] sm:$0xff] }
 0x461   :  { %2373 = vst [vmem:[#allocation1 + $0x3] ss:$9 sm:$0xff] %v2330_v14  ;;  %v4460_v14 = vld [vmem:[#allocation13 + $0x88] sm:$0xff] }
 0x462   :  { %2375 = vst [vmem:[#allocation1 + $0x4] ss:$9 sm:$0xff] %v2331_v17  ;;  %v4463_v17 = vld [vmem:[#allocation13 + $0x60] sm:$0xff] }
 0x463   :  { %2377 = vst [vmem:[#allocation1 + $0x5] ss:$9 sm:$0xff] %v2332_v38  ;;  %v4466_v38 = vld [vmem:[#allocation13 + $0x78] sm:$0xff] }
 0x464   :  { %2379 = vst [vmem:[#allocation1 + $0x6] ss:$9 sm:$0xff] %v2333_v23  ;;  %v4468_v23 = vld [vmem:[#allocation13 + $0x48] sm:$0xff] }
 0x465   :  { %2381 = vst [vmem:[#allocation1 + $0x7] ss:$9 sm:$0xff] %v2334_v49  ;;  %v4469_v49 = vld [vmem:[#allocation13 + $0x50] sm:$0xff] }
 0x46c   :  { %v2382_v18 = vld [vmem:[#allocation1] sm:$0xff] }
 0x46d   :  { %2400 = vmatmul.f32.vlgmr.msra.gmra.mxu0 %v2382_v18  ;;  %2420 = vmatmul.f32.vlgmr.msra.gmra.mxu1 %v2382_v18 }
 0x46e   :  { %2440 = vmatmul.f32.vlgmr.msra.gmra.mxu2 %v2382_v18  ;;  %2460 = vmatmul.f32.vlgmr.msra.gmra.mxu3 %v2382_v18  ;;  %v4470_v18 = vld [vmem:[#allocation13 + $0x58] sm:$0xff] }
 0x46f   :  { %3150 = vmatpush.msra.mxu0 %v4415_v61  ;;  %3170 = vmatpush.msra.mxu1 %v4416_v19  ;;  %v4471_v61 = vld [vmem:[#allocation13 + $0x20] sm:$0xff]  ;;  %v4472_v19 = vld [vmem:[#allocation13 + $0x28] sm:$0xff] }
 0x470   :  { %3190 = vmatpush.msra.mxu2 %v4417_v60  ;;  %3210 = vmatpush.msra.mxu3 %v4418_v10  ;;  %v4473_v60 = vld [vmem:[#allocation13 + $0x30] sm:$0xff]  ;;  %v4474_v10 = vld [vmem:[#allocation13 + $0x38] sm:$0xff] }
 0x471   :  { %3151 = vmatpush.msra.mxu0 %v4419_v32  ;;  %3171 = vmatpush.msra.mxu1 %v4420_v0  ;;  %v4475_v32 = vld [vmem:[#allocation13] sm:$0xff]  ;;  %v4476_v0 = vld [vmem:[#allocation13 + $0x8] sm:$0xff] }
 0x472   :  { %3191 = vmatpush.msra.mxu2 %v4421_v35  ;;  %3211 = vmatpush.msra.mxu3 %v4422_v3  ;;  %v4477_v35 = vld [vmem:[#allocation13 + $0x10] sm:$0xff]  ;;  %v4478_v3 = vld [vmem:[#allocation13 + $0x18] sm:$0xff] }
 0x473   :  { %3152 = vmatpush.msra.mxu0 %v4423_v40  ;;  %3172 = vmatpush.msra.mxu1 %v4424_v13 }
 0x474   :  { %3192 = vmatpush.msra.mxu2 %v4425_v44  ;;  %3212 = vmatpush.msra.mxu3 %v4426_v20 }
 0x475   :  { %3153 = vmatpush.msra.mxu0 %v4427_v28  ;;  %3173 = vmatpush.msra.mxu1 %v4428_v58 }
 0x476   :  { %3193 = vmatpush.msra.mxu2 %v4429_v15  ;;  %3213 = vmatpush.msra.mxu3 %v4430_v26 }
 0x477   :  { %3154 = vmatpush.msra.mxu0 %v4431_v34  ;;  %3174 = vmatpush.msra.mxu1 %v4432_v50 }
 0x478   :  { %3194 = vmatpush.msra.mxu2 %v4433_v6  ;;  %3214 = vmatpush.msra.mxu3 %v4434_v62 }
 0x479   :  { %3155 = vmatpush.msra.mxu0 %v4435_v9  ;;  %3175 = vmatpush.msra.mxu1 %v4436_v59 }
 0x47a   :  { %3195 = vmatpush.msra.mxu2 %v4437_v8  ;;  %3215 = vmatpush.msra.mxu3 %v4438_v43 }
 0x47b   :  { %3156 = vmatpush.msra.mxu0 %v4439_v36  ;;  %3176 = vmatpush.msra.mxu1 %v4440_v2 }
 0x47c   :  { %3196 = vmatpush.msra.mxu2 %v4441_v52  ;;  %3216 = vmatpush.msra.mxu3 %v4442_v24 }
 0x47d   :  { %3157 = vmatpush.msra.mxu0 %v4443_v31  ;;  %3177 = vmatpush.msra.mxu1 %v4444_v7 }
 0x47e   :  { %3197 = vmatpush.msra.mxu2 %v4445_v41  ;;  %3217 = vmatpush.msra.mxu3 %v4446_v27  ;;  %v2344_v27 = vld [vmem:[#allocation2 + $0x5] ss:$8 sm:$0xf] }
 0x47f   :  { %3158 = vmatpush.msra.mxu0 %v4447_v42  ;;  %3178 = vmatpush.msra.mxu1 %v4448_v37 }
 0x480   :  { %3198 = vmatpush.msra.mxu2 %v4449_v1  ;;  %3218 = vmatpush.msra.mxu3 %v4450_v39 }
 0x481   :  { %3159 = vmatpush.msra.mxu0 %v4451_v51  ;;  %3179 = vmatpush.msra.mxu1 %v4452_v12  ;;  %v2346_v51 = vld [vmem:[#allocation2 + $0x25] ss:$8 sm:$0xf] }
 0x482   :  { %3199 = vmatpush.msra.mxu2 %v4453_v21  ;;  %3219 = vmatpush.msra.mxu3 %v4454_v33  ;;  %v2348_v12 = vld [vmem:[#allocation2 + $0x45] ss:$8 sm:$0xf] }
 0x483   :  { %3160 = vmatpush.msra.mxu0 %v4455_v57  ;;  %3180 = vmatpush.msra.mxu1 %v4456_v11  ;;  %v2350_v21 = vld [vmem:[#allocation2 + $0x65] ss:$8 sm:$0xf] }
 0x484   :  { %3200 = vmatpush.msra.mxu2 %v4457_v53  ;;  %3220 = vmatpush.msra.mxu3 %v4458_v54  ;;  %v2352_v54 = vld [vmem:[#allocation2 + $0x85] ss:$8 sm:$0xf] }
 0x485   :  { %3161 = vmatpush.msra.mxu0 %v4459_v30  ;;  %3181 = vmatpush.msra.mxu1 %v4460_v14 }
 0x486   :  { %3201 = vmatpush.msra.mxu2 %v4461_v16  ;;  %3221 = vmatpush.msra.mxu3 %v4462_v22 }
 0x487   :  { %3162 = vmatpush.msra.mxu0 %v4463_v17  ;;  %3182 = vmatpush.msra.mxu1 %v4464_v5  ;;  %v2354_v17 = vld [vmem:[#allocation2 + $0xa5] ss:$8 sm:$0xf] }
 0x488   :  { %3202 = vmatpush.msra.mxu2 %v4465_v55  ;;  %3222 = vmatpush.msra.mxu3 %v4466_v38 }
 0x489   :  { %3163 = vmatpush.msra.mxu0 %v4467_v48  ;;  %3183 = vmatpush.msra.mxu1 %v4468_v23  ;;  %v2356_v23 = vld [vmem:[#allocation2 + $0xc5] ss:$8 sm:$0xf] }
 0x48a   :  { %3203 = vmatpush.msra.mxu2 %v4469_v49  ;;  %3223 = vmatpush.msra.mxu3 %v4470_v18  ;;  %v2358_v49 = vld [vmem:[#allocation2 + $0xe5] ss:$8 sm:$0xf] }
 0x48b   :  { %3164 = vmatpush.msra.mxu0 %v4471_v61  ;;  %3184 = vmatpush.msra.mxu1 %v4472_v19 }
 0x48c   :  { %3204 = vmatpush.msra.mxu2 %v4473_v60  ;;  %3224 = vmatpush.msra.mxu3 %v4474_v10 }
 0x48d   :  { %3165 = vmatpush.msra.mxu0 %v4475_v32  ;;  %3185 = vmatpush.msra.mxu1 %v4476_v0 }
 0x48e   :  { %3205 = vmatpush.msra.mxu2 %v4477_v35  ;;  %3225 = vmatpush.msra.mxu3 %v4478_v3 }
 0x4ea   :  { %v2421_v40 = vpop.f32.mrf.mxu1  ;;  %v2401_v44 = vpop.f32.mrf.mxu0 }
 0x4eb   :  { %v2468_v13 = vrot.slane %v2421_v40, 7 }
 0x4ed   :  { %v2471_v20 = vsel %vm525_vm1, %v2401_v44, %v2468_v13  ;;  %v2474_v28 = vsel %vm531_vm4, %v2401_v44, %v2468_v13  ;;  %v2478_v26 = vsel %vm527_vm2, %v2401_v44, %v2468_v13  ;;  %v2482_v34 = vsel %vm533_vm5, %v2401_v44, %v2468_v13 }
 0x4ee   :  { %v2486_v62 = vsel %vm539_vm7, %v2401_v44, %v2468_v13  ;;  %v2490_v9 = vsel %vm545_vm9, %v2401_v44, %v2468_v13  ;;  %v2494_v59 = vsel %vm551_vm11, %v2401_v44, %v2468_v13  ;;  %v2498_v8 = vsel %vm557_vm13, %v2468_v13, %v2401_v44 }
 0x4f1   :  { %v2441_v58 = vpop.f32.mrf.mxu2  ;;  %v2461_v15 = vpop.f32.mrf.mxu3 }
 0x4f2   :  { %v2469_v50 = vrot.slane %v2441_v58, 6  ;;  %v2470_v6 = vrot.slane %v2461_v15, 5 }
 0x4f4   :  { %v2472_v43 = vsel %vm527_vm2, %v2469_v50, %v2470_v6  ;;  %v2475_v36 = vsel %vm533_vm5, %v2469_v50, %v2470_v6  ;;  %v2479_v2 = vsel %vm539_vm7, %v2469_v50, %v2470_v6  ;;  %v2483_v52 = vsel %vm545_vm9, %v2469_v50, %v2470_v6 }
 0x4f5   :  { %v2473_v24 = vsel %vm529_vm3, %v2471_v20, %v2472_v43  ;;  %v2476_v31 = vsel %vm535_vm6, %v2474_v28, %v2475_v36  ;;  %v2480_v7 = vsel %vm541_vm8, %v2478_v26, %v2479_v2  ;;  %v2484_v41 = vsel %vm547_vm10, %v2482_v34, %v2483_v52 }
 0x4f6   :  { %v2477_v42 = vrot.slane %v2476_v31, 1  ;;  %v2481_v37 = vrot.slane %v2480_v7, 2  ;;  %v2485_v1 = vrot.slane %v2484_v41, 3  ;;  %v2487_v39 = vsel %vm551_vm11, %v2469_v50, %v2470_v6 }
 0x4f7   :  { %v2488_v33 = vsel %vm553_vm12, %v2486_v62, %v2487_v39  ;;  %v2491_v57 = vsel %vm557_vm13, %v2470_v6, %v2469_v50  ;;  %v2495_v11 = vsel %vm525_vm1, %v2469_v50, %v2470_v6  ;;  %v2499_v53 = vsel %vm531_vm4, %v2469_v50, %v2470_v6 }
 0x4f8   :  { %v2489_v30 = vrot.slane %v2488_v33, 4  ;;  %v2492_v14 = vsel %vm559_vm14, %v2490_v9, %v2491_v57  ;;  %v2496_v16 = vsel %vm564_vm15, %v2495_v11, %v2494_v59  ;;  %v2500_v22 = vsel %vm569_vm0, %v2499_v53, %v2498_v8 }
 0x4f9   :  { %v2493_v5 = vrot.slane %v2492_v14, 5  ;;  %v2497_v55 = vrot.slane %v2496_v16, 6  ;;  %v2501_v38 = vrot.slane %v2500_v22, 7  ;;  %v6331_v48 = vadd.f32 %v2473_v24, %v2344_v27 }
 0x4fa   :  { %v6333_v18 = vadd.f32 %v2477_v42, %v2346_v51  ;;  %v6335_v61 = vadd.f32 %v2481_v37, %v2348_v12  ;;  %v6337_v19 = vadd.f32 %v2485_v1, %v2350_v21  ;;  %v6339_v60 = vadd.f32 %v2489_v30, %v2352_v54 }
 0x4fb   :  { %v6341_v10 = vadd.f32 %v2493_v5, %v2354_v17  ;;  %v6343_v32 = vadd.f32 %v2497_v55, %v2356_v23  ;;  %v6345_v0 = vadd.f32 %v2501_v38, %v2358_v49  ;;  %v2518_v35 = vmul.f32 0.5, %v6331_v48 }
 0x4fc   :  { %v2519_v3 = vmul.f32 0.5, %v6333_v18  ;;  %v2520_v40 = vmul.f32 0.5, %v6335_v61  ;;  %v2521_v13 = vmul.f32 0.5, %v6337_v19  ;;  %v2522_v44 = vmul.f32 0.5, %v6339_v60 }
 0x4fd   :  { %4047 = vtanh.f32 %v2518_v35  ;;  %v2523_v20 = vmul.f32 0.5, %v6341_v10  ;;  %v2558_v28 = vrot.slane %v6331_v48, 1  ;;  %v2559_v58 = vrot.slane %v6333_v18, 1 }
 0x4fe   :  { %4049 = vtanh.f32 %v2519_v3  ;;  %v2524_v15 = vmul.f32 0.5, %v6343_v32  ;;  %v2525_v26 = vmul.f32 0.5, %v6345_v0  ;;  %v2560_v34 = vrot.slane %v6335_v61, 1 }
 0x4ff   :  { %4051 = vtanh.f32 %v2520_v40  ;;  %v2561_v50 = vrot.slane %v6337_v19, 1  ;;  %v2562_v6 = vrot.slane %v6339_v60, 1  ;;  %v2563_v62 = vrot.slane %v6341_v10, 1 }
 0x500   :  { %4053 = vtanh.f32 %v2521_v13  ;;  %v2564_v9 = vrot.slane %v6343_v32, 1  ;;  %v2565_v59 = vrot.slane %v6345_v0, 1  ;;  %v2574_v8 = vmul.f32 0.5, %v2558_v28 }
 0x501   :  { %4055 = vtanh.f32 %v2522_v44  ;;  %v2575_v43 = vmul.f32 0.5, %v2559_v58  ;;  %v2576_v2 = vmul.f32 0.5, %v2560_v34  ;;  %v2577_v24 = vmul.f32 0.5, %v2561_v50 }
 0x502   :  { %4057 = vtanh.f32 %v2523_v20  ;;  %v2578_v31 = vmul.f32 0.5, %v2562_v6  ;;  %v2579_v7 = vmul.f32 0.5, %v2563_v62  ;;  %v2580_v42 = vmul.f32 0.5, %v2564_v9 }
 0x503   :  { %v4048_v36 = vpop.eup %4047  ;;  %4059 = vtanh.f32 %v2524_v15  ;;  %v2581_v37 = vmul.f32 0.5, %v2565_v59  ;;  %v2606_v51 = vrot.slane %v6331_v48, 2  ;;  %v2607_v12 = vrot.slane %v6333_v18, 2 }
 0x504   :  { %v4050_v52 = vpop.eup %4049  ;;  %4061 = vtanh.f32 %v2525_v26  ;;  %v2534_v27 = vmul.f32 0.5, %v4048_v36  ;;  %v2608_v57 = vrot.slane %v6335_v61, 2  ;;  %v2609_v11 = vrot.slane %v6337_v19, 2 }
 0x505   :  { %v4052_v41 = vpop.eup %4051  ;;  %4063 = vtanh.f32 %v2574_v8  ;;  %v2535_v39 = vmul.f32 0.5, %v4050_v52  ;;  %v2610_v30 = vrot.slane %v6339_v60, 2  ;;  %v2611_v14 = vrot.slane %v6341_v10, 2 }
 0x506   :  { %v4054_v1 = vpop.eup %4053  ;;  %4065 = vtanh.f32 %v2575_v43  ;;  %v2536_v33 = vmul.f32 0.5, %v4052_v41  ;;  %v6369_v5 = vadd.f32 0.5, %v2534_v27  ;;  %v2612_v49 = vrot.slane %v6343_v32, 2 }
 0x507   :  { %v4056_v21 = vpop.eup %4055  ;;  %4067 = vtanh.f32 %v2576_v2  ;;  %v2537_v54 = vmul.f32 0.5, %v4054_v1  ;;  %v6371_v23 = vadd.f32 0.5, %v2535_v39  ;;  %v2613_v13 = vrot.slane %v6345_v0, 2 }
 0x508   :  { %v4058_v53 = vpop.eup %4057  ;;  %4069 = vtanh.f32 %v2577_v24  ;;  %v2538_v22 = vmul.f32 0.5, %v4056_v21  ;;  %v6374_v40 = vadd.f32 0.5, %v2536_v33  ;;  %v2630_v58 = vrot.slane %v6331_v48, 3 }
 0x509   :  { %v4060_v16 = vpop.eup %4059  ;;  %v2539_v17 = vmul.f32 0.5, %v4058_v53  ;;  %4071 = vtanh.f32 %v2578_v31  ;;  %v6377_v20 = vadd.f32 0.5, %v2537_v54  ;;  %v2631_v50 = vrot.slane %v6333_v18, 3 }
 0x50a   :  { %v4062_v55 = vpop.eup %4061  ;;  %v2540_v38 = vmul.f32 0.5, %v4060_v16  ;;  %4073 = vtanh.f32 %v2579_v7  ;;  %v6380_v26 = vadd.f32 0.5, %v2538_v22  ;;  %v2632_v6 = vrot.slane %v6335_v61, 3 }
 0x50b   :  { %v4064_v35 = vpop.eup %4063  ;;  %v2541_v3 = vmul.f32 0.5, %v4062_v55  ;;  %4075 = vtanh.f32 %v2580_v42  ;;  %v6382_v34 = vadd.f32 0.5, %v2539_v17  ;;  %v2633_v8 = vrot.slane %v6337_v19, 3 }
 0x50c   :  { %v4066_v44 = vpop.eup %4065  ;;  %4077 = vtanh.f32 %v2581_v37  ;;  %v2590_v28 = vmul.f32 0.5, %v4064_v35  ;;  %v6386_v9 = vadd.f32 0.5, %v2540_v38  ;;  %v2634_v48 = vrot.slane %v6339_v60, 3 }
 0x50d   :  { %v4068_v15 = vpop.eup %4067  ;;  %v2591_v59 = vmul.f32 0.5, %v4066_v44  ;;  %4079 = vtanh.f32 %v2606_v51  ;;  %v6389_v36 = vadd.f32 0.5, %v2541_v3  ;;  %v2635_v2 = vrot.slane %v6341_v10, 3 }
 0x50e   :  { %v4070_v62 = vpop.eup %4069  ;;  %4081 = vtanh.f32 %v2607_v12  ;;  %v2592_v24 = vmul.f32 0.5, %v4068_v15  ;;  %v2598_v31 = vadd.f32 0.5, %v2590_v28  ;;  %v2636_v27 = vrot.slane %v6343_v32, 3 }
 0x50f   :  { %v4072_v43 = vpop.eup %4071  ;;  %v2593_v18 = vmul.f32 0.5, %v4070_v62  ;;  %4083 = vtanh.f32 %v2608_v57  ;;  %v2599_v37 = vadd.f32 0.5, %v2591_v59  ;;  %v2646_v1 = vmul.f32 0.5, %v2630_v58 }
 0x510   :  { %v4074_v52 = vpop.eup %4073  ;;  %v2594_v7 = vmul.f32 0.5, %v4072_v43  ;;  %4085 = vtanh.f32 %v2609_v11  ;;  %v2637_v60 = vrot.slane %v6345_v0, 3  ;;  %v2647_v10 = vmul.f32 0.5, %v2631_v50 }
 0x511   :  { %v4076_v61 = vpop.eup %4075  ;;  %v2595_v41 = vmul.f32 0.5, %v4074_v52  ;;  %4087 = vtanh.f32 %v2610_v30  ;;  %v2600_v12 = vadd.f32 0.5, %v2592_v24  ;;  %v2601_v21 = vadd.f32 0.5, %v2593_v18 }
 0x512   :  { %v4078_v19 = vpop.eup %4077  ;;  %v2596_v42 = vmul.f32 0.5, %v4076_v61  ;;  %4089 = vtanh.f32 %v2611_v14  ;;  %v2648_v33 = vmul.f32 0.5, %v2632_v6  ;;  %v2602_v53 = vadd.f32 0.5, %v2594_v7 }
 0x513   :  { %v2597_v39 = vmul.f32 0.5, %v4078_v19  ;;  %v4080_v51 = vpop.eup %4079  ;;  %4091 = vtanh.f32 %v2612_v49  ;;  %v2603_v11 = vadd.f32 0.5, %v2595_v41  ;;  %v2649_v32 = vmul.f32 0.5, %v2633_v8 }
 0x514   :  { %v4082_v57 = vpop.eup %4081  ;;  %4093 = vtanh.f32 %v2613_v13  ;;  %v2604_v16 = vadd.f32 0.5, %v2596_v42  ;;  %v2650_v22 = vmul.f32 0.5, %v2634_v48  ;;  %v2651_v30 = vmul.f32 0.5, %v2635_v2 }
 0x515   :  { %v4084_v54 = vpop.eup %4083  ;;  %4095 = vtanh.f32 %v2646_v1  ;;  %v2605_v14 = vadd.f32 0.5, %v2597_v39  ;;  %v2678_v0 = vmul.f32 %v2598_v31, %v6277_v4  ;;  %v2679_v55 = vmul.f32 %v2599_v37, %v6279_v46 }
 0x516   :  { %v4086_v17 = vpop.eup %4085  ;;  %4097 = vtanh.f32 %v2647_v10  ;;  %v2652_v49 = vmul.f32 0.5, %v2636_v27  ;;  %v2653_v35 = vmul.f32 0.5, %v2637_v60  ;;  %v2680_v3 = vmul.f32 %v2600_v12, %v6283_v45 }
 0x517   :  { %v4088_v38 = vpop.eup %4087  ;;  %4099 = vtanh.f32 %v2648_v33  ;;  %v2681_v44 = vmul.f32 %v2601_v21, %v6287_v47  ;;  %v2686_v28 = vmul.f32 %v4080_v51, %v6369_v5  ;;  %v2687_v58 = vmul.f32 %v4082_v57, %v6371_v23 }
 0x518   :  { %v4090_v13 = vpop.eup %4089  ;;  %4101 = vtanh.f32 %v2649_v32  ;;  %v2682_v4 = vmul.f32 %v2602_v53, %v6290_v56  ;;  %v2683_v46 = vmul.f32 %v2603_v11, %v6294_v29  ;;  %v2688_v50 = vmul.f32 %v4084_v54, %v6374_v40 }
 0x519   :  { %v4092_v15 = vpop.eup %4091  ;;  %4103 = vtanh.f32 %v2650_v22  ;;  %v2689_v45 = vmul.f32 %v4086_v17, %v6377_v20  ;;  %v6405_v62 = vadd.f32 %v2686_v28, %v2678_v0  ;;  %v6407_v59 = vadd.f32 %v2687_v58, %v2679_v55 }
 0x51a   :  { %v4094_v6 = vpop.eup %4093  ;;  %4105 = vtanh.f32 %v2651_v30  ;;  %v2684_v5 = vmul.f32 %v2604_v16, %v6297_v63  ;;  %v2690_v23 = vmul.f32 %v4088_v38, %v6380_v26  ;;  %v6411_v8 = vadd.f32 %v2688_v50, %v2680_v3 }
 0x51b   :  { %v4096_v47 = vpop.eup %4095  ;;  %4107 = vtanh.f32 %v2652_v49  ;;  %v2685_v29 = vmul.f32 %v2605_v14, %v6300_v25  ;;  %v2691_v40 = vmul.f32 %v4090_v13, %v6382_v34  ;;  %v6415_v43 = vadd.f32 %v2689_v45, %v2681_v44 }
 0x51c   :  { %v4098_v56 = vpop.eup %4097  ;;  %4109 = vtanh.f32 %v2653_v35  ;;  %v2692_v48 = vmul.f32 %v4092_v15, %v6386_v9  ;;  %v6418_v2 = vadd.f32 %v2690_v23, %v2682_v4  ;;  %v2662_v52 = vmul.f32 0.5, %v4096_v47 }
 0x51d   :  { %v4100_v20 = vpop.eup %4099  ;;  %4111 = vtanh.f32 %v6405_v62  ;;  %v2693_v26 = vmul.f32 %v4094_v6, %v6389_v36  ;;  %v6422_v24 = vadd.f32 %v2691_v40, %v2683_v46  ;;  %v2663_v18 = vmul.f32 0.5, %v4098_v56 }
 0x51e   :  { %v4102_v63 = vpop.eup %4101  ;;  %4113 = vtanh.f32 %v6407_v59  ;;  %v6425_v34 = vadd.f32 %v2692_v48, %v2684_v5  ;;  %v2664_v9 = vmul.f32 0.5, %v4100_v20  ;;  %v2670_v19 = vadd.f32 0.5, %v2662_v52 }
 0x51f   :  { %v4104_v25 = vpop.eup %4103  ;;  %4115 = vtanh.f32 %v6411_v8  ;;  %v6428_v61 = vadd.f32 %v2693_v26, %v2685_v29  ;;  %v2665_v41 = vmul.f32 0.5, %v4102_v63  ;;  %v2671_v1 = vadd.f32 0.5, %v2663_v18 }
 0x520   :  { %v4106_v31 = vpop.eup %4105  ;;  %4117 = vtanh.f32 %v6415_v43  ;;  %v2666_v27 = vmul.f32 0.5, %v4104_v25  ;;  %v2672_v10 = vadd.f32 0.5, %v2664_v9  ;;  %v2727_v9 = vld [vmem:[#allocation2 + $0x6] ss:$8 sm:$0xf] }
 0x521   :  { %v4108_v7 = vpop.eup %4107  ;;  %4119 = vtanh.f32 %v6418_v2  ;;  %v2667_v37 = vmul.f32 0.5, %v4106_v31  ;;  %v2673_v33 = vadd.f32 0.5, %v2665_v41 }
 0x522   :  { %v4110_v36 = vpop.eup %4109  ;;  %4121 = vtanh.f32 %v6422_v24  ;;  %v2668_v60 = vmul.f32 0.5, %v4108_v7  ;;  %v2674_v11 = vadd.f32 0.5, %v2666_v27 }
 0x523   :  { %v4112_v42 = vpop.eup %4111  ;;  %4123 = vtanh.f32 %v6425_v34  ;;  %v2669_v21 = vmul.f32 0.5, %v4110_v36  ;;  %v2675_v16 = vadd.f32 0.5, %v2667_v37  ;;  %v2733_v37 = vld [vmem:[#allocation2 + $0x66] ss:$8 sm:$0xf] }
 0x524   :  { %v4114_v39 = vpop.eup %4113  ;;  %4125 = vtanh.f32 %v6428_v61  ;;  %v2710_v51 = vmul.f32 %v4112_v42, %v2670_v19  ;;  %v2676_v17 = vadd.f32 0.5, %v2668_v60  ;;  %v2729_v19 = vld [vmem:[#allocation2 + $0x26] ss:$8 sm:$0xf] }
 0x525   :  { %v4116_v12 = vpop.eup %4115  ;;  %v2711_v57 = vmul.f32 %v4114_v39, %v2671_v1  ;;  %v2677_v55 = vadd.f32 0.5, %v2669_v21  ;;  %v2731_v42 = vld [vmem:[#allocation2 + $0x46] ss:$8 sm:$0xf] }
 0x526   :  { %v4118_v53 = vpop.eup %4117  ;;  %v2712_v32 = vmul.f32 %v4116_v12, %v2672_v10  ;;  %2718 = vst [vmem:[#allocation14 + $0x5] sm:$0x1] %v2710_v51 }
 0x527   :  { %v4120_v54 = vpop.eup %4119  ;;  %v2713_v22 = vmul.f32 %v4118_v53, %v2673_v33  ;;  %2719 = vst [vmem:[#allocation14 + $0xd] sm:$0x1] %v2711_v57  ;;  %v2737_v53 = vld [vmem:[#allocation2 + $0xa6] ss:$8 sm:$0xf] }
 0x528   :  { %v4122_v30 = vpop.eup %4121  ;;  %v2714_v14 = vmul.f32 %v4120_v54, %v2674_v11  ;;  %2720 = vst [vmem:[#allocation14 + $0x15] sm:$0x1] %v2712_v32 }
 0x529   :  { %v4124_v0 = vpop.eup %4123  ;;  %v2715_v38 = vmul.f32 %v4122_v30, %v2675_v16  ;;  %2721 = vst [vmem:[#allocation14 + $0x1d] sm:$0x1] %v2713_v22  ;;  %v2741_v30 = vld [vmem:[#allocation2 + $0xe6] ss:$8 sm:$0xf] }
 0x52a   :  { %v4126_v49 = vpop.eup %4125  ;;  %v2716_v35 = vmul.f32 %v4124_v0, %v2676_v17  ;;  %2722 = vst [vmem:[#allocation14 + $0x25] sm:$0x1] %v2714_v14 }
 0x52b   :  { %v2717_v3 = vmul.f32 %v4126_v49, %v2677_v55  ;;  %2723 = vst [vmem:[#allocation14 + $0x2d] sm:$0x1] %v2715_v38 }
 0x52c   :  { %2724 = vst [vmem:[#allocation14 + $0x35] sm:$0x1] %v2716_v35 }
 0x52d   :  { %2725 = vst [vmem:[#allocation14 + $0x3d] sm:$0x1] %v2717_v3 }
 0x52e   :  { %2750 = vst [vmem:[#allocation1] ss:$9 sm:$0xff] %v2710_v51  ;;  %v2735_v51 = vld [vmem:[#allocation2 + $0x86] ss:$8 sm:$0xf] }
 0x52f   :  { %2752 = vst [vmem:[#allocation1 + $0x1] ss:$9 sm:$0xff] %v2711_v57 }
 0x530   :  { %2754 = vst [vmem:[#allocation1 + $0x2] ss:$9 sm:$0xff] %v2712_v32 }
 0x531   :  { %2756 = vst [vmem:[#allocation1 + $0x3] ss:$9 sm:$0xff] %v2713_v22  ;;  %v2739_v22 = vld [vmem:[#allocation2 + $0xc6] ss:$8 sm:$0xf] }
 0x532   :  { %2758 = vst [vmem:[#allocation1 + $0x4] ss:$9 sm:$0xff] %v2714_v14 }
 0x533   :  { %2760 = vst [vmem:[#allocation1 + $0x5] ss:$9 sm:$0xff] %v2715_v38 }
 0x534   :  { %2762 = vst [vmem:[#allocation1 + $0x6] ss:$9 sm:$0xff] %v2716_v35 }
 0x535   :  { %2764 = vst [vmem:[#allocation1 + $0x7] ss:$9 sm:$0xff] %v2717_v3 }
 0x53c   :  { %v2765_v13 = vld [vmem:[#allocation1] sm:$0xff] }
 0x53d   :  { %2783 = vmatmul.f32.vlgmr.msrb.gmra.mxu0 %v2765_v13  ;;  %2803 = vmatmul.f32.vlgmr.msrb.gmra.mxu1 %v2765_v13 }
 0x53e   :  { %2823 = vmatmul.f32.vlgmr.msrb.gmra.mxu2 %v2765_v13  ;;  %2843 = vmatmul.f32.vlgmr.msrb.gmra.mxu3 %v2765_v13 }
 0x5ba   :  { %v2804_v44 = vpop.f32.mrf.mxu1  ;;  %v2784_v58 = vpop.f32.mrf.mxu0 }
 0x5bb   :  { %v2851_v28 = vrot.slane %v2804_v44, 7 }
 0x5bd   :  { %v2854_v15 = vsel %vm525_vm1, %v2784_v58, %v2851_v28  ;;  %v2857_v4 = vsel %vm531_vm4, %v2784_v58, %v2851_v28  ;;  %v2861_v6 = vsel %vm527_vm2, %v2784_v58, %v2851_v28  ;;  %v2865_v45 = vsel %vm533_vm5, %v2784_v58, %v2851_v28 }
 0x5be   :  { %v2869_v23 = vsel %vm539_vm7, %v2784_v58, %v2851_v28  ;;  %v2873_v56 = vsel %vm545_vm9, %v2784_v58, %v2851_v28  ;;  %v2877_v29 = vsel %vm551_vm11, %v2784_v58, %v2851_v28  ;;  %v2881_v40 = vsel %vm557_vm13, %v2851_v28, %v2784_v58 }
 0x5c1   :  { %v2824_v46 = vpop.f32.mrf.mxu2  ;;  %v2844_v50 = vpop.f32.mrf.mxu3 }
 0x5c2   :  { %v2852_v47 = vrot.slane %v2824_v46, 6  ;;  %v2853_v5 = vrot.slane %v2844_v50, 5 }
 0x5c4   :  { %v2855_v20 = vsel %vm527_vm2, %v2852_v47, %v2853_v5  ;;  %v2858_v48 = vsel %vm533_vm5, %v2852_v47, %v2853_v5  ;;  %v2862_v63 = vsel %vm539_vm7, %v2852_v47, %v2853_v5  ;;  %v2866_v52 = vsel %vm545_vm9, %v2852_v47, %v2853_v5 }
 0x5c5   :  { %v2856_v26 = vsel %vm529_vm3, %v2854_v15, %v2855_v20  ;;  %v2859_v25 = vsel %vm535_vm6, %v2857_v4, %v2858_v48  ;;  %v2863_v18 = vsel %vm541_vm8, %v2861_v6, %v2862_v63  ;;  %v2867_v31 = vsel %vm547_vm10, %v2865_v45, %v2866_v52 }
 0x5c6   :  { %v2860_v7 = vrot.slane %v2859_v25, 1  ;;  %v2864_v41 = vrot.slane %v2863_v18, 2  ;;  %v2868_v36 = vrot.slane %v2867_v31, 3  ;;  %v2870_v27 = vsel %vm551_vm11, %v2852_v47, %v2853_v5 }
 0x5c7   :  { %v2871_v1 = vsel %vm553_vm12, %v2869_v23, %v2870_v27  ;;  %v2874_v39 = vsel %vm557_vm13, %v2853_v5, %v2852_v47  ;;  %v2878_v60 = vsel %vm525_vm1, %v2852_v47, %v2853_v5  ;;  %v2882_v10 = vsel %vm531_vm4, %v2852_v47, %v2853_v5 }
 0x5c8   :  { %v2872_v12 = vrot.slane %v2871_v1, 4  ;;  %v2875_v21 = vsel %vm559_vm14, %v2873_v56, %v2874_v39  ;;  %v2879_v33 = vsel %vm564_vm15, %v2878_v60, %v2877_v29  ;;  %v2883_v57 = vsel %vm569_vm0, %v2882_v10, %v2881_v40 }
 0x5c9   :  { %v2876_v11 = vrot.slane %v2875_v21, 5  ;;  %v2880_v32 = vrot.slane %v2879_v33, 6  ;;  %v2884_v54 = vrot.slane %v2883_v57, 7  ;;  %v6459_v16 = vadd.f32 %v2856_v26, %v2727_v9 }
 0x5ca   :  { %v6461_v17 = vadd.f32 %v2860_v7, %v2729_v19  ;;  %v6463_v14 = vadd.f32 %v2864_v41, %v2731_v42  ;;  %v6465_v0 = vadd.f32 %v2868_v36, %v2733_v37  ;;  %v6467_v55 = vadd.f32 %v2872_v12, %v2735_v51 }
 0x5cb   :  { %v6469_v38 = vadd.f32 %v2876_v11, %v2737_v53  ;;  %v6471_v49 = vadd.f32 %v2880_v32, %v2739_v22  ;;  %v6473_v35 = vadd.f32 %v2884_v54, %v2741_v30  ;;  %v2901_v3 = vmul.f32 0.5, %v6459_v16 }
 0x5cc   :  { %v2902_v13 = vmul.f32 0.5, %v6461_v17  ;;  %v2903_v44 = vmul.f32 0.5, %v6463_v14  ;;  %v2904_v28 = vmul.f32 0.5, %v6465_v0  ;;  %v2905_v58 = vmul.f32 0.5, %v6467_v55 }
 0x5cd   :  { %4127 = vtanh.f32 %v2901_v3  ;;  %v2906_v15 = vmul.f32 0.5, %v6469_v38  ;;  %v2941_v4 = vrot.slane %v6459_v16, 1  ;;  %v2942_v46 = vrot.slane %v6461_v17, 1 }
 0x5ce   :  { %4129 = vtanh.f32 %v2902_v13  ;;  %v2907_v50 = vmul.f32 0.5, %v6471_v49  ;;  %v2908_v6 = vmul.f32 0.5, %v6473_v35  ;;  %v2943_v45 = vrot.slane %v6463_v14, 1 }
 0x5cf   :  { %4131 = vtanh.f32 %v2903_v44  ;;  %v2944_v47 = vrot.slane %v6465_v0, 1  ;;  %v2945_v5 = vrot.slane %v6467_v55, 1  ;;  %v2946_v23 = vrot.slane %v6469_v38, 1 }
 0x5d0   :  { %4133 = vtanh.f32 %v2904_v28  ;;  %v2947_v56 = vrot.slane %v6471_v49, 1  ;;  %v2948_v29 = vrot.slane %v6473_v35, 1  ;;  %v2957_v40 = vmul.f32 0.5, %v2941_v4 }
 0x5d1   :  { %4135 = vtanh.f32 %v2905_v58  ;;  %v2958_v20 = vmul.f32 0.5, %v2942_v46  ;;  %v2959_v63 = vmul.f32 0.5, %v2943_v45  ;;  %v2960_v26 = vmul.f32 0.5, %v2944_v47 }
 0x5d2   :  { %4137 = vtanh.f32 %v2906_v15  ;;  %v2961_v25 = vmul.f32 0.5, %v2945_v5  ;;  %v2962_v18 = vmul.f32 0.5, %v2946_v23  ;;  %v2963_v7 = vmul.f32 0.5, %v2947_v56 }
 0x5d3   :  { %v4128_v48 = vpop.eup %4127  ;;  %4139 = vtanh.f32 %v2907_v50  ;;  %v2964_v41 = vmul.f32 0.5, %v2948_v29  ;;  %v2989_v19 = vrot.slane %v6459_v16, 2  ;;  %v2990_v42 = vrot.slane %v6461_v17, 2 }
 0x5d4   :  { %v4130_v52 = vpop.eup %4129  ;;  %4141 = vtanh.f32 %v2908_v6  ;;  %v2917_v9 = vmul.f32 0.5, %v4128_v48  ;;  %v2991_v39 = vrot.slane %v6463_v14, 2  ;;  %v2992_v60 = vrot.slane %v6465_v0, 2 }
 0x5d5   :  { %v4132_v31 = vpop.eup %4131  ;;  %4143 = vtanh.f32 %v2957_v40  ;;  %v2918_v27 = vmul.f32 0.5, %v4130_v52  ;;  %v2993_v12 = vrot.slane %v6467_v55, 2  ;;  %v2994_v21 = vrot.slane %v6469_v38, 2 }
 0x5d6   :  { %v4134_v36 = vpop.eup %4133  ;;  %4145 = vtanh.f32 %v2958_v20  ;;  %v2919_v1 = vmul.f32 0.5, %v4132_v31  ;;  %v6497_v11 = vadd.f32 0.5, %v2917_v9  ;;  %v2995_v30 = vrot.slane %v6471_v49, 2 }
 0x5d7   :  { %v4136_v37 = vpop.eup %4135  ;;  %4147 = vtanh.f32 %v2959_v63  ;;  %v2920_v51 = vmul.f32 0.5, %v4134_v36  ;;  %v6499_v22 = vadd.f32 0.5, %v2918_v27  ;;  %v2996_v28 = vrot.slane %v6473_v35, 2 }
 0x5d8   :  { %v4138_v10 = vpop.eup %4137  ;;  %4149 = vtanh.f32 %v2960_v26  ;;  %v2921_v57 = vmul.f32 0.5, %v4136_v37  ;;  %v6502_v44 = vadd.f32 0.5, %v2919_v1  ;;  %v3013_v46 = vrot.slane %v6459_v16, 3 }
 0x5d9   :  { %v4140_v33 = vpop.eup %4139  ;;  %v2922_v53 = vmul.f32 0.5, %v4138_v10  ;;  %4151 = vtanh.f32 %v2961_v25  ;;  %v6505_v15 = vadd.f32 0.5, %v2920_v51  ;;  %v3014_v47 = vrot.slane %v6461_v17, 3 }
 0x5da   :  { %v4142_v32 = vpop.eup %4141  ;;  %v2923_v54 = vmul.f32 0.5, %v4140_v33  ;;  %4153 = vtanh.f32 %v2962_v18  ;;  %v6508_v6 = vadd.f32 0.5, %v2921_v57  ;;  %v3015_v5 = vrot.slane %v6463_v14, 3 }
 0x5db   :  { %v4144_v3 = vpop.eup %4143  ;;  %v2924_v13 = vmul.f32 0.5, %v4142_v32  ;;  %4155 = vtanh.f32 %v2963_v7  ;;  %v6510_v45 = vadd.f32 0.5, %v2922_v53  ;;  %v3016_v40 = vrot.slane %v6465_v0, 3 }
 0x5dc   :  { %v4146_v58 = vpop.eup %4145  ;;  %4157 = vtanh.f32 %v2964_v41  ;;  %v2973_v4 = vmul.f32 0.5, %v4144_v3  ;;  %v6514_v56 = vadd.f32 0.5, %v2923_v54  ;;  %v3017_v16 = vrot.slane %v6467_v55, 3 }
 0x5dd   :  { %v4148_v50 = vpop.eup %4147  ;;  %v2974_v29 = vmul.f32 0.5, %v4146_v58  ;;  %4159 = vtanh.f32 %v2989_v19  ;;  %v6517_v48 = vadd.f32 0.5, %v2924_v13  ;;  %v3018_v63 = vrot.slane %v6469_v38, 3 }
 0x5de   :  { %v4150_v23 = vpop.eup %4149  ;;  %4161 = vtanh.f32 %v2990_v42  ;;  %v2975_v26 = vmul.f32 0.5, %v4148_v50  ;;  %v2981_v25 = vadd.f32 0.5, %v2973_v4  ;;  %v3019_v9 = vrot.slane %v6471_v49, 3 }
 0x5df   :  { %v4152_v20 = vpop.eup %4151  ;;  %v2976_v17 = vmul.f32 0.5, %v4150_v23  ;;  %4163 = vtanh.f32 %v2991_v39  ;;  %v2982_v41 = vadd.f32 0.5, %v2974_v29  ;;  %v3029_v36 = vmul.f32 0.5, %v3013_v46 }
 0x5e0   :  { %v4154_v52 = vpop.eup %4153  ;;  %v2977_v18 = vmul.f32 0.5, %v4152_v20  ;;  %4165 = vtanh.f32 %v2992_v60  ;;  %v3020_v55 = vrot.slane %v6473_v35, 3  ;;  %v3030_v38 = vmul.f32 0.5, %v3014_v47 }
 0x5e1   :  { %v4156_v14 = vpop.eup %4155  ;;  %v2978_v31 = vmul.f32 0.5, %v4154_v52  ;;  %4167 = vtanh.f32 %v2993_v12  ;;  %v2983_v42 = vadd.f32 0.5, %v2975_v26  ;;  %v2984_v37 = vadd.f32 0.5, %v2976_v17 }
 0x5e2   :  { %v4158_v0 = vpop.eup %4157  ;;  %v2979_v7 = vmul.f32 0.5, %v4156_v14  ;;  %4169 = vtanh.f32 %v2994_v21  ;;  %v3031_v1 = vmul.f32 0.5, %v3015_v5  ;;  %v2985_v10 = vadd.f32 0.5, %v2977_v18 }
 0x5e3   :  { %v2980_v27 = vmul.f32 0.5, %v4158_v0  ;;  %v4160_v19 = vpop.eup %4159  ;;  %4171 = vtanh.f32 %v2995_v30  ;;  %v2986_v60 = vadd.f32 0.5, %v2978_v31  ;;  %v3032_v49 = vmul.f32 0.5, %v3016_v40 }
 0x5e4   :  { %v4162_v39 = vpop.eup %4161  ;;  %4173 = vtanh.f32 %v2996_v28  ;;  %v2987_v33 = vadd.f32 0.5, %v2979_v7  ;;  %v3033_v57 = vmul.f32 0.5, %v3017_v16  ;;  %v3034_v12 = vmul.f32 0.5, %v3018_v63 }
 0x5e5   :  { %v4164_v51 = vpop.eup %4163  ;;  %4175 = vtanh.f32 %v3029_v36  ;;  %v2988_v21 = vadd.f32 0.5, %v2980_v27  ;;  %v3061_v35 = vmul.f32 %v2981_v25, %v6405_v62  ;;  %v3062_v32 = vmul.f32 %v2982_v41, %v6407_v59 }
 0x5e6   :  { %v4166_v53 = vpop.eup %4165  ;;  %4177 = vtanh.f32 %v3030_v38  ;;  %v3035_v30 = vmul.f32 0.5, %v3019_v9  ;;  %v3036_v3 = vmul.f32 0.5, %v3020_v55  ;;  %v3063_v13 = vmul.f32 %v2983_v42, %v6411_v8 }
 0x5e7   :  { %v4168_v54 = vpop.eup %4167  ;;  %4179 = vtanh.f32 %v3031_v1  ;;  %v3064_v58 = vmul.f32 %v2984_v37, %v6415_v43  ;;  %v3069_v4 = vmul.f32 %v4160_v19, %v6497_v11  ;;  %v3070_v46 = vmul.f32 %v4162_v39, %v6499_v22 }
 0x5e8   :  { %v4170_v28 = vpop.eup %4169  ;;  %4181 = vtanh.f32 %v3032_v49  ;;  %v3065_v62 = vmul.f32 %v2985_v10, %v6418_v2  ;;  %v3066_v59 = vmul.f32 %v2986_v60, %v6422_v24  ;;  %v3071_v47 = vmul.f32 %v4164_v51, %v6502_v44 }
 0x5e9   :  { %v4172_v50 = vpop.eup %4171  ;;  %4183 = vtanh.f32 %v3033_v57  ;;  %v3072_v8 = vmul.f32 %v4166_v53, %v6505_v15  ;;  %v6533_v23 = vadd.f32 %v3069_v4, %v3061_v35  ;;  %v6535_v29 = vadd.f32 %v3070_v46, %v3062_v32 }
 0x5ea   :  { %v4174_v5 = vpop.eup %4173  ;;  %4185 = vtanh.f32 %v3034_v12  ;;  %v3067_v11 = vmul.f32 %v2987_v33, %v6425_v34  ;;  %v3073_v22 = vmul.f32 %v4168_v54, %v6508_v6  ;;  %v6539_v40 = vadd.f32 %v3071_v47, %v3063_v13 }
 0x5eb   :  { %v4176_v43 = vpop.eup %4175  ;;  %4187 = vtanh.f32 %v3035_v30  ;;  %v3068_v24 = vmul.f32 %v2988_v21, %v6428_v61  ;;  %v3074_v44 = vmul.f32 %v4170_v28, %v6510_v45  ;;  %v6543_v20 = vadd.f32 %v3072_v8, %v3064_v58 }
 0x5ec   :  { %v4178_v2 = vpop.eup %4177  ;;  %4189 = vtanh.f32 %v3036_v3  ;;  %v3075_v16 = vmul.f32 %v4172_v50, %v6514_v56  ;;  %v6546_v63 = vadd.f32 %v3073_v22, %v3065_v62  ;;  %v3045_v52 = vmul.f32 0.5, %v4176_v43 }
 0x5ed   :  { %v4180_v15 = vpop.eup %4179  ;;  %4191 = vtanh.f32 %v6533_v23  ;;  %v3076_v6 = vmul.f32 %v4174_v5, %v6517_v48  ;;  %v6550_v26 = vadd.f32 %v3074_v44, %v3066_v59  ;;  %v3046_v17 = vmul.f32 0.5, %v4178_v2 }
 0x5ee   :  { %v4182_v34 = vpop.eup %4181  ;;  %4193 = vtanh.f32 %v6535_v29  ;;  %v6553_v45 = vadd.f32 %v3075_v16, %v3067_v11  ;;  %v3047_v56 = vmul.f32 0.5, %v4180_v15  ;;  %v3053_v0 = vadd.f32 0.5, %v3045_v52 }
 0x5ef   :  { %v4184_v61 = vpop.eup %4183  ;;  %4195 = vtanh.f32 %v6539_v40  ;;  %v6556_v14 = vadd.f32 %v3076_v6, %v3068_v24  ;;  %v3048_v31 = vmul.f32 0.5, %v4182_v34  ;;  %v3054_v36 = vadd.f32 0.5, %v3046_v17 }
 0x5f0   :  { %v4186_v25 = vpop.eup %4185  ;;  %4197 = vtanh.f32 %v6543_v20  ;;  %v3049_v9 = vmul.f32 0.5, %v4184_v61  ;;  %v3055_v38 = vadd.f32 0.5, %v3047_v56  ;;  %v3110_v56 = vld [vmem:[#allocation2 + $0x7] ss:$8 sm:$0xf] }
 0x5f1   :  { %v4188_v18 = vpop.eup %4187  ;;  %4199 = vtanh.f32 %v6546_v63  ;;  %v3050_v41 = vmul.f32 0.5, %v4186_v25  ;;  %v3056_v1 = vadd.f32 0.5, %v3048_v31 }
 0x5f2   :  { %v4190_v48 = vpop.eup %4189  ;;  %4201 = vtanh.f32 %v6550_v26  ;;  %v3051_v55 = vmul.f32 0.5, %v4188_v18  ;;  %v3057_v60 = vadd.f32 0.5, %v3049_v9 }
 0x5f3   :  { %v4192_v7 = vpop.eup %4191  ;;  %4203 = vtanh.f32 %v6553_v45  ;;  %v3052_v37 = vmul.f32 0.5, %v4190_v48  ;;  %v3058_v33 = vadd.f32 0.5, %v3050_v41  ;;  %v3116_v41 = vld [vmem:[#allocation2 + $0x67] ss:$8 sm:$0xf] }
 0x5f4   :  { %v4194_v27 = vpop.eup %4193  ;;  %4205 = vtanh.f32 %v6556_v14  ;;  %v3093_v19 = vmul.f32 %v4192_v7, %v3053_v0  ;;  %v3059_v53 = vadd.f32 0.5, %v3051_v55  ;;  %v3112_v0 = vld [vmem:[#allocation2 + $0x27] ss:$8 sm:$0xf] }
 0x5f5   :  { %v4196_v42 = vpop.eup %4195  ;;  %v3094_v39 = vmul.f32 %v4194_v27, %v3054_v36  ;;  %v3060_v32 = vadd.f32 0.5, %v3052_v37  ;;  %v3114_v7 = vld [vmem:[#allocation2 + $0x47] ss:$8 sm:$0xf] }
 0x5f6   :  { %v4198_v10 = vpop.eup %4197  ;;  %v3095_v49 = vmul.f32 %v4196_v42, %v3055_v38  ;;  %3101 = vst [vmem:[#allocation14 + $0x6] sm:$0x1] %v3093_v19 }
 0x5f7   :  { %v4200_v51 = vpop.eup %4199  ;;  %v3096_v57 = vmul.f32 %v4198_v10, %v3056_v1  ;;  %3102 = vst [vmem:[#allocation14 + $0xe] sm:$0x1] %v3094_v39  ;;  %v3120_v10 = vld [vmem:[#allocation2 + $0xa7] ss:$8 sm:$0xf] }
 0x5f8   :  { %v4202_v12 = vpop.eup %4201  ;;  %v3097_v21 = vmul.f32 %v4200_v51, %v3057_v60  ;;  %3103 = vst [vmem:[#allocation14 + $0x16] sm:$0x1] %v3095_v49 }
 0x5f9   :  { %v4204_v35 = vpop.eup %4203  ;;  %v3098_v54 = vmul.f32 %v4202_v12, %v3058_v33  ;;  %3104 = vst [vmem:[#allocation14 + $0x1e] sm:$0x1] %v3096_v57  ;;  %v3124_v12 = vld [vmem:[#allocation2 + $0xe7] ss:$8 sm:$0xf] }
 0x5fa   :  { %v4206_v30 = vpop.eup %4205  ;;  %v3099_v3 = vmul.f32 %v4204_v35, %v3059_v53  ;;  %3105 = vst [vmem:[#allocation14 + $0x26] sm:$0x1] %v3097_v21 }
 0x5fb   :  { %v3100_v13 = vmul.f32 %v4206_v30, %v3060_v32  ;;  %3106 = vst [vmem:[#allocation14 + $0x2e] sm:$0x1] %v3098_v54 }
 0x5fc   :  { %3107 = vst [vmem:[#allocation14 + $0x36] sm:$0x1] %v3099_v3 }
 0x5fd   :  { %3108 = vst [vmem:[#allocation14 + $0x3e] sm:$0x1] %v3100_v13 }
 0x5fe   :  { %3133 = vst [vmem:[#allocation1] ss:$9 sm:$0xff] %v3093_v19  ;;  %v3118_v19 = vld [vmem:[#allocation2 + $0x87] ss:$8 sm:$0xf] }
 0x5ff   :  { %3135 = vst [vmem:[#allocation1 + $0x1] ss:$9 sm:$0xff] %v3094_v39 }
 0x600   :  { %3137 = vst [vmem:[#allocation1 + $0x2] ss:$9 sm:$0xff] %v3095_v49 }
 0x601   :  { %3139 = vst [vmem:[#allocation1 + $0x3] ss:$9 sm:$0xff] %v3096_v57  ;;  %v3122_v57 = vld [vmem:[#allocation2 + $0xc7] ss:$8 sm:$0xf] }
 0x602   :  { %3141 = vst [vmem:[#allocation1 + $0x4] ss:$9 sm:$0xff] %v3097_v21 }
 0x603   :  { %3143 = vst [vmem:[#allocation1 + $0x5] ss:$9 sm:$0xff] %v3098_v54 }
 0x604   :  { %3145 = vst [vmem:[#allocation1 + $0x6] ss:$9 sm:$0xff] %v3099_v3 }
 0x605   :  { %3147 = vst [vmem:[#allocation1 + $0x7] ss:$9 sm:$0xff] %v3100_v13 }
 0x60c   :  { %v3148_v28 = vld [vmem:[#allocation1] sm:$0xff] }
 0x60d   :  { %3166 = vmatmul.f32.vlgmr.msra.gmra.mxu0 %v3148_v28  ;;  %3186 = vmatmul.f32.vlgmr.msra.gmra.mxu1 %v3148_v28 }
 0x60e   :  { %3206 = vmatmul.f32.vlgmr.msra.gmra.mxu2 %v3148_v28  ;;  %3226 = vmatmul.f32.vlgmr.msra.gmra.mxu3 %v3148_v28 }
 0x68a   :  { %v3187_v58 = vpop.f32.mrf.mxu1  ;;  %v3167_v46 = vpop.f32.mrf.mxu0 }
 0x68b   :  { %v3234_v4 = vrot.slane %v3187_v58, 7 }
 0x68d   :  { %v3237_v50 = vsel %vm525_vm1, %v3167_v46, %v3234_v4  ;;  %v3240_v62 = vsel %vm531_vm4, %v3167_v46, %v3234_v4  ;;  %v3244_v5 = vsel %vm527_vm2, %v3167_v46, %v3234_v4  ;;  %v3248_v8 = vsel %vm533_vm5, %v3167_v46, %v3234_v4 }
 0x68e   :  { %v3252_v22 = vsel %vm539_vm7, %v3167_v46, %v3234_v4  ;;  %v3256_v2 = vsel %vm545_vm9, %v3167_v46, %v3234_v4  ;;  %v3260_v24 = vsel %vm551_vm11, %v3167_v46, %v3234_v4  ;;  %v3264_v44 = vsel %vm557_vm13, %v3234_v4, %v3167_v46 }
 0x691   :  { %v3207_v59 = vpop.f32.mrf.mxu2  ;;  %v3227_v47 = vpop.f32.mrf.mxu3 }
 0x692   :  { %v3235_v43 = vrot.slane %v3207_v59, 6  ;;  %v3236_v11 = vrot.slane %v3227_v47, 5 }
 0x694   :  { %v3238_v15 = vsel %vm527_vm2, %v3235_v43, %v3236_v11  ;;  %v3241_v16 = vsel %vm533_vm5, %v3235_v43, %v3236_v11  ;;  %v3245_v34 = vsel %vm539_vm7, %v3235_v43, %v3236_v11  ;;  %v3249_v52 = vsel %vm545_vm9, %v3235_v43, %v3236_v11 }
 0x695   :  { %v3239_v6 = vsel %vm529_vm3, %v3237_v50, %v3238_v15  ;;  %v3242_v61 = vsel %vm535_vm6, %v3240_v62, %v3241_v16  ;;  %v3246_v17 = vsel %vm541_vm8, %v3244_v5, %v3245_v34  ;;  %v3250_v25 = vsel %vm547_vm10, %v3248_v8, %v3249_v52 }
 0x696   :  { %v3243_v18 = vrot.slane %v3242_v61, 1  ;;  %v3247_v31 = vrot.slane %v3246_v17, 2  ;;  %v3251_v48 = vrot.slane %v3250_v25, 3  ;;  %v3253_v9 = vsel %vm551_vm11, %v3235_v43, %v3236_v11 }
 0x697   :  { %v3254_v36 = vsel %vm553_vm12, %v3252_v22, %v3253_v9  ;;  %v3257_v27 = vsel %vm557_vm13, %v3236_v11, %v3235_v43  ;;  %v3261_v55 = vsel %vm525_vm1, %v3235_v43, %v3236_v11  ;;  %v3265_v38 = vsel %vm531_vm4, %v3235_v43, %v3236_v11 }
 0x698   :  { %v3255_v42 = vrot.slane %v3254_v36, 4  ;;  %v3258_v37 = vsel %vm559_vm14, %v3256_v2, %v3257_v27  ;;  %v3262_v1 = vsel %vm564_vm15, %v3261_v55, %v3260_v24  ;;  %v3266_v39 = vsel %vm569_vm0, %v3265_v38, %v3264_v44 }
 0x699   :  { %v3259_v60 = vrot.slane %v3258_v37, 5  ;;  %v3263_v49 = vrot.slane %v3262_v1, 6  ;;  %v3267_v51 = vrot.slane %v3266_v39, 7  ;;  %v6587_v33 = vadd.f32 %v3239_v6, %v3110_v56 }
 0x69a   :  { %v6589_v53 = vadd.f32 %v3243_v18, %v3112_v0  ;;  %v6591_v21 = vadd.f32 %v3247_v31, %v3114_v7  ;;  %v6593_v35 = vadd.f32 %v3251_v48, %v3116_v41  ;;  %v6595_v32 = vadd.f32 %v3255_v42, %v3118_v19 }
 0x69b   :  { %v6597_v54 = vadd.f32 %v3259_v60, %v3120_v10  ;;  %v6599_v30 = vadd.f32 %v3263_v49, %v3122_v57  ;;  %v6601_v3 = vadd.f32 %v3267_v51, %v3124_v12  ;;  %v3284_v13 = vmul.f32 0.5, %v6587_v33 }
 0x69c   :  { %v3285_v28 = vmul.f32 0.5, %v6589_v53  ;;  %v3286_v58 = vmul.f32 0.5, %v6591_v21  ;;  %v3287_v4 = vmul.f32 0.5, %v6593_v35  ;;  %v3288_v46 = vmul.f32 0.5, %v6595_v32 }
 0x69d   :  { %4207 = vtanh.f32 %v3284_v13  ;;  %v3289_v50 = vmul.f32 0.5, %v6597_v54  ;;  %v3324_v62 = vrot.slane %v6587_v33, 1  ;;  %v3325_v59 = vrot.slane %v6589_v53, 1 }
 0x69e   :  { %4209 = vtanh.f32 %v3285_v28  ;;  %v3290_v47 = vmul.f32 0.5, %v6599_v30  ;;  %v3291_v5 = vmul.f32 0.5, %v6601_v3  ;;  %v3326_v8 = vrot.slane %v6591_v21, 1 }
 0x69f   :  { %4211 = vtanh.f32 %v3286_v58  ;;  %v3327_v43 = vrot.slane %v6593_v35, 1  ;;  %v3328_v11 = vrot.slane %v6595_v32, 1  ;;  %v3329_v22 = vrot.slane %v6597_v54, 1 }
 0x6a0   :  { %4213 = vtanh.f32 %v3287_v4  ;;  %v3330_v2 = vrot.slane %v6599_v30, 1  ;;  %v3331_v24 = vrot.slane %v6601_v3, 1  ;;  %v3340_v44 = vmul.f32 0.5, %v3324_v62 }
 0x6a1   :  { %4215 = vtanh.f32 %v3288_v46  ;;  %v3341_v15 = vmul.f32 0.5, %v3325_v59  ;;  %v3342_v34 = vmul.f32 0.5, %v3326_v8  ;;  %v3343_v6 = vmul.f32 0.5, %v3327_v43 }
 0x6a2   :  { %4217 = vtanh.f32 %v3289_v50  ;;  %v3344_v61 = vmul.f32 0.5, %v3328_v11  ;;  %v3345_v17 = vmul.f32 0.5, %v3329_v22  ;;  %v3346_v18 = vmul.f32 0.5, %v3330_v2 }
 0x6a3   :  { %v4208_v16 = vpop.eup %4207  ;;  %4219 = vtanh.f32 %v3290_v47  ;;  %v3347_v31 = vmul.f32 0.5, %v3331_v24  ;;  %v3372_v0 = vrot.slane %v6587_v33, 2  ;;  %v3373_v7 = vrot.slane %v6589_v53, 2 }
 0x6a4   :  { %v4210_v52 = vpop.eup %4209  ;;  %4221 = vtanh.f32 %v3291_v5  ;;  %v3300_v56 = vmul.f32 0.5, %v4208_v16  ;;  %v3374_v27 = vrot.slane %v6591_v21, 2  ;;  %v3375_v55 = vrot.slane %v6593_v35, 2 }
 0x6a5   :  { %v4212_v25 = vpop.eup %4211  ;;  %4223 = vtanh.f32 %v3340_v44  ;;  %v3301_v9 = vmul.f32 0.5, %v4210_v52  ;;  %v3376_v42 = vrot.slane %v6595_v32, 2  ;;  %v3377_v37 = vrot.slane %v6597_v54, 2 }
 0x6a6   :  { %v4214_v48 = vpop.eup %4213  ;;  %4225 = vtanh.f32 %v3341_v15  ;;  %v3302_v36 = vmul.f32 0.5, %v4212_v25  ;;  %v6625_v60 = vadd.f32 0.5, %v3300_v56  ;;  %v3378_v12 = vrot.slane %v6599_v30, 2 }
 0x6a7   :  { %v4216_v41 = vpop.eup %4215  ;;  %4227 = vtanh.f32 %v3342_v34  ;;  %v3303_v19 = vmul.f32 0.5, %v4214_v48  ;;  %v6627_v57 = vadd.f32 0.5, %v3301_v9  ;;  %v3379_v4 = vrot.slane %v6601_v3, 2 }
 0x6a8   :  { %v4218_v38 = vpop.eup %4217  ;;  %4229 = vtanh.f32 %v3343_v6  ;;  %v3304_v39 = vmul.f32 0.5, %v4216_v41  ;;  %v6630_v58 = vadd.f32 0.5, %v3302_v36  ;;  %v3396_v59 = vrot.slane %v6587_v33, 3 }
 0x6a9   :  { %v4220_v1 = vpop.eup %4219  ;;  %v3305_v10 = vmul.f32 0.5, %v4218_v38  ;;  %4231 = vtanh.f32 %v3344_v61  ;;  %v6633_v50 = vadd.f32 0.5, %v3303_v19  ;;  %v3397_v43 = vrot.slane %v6589_v53, 3 }
 0x6aa   :  { %v4222_v49 = vpop.eup %4221  ;;  %v3306_v51 = vmul.f32 0.5, %v4220_v1  ;;  %4233 = vtanh.f32 %v3345_v17  ;;  %v6636_v5 = vadd.f32 0.5, %v3304_v39  ;;  %v3398_v11 = vrot.slane %v6591_v21, 3 }
 0x6ab   :  { %v4224_v13 = vpop.eup %4223  ;;  %v3307_v28 = vmul.f32 0.5, %v4222_v49  ;;  %4235 = vtanh.f32 %v3346_v18  ;;  %v6638_v8 = vadd.f32 0.5, %v3305_v10  ;;  %v3399_v44 = vrot.slane %v6593_v35, 3 }
 0x6ac   :  { %v4226_v46 = vpop.eup %4225  ;;  %4237 = vtanh.f32 %v3347_v31  ;;  %v3356_v62 = vmul.f32 0.5, %v4224_v13  ;;  %v6642_v2 = vadd.f32 0.5, %v3306_v51  ;;  %v3400_v33 = vrot.slane %v6595_v32, 3 }
 0x6ad   :  { %v4228_v47 = vpop.eup %4227  ;;  %v3357_v24 = vmul.f32 0.5, %v4226_v46  ;;  %4239 = vtanh.f32 %v3372_v0  ;;  %v6645_v16 = vadd.f32 0.5, %v3307_v28  ;;  %v3401_v34 = vrot.slane %v6597_v54, 3 }
 0x6ae   :  { %v4230_v22 = vpop.eup %4229  ;;  %4241 = vtanh.f32 %v3373_v7  ;;  %v3358_v6 = vmul.f32 0.5, %v4228_v47  ;;  %v3364_v61 = vadd.f32 0.5, %v3356_v62  ;;  %v3402_v56 = vrot.slane %v6599_v30, 3 }
 0x6af   :  { %v4232_v15 = vpop.eup %4231  ;;  %v3359_v53 = vmul.f32 0.5, %v4230_v22  ;;  %4243 = vtanh.f32 %v3374_v27  ;;  %v3365_v31 = vadd.f32 0.5, %v3357_v24  ;;  %v3412_v48 = vmul.f32 0.5, %v3396_v59 }
 0x6b0   :  { %v4234_v52 = vpop.eup %4233  ;;  %v3360_v17 = vmul.f32 0.5, %v4232_v15  ;;  %4245 = vtanh.f32 %v3375_v55  ;;  %v3403_v32 = vrot.slane %v6601_v3, 3  ;;  %v3413_v54 = vmul.f32 0.5, %v3397_v43 }
 0x6b1   :  { %v4236_v21 = vpop.eup %4235  ;;  %v3361_v25 = vmul.f32 0.5, %v4234_v52  ;;  %4247 = vtanh.f32 %v3376_v42  ;;  %v3366_v7 = vadd.f32 0.5, %v3358_v6  ;;  %v3367_v41 = vadd.f32 0.5, %v3359_v53 }
 0x6b2   :  { %v4238_v35 = vpop.eup %4237  ;;  %v3362_v18 = vmul.f32 0.5, %v4236_v21  ;;  %4249 = vtanh.f32 %v3377_v37  ;;  %v3414_v36 = vmul.f32 0.5, %v3398_v11  ;;  %v3368_v38 = vadd.f32 0.5, %v3360_v17 }
 0x6b3   :  { %v3363_v9 = vmul.f32 0.5, %v4238_v35  ;;  %v4240_v0 = vpop.eup %4239  ;;  %4251 = vtanh.f32 %v3378_v12  ;;  %v3369_v55 = vadd.f32 0.5, %v3361_v25  ;;  %v3415_v30 = vmul.f32 0.5, %v3399_v44 }
 0x6b4   :  { %v4242_v27 = vpop.eup %4241  ;;  %4253 = vtanh.f32 %v3379_v4  ;;  %v3370_v1 = vadd.f32 0.5, %v3362_v18  ;;  %v3416_v39 = vmul.f32 0.5, %v3400_v33  ;;  %v3417_v42 = vmul.f32 0.5, %v3401_v34 }
 0x6b5   :  { %v4244_v19 = vpop.eup %4243  ;;  %4255 = vtanh.f32 %v3412_v48  ;;  %v3371_v37 = vadd.f32 0.5, %v3363_v9  ;;  %v3444_v3 = vmul.f32 %v3364_v61, %v6533_v23  ;;  %v3445_v49 = vmul.f32 %v3365_v31, %v6535_v29 }
 0x6b6   :  { %v4246_v10 = vpop.eup %4245  ;;  %4257 = vtanh.f32 %v3413_v54  ;;  %v3418_v12 = vmul.f32 0.5, %v3402_v56  ;;  %v3419_v13 = vmul.f32 0.5, %v3403_v32  ;;  %v3446_v28 = vmul.f32 %v3366_v7, %v6539_v40 }
 0x6b7   :  { %v4248_v51 = vpop.eup %4247  ;;  %4259 = vtanh.f32 %v3414_v36  ;;  %v3447_v46 = vmul.f32 %v3367_v41, %v6543_v20  ;;  %v3452_v62 = vmul.f32 %v4240_v0, %v6625_v60  ;;  %v3453_v59 = vmul.f32 %v4242_v27, %v6627_v57 }
 0x6b8   :  { %v4250_v4 = vpop.eup %4249  ;;  %4261 = vtanh.f32 %v3415_v30  ;;  %v3448_v23 = vmul.f32 %v3368_v38, %v6546_v63  ;;  %v3449_v29 = vmul.f32 %v3369_v55, %v6550_v26  ;;  %v3454_v43 = vmul.f32 %v4244_v19, %v6630_v58 }
 0x6b9   :  { %v4252_v47 = vpop.eup %4251  ;;  %4263 = vtanh.f32 %v3416_v39  ;;  %v3455_v40 = vmul.f32 %v4246_v10, %v6633_v50  ;;  %v6661_v22 = vadd.f32 %v3452_v62, %v3444_v3  ;;  %v6663_v24 = vadd.f32 %v3453_v59, %v3445_v49 }
 0x6ba   :  { %v4254_v11 = vpop.eup %4253  ;;  %4265 = vtanh.f32 %v3417_v42  ;;  %v3450_v60 = vmul.f32 %v3370_v1, %v6553_v45  ;;  %v3456_v57 = vmul.f32 %v4248_v51, %v6636_v5  ;;  %v6667_v44 = vadd.f32 %v3454_v43, %v3446_v28 }
 0x6bb   :  { %v4256_v20 = vpop.eup %4255  ;;  %4267 = vtanh.f32 %v3418_v12  ;;  %v3451_v26 = vmul.f32 %v3371_v37, %v6556_v14  ;;  %v3457_v58 = vmul.f32 %v4250_v4, %v6638_v8  ;;  %v6671_v15 = vadd.f32 %v3455_v40, %v3447_v46 }
 0x6bc   :  { %v4258_v63 = vpop.eup %4257  ;;  %4269 = vtanh.f32 %v3419_v13  ;;  %v3458_v33 = vmul.f32 %v4252_v47, %v6642_v2  ;;  %v6674_v34 = vadd.f32 %v3456_v57, %v3448_v23  ;;  %v3428_v52 = vmul.f32 0.5, %v4256_v20 }
 0x6bd   :  { %v4260_v50 = vpop.eup %4259  ;;  %4271 = vtanh.f32 %v6661_v22  ;;  %v3459_v5 = vmul.f32 %v4254_v11, %v6645_v16  ;;  %v6678_v6 = vadd.f32 %v3457_v58, %v3449_v29  ;;  %v3429_v53 = vmul.f32 0.5, %v4258_v63 }
 0x6be   :  { %v4262_v45 = vpop.eup %4261  ;;  %4273 = vtanh.f32 %v6663_v24  ;;  %v6681_v8 = vadd.f32 %v3458_v33, %v3450_v60  ;;  %v3430_v2 = vmul.f32 0.5, %v4260_v50  ;;  %v3436_v35 = vadd.f32 0.5, %v3428_v52 }
 0x6bf   :  { %v4264_v14 = vpop.eup %4263  ;;  %4275 = vtanh.f32 %v6667_v44  ;;  %v6684_v21 = vadd.f32 %v3459_v5, %v3451_v26  ;;  %v3431_v25 = vmul.f32 0.5, %v4262_v45  ;;  %v3437_v48 = vadd.f32 0.5, %v3429_v53 }
 0x6c0   :  { %v4266_v61 = vpop.eup %4265  ;;  %4277 = vtanh.f32 %v6671_v15  ;;  %v3432_v56 = vmul.f32 0.5, %v4264_v14  ;;  %v3438_v54 = vadd.f32 0.5, %v3430_v2 }
 0x6c1   :  { %v4268_v17 = vpop.eup %4267  ;;  %4279 = vtanh.f32 %v6674_v34  ;;  %v3433_v31 = vmul.f32 0.5, %v4266_v61  ;;  %v3439_v36 = vadd.f32 0.5, %v3431_v25 }
 0x6c2   :  { %v4270_v16 = vpop.eup %4269  ;;  %4281 = vtanh.f32 %v6678_v6  ;;  %v3434_v32 = vmul.f32 0.5, %v4268_v17  ;;  %v3440_v55 = vadd.f32 0.5, %v3432_v56 }
 0x6c3   :  { %v4272_v18 = vpop.eup %4271  ;;  %4283 = vtanh.f32 %v6681_v8  ;;  %v3435_v41 = vmul.f32 0.5, %v4270_v16  ;;  %v3441_v1 = vadd.f32 0.5, %v3433_v31 }
 0x6c4   :  { %v4274_v9 = vpop.eup %4273  ;;  %4285 = vtanh.f32 %v6684_v21  ;;  %v3476_v0 = vmul.f32 %v4272_v18, %v3436_v35  ;;  %v3442_v10 = vadd.f32 0.5, %v3434_v32 }
 0x6c5   :  { %v4276_v7 = vpop.eup %4275  ;;  %v3477_v27 = vmul.f32 %v4274_v9, %v3437_v48  ;;  %v3443_v49 = vadd.f32 0.5, %v3435_v41 }
 0x6c6   :  { %v4278_v38 = vpop.eup %4277  ;;  %v3478_v30 = vmul.f32 %v4276_v7, %v3438_v54  ;;  %3484 = vst [vmem:[#allocation14 + $0x7] sm:$0x1] %v3476_v0 }
 0x6c7   :  { %v4280_v19 = vpop.eup %4279  ;;  %v3479_v39 = vmul.f32 %v4278_v38, %v3439_v36  ;;  %3485 = vst [vmem:[#allocation14 + $0xf] sm:$0x1] %v3477_v27 }
 0x6c8   :  { %v4282_v42 = vpop.eup %4281  ;;  %v3480_v37 = vmul.f32 %v4280_v19, %v3440_v55  ;;  %3486 = vst [vmem:[#allocation14 + $0x17] sm:$0x1] %v3478_v30 }
 0x6c9   :  { %v4284_v3 = vpop.eup %4283  ;;  %v3481_v51 = vmul.f32 %v4282_v42, %v3441_v1  ;;  %3487 = vst [vmem:[#allocation14 + $0x1f] sm:$0x1] %v3479_v39 }
 0x6ca   :  { %v4286_v12 = vpop.eup %4285  ;;  %v3482_v13 = vmul.f32 %v4284_v3, %v3442_v10  ;;  %3488 = vst [vmem:[#allocation14 + $0x27] sm:$0x1] %v3480_v37 }
 0x6cb   :  { %v3483_v28 = vmul.f32 %v4286_v12, %v3443_v49  ;;  %3489 = vst [vmem:[#allocation14 + $0x2f] sm:$0x1] %v3481_v51 }
 0x6cc   :  { %3490 = vst [vmem:[#allocation14 + $0x37] sm:$0x1] %v3482_v13 }
 0x6cd   :  { %3491 = vst [vmem:[#allocation14 + $0x3f] sm:$0x1] %v3483_v28 }
 0x6ce   :  { %3500 = vst [vmem:[#allocation1] ss:$9 sm:$0xff] %v3476_v0  ;;  %3563 = dma.vmem_to_hbm [thread:$0]  %s3556_s9, 1024, %s3558_s12, [#allocation7], %s4686_s23, %s4686_s23, %s4687_s24  }
 0x6cf   :  { %3502 = vst [vmem:[#allocation1 + $0x1] ss:$9 sm:$0xff] %v3477_v27 }
 0x6d0   :  { %3504 = vst [vmem:[#allocation1 + $0x2] ss:$9 sm:$0xff] %v3478_v30 }
 0x6d1   :  { %3506 = vst [vmem:[#allocation1 + $0x3] ss:$9 sm:$0xff] %v3479_v39 }
 0x6d2   :  { %3508 = vst [vmem:[#allocation1 + $0x4] ss:$9 sm:$0xff] %v3480_v37 }
 0x6d3   :  { %3510 = vst [vmem:[#allocation1 + $0x5] ss:$9 sm:$0xff] %v3481_v51 }
 0x6d4   :  { %3512 = vst [vmem:[#allocation1 + $0x6] ss:$9 sm:$0xff] %v3482_v13 }
 0x6d5   :  { %3514 = vst [vmem:[#allocation1 + $0x7] ss:$9 sm:$0xff] %v3483_v28 }
 0x6dc   :  { %v3515_v4 = vld [vmem:[#allocation1] sm:$0xff] }
 0x6dd   :  { %3548 = vst [vmem:[#allocation15] sm:$0xff] %v3515_v4 }
 0x6de   :  { %3574 = dma.vmem_to_hbm [thread:$0]  %s3570_s13, 128, %s3572_s16, [#allocation16]   ;;  %3526 = vst [vmem:[#allocation1] ss:$9 sm:$0xff] %v6661_v22 }
 0x6df   :  { %3528 = vst [vmem:[#allocation1 + $0x1] ss:$9 sm:$0xff] %v6663_v24 }
 0x6e0   :  { %3530 = vst [vmem:[#allocation1 + $0x2] ss:$9 sm:$0xff] %v6667_v44 }
 0x6e1   :  { %3532 = vst [vmem:[#allocation1 + $0x3] ss:$9 sm:$0xff] %v6671_v15 }
 0x6e2   :  { %3534 = vst [vmem:[#allocation1 + $0x4] ss:$9 sm:$0xff] %v6674_v34 }
 0x6e3   :  { %3536 = vst [vmem:[#allocation1 + $0x5] ss:$9 sm:$0xff] %v6678_v6 }
 0x6e4   :  { %3538 = vst [vmem:[#allocation1 + $0x6] ss:$9 sm:$0xff] %v6681_v8 }
 0x6e5   :  { %3540 = vst [vmem:[#allocation1 + $0x7] ss:$9 sm:$0xff] %v6684_v21 }
 0x6ec   :  { %v3541_v46 = vld [vmem:[#allocation1] sm:$0xff] }
 0x6ed   :  { %3550 = vst [vmem:[#allocation17] sm:$0xff] %v3541_v46 }
 0x6ee   :  { %3585 = dma.vmem_to_hbm [thread:$0]  %s3581_s17, 128, %s3583_s19, [#allocation16]  }
 0x6ef   :  { %4677 = dma.done.wait [#allocation7], 1024  }
 0x6f0   :  { %4678 = vsyncadd [#allocation7], 4294966272 }
 0x6f1   :  { %4679 = dma.done.wait [#allocation16], 256  }
 0x6f2   :  { %4680 = vsyncadd [#allocation16], 4294967040 }
 0x6f3   :  { %3598 = vsyncpa [#allocation6], 1 }
 0x6f4   :  { %3599 = vsyncpa [#allocation9], 1 }
 0x6f5   :  { %3600 = vsyncpa [#allocation12], 1 }
 0x6f6   :  { %3601 = vsyncpa [#allocation7], 1 }
 0x6f7   :  { %3602 = vsyncpa [#allocation16], 1 }

</bundles_post_ra>
